<compile_context>
chip_gen: v7x
topology: tpu7x:2x2x1
jax: 0.10.0
libtpu: 0.0.40
codegen_flags: <defaults>
</compile_context>

<pallas_src>
import functools

import jax
import jax.numpy as jnp
from jax import lax
from jax.experimental import pallas as pl
from jax.experimental.pallas import tpu as pltpu

EMBED_DIMS = 32
DEPTH_NUM = 64
DEPTH_START = 1.0
DEPTH_MAX = 61.0
ERROR_TOLERANCE = 1.0
OPACITY_THRESHOLD = 0.05

C_MID = 64                          # backbone stand-in output channels
C_OUT = 128                         # lane-dense neck width: 64 depth + 32 feat + 1 opac + 31 pad
C_REAL = DEPTH_NUM + EMBED_DIMS + 1
STATS_W = 16                        # mean3 | cov6 | dir3 | sigmoid(opacity) | pad3


def _pick_tile(hw, target=2048):
    """Return (tile, padded_hw).  tile is a multiple of 128; prefer exact divisors
    of hw (no padding), otherwise pad hw up to a multiple of `target`."""
    if hw <= target:
        hwp = ((hw + 127) // 128) * 128
        return hwp, hwp
    best = 0
    for t in range(128, target + 1, 128):
        if hw % t == 0:
            best = t
    if best:
        return best, hw
    hwp = ((hw + target - 1) // target) * target
    return target, hwp


# ---------------------------------------------------------------------------
# Fused Pallas kernel:
#   pixels on sublanes, channels on lanes.
#   backbone (3->64, VPU FMAs + ReLU)  ->  neck (64->128, bf16 MXU)
#   -> depth softmax statistics over the 64 depth lanes (lane-0 aligned)
#   -> affine frustum mapping to a single packed (mean3|cov6|dir3|opacity) store,
#   -> depth logits written transposed (NCHW layout, bf16, lane-dense).
# ---------------------------------------------------------------------------
def _fused_kernel(x_ref, cam_ref, w1_ref, b1_ref, w2_ref, b2_ref,
                  depth_ref, feat_ref, stats_ref, *, W, tile, cov_scale):
    j = pl.program_id(1)

    # ---- backbone stand-in: 1x1 conv 3->C_MID as three broadcast FMAs + ReLU
    # (ImageNet norm already folded into w1/b1 by the wrapper; K=3 not worth MXU).
    x = x_ref[0]                                        # (tile, 3) f32
    w1 = w1_ref[...]                                    # (3, C_MID) f32
    h = (x[:, 0:1] * w1[0:1, :] + x[:, 1:2] * w1[1:2, :]
         + x[:, 2:3] * w1[2:3, :] + b1_ref[...])
    h = jnp.maximum(h, 0.0)

    # ---- neck stand-in: 1x1 conv C_MID->C_OUT on the MXU (bf16 in, f32 acc)
    # channel layout: [depth(0:64) | feat(64:96) | opacity(96) | zero pad(97:128)]
    y = jnp.dot(h.astype(jnp.bfloat16), w2_ref[...],
                preferred_element_type=jnp.float32) + b2_ref[...]   # (tile, 128)

    # ---- depth logits in NCHW layout: transpose the full lane-dense 128-wide tile
    # (XLU slot has slack), keep the first 64 rows, store bf16.  This removes the
    # wrapper-side NCHW transpose pass entirely.
    y_t = y.T                                           # (C_OUT, tile) f32
    depth_ref[0] = y_t[0:DEPTH_NUM, :].astype(jnp.bfloat16)

    # ---- features: single f32 store
    feat_ref[0] = y[:, DEPTH_NUM:DEPTH_NUM + EMBED_DIMS]

    # ---- depth statistics (pred_depth_2): softmax over D on the lane axis.
    # Use the same bf16-quantized logits that were stored, so downstream consumers
    # of `depth` see values consistent with the in-kernel statistics.
    logits = y[:, 0:DEPTH_NUM].astype(jnp.bfloat16).astype(jnp.float32)
    m = jnp.max(logits, axis=-1, keepdims=True)
    e = jnp.exp(logits - m)
    se = jnp.sum(e, axis=-1, keepdims=True)             # (tile, 1)
    inv = pl.reciprocal(se, approx=True)
    inv = inv * (2.0 - se * inv)                        # one Newton step -> f32 accuracy

    # LID depth-bin centers z_d, built in-register (no coordinate stream from HBM)
    d = lax.broadcasted_iota(jnp.int32, (1, DEPTH_NUM), 1).astype(jnp.float32)
    bin_size = (DEPTH_MAX - DEPTH_START) / (DEPTH_NUM * (1 + DEPTH_NUM))
    z = DEPTH_START + bin_size * d * (d + 1.0)          # (1, D)

    ez = jnp.sum(e * z, axis=-1, keepdims=True) * inv   # E[z]           (tile, 1)
    dz = z - ez
    var = jnp.sum(e * dz * dz, axis=-1, keepdims=True) * inv   # Var[z] (centered)

    # ---- pixel -> (row, col) without integer div/mod: exact float mul + floor
    # (pix < 2^24 so f32 is exact; +0.5 guards the floor against rounding).
    pix = (j * tile + lax.broadcasted_iota(jnp.int32, (tile, 1), 0)).astype(jnp.float32)
    hi = jnp.floor((pix + 0.5) * (1.0 / W))             # pixel row index
    wi = pix - hi * float(W)                            # pixel column index

    # ---- affine frustum: coords3d_i(d, pix) = g_i(pix) * z_d + t_i ------------
    cam = cam_ref[0]                                    # (1, 16): [A|B|C|t|pad]
    g = wi * cam[:, 0:3] + hi * cam[:, 3:6] + cam[:, 6:9]   # (tile, 3)
    t = cam[:, 9:12]                                    # (1, 3)

    mean3 = g * ez + t                                  # expected coords3d
    gx = g[:, 0:1]
    gy = g[:, 1:2]
    gz = g[:, 2:3]
    cvar = var * cov_scale
    cov_x = g * (gx * cvar)                             # (tile,3): xx xy xz
    cov_yz = g[:, 1:3] * (gy * cvar)                    # (tile,2): yy yz
    cov_zz = gz * gz * cvar                             # (tile,1): zz
    inv_n = lax.rsqrt(jnp.maximum(gx * gx + gy * gy + gz * gz, 1e-24))
    dirv = g * inv_n                                    # normalize(c(z1) - c(z0))
    opac = jax.nn.sigmoid(y[:, C_REAL - 1:C_REAL])      # (tile,1) sigmoid in-kernel

    # single packed store: [mean3 | cov6 | dir3 | opacity | pad3]
    stats_ref[0] = jnp.concatenate(
        [mean3, cov_x, cov_yz, cov_zz, dirv, opac,
         jnp.zeros((tile, 3), jnp.float32)], axis=-1)


def fused_backbone_neck_depth(x, cam, w1, b1, w2, b2, *, W, tile=None):
    """x: (BN, HW, 3) pooled pixels; cam: (BN, 1, 16) per-camera affine params.

    Returns (depth_nchw_bf16 (BN, D, HWp), feat (BN, HWp, 32), stats (BN, HWp, 16))
    where HWp >= HW is padded to a multiple of the tile size."""
    BN, HW, _ = x.shape
    if tile is None:
        tile, HWp = _pick_tile(HW)
    else:
        HWp = ((HW + tile - 1) // tile) * tile
    if HWp != HW:
        x = jnp.pad(x, ((0, 0), (0, HWp - HW), (0, 0)))

    kern = functools.partial(_fused_kernel, W=W, tile=tile,
                             cov_scale=ERROR_TOLERANCE ** 2 / 9.0)
    return pl.pallas_call(
        kern,
        out_shape=(jax.ShapeDtypeStruct((BN, DEPTH_NUM, HWp), jnp.bfloat16),
                   jax.ShapeDtypeStruct((BN, HWp, EMBED_DIMS), jnp.float32),
                   jax.ShapeDtypeStruct((BN, HWp, STATS_W), jnp.float32)),
        grid_spec=pltpu.PrefetchScalarGridSpec(
            num_scalar_prefetch=0,
            grid=(BN, HWp // tile),
            in_specs=[
                pl.BlockSpec((1, tile, 3), lambda b, j: (b, j, 0)),
                pl.BlockSpec((1, 1, 16), lambda b, j: (b, 0, 0)),
                pl.BlockSpec((3, C_MID), lambda b, j: (0, 0)),
                pl.BlockSpec((1, C_MID), lambda b, j: (0, 0)),
                pl.BlockSpec((C_MID, C_OUT), lambda b, j: (0, 0)),
                pl.BlockSpec((1, C_OUT), lambda b, j: (0, 0)),
            ],
            out_specs=[
                pl.BlockSpec((1, DEPTH_NUM, tile), lambda b, j: (b, 0, j)),
                pl.BlockSpec((1, tile, EMBED_DIMS), lambda b, j: (b, j, 0)),
                pl.BlockSpec((1, tile, STATS_W), lambda b, j: (b, j, 0)),
            ],
        ),
        compiler_params=pltpu.CompilerParams(
            dimension_semantics=("parallel", "parallel"),
            vmem_limit_bytes=32 * 1024 * 1024),
    )(x, cam, w1, b1, w2, b2)


# ---------------------------------------------------------------------------
# Glue (plain JAX): camera affine parameters, parameter setup, forward pass.
# ---------------------------------------------------------------------------
def camera_affine_params(lidar2img, H, W):
    """coords3d_i(d,h,w) = (A_i*w + B_i*h + C_i) * z_d + t_i.

    Uses the same hard-coded 224x480 source resolution as the PyTorch module.
    Packed per camera as (BN, 1, 16): [A(3) | B(3) | C(3) | t(3) | pad(4)].
    """
    B, N = lidar2img.shape[:2]
    M = jnp.linalg.inv(lidar2img).reshape(B * N, 4, 4)
    scale = 224 // H
    h0 = float(scale // 2)
    w0 = float(scale // 2)
    dh = (float(224 - scale // 2) - h0) / max(H - 1, 1)
    dw = (float(480 - scale // 2) - w0) / max(W - 1, 1)
    A = M[:, :3, 0] * dw
    Bc = M[:, :3, 1] * dh
    C = M[:, :3, 0] * w0 + M[:, :3, 1] * h0 + M[:, :3, 2]
    t = M[:, :3, 3]
    cam = jnp.concatenate(
        [A, Bc, C, t, jnp.zeros((B * N, 4), jnp.float32)], axis=-1)
    return cam.astype(jnp.float32).reshape(B * N, 1, 16)


def init_params(key):
    k1, k2 = jax.random.split(key, 2)
    return {
        "w_bb": 0.1 * jax.random.normal(k1, (3, C_MID), jnp.float32),
        "b_bb": jnp.zeros((1, C_MID), jnp.float32),
        "w_nk": 0.1 * jax.random.normal(k2, (C_MID, C_OUT), jnp.float32),
        "b_nk": jnp.zeros((1, C_OUT), jnp.float32),
    }


def gaussian_lss_forward(params, image, lidar2img):
    """image: (B, N, 3, Himg, Wimg) in [0,1];  lidar2img: (B, N, 4, 4)."""
    B, N, _, Himg, Wimg = image.shape
    BN = B * N
    H, W = Himg // 2, Wimg // 2
    HW = H * W

    # backbone stand-in front half: 2x2 average pool, then channels-last pixels
    img = image.reshape(BN, 3, Himg, Wimg)
    pooled = img.reshape(BN, 3, H, 2, W, 2).mean(axis=(3, 5))          # (BN,3,H,W)
    x = jnp.transpose(pooled, (0, 2, 3, 1)).reshape(BN, HW, 3)

    # Fold Normalize() (ImageNet statistics) into the first 1x1 conv.
    mean = jnp.array([0.485, 0.456, 0.406], jnp.float32)
    std = jnp.array([0.229, 0.224, 0.225], jnp.float32)
    w1 = (params["w_bb"] / std[:, None]).astype(jnp.float32)
    b1 = (params["b_bb"] - (mean / std) @ params["w_bb"]).astype(jnp.float32)

    # Zero the lane-padding columns (97..127) of the neck; bf16 weights for the MXU.
    col_mask = (jnp.arange(C_OUT) < C_REAL).astype(jnp.float32)
    w2 = (params["w_nk"] * col_mask).astype(jnp.bfloat16)
    b2 = (params["b_nk"] * col_mask).astype(jnp.float32)

    cam = camera_affine_params(lidar2img, H, W)                        # (BN,1,16)

    depth_p, feat_p, stats_p = fused_backbone_neck_depth(x, cam, w1, b1, w2, b2, W=W)

    # (slices below are no-ops when HW is already a multiple of the tile)
    depth_nchw = depth_p[:, :, :HW].reshape(BN, DEPTH_NUM, H, W)       # bf16 logits, NCHW
    features = feat_p[:, :HW]                                          # (BN,HW,32) f32
    stats = stats_p[:, :HW]                                            # (BN,HW,16)

    means3D = stats[..., 0:3]
    cov3D = stats[..., 3:9]
    direction_vector = stats[..., 9:12].reshape(BN, H, W, 3)
    opacities = stats[..., 12:13]                                      # sigmoid already applied

    features_b = features.reshape(B, N * HW, EMBED_DIMS)
    means_b = means3D.reshape(B, N * HW, 3)
    cov_b = cov3D.reshape(B, N * HW, 6)
    opac_b = opacities.reshape(B, N * HW, 1)

    mask = (opac_b > OPACITY_THRESHOLD)[..., 0]
    num_gaussians = mask.astype(jnp.float32).sum(axis=1).mean()

    # TODO(synk): GaussianRasterizer (diff_gaussian_rasterization EWA splatting with
    # depth-sorted alpha compositing), the spconv decoder and the injected head have
    # no clean Pallas equivalent; the rendered BEV `x` / `output[k]` heads are omitted.
    output = {
        "mid_output": {
            "features": features_b,
            "mean": means_b,
            "uncertainty": cov_b,
            "opacities": opac_b,
            "depth": depth_nchw,              # bf16 (halved writeback, per perf review)
            "direction_vector": direction_vector,
        },
        "num_gaussians": num_gaussians,
    }
    return output


# ---------------------------------------------------------------------------
# Pure-JAX reference of the PyTorch pred_depth_2 (full matrix path) — used only
# to validate the in-kernel affine restructuring.
# ---------------------------------------------------------------------------
def get_pixel_coords_3d(H, W, lidar2img):
    eps = 1e-5
    scale = 224 // H
    coords_h = jnp.linspace(scale // 2, 224 - scale // 2, H, dtype=jnp.float32)
    coords_w = jnp.linspace(scale // 2, 480 - scale // 2, W, dtype=jnp.float32)
    index = jnp.arange(DEPTH_NUM, dtype=jnp.float32)
    bin_size = (DEPTH_MAX - DEPTH_START) / (DEPTH_NUM * (1 + DEPTH_NUM))
    coords_d = DEPTH_START + bin_size * index * (index + 1.0)

    gw, gh, gd = jnp.meshgrid(coords_w, coords_h, coords_d, indexing="ij")  # (W,H,D)
    coords = jnp.stack([gw, gh, gd], axis=-1)                               # (W,H,D,3)
    coords = jnp.concatenate([coords, jnp.ones_like(coords[..., :1])], -1)  # (W,H,D,4)
    z = jnp.maximum(coords[..., 2:3], eps)
    coords = jnp.concatenate([coords[..., :2] * z, coords[..., 2:]], -1)
    img2lidars = jnp.linalg.inv(lidar2img)                                  # (B,N,4,4)
    coords3d = jnp.einsum("bnij,whdj->bnwhdi", img2lidars, coords)[..., :3]
    return coords3d, coords_d


def pred_depth_2_ref(lidar2img, depth_logits):
    BN, D, H, W = depth_logits.shape
    coords3d, _ = get_pixel_coords_3d(H, W, lidar2img)
    coords3d = jnp.transpose(coords3d, (0, 1, 4, 3, 2, 5)).reshape(BN, D, H, W, 3)
    prob = jax.nn.softmax(depth_logits, axis=1)
    pred = jnp.sum(prob[..., None] * coords3d, axis=1)
    delta = pred[:, None] - coords3d
    cov = jnp.sum(prob[..., None, None] * (delta[..., :, None] * delta[..., None, :]),
                  axis=1) * (ERROR_TOLERANCE ** 2 / 9.0)
    cov = cov.reshape(BN, H, W, 9)
    cov6 = jnp.concatenate([cov[..., 0:3], cov[..., 4:6], cov[..., 8:9]], axis=-1)
    dv = coords3d[:, 1] - coords3d[:, 0]
    dv = dv / jnp.maximum(jnp.linalg.norm(dv, axis=-1, keepdims=True), 1e-12)
    return pred, cov6, dv


if __name__ == "__main__":
    key = jax.random.PRNGKey(0)
    k_img, k_l2i, k_param = jax.random.split(key, 3)

    B, N, Himg, Wimg = 1, 2, 32, 32           # feature grid -> H=W=16, HW=256
    image = jax.random.uniform(k_img, (B, N, 3, Himg, Wimg), jnp.float32)
    lidar2img = (jnp.eye(4, dtype=jnp.float32)[None, None]
                 + 0.05 * jax.random.normal(k_l2i, (B, N, 4, 4), jnp.float32))
    params = init_params(k_param)

    out = jax.jit(gaussian_lss_forward)(params, image, lidar2img)
    jax.block_until_ready(out)

    # Validate the fused (affine) depth statistics against the pure-JAX reference.
    # (Reference consumes the kernel's stored bf16 logits, cast to f32.)
    depth_f32 = out["mid_output"]["depth"].astype(jnp.float32)
    pred_ref, cov_ref, dir_ref = pred_depth_2_ref(lidar2img, depth_f32)
    BN, _, H, W = depth_f32.shape
    pred_k = out["mid_output"]["mean"].reshape(BN, H, W, 3)
    cov_k = out["mid_output"]["uncertainty"].reshape(BN, H, W, 6)
    dir_k = out["mid_output"]["direction_vector"]

    def rel_err(a, b):
        return float(jnp.max(jnp.abs(a - b)) / (jnp.max(jnp.abs(b)) + 1e-6))

    assert rel_err(pred_k, pred_ref) < 1e-3, "pred_coords mismatch"
    assert rel_err(cov_k, cov_ref) < 1e-3, "cov3D mismatch"
    assert rel_err(dir_k, dir_ref) < 1e-3, "direction_vector mismatch"

    print("KERNEL_OK")
</pallas_src>

<mosaic_0001>
module attributes {stable_mosaic.version = 11 : i64} {
  func.func @_fused_kernel(%arg0: i32, %arg1: i32, %arg2: memref<1x256x3xf32, #tpu.memory_space<vmem>>, %arg3: memref<1x1x16xf32, #tpu.memory_space<vmem>>, %arg4: memref<3x64xf32, #tpu.memory_space<vmem>>, %arg5: memref<1x64xf32, #tpu.memory_space<vmem>>, %arg6: memref<64x128xbf16, #tpu.memory_space<vmem>>, %arg7: memref<1x128xf32, #tpu.memory_space<vmem>>, %arg8: memref<1x64x256xbf16, #tpu.memory_space<vmem>>, %arg9: memref<1x256x32xf32, #tpu.memory_space<vmem>>, %arg10: memref<1x256x16xf32, #tpu.memory_space<vmem>>) attributes {dimension_semantics = [#tpu.dimension_semantics<parallel>, #tpu.dimension_semantics<parallel>], iteration_bounds = array<i64: 2, 1>, scalar_prefetch = 0 : i64, scratch_operands = 0 : i64, tpu.core_type = #tpu.core_type<tc>, window_params = [{transform_indices = @transform_0, window_bounds = array<i64: 1, 256, 3>}, {transform_indices = @transform_1, window_bounds = array<i64: 1, 1, 16>}, {pipeline_mode = #tpu.pipeline_mode<synchronous>, transform_indices = @transform_2, window_bounds = array<i64: 3, 64>}, {pipeline_mode = #tpu.pipeline_mode<synchronous>, transform_indices = @transform_3, window_bounds = array<i64: 1, 64>}, {pipeline_mode = #tpu.pipeline_mode<synchronous>, transform_indices = @transform_4, window_bounds = array<i64: 64, 128>}, {pipeline_mode = #tpu.pipeline_mode<synchronous>, transform_indices = @transform_5, window_bounds = array<i64: 1, 128>}, {transform_indices = @transform_6, window_bounds = array<i64: 1, 64, 256>}, {transform_indices = @transform_7, window_bounds = array<i64: 1, 256, 32>}, {transform_indices = @transform_8, window_bounds = array<i64: 1, 256, 16>}]} {
    %c0 = arith.constant 0 : index
    %c0_0 = arith.constant 0 : index
    %c0_1 = arith.constant 0 : index
    %0 = vector.load %arg2[%c0, %c0_0, %c0_1] : memref<1x256x3xf32, #tpu.memory_space<vmem>>, vector<1x256x3xf32>
    %1 = vector.shape_cast %0 : vector<1x256x3xf32> to vector<256x3xf32>
    %c0_2 = arith.constant 0 : index
    %c0_3 = arith.constant 0 : index
    %2 = vector.load %arg4[%c0_2, %c0_3] : memref<3x64xf32, #tpu.memory_space<vmem>>, vector<3x64xf32>
    %3 = vector.extract_strided_slice %1 {offsets = [0, 0], sizes = [256, 1], strides = [1, 1]} : vector<256x3xf32> to vector<256x1xf32>
    %4 = vector.extract_strided_slice %2 {offsets = [0, 0], sizes = [1, 64], strides = [1, 1]} : vector<3x64xf32> to vector<1x64xf32>
    %5 = vector.broadcast %3 : vector<256x1xf32> to vector<256x64xf32>
    %6 = vector.broadcast %4 : vector<1x64xf32> to vector<256x64xf32>
    %7 = arith.mulf %5, %6 : vector<256x64xf32>
    %8 = vector.extract_strided_slice %1 {offsets = [0, 1], sizes = [256, 1], strides = [1, 1]} : vector<256x3xf32> to vector<256x1xf32>
    %9 = vector.extract_strided_slice %2 {offsets = [1, 0], sizes = [1, 64], strides = [1, 1]} : vector<3x64xf32> to vector<1x64xf32>
    %10 = vector.broadcast %8 : vector<256x1xf32> to vector<256x64xf32>
    %11 = vector.broadcast %9 : vector<1x64xf32> to vector<256x64xf32>
    %12 = arith.mulf %10, %11 : vector<256x64xf32>
    %13 = arith.addf %7, %12 : vector<256x64xf32>
    %14 = vector.extract_strided_slice %1 {offsets = [0, 2], sizes = [256, 1], strides = [1, 1]} : vector<256x3xf32> to vector<256x1xf32>
    %15 = vector.extract_strided_slice %2 {offsets = [2, 0], sizes = [1, 64], strides = [1, 1]} : vector<3x64xf32> to vector<1x64xf32>
    %16 = vector.broadcast %14 : vector<256x1xf32> to vector<256x64xf32>
    %17 = vector.broadcast %15 : vector<1x64xf32> to vector<256x64xf32>
    %18 = arith.mulf %16, %17 : vector<256x64xf32>
    %19 = arith.addf %13, %18 : vector<256x64xf32>
    %c0_4 = arith.constant 0 : index
    %c0_5 = arith.constant 0 : index
    %20 = vector.load %arg5[%c0_4, %c0_5] : memref<1x64xf32, #tpu.memory_space<vmem>>, vector<1x64xf32>
    %21 = vector.broadcast %20 : vector<1x64xf32> to vector<256x64xf32>
    %22 = arith.addf %19, %21 : vector<256x64xf32>
    %cst = arith.constant 0.000000e+00 : f32
    %23 = vector.broadcast %cst : f32 to vector<256x64xf32>
    %24 = arith.maximumf %22, %23 : vector<256x64xf32>
    %25 = arith.truncf %24 : vector<256x64xf32> to vector<256x64xbf16>
    %c0_6 = arith.constant 0 : index
    %c0_7 = arith.constant 0 : index
    %26 = vector.load %arg6[%c0_6, %c0_7] : memref<64x128xbf16, #tpu.memory_space<vmem>>, vector<64x128xbf16>
    %cst_8 = arith.constant dense<0.000000e+00> : vector<256x128xf32>
    %27 = tpu.matmul %25, %26, %cst_8 {dimension_numbers = #tpu.dot_dimension_numbers<[1], [0], [0], [1], [0, 0, 1, 1], [], []>} : vector<256x64xbf16>, vector<64x128xbf16>, vector<256x128xf32> -> vector<256x128xf32>
    %c0_9 = arith.constant 0 : index
    %c0_10 = arith.constant 0 : index
    %28 = vector.load %arg7[%c0_9, %c0_10] : memref<1x128xf32, #tpu.memory_space<vmem>>, vector<1x128xf32>
    %29 = vector.broadcast %28 : vector<1x128xf32> to vector<256x128xf32>
    %30 = arith.addf %27, %29 : vector<256x128xf32>
    %31 = tpu.transpose %30, [1, 0] : vector<256x128xf32> -> vector<128x256xf32>
    %32 = vector.extract_strided_slice %31 {offsets = [0, 0], sizes = [64, 256], strides = [1, 1]} : vector<128x256xf32> to vector<64x256xf32>
    %33 = arith.truncf %32 : vector<64x256xf32> to vector<64x256xbf16>
    %c0_11 = arith.constant 0 : index
    %c0_12 = arith.constant 0 : index
    %c0_13 = arith.constant 0 : index
    %34 = vector.load %arg8[%c0_11, %c0_12, %c0_13] : memref<1x64x256xbf16, #tpu.memory_space<vmem>>, vector<1x64x256xbf16>
    %35 = vector.shape_cast %34 : vector<1x64x256xbf16> to vector<64x256xbf16>
    %36 = vector.shape_cast %33 : vector<64x256xbf16> to vector<1x64x256xbf16>
    tpu.vector_store %arg8[%c0_11, %c0_12, %c0_13], %36 {strides = array<i32>} : memref<1x64x256xbf16, #tpu.memory_space<vmem>>, vector<1x64x256xbf16>,
    %37 = vector.extract_strided_slice %30 {offsets = [0, 64], sizes = [256, 32], strides = [1, 1]} : vector<256x128xf32> to vector<256x32xf32>
    %c0_14 = arith.constant 0 : index
    %c0_15 = arith.constant 0 : index
    %c0_16 = arith.constant 0 : index
    %38 = vector.load %arg9[%c0_14, %c0_15, %c0_16] : memref<1x256x32xf32, #tpu.memory_space<vmem>>, vector<1x256x32xf32>
    %39 = vector.shape_cast %38 : vector<1x256x32xf32> to vector<256x32xf32>
    %40 = vector.shape_cast %37 : vector<256x32xf32> to vector<1x256x32xf32>
    tpu.vector_store %arg9[%c0_14, %c0_15, %c0_16], %40 {strides = array<i32>} : memref<1x256x32xf32, #tpu.memory_space<vmem>>, vector<1x256x32xf32>,
    %41 = vector.extract_strided_slice %30 {offsets = [0, 0], sizes = [256, 64], strides = [1, 1]} : vector<256x128xf32> to vector<256x64xf32>
    %42 = arith.truncf %41 : vector<256x64xf32> to vector<256x64xbf16>
    %43 = arith.extf %42 : vector<256x64xbf16> to vector<256x64xf32>
    %cst_17 = arith.constant dense<0xFF800000> : vector<256xf32>
    %44 = vector.multi_reduction <maximumf>, %43, %cst_17 [1] : vector<256x64xf32> to vector<256xf32>
    %45 = vector.shape_cast %44 : vector<256xf32> to vector<256x1xf32>
    %46 = vector.broadcast %45 : vector<256x1xf32> to vector<256x64xf32>
    %47 = arith.subf %43, %46 : vector<256x64xf32>
    %48 = math.exp %47 : vector<256x64xf32>
    %cst_18 = arith.constant dense<0.000000e+00> : vector<256xf32>
    %49 = vector.multi_reduction <add>, %48, %cst_18 [1] : vector<256x64xf32> to vector<256xf32>
    %50 = vector.shape_cast %49 : vector<256xf32> to vector<256x1xf32>
    %51 = tpu.reciprocal %50 {approx = true} : vector<256x1xf32> -> vector<256x1xf32>
    %52 = arith.mulf %50, %51 : vector<256x1xf32>
    %cst_19 = arith.constant 2.000000e+00 : f32
    %53 = vector.broadcast %cst_19 : f32 to vector<256x1xf32>
    %54 = arith.subf %53, %52 : vector<256x1xf32>
    %55 = arith.mulf %51, %54 : vector<256x1xf32>
    %56 = tpu.iota {dimensions = array<i32: 1>} : vector<1x64xi32>
    %57 = arith.sitofp %56 : vector<1x64xi32> to vector<1x64xf32>
    %cst_20 = arith.constant 0.014423077 : f32
    %58 = vector.broadcast %cst_20 : f32 to vector<1x64xf32>
    %59 = arith.mulf %58, %57 : vector<1x64xf32>
    %cst_21 = arith.constant 1.000000e+00 : f32
    %60 = vector.broadcast %cst_21 : f32 to vector<1x64xf32>
    %61 = arith.addf %57, %60 : vector<1x64xf32>
    %62 = arith.mulf %59, %61 : vector<1x64xf32>
    %cst_22 = arith.constant 1.000000e+00 : f32
    %63 = vector.broadcast %cst_22 : f32 to vector<1x64xf32>
    %64 = arith.addf %63, %62 : vector<1x64xf32>
    %65 = vector.broadcast %64 : vector<1x64xf32> to vector<256x64xf32>
    %66 = arith.mulf %48, %65 : vector<256x64xf32>
    %cst_23 = arith.constant dense<0.000000e+00> : vector<256xf32>
    %67 = vector.multi_reduction <add>, %66, %cst_23 [1] : vector<256x64xf32> to vector<256xf32>
    %68 = vector.shape_cast %67 : vector<256xf32> to vector<256x1xf32>
    %69 = arith.mulf %68, %55 : vector<256x1xf32>
    %70 = vector.broadcast %64 : vector<1x64xf32> to vector<256x64xf32>
    %71 = vector.broadcast %69 : vector<256x1xf32> to vector<256x64xf32>
    %72 = arith.subf %70, %71 : vector<256x64xf32>
    %73 = arith.mulf %48, %72 : vector<256x64xf32>
    %74 = arith.mulf %73, %72 : vector<256x64xf32>
    %cst_24 = arith.constant dense<0.000000e+00> : vector<256xf32>
    %75 = vector.multi_reduction <add>, %74, %cst_24 [1] : vector<256x64xf32> to vector<256xf32>
    %76 = vector.shape_cast %75 : vector<256xf32> to vector<256x1xf32>
    %77 = arith.mulf %76, %55 : vector<256x1xf32>
    %c256_i32 = arith.constant 256 : i32
    %78 = arith.muli %arg1, %c256_i32 : i32
    %79 = tpu.iota {dimensions = array<i32: 0>} : vector<256x1xi32>
    %80 = vector.broadcast %78 : i32 to vector<256x1xi32>
    %81 = arith.addi %80, %79 : vector<256x1xi32>
    %82 = arith.sitofp %81 : vector<256x1xi32> to vector<256x1xf32>
    %cst_25 = arith.constant 5.000000e-01 : f32
    %83 = vector.broadcast %cst_25 : f32 to vector<256x1xf32>
    %84 = arith.addf %82, %83 : vector<256x1xf32>
    %cst_26 = arith.constant 6.250000e-02 : f32
    %85 = vector.broadcast %cst_26 : f32 to vector<256x1xf32>
    %86 = arith.mulf %84, %85 : vector<256x1xf32>
    %87 = math.floor %86 : vector<256x1xf32>
    %cst_27 = arith.constant 1.600000e+01 : f32
    %88 = vector.broadcast %cst_27 : f32 to vector<256x1xf32>
    %89 = arith.mulf %87, %88 : vector<256x1xf32>
    %90 = arith.subf %82, %89 : vector<256x1xf32>
    %c0_28 = arith.constant 0 : index
    %c0_29 = arith.constant 0 : index
    %c0_30 = arith.constant 0 : index
    %91 = vector.load %arg3[%c0_28, %c0_29, %c0_30] : memref<1x1x16xf32, #tpu.memory_space<vmem>>, vector<1x1x16xf32>
    %92 = vector.shape_cast %91 : vector<1x1x16xf32> to vector<1x16xf32>
    %93 = vector.extract_strided_slice %92 {offsets = [0, 0], sizes = [1, 3], strides = [1, 1]} : vector<1x16xf32> to vector<1x3xf32>
    %94 = vector.broadcast %90 : vector<256x1xf32> to vector<256x3xf32>
    %95 = vector.broadcast %93 : vector<1x3xf32> to vector<256x3xf32>
    %96 = arith.mulf %94, %95 : vector<256x3xf32>
    %97 = vector.extract_strided_slice %92 {offsets = [0, 3], sizes = [1, 3], strides = [1, 1]} : vector<1x16xf32> to vector<1x3xf32>
    %98 = vector.broadcast %87 : vector<256x1xf32> to vector<256x3xf32>
    %99 = vector.broadcast %97 : vector<1x3xf32> to vector<256x3xf32>
    %100 = arith.mulf %98, %99 : vector<256x3xf32>
    %101 = arith.addf %96, %100 : vector<256x3xf32>
    %102 = vector.extract_strided_slice %92 {offsets = [0, 6], sizes = [1, 3], strides = [1, 1]} : vector<1x16xf32> to vector<1x3xf32>
    %103 = vector.broadcast %102 : vector<1x3xf32> to vector<256x3xf32>
    %104 = arith.addf %101, %103 : vector<256x3xf32>
    %105 = vector.extract_strided_slice %92 {offsets = [0, 9], sizes = [1, 3], strides = [1, 1]} : vector<1x16xf32> to vector<1x3xf32>
    %106 = vector.broadcast %69 : vector<256x1xf32> to vector<256x3xf32>
    %107 = arith.mulf %104, %106 : vector<256x3xf32>
    %108 = vector.broadcast %105 : vector<1x3xf32> to vector<256x3xf32>
    %109 = arith.addf %107, %108 : vector<256x3xf32>
    %110 = vector.extract_strided_slice %104 {offsets = [0, 0], sizes = [256, 1], strides = [1, 1]} : vector<256x3xf32> to vector<256x1xf32>
    %111 = vector.extract_strided_slice %104 {offsets = [0, 1], sizes = [256, 1], strides = [1, 1]} : vector<256x3xf32> to vector<256x1xf32>
    %112 = vector.extract_strided_slice %104 {offsets = [0, 2], sizes = [256, 1], strides = [1, 1]} : vector<256x3xf32> to vector<256x1xf32>
    %cst_31 = arith.constant 0.111111112 : f32
    %113 = vector.broadcast %cst_31 : f32 to vector<256x1xf32>
    %114 = arith.mulf %77, %113 : vector<256x1xf32>
    %115 = arith.mulf %110, %114 : vector<256x1xf32>
    %116 = vector.broadcast %115 : vector<256x1xf32> to vector<256x3xf32>
    %117 = arith.mulf %104, %116 : vector<256x3xf32>
    %118 = vector.extract_strided_slice %104 {offsets = [0, 1], sizes = [256, 2], strides = [1, 1]} : vector<256x3xf32> to vector<256x2xf32>
    %119 = arith.mulf %111, %114 : vector<256x1xf32>
    %120 = vector.broadcast %119 : vector<256x1xf32> to vector<256x2xf32>
    %121 = arith.mulf %118, %120 : vector<256x2xf32>
    %122 = arith.mulf %112, %112 : vector<256x1xf32>
    %123 = arith.mulf %122, %114 : vector<256x1xf32>
    %124 = arith.mulf %110, %110 : vector<256x1xf32>
    %125 = arith.mulf %111, %111 : vector<256x1xf32>
    %126 = arith.addf %124, %125 : vector<256x1xf32>
    %127 = arith.mulf %112, %112 : vector<256x1xf32>
    %128 = arith.addf %126, %127 : vector<256x1xf32>
    %cst_32 = arith.constant 1.000000e-24 : f32
    %129 = vector.broadcast %cst_32 : f32 to vector<256x1xf32>
    %130 = arith.maximumf %128, %129 : vector<256x1xf32>
    %131 = math.rsqrt %130 : vector<256x1xf32>
    %132 = vector.broadcast %131 : vector<256x1xf32> to vector<256x3xf32>
    %133 = arith.mulf %104, %132 : vector<256x3xf32>
    %134 = vector.extract_strided_slice %30 {offsets = [0, 96], sizes = [256, 1], strides = [1, 1]} : vector<256x128xf32> to vector<256x1xf32>
    %135 = arith.negf %134 : vector<256x1xf32>
    %136 = math.exp %135 : vector<256x1xf32>
    %cst_33 = arith.constant 1.000000e+00 : f32
    %137 = vector.broadcast %cst_33 : f32 to vector<256x1xf32>
    %138 = arith.addf %137, %136 : vector<256x1xf32>
    %139 = arith.divf %137, %138 : vector<256x1xf32>
    %cst_34 = arith.constant 0.000000e+00 : f32
    %140 = vector.broadcast %cst_34 : f32 to vector<256x3xf32>
    %141 = tpu.concatenate %109, %117, %121, %123, %133, %139, %140 in 1 : vector<256x3xf32>, vector<256x3xf32>, vector<256x2xf32>, vector<256x1xf32>, vector<256x3xf32>, vector<256x1xf32>, vector<256x3xf32> -> vector<256x16xf32>
    %c0_35 = arith.constant 0 : index
    %c0_36 = arith.constant 0 : index
    %c0_37 = arith.constant 0 : index
    %142 = vector.load %arg10[%c0_35, %c0_36, %c0_37] : memref<1x256x16xf32, #tpu.memory_space<vmem>>, vector<1x256x16xf32>
    %143 = vector.shape_cast %142 : vector<1x256x16xf32> to vector<256x16xf32>
    %144 = vector.shape_cast %141 : vector<256x16xf32> to vector<1x256x16xf32>
    tpu.vector_store %arg10[%c0_35, %c0_36, %c0_37], %144 {strides = array<i32>} : memref<1x256x16xf32, #tpu.memory_space<vmem>>, vector<1x256x16xf32>,
    return
  }
  func.func @transform_0(%arg0: i32, %arg1: i32) -> (i32, i32, i32) {
    %c0_i32 = arith.constant 0 : i32
    %c0_i32_0 = arith.constant 0 : i32
    return %arg0, %arg1, %c0_i32 : i32, i32, i32
  }
  func.func @transform_1(%arg0: i32, %arg1: i32) -> (i32, i32, i32) {
    %c0_i32 = arith.constant 0 : i32
    %c0_i32_0 = arith.constant 0 : i32
    %c0_i32_1 = arith.constant 0 : i32
    return %arg0, %c0_i32, %c0_i32_0 : i32, i32, i32
  }
  func.func @transform_2(%arg0: i32, %arg1: i32) -> (i32, i32) {
    %c0_i32 = arith.constant 0 : i32
    %c0_i32_0 = arith.constant 0 : i32
    %c0_i32_1 = arith.constant 0 : i32
    return %c0_i32, %c0_i32_0 : i32, i32
  }
  func.func @transform_3(%arg0: i32, %arg1: i32) -> (i32, i32) {
    %c0_i32 = arith.constant 0 : i32
    %c0_i32_0 = arith.constant 0 : i32
    %c0_i32_1 = arith.constant 0 : i32
    return %c0_i32, %c0_i32_0 : i32, i32
  }
  func.func @transform_4(%arg0: i32, %arg1: i32) -> (i32, i32) {
    %c0_i32 = arith.constant 0 : i32
    %c0_i32_0 = arith.constant 0 : i32
    %c0_i32_1 = arith.constant 0 : i32
    return %c0_i32, %c0_i32_0 : i32, i32
  }
  func.func @transform_5(%arg0: i32, %arg1: i32) -> (i32, i32) {
    %c0_i32 = arith.constant 0 : i32
    %c0_i32_0 = arith.constant 0 : i32
    %c0_i32_1 = arith.constant 0 : i32
    return %c0_i32, %c0_i32_0 : i32, i32
  }
  func.func @transform_6(%arg0: i32, %arg1: i32) -> (i32, i32, i32) {
    %c0_i32 = arith.constant 0 : i32
    %c0_i32_0 = arith.constant 0 : i32
    return %arg0, %c0_i32, %arg1 : i32, i32, i32
  }
  func.func @transform_7(%arg0: i32, %arg1: i32) -> (i32, i32, i32) {
    %c0_i32 = arith.constant 0 : i32
    %c0_i32_0 = arith.constant 0 : i32
    return %arg0, %arg1, %c0_i32 : i32, i32, i32
  }
  func.func @transform_8(%arg0: i32, %arg1: i32) -> (i32, i32, i32) {
    %c0_i32 = arith.constant 0 : i32
    %c0_i32_0 = arith.constant 0 : i32
    return %arg0, %arg1, %c0_i32 : i32, i32, i32
  }
}

</mosaic_0001>

<bundles_post_ra>
// kernel: custom-call.11
= control target key start
LH: loop header
LB: loop body
LE: loop exit
PB: predicated region body
PF: predicated region fallthrough
CT: control target
= control target key end

     0   :  { %5 = vsyncpa [#allocation2], 0  ;;  %s944_s0 = inlined_call_operand.hbm [shape: f32[2,4,4], index: 0, kind: input, shape index: {}]   ;;  %s945_s1 = inlined_call_operand.vmem [shape: f32[2,4,4], index: 1, kind: output, shape index: {0}]   ;;  %s946_s2 = inlined_call_operand.hbm [shape: s32[2,4], index: 2, kind: output, shape index: {1}]   ;;  %s947_s3 = inlined_call_operand.vmem [shape: s32[2,4], index: 3, kind: output, shape index: {2}]  }
   0x1   :  { %7 = vsyncpa [#allocation2 + $0x1], 0 }
   0x2   :  { %8 = vsyncpa [#allocation3], 0 }
   0x3   :  { %10 = vsyncpa [#allocation3 + $0x1], 0  ;;  %s735_s12 = smov 0   ;;  %s737_s13 = smov 0  }
   0x4   :  { %s739_s14 = smov 0   ;;  %s741_s15 = smov 0  }
   0x5 LB: > { %s756_s16 = sadd.s32 4294967295, %s706_s15   ;;  %s536_s17 = sadd.s32 4294967294, %s706_s15   ;;  %s706_s15 = sphi %s741_s15, %s959_s15   ;;  %s702_s14 = sphi %s739_s14, %s958_s14   ;;  %s698_s13 = sphi %s737_s13, %s957_s13   ;;  %s694_s12 = sphi %s735_s12, %s956_s12  }
   0x6   : > { %s760_s18 = sadd.s32 1, %s706_s15   ;;  %s20_s19 = sshrl.u32 %s706_s15, 3 }
   0x7   : > { %s21_s20 = sshrl.u32 %s760_s18, 3  ;;  %s25_s21 = sadd.s32 1, %s702_s14 }
   0x8   : > { %s22_s22 = ssub.s32 %s20_s19, %s21_s20  ;;  %p35_p0 = scmp.ne.s32.totalorder %s702_s14, %s698_s13 }
   0x9   : > { %p23_p1 = scmp.eq.s32.totalorder %s22_s22, 0  ;;  %p36_p2 = scmp.eq.s32.totalorder %s756_s16, 1 }
   0xa   : > { %p41_p3 = scmp.ne.s32.totalorder %s698_s13, %s694_s12  ;;  %p42_p4 = scmp.eq.s32.totalorder %s536_s17, 1 }
   0xb   : > { %s771_s23 = scalar_select %p23_p1, %s702_s14, %s25_s21  }
   0xc   : > { %p773_p5 = por %p36_p2, %p35_p0  ;;  %p777_p6 = por %p42_p4, %p41_p3 }
   0xd   : > { %p565_p8 = scmp.lt.s32.totalorder %s706_s15, 2  ;;  %s87_s26 = sand.u32 1, %s706_s15  }
   0xe   : > { %s950_s25 = scalar_select %p777_p6, 1, 0 }
   0xf   : > { %s540_s27 = sshll.u32 %s706_s15, 6  ;;  %s539_s28 = sshll.u32 %s87_s26, 2 }
  0x10   : > { %s788_s4 = scalar_lea.hbm %s944_s0, %s540_s27  ;;  %s91_s5 = scalar_lea.vmem [#allocation1], %s539_s28 }
  0x11   : > { %s98_s6 = sshll.u32 %s91_s5, 4  ;;  %s88_s7 = scalar_lea.sflag [#allocation2], %s87_s26  ;;  %s791_s6 = int_to_ptr.vmem [resolvable:$true] %s98_s6 }
  0x12   : > { %s610_s8 = scalar_lea.hbm %s788_s4, 64  ;;  %s614_s11 = scalar_lea.hbm %s944_s0, 128 }
  0x13   : > { %p611_p11 = scmp.ne.s32.totalorder %s788_s4, %s610_s8  ;;  %p615_p0 = scmp.lt.u32.totalorder %s788_s4, %s944_s0 }
  0x14   : > { %p616_p1 = scmp.lt.u32.totalorder %s614_s11, %s610_s8  ;;  %p618_p3 = scmp.lt.u32.totalorder %s610_s8, %s788_s4 }
  0x15   : > { %p612_p12 = pnand %p611_p11, %p565_p8 }
  0x16   : > { %p617_p2 = por %p616_p1, %p615_p0 }
  0x17   : > { %p613_p13 = pneg %p612_p12 }
  0x18   : > { %p619_p4 = por %p618_p3, %p617_p2 }
  0x1a   : > { %p620_p7 = pnand %p619_p4, %p613_p13 }
  0x1c   : > { %623 = shalt.err (!%p620_p7)
}
  0x1d   : > { %s624_s20 = scalar_lea.vmem %s791_s6, 64  ;;  %s712_s21 = smov [#allocation1]  }
  0x1e   : > { %p625_p11 = scmp.ne.s32.totalorder %s791_s6, %s624_s20  ;;  %s628_s22 = sshll.u32 %s712_s21, 4  ;;  %s629_s22 = int_to_ptr.vmem [resolvable:$false] %s628_s22 }
  0x1f   : > { %s630_s26 = scalar_lea.vmem %s629_s22, 128  ;;  %p631_p10 = scmp.lt.s32.totalorder %s791_s6, %s629_s22 }
  0x20   : > { %p626_p12 = pnand %p625_p11, %p565_p8  ;;  %p632_p6 = scmp.lt.s32.totalorder %s630_s26, %s624_s20 }
  0x22   : > { %p627_p9 = pneg %p626_p12  ;;  %p633_p0 = por %p632_p6, %p631_p10 }
  0x24   : > { %p634_p1 = pnand %p633_p0, %p627_p9 }
  0x26   : > { %637 = shalt.err (!%p634_p1)
}
  0x27   : > { %558 = dma.hbm_to_vmem [thread:$0]  (%p565_p8), %s788_s4, 64, %s791_s6, %s88_s7  }
  0x28   : > { %p951_p7 = scmp.lt.s32.totalorder %s706_s15, 3  ;;  %p952_p13 = scmp.ge.s32.totalorder %s706_s15, 1 }
  0x2a   : > { %p104_p2 = pnand %p952_p13, %p951_p7 }
  0x2c   : > { %107 = sbr.rel (%p104_p2) target bundleno = 474 (0x1da), region = 20 }
  0x33   : > { %s109_s27 = sand.u32 1, %s756_s16  }
  0x34   : > { %s110_s28 = scalar_lea.sflag [#allocation2], %s109_s27 }
  0x35   : > { %686 = dma.done.wait %s110_s28, 64  }
  0x36   : > { %687 = vsyncadd %s110_s28, 4294967232  ;;  %s820_s29 = sshll.u32 %s109_s27, 2  ;;  %s145_s30 = sand.u32 7, %s756_s16   ;;  %v150_v0 = vlaneseq  ;;  %v713_v2 = vmov 0  }
  0x37   : > { %s826_s4 = scalar_lea.vmem [#allocation6], %s145_s30  ;;  %s128_s5 = sand.u32 1, %s698_s13  }
  0x38   : > { %v824_v1 = vshrl.u32 %v150_v0, 7  ;;  %149 = vst [vmem:[%s826_s4] sm:$0x1] %v713_v2  ;;  %s833_s6 = sshll.u32 %s128_s5, 1  ;;  %s119_s7 = scalar_lea.vmem [#allocation1], %s820_s29 }
  0x39   : > { %v139_v3 = vld [vmem:[%s119_s7] sm:$0xf]  ;;  %s123_s8 = scalar_lea.vmem [#allocation5], %s820_s29  ;;  %s130_s9 = scalar_lea.vmem [#allocation7], %s833_s6 }
  0x3a   : > { %154 = vst [vmem:[#allocation10] sm:$0xff] %v824_v1  ;;  %140 = vst [vmem:[#allocation0] sm:$0xf] %v139_v3  ;;  %s136_s10 = scalar_lea.vmem [#allocation9], %s833_s6  ;;  %s839_s11 = scalar_lea.vmem [#allocation8], %s145_s30 }
  0x3b   : > { %s841_s17 = smov 0  }
  0x41   : > { %v143_v4 = vld [vmem:[#allocation0] sm:$0xff] }
  0x42   : > { %144 = vst [vmem:[#allocation4] sm:$0xff] %v143_v4 }
  0x43 LB: >> { %vm170_vm0 = vcmp.lt.s32.totalorder %v824_v1, 4  ;;  %v848_v7 = vstv %s710_s17  ;;  %s211_s19 = ssub.s32 128, %s710_s17  ;;  %v217_v37 = vand.u32 127, %v150_v0  ;;  %v220_v39 = vld [vmem:[%s826_s4] ss:$0 sm:$0xff]  ;;  %s223_s20 = scalar_lea.vmem [#allocation4], %s710_s17  ;;  %s710_s17 = sphi %s841_s17, %s160_s17  }
  0x44   : >> { %vm169_vm1 = vcmp.ge.s32.totalorder %v824_v1, %v848_v7  ;;  %s229_s22 = scalar_lea.vmem [#allocation10], %s710_s17  ;;  %vm249_vm15 = vcmp.gt.s32.totalorder %v824_v1, %v848_v7  ;;  %s160_s17 = sadd.s32 1, %s710_s17  }
  0x45   : >> { %vm171_vm3 = vmand %vm169_vm1, %vm170_vm0  ;;  %vm241_vm12 = vcmp.gt.s32.totalorder %v217_v37, %v848_v7  ;;  %vm218_vm13 = vcmp.eq.s32.totalorder %v217_v37, %v848_v7  ;;  %v231_v41 = vld [vmem:[%s229_s22] ss:$0 sm:$0xff]  ;;  %p157_p6 = scmp.ge.s32.totalorder %s160_s17, 4  }
  0x46   : >> { %vm253_vm1 = vmand %vm249_vm15, %vm218_vm13  ;;  %s948_s28 = sshrl.u32 (%p157_p6), %s756_s16, 3  ;;  %s550_s30 = sshll.u32 (%p157_p6), %s756_s16, 2 }
  0x47   : > { %s551_s7 = sshll.u32 (%p157_p6), %s948_s28, 5 }
  0x49   : >> { %v165_v5 = vld [vmem:[#allocation4] sm:$0xff]  ;;  %v225_v40 = vld [vmem:[%s223_s20] ss:$0 sm:$0xff] }
  0x4a   : >> { %v166_v6 = vand.u32 2147483647, %v165_v5 }
  0x4c   : >> { %vm546_vm2 = vcmp.gt.f32.partialorder %v166_v6, -inf }
  0x4d   : >> { %vm173_vm4 = vmand %vm171_vm3, %vm546_vm2 }
  0x4e   : >> { %v174_v8 = vsel %vm173_vm4, %v824_v1, %v848_v7  ;;  %v175_v9 = vsel %vm173_vm4, %v166_v6, -inf }
  0x4f   : >> { %v176_v10 = vrot.slane %v175_v9, 1  ;;  %v177_v11 = vrot.slane %v174_v8, 1 }
  0x51   : >> { %vm178_vm5 = vcmp.ge.f32.partialorder %v176_v10, %v175_v9  ;;  %v181_v12 = vrot.slane %v176_v10, 1  ;;  %v182_v13 = vrot.slane %v177_v11, 1 }
  0x52   : >> { %v179_v14 = vsel %vm178_vm5, %v176_v10, %v175_v9  ;;  %v180_v15 = vsel %vm178_vm5, %v177_v11, %v174_v8 }
  0x53   : >> { %vm183_vm6 = vcmp.ge.f32.partialorder %v181_v12, %v179_v14  ;;  %v186_v16 = vrot.slane %v181_v12, 1  ;;  %v187_v17 = vrot.slane %v182_v13, 1 }
  0x54   : >> { %v184_v18 = vsel %vm183_vm6, %v181_v12, %v179_v14  ;;  %v185_v19 = vsel %vm183_vm6, %v182_v13, %v180_v15 }
  0x55   : >> { %vm188_vm7 = vcmp.ge.f32.partialorder %v186_v16, %v184_v18  ;;  %v191_v20 = vrot.slane %v186_v16, 1  ;;  %v192_v21 = vrot.slane %v187_v17, 1 }
  0x56   : >> { %v189_v22 = vsel %vm188_vm7, %v186_v16, %v184_v18  ;;  %v190_v23 = vsel %vm188_vm7, %v187_v17, %v185_v19 }
  0x57   : >> { %vm193_vm8 = vcmp.ge.f32.partialorder %v191_v20, %v189_v22  ;;  %v196_v24 = vrot.slane %v191_v20, 1  ;;  %v197_v25 = vrot.slane %v192_v21, 1 }
  0x58   : >> { %v194_v26 = vsel %vm193_vm8, %v191_v20, %v189_v22  ;;  %v195_v27 = vsel %vm193_vm8, %v192_v21, %v190_v23 }
  0x59   : >> { %vm198_vm9 = vcmp.ge.f32.partialorder %v196_v24, %v194_v26  ;;  %v201_v28 = vrot.slane %v196_v24, 1  ;;  %v202_v29 = vrot.slane %v197_v25, 1 }
  0x5a   : >> { %v199_v30 = vsel %vm198_vm9, %v196_v24, %v194_v26  ;;  %v200_v31 = vsel %vm198_vm9, %v197_v25, %v195_v27 }
  0x5b   : >> { %vm203_vm10 = vcmp.ge.f32.partialorder %v201_v28, %v199_v30  ;;  %v206_v32 = vrot.slane %v201_v28, 1  ;;  %v207_v33 = vrot.slane %v202_v29, 1 }
  0x5c   : >> { %v204_v34 = vsel %vm203_vm10, %v201_v28, %v199_v30  ;;  %v205_v35 = vsel %vm203_vm10, %v202_v29, %v200_v31 }
  0x5d   : >> { %vm208_vm11 = vcmp.ge.f32.partialorder %v206_v32, %v204_v34 }
  0x5e   : >> { %v210_v36 = vsel %vm208_vm11, %v207_v33, %v205_v35 }
  0x5f   : >> { %212 = vrot.lane.b32.xlu0 %v210_v36, %s211_s19  ;;  %s341_s19 = scalar_lea.vmem (%p157_p6), %s945_s1, %s550_s30 }
  0xd1   : >> { %v213_v38 = vpop.permute.xlu0 %212 }
  0xd2   : >> { %555 = vpush %v213_v38 }
 0x103   : >> { %s556_s21 = spop %555 }
 0x104   : >> { %v219_v42 = vstv %s556_s21  ;;  %s224_s26 = scalar_lea.vmem [#allocation4], %s556_s21  ;;  %s230_s27 = scalar_lea.vmem [#allocation10], %s556_s21 }
 0x105   : >> { %v226_v43 = vld [vmem:[%s224_s26] ss:$0 sm:$0xff]  ;;  %v221_v45 = vsel %vm218_vm13, %v219_v42, %v220_v39 }
 0x106   : >> { %v232_v44 = vld [vmem:[%s230_s27] ss:$0 sm:$0xff]  ;;  %227 = vst [vmem:[%s224_s26] sm:$0x1] %v225_v40  ;;  %vm235_vm14 = vcmp.ne.f32.partialorder %v226_v43, 0.0  ;;  %222 = vst [vmem:[%s826_s4] sm:$0x1] %v221_v45  ;;  %v242_v52 = vsel %vm241_vm12, %v226_v43, 0.0 }
 0x107   : >> { %233 = vst [vmem:[%s230_s27] sm:$0x1] %v231_v41  ;;  %228 = vst [vmem:[%s223_s20] sm:$0x1] %v226_v43  ;;  %s383_s26 = sshll.u32 (%p157_p6), %s130_s9, 4  ;;  %s332_s27 = scalar_lea.sflag (%p157_p6), [#allocation3], %s128_s5  ;;  %s384_s26 = int_to_ptr.vmem [resolvable:$true] %s383_s26 }
 0x108   : >> { %234 = vst [vmem:[%s229_s22] sm:$0x1] %v232_v44  ;;  %vm236_vm0 = vmand %vm218_vm13, %vm235_vm14  ;;  %s891_s22 = scalar_lea.hbm (%p157_p6), %s946_s2, %s551_s7  ;;  %s638_s28 = scalar_lea.vmem (%p157_p6), %s384_s26, 32 }
 0x109   : >> { %v237_v46 = vsel %vm236_vm0, %v226_v43, 1.0  ;;  %p639_p8 = scmp.ne.s32.totalorder (%p157_p6), %s384_s26, %s638_s28  ;;  %s714_s4 = smov (%p157_p6), [#allocation7]  }
 0x10a   : >> { %v250_v47 = vsel %vm249_vm15, %v237_v46, 1.0  ;;  %s642_s30 = sshll.u32 (%p157_p6), %s714_s4, 4  ;;  %s643_s30 = int_to_ptr.vmem [resolvable:$false] %s642_s30 }
 0x10b   : >> { %608 = vrcp.f32 %v250_v47  ;;  %p640_p9 = pnand (%p157_p6), %p639_p8, %p773_p5  ;;  %s644_s29 = scalar_lea.vmem (%p157_p6), %s643_s30, 64 }
 0x10c   : > { %p645_p3 = scmp.lt.s32.totalorder (%p157_p6), %s384_s26, %s643_s30  ;;  %p646_p4 = scmp.lt.s32.totalorder (%p157_p6), %s644_s29, %s638_s28 }
 0x10d   : > { %v318_v58 = vld [vmem:[#allocation6] sm:$0x3] (%p157_p6)  ;;  %p641_p10 = pneg (%p157_p6), %p640_p9 }
 0x10e   : >> { %v246_v49 = vld [vmem:[#allocation4] sm:$0xff]  ;;  %320 = vst [vmem:[%s130_s9] sm:$0x3] (%p157_p6), %v318_v58  ;;  %p647_p11 = por (%p157_p6), %p646_p4, %p645_p3 }
 0x10f   : > { %v260_v56 = vld [vmem:[#allocation10] sm:$0xff] (%p157_p6) }
 0x110   : > { %p648_p12 = pnand (%p157_p6), %p647_p11, %p641_p10 }
 0x115   : >> { %v609_v48 = vpop.eup %608 }
 0x116   : >> { %v252_v50 = vmul.f32 %v609_v48, %v246_v49 }
 0x118   : >> { %v254_v51 = vsel %vm253_vm1, %v252_v50, 0.0 }
 0x119   : >> { %255 = vadd.xlane.f32.xlu0 %v254_v51 }
 0x146   : > { %276 = vxpose.xlu0.b32.start.end [1/1] (short) (narrow) (%p157_p6), %v260_v56, 8 }
 0x1a5   : > { %159 = sbr.rel (!%p157_p6) target bundleno = 67 (0x43), region = 173 }
 0x1a6   : >> { %v256_v53 = vpop.xlane.xlu0 %255 }
 0x1a7   : >> { %v257_v54 = vmul.f32 %v256_v53, %v242_v52 }
 0x1a9   : >> { %v258_v55 = vsub.f32 %v252_v50, %v257_v54 }
 0x1ab   : >> { %259 = vst [vmem:[#allocation4] sm:$0xff] %v258_v55 }
 0x1b2   : > { %v312_v57 = vld [vmem:[#allocation4] sm:$0xf] }
 0x1b3   : > { %314 = vst [vmem:[%s123_s8] sm:$0xf] %v312_v57 }
 0x1ba   : > { %v357_v59 = vld [vmem:[%s123_s8] sm:$0xf] }
 0x1bb   : > { %358 = vst [vmem:[%s341_s19] sm:$0xf] %v357_v59 }
 0x1bc   : > { %651 = shalt.err (!%p648_p12)
}
 0x1bd   : > { %s652_s5 = scalar_lea.hbm %s891_s22, 32  ;;  %s656_s7 = scalar_lea.hbm %s946_s2, 32 }
 0x1be   : > { %p653_p0 = scmp.ne.s32.totalorder %s891_s22, %s652_s5  ;;  %p657_p13 = scmp.lt.u32.totalorder %s891_s22, %s946_s2 }
 0x1bf   : > { %p658_p2 = scmp.lt.u32.totalorder %s656_s7, %s652_s5  ;;  %p660_p8 = scmp.lt.u32.totalorder %s652_s5, %s891_s22 }
 0x1c0   : > { %p654_p1 = pnand %p653_p0, %p773_p5 }
 0x1c1   : > { %p659_p6 = por %p658_p2, %p657_p13 }
 0x1c2   : > { %p655_p7 = pneg %p654_p1 }
 0x1c3   : > { %p661_p9 = por %p660_p8, %p659_p6 }
 0x1c5   : > { %p662_p10 = pnand %p661_p9, %p655_p7 }
 0x1c7   : > { %665 = shalt.err (!%p662_p10)
}
 0x1c8   : > { %559 = dma.vmem_to_hbm [thread:$0]  (%p773_p5), %s384_s26, 32, %s891_s22, %s332_s27   ;;  %v292_v60 = vpop.trf.xlu0 }
 0x1c9   : > { %308 = vst [vmem:[%s839_s11] sm:$0x1] %v292_v60  ;;  %s953_s28 = sshrl.u32 (%p773_p5), %s756_s16, 3 }
 0x1ca   : > { %s552_s20 = sshll.u32 (%p773_p5), %s953_s28, 1 }
 0x1cb   : > { %389 = sbr.rel (!%p773_p5) target bundleno = 474 (0x1da), region = 66  ;;  %s392_s30 = scalar_lea.vmem (%p773_p5), %s947_s3, %s552_s20 }
 0x1d0   : > { %v324_v61 = vld [vmem:[#allocation8] sm:$0x3] }
 0x1d1   : > { %326 = vst [vmem:[%s136_s10] sm:$0x3] %v324_v61 }
 0x1d8   : > { %v408_v62 = vld [vmem:[%s136_s10] sm:$0x3] }
 0x1d9   : > { %409 = vst [vmem:[%s392_s30] sm:$0x3] %v408_v62 }
 0x1da PF: > { %s436_s11 = sand.u32 1, %s694_s12   ;;  %p954_p3 = scmp.ne.s32.totalorder %s950_s25, 0 }
 0x1db   : > { %p955_p4 = scmp.ge.s32.totalorder %s706_s15, 2  ;;  %s437_s24 = scalar_lea.sflag [#allocation3], %s436_s11 }
 0x1dd   : > { %p562_p5 = pnand %p955_p4, %p954_p3 }
 0x1df   : > { %689 = dma.done.wait (!%p562_p5), %s437_s24, 32  }
 0x1e0   : > { %691 = vsyncadd (!%p562_p5), %s437_s24, 4294967264  ;;  %p13_p11 = scmp.ge.s32.totalorder %s760_s18, 4   ;;  %s956_s12 = smov %s698_s13 }
 0x1e1   : > { %s957_s13 = smov %s702_s14  ;;  %s958_s14 = smov %s771_s23 }
 0x1e2   : > { %s959_s15 = smov %s760_s18  ;;  %15 = sbr.rel (!%p13_p11) target bundleno = 5 (0x5), region = 184 }
 0x1e9   :  { %449 = vsyncpa [#allocation2], 1 }
 0x1ea   :  { %451 = vsyncpa [#allocation2 + $0x1], 1 }
 0x1eb   :  { %452 = vsyncpa [#allocation3], 1 }
 0x1ec   :  { %454 = vsyncpa [#allocation3 + $0x1], 1 }

// kernel: custom-call.13
= control target key start
LH: loop header
LB: loop body
LE: loop exit
PB: predicated region body
PF: predicated region fallthrough
CT: control target
= control target key end

     0   :  { %s353_s6 = smov 0   ;;  %s355_s7 = smov 0   ;;  %s400_s0 = inlined_call_operand.vmem [shape: f32[2,1,4,4], index: 0, kind: input, shape index: {}]   ;;  %s401_s1 = inlined_call_operand.vmem [shape: f32[2,1,4,4], index: 1, kind: output, shape index: {}]  }
   0x1   :  { %s357_s8 = smov 0  }
   0x2 LB: > { %s279_s9 = sadd.s32 4294967295, %s340_s8   ;;  %s33_s10 = sadd.s32 1, %s336_s7  ;;  %s340_s8 = sphi %s357_s8, %s7_s8   ;;  %s336_s7 = sphi %s355_s7, %s403_s7   ;;  %s332_s6 = sphi %s353_s6, %s402_s6  }
   0x3   : > { %p35_p0 = scmp.ge.s32.totalorder %s33_s10, 2  ;;  %p281_p1 = scmp.ge.s32.totalorder %s340_s8, 2 }
   0x4   : > { %s49_s11 = sand.u32 (!%p281_p1), 1, %s340_s8   ;;  %s283_s12 = sshll.u32 (!%p281_p1), %s336_s7, 2 }
   0x5   : > { %s405_s10 = smov (%p35_p0, %s33_s10), 0  ;;  %47 = sbr.rel (%p281_p1) target bundleno = 12 (0xc), region = 16 }
   0x6   : > { %s282_s13 = sshll.u32 (!%p281_p1), %s49_s11, 2  ;;  %s56_s16 = scalar_lea.vmem (!%p281_p1), %s400_s0, %s283_s12 }
   0x7   : > { %v72_v0 = vld [vmem:[%s56_s16] sm:$0xf] (!%p281_p1)  ;;  %s51_s17 = scalar_lea.vmem (!%p281_p1), [#allocation1], %s282_s13 }
   0x8   : > { %73 = vst [vmem:[%s51_s17] sm:$0xf] (!%p281_p1), %v72_v0 }
   0xc PF: > { %p284_p2 = scmp.ge.s32.totalorder %s340_s8, 1  ;;  %p89_p3 = scmp.lt.s32.totalorder %s340_s8, 3 }
   0xe   : > { %p90_p4 = pnand %p284_p2, %p89_p3 }
  0x10   : > { %93 = sbr.rel (%p90_p4) target bundleno = 656 (0x290), region = 50 }
  0x17   : > { %s380_s18 = sand.u32 1, %s279_s9   ;;  %v111_v1 = vlaneseq  ;;  %v342_v11 = vmov -1.0   ;;  %s288_s22 = sshll.u32 %s332_s6, 2 }
  0x18   : > { %s285_s19 = sshll.u32 %s380_s18, 2  ;;  %s188_s25 = scalar_lea.vmem %s401_s1, %s288_s22 }
  0x19   : > { %s102_s20 = scalar_lea.vmem [#allocation1], %s285_s19  ;;  %v112_v3 = vand.u32 127, %v111_v1  ;;  %v115_v4 = vshrl.u32 %v111_v1, 7  ;;  %s106_s21 = scalar_lea.vmem [#allocation3], %s285_s19 }
  0x1a   : > { %v109_v2 = vld [vmem:[%s102_s20] sm:$0xf] }
  0x1b   : > { %110 = vst [vmem:[#allocation0] sm:$0xf] %v109_v2  ;;  %vm113_vm0 = vcmp.lt.s32.totalorder %v112_v3, 4  ;;  %vm122_vm1 = vcmp.ge.s32.totalorder %v115_v4, %v112_v3  ;;  %vm117_vm2 = vcmp.eq.s32.totalorder %v115_v4, %v112_v3  ;;  %vm136_vm4 = vcmp.eq.s32.totalorder %v112_v3, 0 }
  0x1c   : > { %vm123_vm3 = vmand %vm122_vm1, %vm113_vm0  ;;  %vm133_vm5 = vcmp.eq.s32.totalorder %v112_v3, %v115_v4  ;;  %v137_v12 = vsel %vm136_vm4, 1.0, %v342_v11  ;;  %vm144_vm6 = vcmp.eq.s32.totalorder %v112_v3, 1  ;;  %vm154_vm7 = vcmp.eq.s32.totalorder %v112_v3, 2 }
  0x1d   : > { %v138_v13 = vsel %vm133_vm5, %v137_v12, 0.0  ;;  %vm164_vm8 = vcmp.eq.s32.totalorder %v112_v3, 3 }
  0x22   : > { %v118_v5 = vld [vmem:[#allocation0] sm:$0xff] }
  0x23   : > { %v119_v6 = vsel %vm117_vm2, %v118_v5, 0.0  ;;  %v124_v7 = vsel %vm123_vm3, %v118_v5, 0.0 }
  0x24   : > { %120 = vadd.xlane.f32.xlu0 %v119_v6 }
  0xb1   : > { %v121_v8 = vpop.xlane.xlu0 %120 }
  0xb2   : > { %316 = vrcp.f32 %v121_v8  ;;  %vm171_vm9 = vweird.f32 %v121_v8 }
  0xbc   : > { %v317_v9 = vpop.eup %316 }
  0xbd   : > { %v126_v10 = vmul.f32 %v317_v9, %v124_v7 }
  0xbf   : > { %127 = vst [vmem:[#allocation4] sm:$0xff] %v126_v10 }
  0xc6   : > { %v140_v14 = vld [vmem:[#allocation4 + $0x1] ss:$0 sm:$0xff]  ;;  %v150_v17 = vld [vmem:[#allocation4 + $0x2] ss:$0 sm:$0xff]  ;;  %v160_v22 = vld [vmem:[#allocation4 + $0x3] ss:$0 sm:$0xff] }
  0xc7   : > { %v141_v15 = vxor.u32 2147483648, %v140_v14  ;;  %v151_v19 = vxor.u32 2147483648, %v150_v17  ;;  %v161_v24 = vxor.u32 2147483648, %v160_v22 }
  0xc9   : > { %v145_v16 = vmul.f32 %v141_v15, %v138_v13 }
  0xcb   : > { %146 = vadd.xlane.f32.xlu0 %v145_v16 }
 0x158   : > { %v147_v18 = vpop.xlane.xlu0 %146 }
 0x159   : > { %v148_v20 = vsel %vm144_vm6, %v147_v18, %v138_v13 }
 0x15a   : > { %v155_v21 = vmul.f32 %v151_v19, %v148_v20 }
 0x15c   : > { %156 = vadd.xlane.f32.xlu1 %v155_v21 }
 0x1e9   : > { %v157_v23 = vpop.xlane.xlu1 %156 }
 0x1ea   : > { %v158_v25 = vsel %vm154_vm7, %v157_v23, %v148_v20 }
 0x1eb   : > { %v165_v26 = vmul.f32 %v161_v24, %v158_v25 }
 0x1ed   : > { %166 = vadd.xlane.f32.xlu1 %v165_v26 }
 0x27a   : > { %v167_v27 = vpop.xlane.xlu1 %166 }
 0x27b   : > { %v168_v28 = vsel %vm164_vm8, %v167_v27, %v158_v25 }
 0x27c   : > { %v170_v29 = vmul.f32 %v317_v9, %v168_v28 }
 0x27e   : > { %v172_v30 = vsel %vm171_vm9, %v168_v28, %v170_v29 }
 0x27f   : > { %173 = vst [vmem:[#allocation2] sm:$0xff] %v172_v30 }
 0x286   : > { %v177_v31 = vld [vmem:[#allocation2] sm:$0xf] }
 0x287   : > { %179 = vst [vmem:[%s106_s21] sm:$0xf] %v177_v31 }
 0x28e   : > { %v204_v32 = vld [vmem:[%s106_s21] sm:$0xf] }
 0x28f   : > { %205 = vst [vmem:[%s188_s25] sm:$0xf] %v204_v32 }
 0x290 PF: > { %s7_s8 = sadd.s32 1, %s340_s8   ;;  %s402_s6 = smov %s336_s7 }
 0x291   : > { %p4_p5 = scmp.ge.s32.totalorder %s7_s8, 4   ;;  %s403_s7 = smov %s405_s10 }
 0x293   :  { %6 = sbr.rel (!%p4_p5) target bundleno = 2 (0x2), region = 113 }

// kernel: custom-call.12
= control target key start
LH: loop header
LB: loop body
LE: loop exit
PB: predicated region body
PF: predicated region fallthrough
CT: control target
= control target key end

     0   :  { %s352_s6 = smov 0   ;;  %s354_s7 = smov 0   ;;  %s399_s0 = inlined_call_operand.vmem [shape: f32[2,1,4,4], index: 0, kind: input, shape index: {}]   ;;  %s400_s1 = inlined_call_operand.vmem [shape: f32[2,1,4,4], index: 1, kind: output, shape index: {}]  }
   0x1   :  { %s356_s8 = smov 0  }
   0x2 LB: > { %s278_s9 = sadd.s32 4294967295, %s339_s8   ;;  %s33_s10 = sadd.s32 1, %s335_s7  ;;  %s339_s8 = sphi %s356_s8, %s7_s8   ;;  %s335_s7 = sphi %s354_s7, %s402_s7   ;;  %s331_s6 = sphi %s352_s6, %s401_s6  }
   0x3   : > { %p35_p0 = scmp.ge.s32.totalorder %s33_s10, 2  ;;  %p280_p1 = scmp.ge.s32.totalorder %s339_s8, 2 }
   0x4   : > { %s49_s11 = sand.u32 (!%p280_p1), 1, %s339_s8   ;;  %s282_s12 = sshll.u32 (!%p280_p1), %s335_s7, 2 }
   0x5   : > { %s404_s10 = smov (%p35_p0, %s33_s10), 0  ;;  %47 = sbr.rel (%p280_p1) target bundleno = 12 (0xc), region = 16 }
   0x6   : > { %s281_s13 = sshll.u32 (!%p280_p1), %s49_s11, 2  ;;  %s56_s16 = scalar_lea.vmem (!%p280_p1), %s399_s0, %s282_s12 }
   0x7   : > { %v72_v0 = vld [vmem:[%s56_s16] sm:$0xf] (!%p280_p1)  ;;  %s51_s17 = scalar_lea.vmem (!%p280_p1), [#allocation1], %s281_s13 }
   0x8   : > { %73 = vst [vmem:[%s51_s17] sm:$0xf] (!%p280_p1), %v72_v0 }
   0xc PF: > { %p283_p2 = scmp.ge.s32.totalorder %s339_s8, 1  ;;  %p89_p3 = scmp.lt.s32.totalorder %s339_s8, 3 }
   0xe   : > { %p90_p4 = pnand %p283_p2, %p89_p3 }
  0x10   : > { %93 = sbr.rel (%p90_p4) target bundleno = 656 (0x290), region = 50 }
  0x17   : > { %s379_s18 = sand.u32 1, %s278_s9   ;;  %v111_v1 = vlaneseq  ;;  %v341_v11 = vmov -1.0   ;;  %s287_s22 = sshll.u32 %s331_s6, 2 }
  0x18   : > { %s284_s19 = sshll.u32 %s379_s18, 2  ;;  %s187_s25 = scalar_lea.vmem %s400_s1, %s287_s22 }
  0x19   : > { %s102_s20 = scalar_lea.vmem [#allocation1], %s284_s19  ;;  %v112_v3 = vand.u32 127, %v111_v1  ;;  %v115_v4 = vshrl.u32 %v111_v1, 7  ;;  %s106_s21 = scalar_lea.vmem [#allocation3], %s284_s19 }
  0x1a   : > { %v109_v2 = vld [vmem:[%s102_s20] sm:$0xf] }
  0x1b   : > { %110 = vst [vmem:[#allocation0] sm:$0xf] %v109_v2  ;;  %vm113_vm0 = vcmp.lt.s32.totalorder %v112_v3, 4  ;;  %vm122_vm1 = vcmp.le.s32.totalorder %v115_v4, %v112_v3  ;;  %vm117_vm2 = vcmp.eq.s32.totalorder %v115_v4, %v112_v3  ;;  %vm136_vm4 = vcmp.eq.s32.totalorder %v112_v3, 3 }
  0x1c   : > { %vm123_vm3 = vmand %vm122_vm1, %vm113_vm0  ;;  %vm133_vm5 = vcmp.eq.s32.totalorder %v112_v3, %v115_v4  ;;  %v137_v12 = vsel %vm136_vm4, 1.0, %v341_v11  ;;  %vm144_vm6 = vcmp.eq.s32.totalorder %v112_v3, 2  ;;  %vm154_vm7 = vcmp.eq.s32.totalorder %v112_v3, 1 }
  0x1d   : > { %v138_v13 = vsel %vm133_vm5, %v137_v12, 0.0  ;;  %vm163_vm8 = vcmp.eq.s32.totalorder %v112_v3, 0 }
  0x22   : > { %v118_v5 = vld [vmem:[#allocation0] sm:$0xff] }
  0x23   : > { %v119_v6 = vsel %vm117_vm2, %v118_v5, 0.0  ;;  %v124_v7 = vsel %vm123_vm3, %v118_v5, 0.0 }
  0x24   : > { %120 = vadd.xlane.f32.xlu0 %v119_v6 }
  0xb1   : > { %v121_v8 = vpop.xlane.xlu0 %120 }
  0xb2   : > { %315 = vrcp.f32 %v121_v8  ;;  %vm170_vm9 = vweird.f32 %v121_v8 }
  0xbc   : > { %v316_v9 = vpop.eup %315 }
  0xbd   : > { %v126_v10 = vmul.f32 %v316_v9, %v124_v7 }
  0xbf   : > { %127 = vst [vmem:[#allocation4] sm:$0xff] %v126_v10 }
  0xc6   : > { %v140_v14 = vld [vmem:[#allocation4 + $0x2] ss:$0 sm:$0xff]  ;;  %v150_v17 = vld [vmem:[#allocation4 + $0x1] ss:$0 sm:$0xff]  ;;  %v159_v22 = vld [vmem:[#allocation4] ss:$0 sm:$0xff] }
  0xc7   : > { %v141_v15 = vxor.u32 2147483648, %v140_v14  ;;  %v151_v19 = vxor.u32 2147483648, %v150_v17  ;;  %v160_v24 = vxor.u32 2147483648, %v159_v22 }
  0xc9   : > { %v145_v16 = vmul.f32 %v141_v15, %v138_v13 }
  0xcb   : > { %146 = vadd.xlane.f32.xlu0 %v145_v16 }
 0x158   : > { %v147_v18 = vpop.xlane.xlu0 %146 }
 0x159   : > { %v148_v20 = vsel %vm144_vm6, %v147_v18, %v138_v13 }
 0x15a   : > { %v155_v21 = vmul.f32 %v151_v19, %v148_v20 }
 0x15c   : > { %156 = vadd.xlane.f32.xlu1 %v155_v21 }
 0x1e9   : > { %v157_v23 = vpop.xlane.xlu1 %156 }
 0x1ea   : > { %v158_v25 = vsel %vm154_vm7, %v157_v23, %v148_v20 }
 0x1eb   : > { %v164_v26 = vmul.f32 %v160_v24, %v158_v25 }
 0x1ed   : > { %165 = vadd.xlane.f32.xlu1 %v164_v26 }
 0x27a   : > { %v166_v27 = vpop.xlane.xlu1 %165 }
 0x27b   : > { %v167_v28 = vsel %vm163_vm8, %v166_v27, %v158_v25 }
 0x27c   : > { %v169_v29 = vmul.f32 %v316_v9, %v167_v28 }
 0x27e   : > { %v171_v30 = vsel %vm170_vm9, %v167_v28, %v169_v29 }
 0x27f   : > { %172 = vst [vmem:[#allocation2] sm:$0xff] %v171_v30 }
 0x286   : > { %v176_v31 = vld [vmem:[#allocation2] sm:$0xf] }
 0x287   : > { %178 = vst [vmem:[%s106_s21] sm:$0xf] %v176_v31 }
 0x28e   : > { %v203_v32 = vld [vmem:[%s106_s21] sm:$0xf] }
 0x28f   : > { %204 = vst [vmem:[%s187_s25] sm:$0xf] %v203_v32 }
 0x290 PF: > { %s7_s8 = sadd.s32 1, %s339_s8   ;;  %s401_s6 = smov %s335_s7 }
 0x291   : > { %p4_p5 = scmp.ge.s32.totalorder %s7_s8, 4   ;;  %s402_s7 = smov %s404_s10 }
 0x293   :  { %6 = sbr.rel (!%p4_p5) target bundleno = 2 (0x2), region = 112 }

// kernel: gaussian_lss_forward.1
= control target key start
LH: loop header
LB: loop body
LE: loop exit
PB: predicated region body
PF: predicated region fallthrough
CT: control target
= control target key end

     0   :  { %s6091_s27 = smov 0   ;;  %s6093_s28 = smov 0   ;;  %s10722_s0 = inlined_call_operand.vmem [shape: f32[2,256,3], index: 0, kind: input, shape index: {}]   ;;  %s10723_s1 = inlined_call_operand.vmem [shape: f32[2,1,16], index: 1, kind: input, shape index: {}]   ;;  %s10724_s2 = inlined_call_operand.vmem [shape: f32[3,64], index: 2, kind: input, shape index: {}]   ;;  %s10725_s3 = inlined_call_operand.vmem [shape: f32[1,64], index: 3, kind: input, shape index: {}]   ;;  %s10726_s4 = inlined_call_operand.vmem [shape: bf16[64,128], index: 4, kind: input, shape index: {}]   ;;  %s10727_s5 = inlined_call_operand.vmem [shape: f32[1,128], index: 5, kind: input, shape index: {}]   ;;  %s10728_s6 = inlined_call_operand.vmem [shape: bf16[2,64,256], index: 6, kind: output, shape index: {0}]   ;;  %s10729_s7 = inlined_call_operand.vmem [shape: f32[2,256,32], index: 7, kind: output, shape index: {1}]   ;;  %s10730_s8 = inlined_call_operand.vmem [shape: f32[2,256,16], index: 8, kind: output, shape index: {2}]  }
   0x1   :  { %s6095_s29 = smov 0  }
   0x2 LB: > { %s31_s30 = sadd.s32 1, %s6026_s28  ;;  %p5379_p0 = scmp.ge.s32.totalorder %s6030_s29, 1  ;;  %s6030_s29 = sphi %s6095_s29, %s19_s29   ;;  %s6026_s28 = sphi %s6093_s28, %s12205_s28   ;;  %s6022_s27 = sphi %s6091_s27, %s12204_s27  }
   0x3   : > { %p33_p1 = scmp.ge.s32.totalorder %s31_s30, 2  ;;  %p300_p2 = scmp.lt.s32.totalorder %s6030_s29, 3 }
   0x5   : > { %s12207_s30 = smov (%p33_p1, %s31_s30), 0  ;;  %p301_p3 = pnand %p5379_p0, %p300_p2 }
   0x7   : > { %304 = sbr.rel (%p301_p3) target bundleno = 2440 (0x988), region = 44 }
   0xe   : > { %p364_p4 = scmp.lt.s32.totalorder %s6022_s27, 1  ;;  %v10733_v0 = vmov 1   ;;  %v10731_v1 = vmov 0   ;;  %v6034_v20 = vmov 2   ;;  %v5682_v37 = vld [vmem:[%s10726_s4] sm:$0xff]   ;;  %v5683_v40 = vld [vmem:[%s10726_s4 + $0x8] sm:$0xff]  }
   0xf   : > { %5572 = vset.pattern.permute.xlu0 %v10733_v0  ;;  %5571 = vset.pattern.permute.xlu1 %v10731_v1  ;;  %v5684_v43 = vld [vmem:[%s10726_s4 + $0x10] sm:$0xff]   ;;  %v5685_v48 = vld [vmem:[%s10726_s4 + $0x18] sm:$0xff]   ;;  %vm1154_vm0 = vcmask 523264   ;;  %s6035_s10 = smov 64   ;;  %vm1612_vm1 = vcmask 261120   ;;  %s6037_s21 = smov 122  }
  0x10   : > { %s12209_s27 = smov (!%p364_p4, %s6022_s27), 1  ;;  %5485 = vmatprep.subr.bf16.mxu0 %v5682_v37  ;;  %5525 = vmatprep.subr.bf16.mxu1 %v5682_v37  ;;  %s6038_s22 = smov 119   ;;  %vm4948_vm2 = vcmask 23552   ;;  %vm4981_vm3 = vcmask 48128   ;;  %vm5014_vm4 = vcmask 64512   ;;  %vm5047_vm5 = vcmask 72704  }
  0x11   : > { %s6114_s9 = sshll.u32 %s12209_s27, 8  ;;  %5486 = vmatpush3.bf16.msra.mxu0 %v5682_v37  ;;  %5529 = vmatpush3.bf16.msra.mxu1 %v5682_v37  ;;  %s5454_s14 = sshll.u32 %s12209_s27, 6  ;;  %vm5080_vm6 = vcmask 97280   ;;  %vm5113_vm7 = vcmask 105472   ;;  %vm5146_vm8 = vcmask 130048  }
  0x12   : > { %s6120_s12 = scalar_lea.vmem %s10722_s0, %s6114_s9  ;;  %5487 = vmatprep.subr.bf16.mxu0 %v5683_v40  ;;  %5526 = vmatprep.subr.bf16.mxu1 %v5683_v40  ;;  %s6872_s13 = scalar_lea.vmem %s10729_s7, %s6114_s9 }
  0x13   : > { %v6123_v2 = vld [vmem:[%s6120_s12 + $0x10] sm:$0xff]  ;;  %v6126_v3 = vld [vmem:[%s6120_s12] sm:$0xff]  ;;  %v6131_v4 = vld [vmem:[%s6120_s12 + $0x18] sm:$0xff]  ;;  %s7123_s17 = scalar_lea.vmem %s10728_s6, %s5454_s14  ;;  %s7293_s20 = scalar_lea.vmem %s10723_s1, %s12209_s27 }
  0x14   : > { %452 = vperm.xlu1 %5571, %v6123_v2   ;;  %637 = vperm.xlu0 %5572, %v6126_v3   ;;  %v6136_v5 = vld [vmem:[%s6120_s12 + $0x28] sm:$0xff]  ;;  %v6141_v6 = vld [vmem:[%s6120_s12 + $0x38] sm:$0xff]  ;;  %v411_v21 = vld [vmem:[%s6120_s12 + $0x20] sm:$0xff]  ;;  %s6036_s27 = smov 125   ;;  %s6039_s23 = smov 127  }
  0x15   : > { %v6146_v7 = vld [vmem:[%s6120_s12 + $0x48] sm:$0xff]  ;;  %v6151_v8 = vld [vmem:[%s6120_s12 + $0x58] sm:$0xff]  ;;  %v6210_v22 = vld [vmem:[%s6120_s12 + $0x30] sm:$0xff]  ;;  %5488 = vmatpush3.bf16.msra.mxu0 %v5683_v40  ;;  %5530 = vmatpush3.bf16.msra.mxu1 %v5683_v40  ;;  %s6040_s24 = smov 126   ;;  %s6041_s25 = smov 3  }
  0x16   : > { %v6156_v9 = vld [vmem:[%s6120_s12 + $0x68] sm:$0xff]  ;;  %v6161_v10 = vld [vmem:[%s6120_s12 + $0x78] sm:$0xff]  ;;  %v6214_v23 = vld [vmem:[%s6120_s12 + $0x40] sm:$0xff]  ;;  %5489 = vmatprep.subr.bf16.mxu0 %v5684_v43  ;;  %5527 = vmatprep.subr.bf16.mxu1 %v5684_v43  ;;  %s6042_s26 = smov 5   ;;  %s6044_s11 = smov 9  }
  0x17   : > { %v6166_v11 = vld [vmem:[%s6120_s12 + $0x88] sm:$0xff]  ;;  %v6171_v12 = vld [vmem:[%s6120_s12 + $0x98] sm:$0xff]  ;;  %v6219_v24 = vld [vmem:[%s6120_s12 + $0x50] sm:$0xff]  ;;  %s10381_s15 = scalar_lea.vmem %s10730_s8, %s6114_s9 }
  0x18   : > { %457 = vperm.xlu1 %5571, %v6131_v4   ;;  %649 = vperm.xlu0 %5572, %v6131_v4   ;;  %v6176_v13 = vld [vmem:[%s6120_s12 + $0xa8] sm:$0xff]  ;;  %v6181_v14 = vld [vmem:[%s6120_s12 + $0xb8] sm:$0xff]  ;;  %v6224_v25 = vld [vmem:[%s6120_s12 + $0x60] sm:$0xff] }
  0x19   : > { %v6186_v15 = vld [vmem:[%s6120_s12 + $0xc8] sm:$0xff]  ;;  %v6191_v16 = vld [vmem:[%s6120_s12 + $0xd8] sm:$0xff]  ;;  %v6229_v26 = vld [vmem:[%s6120_s12 + $0x70] sm:$0xff]  ;;  %5490 = vmatpush3.bf16.msra.mxu0 %v5684_v43  ;;  %5531 = vmatpush3.bf16.msra.mxu1 %v5684_v43 }
  0x1a   : > { %v6196_v17 = vld [vmem:[%s6120_s12 + $0xe8] sm:$0xff]  ;;  %v6201_v18 = vld [vmem:[%s6120_s12 + $0xf8] sm:$0xff]  ;;  %v6234_v27 = vld [vmem:[%s6120_s12 + $0x80] sm:$0xff]  ;;  %5491 = vmatprep.subr.bf16.mxu0 %v5685_v48  ;;  %5528 = vmatprep.subr.bf16.mxu1 %v5685_v48 }
  0x1b   : > { %v408_v19 = vld [vmem:[%s6120_s12 + $0x8] sm:$0xff]  ;;  %v6239_v28 = vld [vmem:[%s6120_s12 + $0x90] sm:$0xff]  ;;  %v6244_v29 = vld [vmem:[%s6120_s12 + $0xa0] sm:$0xff] }
  0x1c   : > { %467 = vperm.xlu1 %5571, %v6136_v5   ;;  %657 = vperm.xlu0 %5572, %v6136_v5   ;;  %v6249_v30 = vld [vmem:[%s6120_s12 + $0xb0] sm:$0xff]  ;;  %v6254_v31 = vld [vmem:[%s6120_s12 + $0xc0] sm:$0xff] }
  0x1d   : > { %v6259_v32 = vld [vmem:[%s6120_s12 + $0xd0] sm:$0xff]  ;;  %v6264_v33 = vld [vmem:[%s6120_s12 + $0xe0] sm:$0xff]  ;;  %5492 = vmatpush3.bf16.msra.mxu0 %v5685_v48  ;;  %5532 = vmatpush3.bf16.msra.mxu1 %v5685_v48 }
  0x1e   : > { %v6269_v34 = vld [vmem:[%s6120_s12 + $0xf0] sm:$0xff]  ;;  %s6045_s12 = smov 44  }
  0x20   : > { %477 = vperm.xlu1 %5571, %v6141_v6   ;;  %665 = vperm.xlu0 %5572, %v6141_v6  }
  0x24   : > { %487 = vperm.xlu1 %5571, %v6146_v7   ;;  %673 = vperm.xlu0 %5572, %v6146_v7  }
  0x28   : > { %497 = vperm.xlu1 %5571, %v6151_v8   ;;  %681 = vperm.xlu0 %5572, %v6151_v8  }
  0x2c   : > { %507 = vperm.xlu1 %5571, %v6156_v9   ;;  %689 = vperm.xlu0 %5572, %v6156_v9  }
  0x30   : > { %517 = vperm.xlu1 %5571, %v6161_v10   ;;  %697 = vperm.xlu0 %5572, %v6161_v10  }
  0x34   : > { %527 = vperm.xlu1 %5571, %v6166_v11   ;;  %705 = vperm.xlu0 %5572, %v6166_v11  }
  0x38   : > { %537 = vperm.xlu1 %5571, %v6171_v12   ;;  %713 = vperm.xlu0 %5572, %v6171_v12  }
  0x3c   : > { %547 = vperm.xlu1 %5571, %v6176_v13   ;;  %721 = vperm.xlu0 %5572, %v6176_v13  }
  0x40   : > { %557 = vperm.xlu1 %5571, %v6181_v14   ;;  %729 = vperm.xlu0 %5572, %v6181_v14  }
  0x44   : > { %567 = vperm.xlu1 %5571, %v6186_v15   ;;  %737 = vperm.xlu0 %5572, %v6186_v15  }
  0x48   : > { %577 = vperm.xlu1 %5571, %v6191_v16   ;;  %745 = vperm.xlu0 %5572, %v6191_v16  }
  0x4c   : > { %587 = vperm.xlu1 %5571, %v6196_v17   ;;  %753 = vperm.xlu0 %5572, %v6196_v17  }
  0x50   : > { %597 = vperm.xlu1 %5571, %v6201_v18   ;;  %761 = vperm.xlu0 %5572, %v6201_v18  }
  0x54   : > { %5573 = vset.pattern.permute.xlu1 %v10733_v0  ;;  %5575 = vset.pattern.permute.xlu0 %v6034_v20 }
  0x55   : > { %641 = vperm.xlu1 %5573, %v408_v19   ;;  %837 = vperm.xlu0 %5575, %v408_v19  }
  0x59   : > { %645 = vperm.xlu1 %5573, %v6123_v2   ;;  %849 = vperm.xlu0 %5575, %v411_v21  }
  0x5d   : > { %653 = vperm.xlu1 %5573, %v411_v21   ;;  %857 = vperm.xlu0 %5575, %v6210_v22  }
  0x61   : > { %661 = vperm.xlu1 %5573, %v6210_v22   ;;  %865 = vperm.xlu0 %5575, %v6214_v23  }
  0x65   : > { %669 = vperm.xlu1 %5573, %v6214_v23   ;;  %873 = vperm.xlu0 %5575, %v6219_v24  }
  0x69   : > { %677 = vperm.xlu1 %5573, %v6219_v24   ;;  %881 = vperm.xlu0 %5575, %v6224_v25  }
  0x6d   : > { %685 = vperm.xlu1 %5573, %v6224_v25   ;;  %889 = vperm.xlu0 %5575, %v6229_v26  }
  0x71   : > { %693 = vperm.xlu1 %5573, %v6229_v26   ;;  %897 = vperm.xlu0 %5575, %v6234_v27  }
  0x75   : > { %701 = vperm.xlu1 %5573, %v6234_v27   ;;  %905 = vperm.xlu0 %5575, %v6239_v28  }
  0x79   : > { %709 = vperm.xlu1 %5573, %v6239_v28   ;;  %913 = vperm.xlu0 %5575, %v6244_v29  }
  0x7d   : > { %717 = vperm.xlu1 %5573, %v6244_v29   ;;  %921 = vperm.xlu0 %5575, %v6249_v30  }
  0x81   : > { %725 = vperm.xlu1 %5573, %v6249_v30   ;;  %929 = vperm.xlu0 %5575, %v6254_v31  }
  0x85   : > { %733 = vperm.xlu1 %5573, %v6254_v31   ;;  %937 = vperm.xlu0 %5575, %v6259_v32  }
  0x89   : > { %741 = vperm.xlu1 %5573, %v6259_v32   ;;  %945 = vperm.xlu0 %5575, %v6264_v33  }
  0x8d   : > { %749 = vperm.xlu1 %5573, %v6264_v33   ;;  %953 = vperm.xlu0 %5575, %v6269_v34  }
  0x91   : > { %757 = vperm.xlu1 %5573, %v6269_v34   ;;  %5576 = vset.pattern.permute.xlu0 %v10731_v1 }
  0x92   : > { %442 = vperm.xlu0 %5576, %v6126_v3  }
  0x93   : > { %v6276_v35 = vpop.permute.xlu1 %452  ;;  %v6278_v36 = vpop.permute.xlu0 %637 }
  0x95   : > { %5574 = vset.pattern.permute.xlu1 %v6034_v20 }
  0x96   : > { %833 = vperm.xlu1 %5574, %v6126_v3   ;;  %447 = vperm.xlu0 %5576, %v408_v19  }
  0x97   : > { %v6284_v38 = vpop.permute.xlu1 %457  ;;  %v6286_v39 = vpop.permute.xlu0 %649 }
  0x9a   : > { %841 = vperm.xlu1 %5574, %v6123_v2   ;;  %462 = vperm.xlu0 %5576, %v411_v21  }
  0x9b   : > { %v6292_v41 = vpop.permute.xlu1 %467  ;;  %v6294_v42 = vpop.permute.xlu0 %657 }
  0x9e   : > { %845 = vperm.xlu1 %5574, %v6131_v4   ;;  %472 = vperm.xlu0 %5576, %v6210_v22  }
  0x9f   : > { %v6301_v44 = vpop.permute.xlu1 %477  ;;  %v6303_v45 = vpop.permute.xlu0 %665 }
  0xa2   : > { %853 = vperm.xlu1 %5574, %v6136_v5   ;;  %482 = vperm.xlu0 %5576, %v6214_v23  }
  0xa3   : > { %v6307_v46 = vpop.permute.xlu1 %487  ;;  %v6309_v47 = vpop.permute.xlu0 %673 }
  0xa6   : > { %861 = vperm.xlu1 %5574, %v6141_v6   ;;  %492 = vperm.xlu0 %5576, %v6219_v24  }
  0xa7   : > { %v6316_v49 = vpop.permute.xlu1 %497  ;;  %v6318_v50 = vpop.permute.xlu0 %681 }
  0xaa   : > { %869 = vperm.xlu1 %5574, %v6146_v7   ;;  %502 = vperm.xlu0 %5576, %v6224_v25  }
  0xab   : > { %v6322_v51 = vpop.permute.xlu1 %507  ;;  %v6324_v52 = vpop.permute.xlu0 %689 }
  0xae   : > { %877 = vperm.xlu1 %5574, %v6151_v8   ;;  %512 = vperm.xlu0 %5576, %v6229_v26  }
  0xaf   : > { %v6328_v53 = vpop.permute.xlu1 %517  ;;  %v6330_v54 = vpop.permute.xlu0 %697 }
  0xb2   : > { %885 = vperm.xlu1 %5574, %v6156_v9   ;;  %522 = vperm.xlu0 %5576, %v6234_v27  }
  0xb3   : > { %v6334_v55 = vpop.permute.xlu1 %527  ;;  %v6336_v56 = vpop.permute.xlu0 %705 }
  0xb6   : > { %893 = vperm.xlu1 %5574, %v6161_v10   ;;  %532 = vperm.xlu0 %5576, %v6239_v28  }
  0xb7   : > { %v6340_v57 = vpop.permute.xlu1 %537  ;;  %v6342_v58 = vpop.permute.xlu0 %713 }
  0xba   : > { %901 = vperm.xlu1 %5574, %v6166_v11   ;;  %542 = vperm.xlu0 %5576, %v6244_v29  }
  0xbb   : > { %v6346_v59 = vpop.permute.xlu1 %547  ;;  %v6348_v60 = vpop.permute.xlu0 %721 }
  0xbe   : > { %909 = vperm.xlu1 %5574, %v6171_v12   ;;  %552 = vperm.xlu0 %5576, %v6249_v30  }
  0xbf   : > { %v6352_v61 = vpop.permute.xlu1 %557  ;;  %v6354_v62 = vpop.permute.xlu0 %729 }
  0xc0   : > { %11148 = vst [vmem:[#allocation2_spill] sm:$0xff] %v6352_v61  ;;  %11149 = vst [vmem:[#allocation3_spill] sm:$0xff] %v6354_v62 }
  0xc2   : > { %917 = vperm.xlu1 %5574, %v6176_v13   ;;  %562 = vperm.xlu0 %5576, %v6254_v31  }
  0xc3   : > { %v6358_v63 = vpop.permute.xlu1 %567  ;;  %v6360_v2 = vpop.permute.xlu0 %737 }
  0xc4   : > { %11150 = vst [vmem:[#allocation4_spill] sm:$0xff] %v6358_v63  ;;  %11151 = vst [vmem:[#allocation5_spill] sm:$0xff] %v6360_v2 }
  0xc6   : > { %925 = vperm.xlu1 %5574, %v6181_v14   ;;  %572 = vperm.xlu0 %5576, %v6259_v32  }
  0xc7   : > { %v6364_v3 = vpop.permute.xlu1 %577  ;;  %v6366_v4 = vpop.permute.xlu0 %745 }
  0xc8   : > { %11152 = vst [vmem:[#allocation6_spill] sm:$0xff] %v6364_v3  ;;  %11153 = vst [vmem:[#allocation7_spill] sm:$0xff] %v6366_v4 }
  0xca   : > { %933 = vperm.xlu1 %5574, %v6186_v15   ;;  %582 = vperm.xlu0 %5576, %v6264_v33   ;;  %v10735_v33 = vlaneseq }
  0xcb   : > { %v6370_v5 = vpop.permute.xlu1 %587  ;;  %v6372_v6 = vpop.permute.xlu0 %753 }
  0xcc   : > { %11154 = vst [vmem:[#allocation8_spill] sm:$0xff] %v6370_v5  ;;  %11155 = vst [vmem:[#allocation9_spill] sm:$0xff] %v6372_v6  ;;  %v6428_v40 = vshrl.u32 %v10735_v33, 7 }
  0xce   : > { %941 = vperm.xlu1 %5574, %v6191_v16   ;;  %592 = vperm.xlu0 %5576, %v6269_v34   ;;  %11162 = vst [vmem:[#allocation16_spill] sm:$0xff] %v6428_v40  ;;  %v766_v6 = vsub.s32 1, %v6428_v40  ;;  %v962_v33 = vsub.s32 2, %v6428_v40 }
  0xcf   : > { %v6376_v7 = vpop.permute.xlu1 %597  ;;  %v6378_v8 = vpop.permute.xlu0 %761 }
  0xd0   : > { %11156 = vst [vmem:[#allocation10_spill] sm:$0xff] %v6376_v7  ;;  %11157 = vst [vmem:[#allocation11_spill] sm:$0xff] %v6378_v8  ;;  %v439_v7 = vld [vmem:[%s10724_s2] sm:$0x7] }
  0xd2   : > { %949 = vperm.xlu1 %5574, %v6196_v17  }
  0xd4   : > { %v642_v9 = vpop.permute.xlu1 %641  ;;  %v838_v10 = vpop.permute.xlu0 %837 }
  0xd6   : > { %957 = vperm.xlu1 %5574, %v6201_v18  }
  0xd8   : > { %v646_v11 = vpop.permute.xlu1 %645  ;;  %v6382_v12 = vpop.permute.xlu0 %849 }
  0xda   : > { %5649 = vset.pattern.permute.xlu1 %v10731_v1  ;;  %v602_v1 = vsub.s32 0, %v6428_v40 }
  0xdc   : > { %v654_v13 = vpop.permute.xlu1 %653  ;;  %v6385_v14 = vpop.permute.xlu0 %857  ;;  %v6443_v5 = vrot.slane %v439_v7, %v602_v1 }
  0xe0   : > { %v6387_v15 = vpop.permute.xlu1 %661  ;;  %v6389_v16 = vpop.permute.xlu0 %865 }
  0xe4   : > { %v6391_v19 = vpop.permute.xlu1 %669  ;;  %v6393_v20 = vpop.permute.xlu0 %873 }
  0xe8   : > { %v6395_v17 = vpop.permute.xlu1 %677  ;;  %v6397_v21 = vpop.permute.xlu0 %881 }
  0xec   : > { %v6399_v18 = vpop.permute.xlu1 %685  ;;  %v6401_v22 = vpop.permute.xlu0 %889 }
  0xf0   : > { %v6403_v23 = vpop.permute.xlu1 %693  ;;  %v6405_v24 = vpop.permute.xlu0 %897 }
  0xf4   : > { %v6407_v25 = vpop.permute.xlu1 %701  ;;  %v6409_v26 = vpop.permute.xlu0 %905 }
  0xf8   : > { %v6411_v27 = vpop.permute.xlu1 %709  ;;  %v6413_v28 = vpop.permute.xlu0 %913 }
  0xfc   : > { %v6415_v29 = vpop.permute.xlu1 %717  ;;  %v6417_v30 = vpop.permute.xlu0 %921 }
  0xfd   : > { %11158 = vst [vmem:[#allocation12_spill] sm:$0xff] %v6417_v30 }
 0x100   : > { %v6419_v31 = vpop.permute.xlu1 %725  ;;  %v6421_v32 = vpop.permute.xlu0 %929 }
 0x101   : > { %11159 = vst [vmem:[#allocation13_spill] sm:$0xff] %v6421_v32 }
 0x104   : > { %v6423_v34 = vpop.permute.xlu1 %733  ;;  %v6425_v37 = vpop.permute.xlu0 %937 }
 0x105   : > { %11160 = vst [vmem:[#allocation14_spill] sm:$0xff] %v6423_v34  ;;  %11161 = vst [vmem:[#allocation15_spill] sm:$0xff] %v6425_v37 }
 0x108   : > { %v6430_v43 = vpop.permute.xlu1 %741  ;;  %v6432_v48 = vpop.permute.xlu0 %945 }
 0x109   : > { %11163 = vst [vmem:[#allocation17_spill] sm:$0xff] %v6430_v43  ;;  %11164 = vst [vmem:[#allocation18_spill] sm:$0xff] %v6432_v48  ;;  %v6448_v48 = vrot.slane %v439_v7, %v766_v6 }
 0x10b   : > { %v769_v34 = vmul.f32 %v6448_v48, %v642_v9  ;;  %v609_v9 = vmul.f32 %v6443_v5, %v6292_v41 }
 0x10c   : > { %v6435_v0 = vpop.permute.xlu1 %749  ;;  %v6437_v8 = vpop.permute.xlu0 %953 }
 0x10d   : > { %11165 = vst [vmem:[#allocation19_spill] sm:$0xff] %v6435_v0  ;;  %11166 = vst [vmem:[#allocation20_spill] sm:$0xff] %v6437_v8  ;;  %v768_v8 = vmul.f32 %v6448_v48, %v6278_v36  ;;  %v6453_v0 = vrot.slane %v439_v7, %v962_v33  ;;  %v6463_v36 = vld [vmem:[%s10725_s3] ss:$0 sm:$0xff]  ;;  %v606_v7 = vmul.f32 %v6443_v5, %v6276_v35 }
 0x10f   : > { %v965_v6 = vmul.f32 %v6453_v0, %v838_v10 }
 0x110   : > { %v6446_v37 = vpop.permute.xlu1 %757 }
 0x111   : > { %11167 = vst [vmem:[#allocation21_spill] sm:$0xff] %v6446_v37  ;;  %v443_v4 = vpop.permute.xlu0 %442  ;;  %v770_v37 = vmul.f32 %v6448_v48, %v646_v11 }
 0x112   : > { %v604_v3 = vmul.f32 %v6443_v5, %v443_v4 }
 0x113   : > { %v802_v35 = vadd.f32 %v770_v37, %v606_v7  ;;  %v611_v7 = vmul.f32 %v6443_v5, %v6301_v44 }
 0x114   : > { %v800_v1 = vadd.f32 %v768_v8, %v604_v3  ;;  %v607_v3 = vmul.f32 %v6443_v5, %v6284_v38  ;;  %v771_v8 = vmul.f32 %v6448_v48, %v6286_v39 }
 0x115   : > { %v834_v43 = vpop.permute.xlu1 %833  ;;  %v448_v32 = vpop.permute.xlu0 %447 }
 0x116   : > { %v964_v30 = vmul.f32 %v6453_v0, %v834_v43  ;;  %v605_v40 = vmul.f32 %v6443_v5, %v448_v32  ;;  %v803_v62 = vadd.f32 %v771_v8, %v607_v3 }
 0x118   : > { %v996_v2 = vadd.f32 %v964_v30, %v800_v1  ;;  %v801_v4 = vadd.f32 %v769_v34, %v605_v40  ;;  %v773_v30 = vmul.f32 %v6448_v48, %v6294_v42  ;;  %v772_v40 = vmul.f32 %v6448_v48, %v654_v13 }
 0x119   : > { %v842_v10 = vpop.permute.xlu1 %841  ;;  %v463_v11 = vpop.permute.xlu0 %462  ;;  %v774_v13 = vmul.f32 %v6448_v48, %v6387_v15  ;;  %v613_v15 = vmul.f32 %v6443_v5, %v6307_v46 }
 0x11a   : > { %v997_v32 = vadd.f32 %v965_v6, %v801_v4  ;;  %v966_v33 = vmul.f32 %v6453_v0, %v842_v10  ;;  %v608_v34 = vmul.f32 %v6443_v5, %v463_v11  ;;  %v1035_v38 = vadd.f32 %v6463_v36, %v996_v2 }
 0x11b   : > { %v805_v61 = vadd.f32 %v773_v30, %v609_v9  ;;  %v968_v4 = vmul.f32 %v6453_v0, %v6382_v12  ;;  %v775_v10 = vmul.f32 %v6448_v48, %v6303_v45  ;;  %v970_v45 = vmul.f32 %v6453_v0, %v6385_v14 }
 0x11c   : > { %v1036_v39 = vadd.f32 %v6463_v36, %v997_v32  ;;  %v998_v43 = vadd.f32 %v966_v33, %v802_v35  ;;  %v804_v1 = vadd.f32 %v772_v40, %v608_v34  ;;  %v1067_v37 = vmax.f32 %v1035_v38, 0.0 }
 0x11d   : > { %v846_v41 = vpop.permute.xlu1 %845  ;;  %v473_v63 = vpop.permute.xlu0 %472  ;;  %v777_v32 = vmul.f32 %v6448_v48, %v6309_v47  ;;  %v807_v35 = vadd.f32 %v775_v10, %v611_v7  ;;  %v617_v7 = vmul.f32 %v6443_v5, %v6322_v51 }
 0x11e   : > { %v967_v42 = vmul.f32 %v6453_v0, %v846_v41  ;;  %v610_v6 = vmul.f32 %v6443_v5, %v473_v63  ;;  %v1068_v2 = vmax.f32 %v1036_v39, 0.0  ;;  %v1037_v8 = vadd.f32 %v6463_v36, %v998_v43 }
 0x11f   : > { %v1000_v9 = vadd.f32 %v968_v4, %v804_v1  ;;  %v615_v4 = vmul.f32 %v6443_v5, %v6316_v49 }
 0x120   : > { %v999_v3 = vadd.f32 %v967_v42, %v803_v62  ;;  %v806_v63 = vadd.f32 %v774_v13, %v610_v6  ;;  %v1099_v12 = vpack.c.bf16 %v1068_v2, %v1067_v37  ;;  %v776_v62 = vmul.f32 %v6448_v48, %v6391_v19 }
 0x121   : > { %v854_v11 = vpop.permute.xlu1 %853  ;;  %v483_v30 = vpop.permute.xlu0 %482  ;;  %v1069_v38 = vmax.f32 %v1037_v8, 0.0  ;;  %v1039_v47 = vadd.f32 %v6463_v36, %v1000_v9  ;;  %v809_v42 = vadd.f32 %v777_v32, %v613_v15  ;;  %v778_v13 = vmul.f32 %v6448_v48, %v6395_v17 }
 0x122   : > { %v1038_v44 = vadd.f32 %v6463_v36, %v999_v3  ;;  %v969_v33 = vmul.f32 %v6453_v0, %v854_v11  ;;  %v612_v34 = vmul.f32 %v6443_v5, %v483_v30  ;;  %5493 = vmatprep.mubr.msk.bf16.mxu0 %vm1154_vm0, %v1099_v12  ;;  %v1002_v39 = vadd.f32 %v970_v45, %v806_v63 }
 0x123   : > { %v779_v2 = vmul.f32 %v6448_v48, %v6318_v50  ;;  %v1071_v8 = vmax.f32 %v1039_v47, 0.0  ;;  %v781_v17 = vmul.f32 %v6448_v48, %v6324_v52  ;;  %v974_v12 = vmul.f32 %v6453_v0, %v6393_v20 }
 0x124   : > { %v1070_v40 = vmax.f32 %v1038_v44, 0.0  ;;  %v1001_v46 = vadd.f32 %v969_v33, %v805_v61  ;;  %v808_v43 = vadd.f32 %v776_v62, %v612_v34  ;;  %v972_v61 = vmul.f32 %v6453_v0, %v6389_v16 }
 0x125   : > { %v862_v1 = vpop.permute.xlu1 %861  ;;  %v493_v41 = vpop.permute.xlu0 %492  ;;  %v1041_v9 = vadd.f32 %v6463_v36, %v1002_v39  ;;  %v780_v15 = vmul.f32 %v6448_v48, %v6399_v18  ;;  %v976_v18 = vmul.f32 %v6453_v0, %v6397_v21  ;;  %v782_v39 = vmul.f32 %v6448_v48, %v6403_v23 }
 0x126   : > { %v1040_v14 = vadd.f32 %v6463_v36, %v1001_v46  ;;  %v971_v6 = vmul.f32 %v6453_v0, %v862_v1  ;;  %v614_v19 = vmul.f32 %v6443_v5, %v493_v41  ;;  %v1100_v37 = vpack.c.bf16 %v1070_v40, %v1069_v38 }
 0x127   : > { %v1004_v63 = vadd.f32 %v972_v61, %v808_v43  ;;  %v1073_v45 = vmax.f32 %v1041_v9, 0.0  ;;  %v811_v46 = vadd.f32 %v779_v2, %v615_v4  ;;  %v813_v38 = vadd.f32 %v781_v17, %v617_v7 }
 0x128   : > { %v1072_v10 = vmax.f32 %v1040_v14, 0.0  ;;  %v1003_v3 = vadd.f32 %v971_v6, %v807_v35  ;;  %v810_v49 = vadd.f32 %v778_v13, %v614_v19  ;;  %5494 = vmatmul.mubr.msk.bf16.vlgmr.msra.gmra.mrb[0].mxu0 %vm1154_vm0, %v1100_v37  ;;  %v619_v41 = vmul.f32 %v6443_v5, %v6328_v53 }
 0x129   : > { %v870_v16 = vpop.permute.xlu1 %869  ;;  %v503_v11 = vpop.permute.xlu0 %502  ;;  %v1043_v62 = vadd.f32 %v6463_v36, %v1004_v63  ;;  %v784_v37 = vmul.f32 %v6448_v48, %v6407_v25  ;;  %v621_v7 = vmul.f32 %v6443_v5, %v6334_v55  ;;  %v980_v55 = vmul.f32 %v6453_v0, %v6405_v24 }
 0x12a   : > { %v1042_v30 = vadd.f32 %v6463_v36, %v1003_v3  ;;  %v973_v50 = vmul.f32 %v6453_v0, %v870_v16  ;;  %v616_v51 = vmul.f32 %v6443_v5, %v503_v11  ;;  %v1101_v32 = vpack.c.bf16 %v1072_v10, %v1071_v8 }
 0x12b   : > { %v1006_v34 = vadd.f32 %v974_v12, %v810_v49  ;;  %v1075_v19 = vmax.f32 %v1043_v62, 0.0  ;;  %v785_v10 = vmul.f32 %v6448_v48, %v6336_v56  ;;  %v978_v3 = vmul.f32 %v6453_v0, %v6401_v22 }
 0x12c   : > { %v1074_v44 = vmax.f32 %v1042_v30, 0.0  ;;  %v1005_v33 = vadd.f32 %v973_v50, %v809_v42  ;;  %v812_v52 = vadd.f32 %v780_v15, %v616_v51  ;;  %5497 = vmatprep.mubr.msk.bf16.mxu0 %vm1154_vm0, %v1101_v32  ;;  %v783_v42 = vmul.f32 %v6448_v48, %v6330_v54 }
 0x12d   : > { %v878_v35 = vpop.permute.xlu1 %877  ;;  %v513_v40 = vpop.permute.xlu0 %512  ;;  %v1045_v4 = vadd.f32 %v6463_v36, %v1006_v34  ;;  %v817_v12 = vadd.f32 %v785_v10, %v621_v7  ;;  %v623_v15 = vmul.f32 %v6443_v5, %v6340_v57  ;;  %v786_v32 = vmul.f32 %v6448_v48, %v6411_v27 }
 0x12e   : > { %v1044_v47 = vadd.f32 %v6463_v36, %v1005_v33  ;;  %v975_v20 = vmul.f32 %v6453_v0, %v878_v35  ;;  %v618_v43 = vmul.f32 %v6443_v5, %v513_v40  ;;  %v1102_v1 = vpack.c.bf16 %v1074_v44, %v1073_v45 }
 0x12f   : > { %v1008_v61 = vadd.f32 %v976_v18, %v812_v52  ;;  %v815_v25 = vadd.f32 %v783_v42, %v619_v41  ;;  %v1077_v16 = vmax.f32 %v1045_v4, 0.0  ;;  %v787_v33 = vmul.f32 %v6448_v48, %v6342_v58 }
 0x130   : > { %v1076_v14 = vmax.f32 %v1044_v47, 0.0  ;;  %v1007_v6 = vadd.f32 %v975_v20, %v811_v46  ;;  %v814_v13 = vadd.f32 %v782_v39, %v618_v43  ;;  %5498 = vmatmul.mubr.msk.bf16.gmra.mrb[4].mxu0 %vm1154_vm0, %v1102_v1  ;;  %v625_v34 = vmul.f32 %v6443_v5, %v6346_v59 }
 0x131   : > { %v886_v21 = vpop.permute.xlu1 %885  ;;  %v523_v23 = vpop.permute.xlu0 %522  ;;  %v1047_v11 = vadd.f32 %v6463_v36, %v1008_v61  ;;  %v789_v27 = vmul.f32 %v6448_v48, %v6348_v60  ;;  %v982_v59 = vmul.f32 %v6453_v0, %v6409_v26  ;;  %v788_v20 = vmul.f32 %v6448_v48, %v6415_v29 }
 0x132   : > { %v1046_v2 = vadd.f32 %v6463_v36, %v1007_v6  ;;  %v977_v53 = vmul.f32 %v6453_v0, %v886_v21  ;;  %v620_v54 = vmul.f32 %v6443_v5, %v523_v23  ;;  %v1103_v8 = vpack.c.bf16 %v1076_v14, %v1075_v19 }
 0x133   : > { %v1010_v17 = vadd.f32 %v978_v3, %v814_v13  ;;  %v1079_v52 = vmax.f32 %v1047_v11, 0.0  ;;  %v819_v19 = vadd.f32 %v787_v33, %v623_v15  ;;  %v821_v4 = vadd.f32 %v789_v27, %v625_v34 }
 0x134   : > { %v1078_v9 = vmax.f32 %v1046_v2, 0.0  ;;  %v1009_v63 = vadd.f32 %v977_v53, %v813_v38  ;;  %v816_v49 = vadd.f32 %v784_v37, %v620_v54  ;;  %5501 = vmatprep.mubr.msk.bf16.mxu0 %vm1154_vm0, %v1103_v8  ;;  %v984_v29 = vmul.f32 %v6453_v0, %v6413_v28  ;;  %v11168_v37 = vld [vmem:[#allocation2_spill] sm:$0xff]  ;;  %v11169_v53 = vld [vmem:[#allocation3_spill] sm:$0xff] }
 0x135   : > { %v894_v30 = vpop.permute.xlu1 %893  ;;  %v533_v50 = vpop.permute.xlu0 %532  ;;  %v1049_v35 = vadd.f32 %v6463_v36, %v1010_v17  ;;  %v790_v13 = vmul.f32 %v6448_v48, %v6419_v31  ;;  %v627_v2 = vmul.f32 %v6443_v5, %v11168_v37  ;;  %v791_v54 = vmul.f32 %v6448_v48, %v11169_v53 }
 0x136   : > { %v1048_v56 = vadd.f32 %v6463_v36, %v1009_v63  ;;  %v979_v22 = vmul.f32 %v6453_v0, %v894_v30  ;;  %v622_v51 = vmul.f32 %v6443_v5, %v533_v50  ;;  %v1104_v44 = vpack.c.bf16 %v1078_v9, %v1077_v16  ;;  %v11171_v16 = vld [vmem:[#allocation5_spill] sm:$0xff]  ;;  %v11172_v50 = vld [vmem:[#allocation12_spill] sm:$0xff] }
 0x137   : > { %v1012_v62 = vadd.f32 %v980_v55, %v816_v49  ;;  %v1081_v41 = vmax.f32 %v1049_v35, 0.0  ;;  %v11170_v49 = vld [vmem:[#allocation4_spill] sm:$0xff]  ;;  %v793_v11 = vmul.f32 %v6448_v48, %v11171_v16  ;;  %v986_v55 = vmul.f32 %v6453_v0, %v11172_v50 }
 0x138   : > { %v1080_v45 = vmax.f32 %v1048_v56, 0.0  ;;  %v1011_v24 = vadd.f32 %v979_v22, %v815_v25  ;;  %v818_v40 = vadd.f32 %v786_v32, %v622_v51  ;;  %5502 = vmatmul.mubr.msk.bf16.gmra.mrb[8].mxu0 %vm1154_vm0, %v1104_v44  ;;  %v629_v25 = vmul.f32 %v6443_v5, %v11170_v49  ;;  %v11173_v56 = vld [vmem:[#allocation14_spill] sm:$0xff]  ;;  %v11174_v32 = vld [vmem:[#allocation13_spill] sm:$0xff] }
 0x139   : > { %v902_v57 = vpop.permute.xlu1 %901  ;;  %v543_v46 = vpop.permute.xlu0 %542  ;;  %v1051_v1 = vadd.f32 %v6463_v36, %v1012_v62  ;;  %v792_v22 = vmul.f32 %v6448_v48, %v11173_v56  ;;  %v823_v15 = vadd.f32 %v791_v54, %v627_v2  ;;  %v988_v44 = vmul.f32 %v6453_v0, %v11174_v32 }
 0x13a   : > { %v1050_v38 = vadd.f32 %v6463_v36, %v1011_v24  ;;  %v981_v58 = vmul.f32 %v6453_v0, %v902_v57  ;;  %v624_v47 = vmul.f32 %v6443_v5, %v543_v46  ;;  %v1105_v18 = vpack.c.bf16 %v1080_v45, %v1079_v52  ;;  %v11175_v57 = vld [vmem:[#allocation17_spill] sm:$0xff] }
 0x13b   : > { %v1014_v42 = vadd.f32 %v982_v59, %v818_v40  ;;  %v1083_v10 = vmax.f32 %v1051_v1, 0.0  ;;  %v794_v46 = vmul.f32 %v6448_v48, %v11175_v57  ;;  %v11176_v59 = vld [vmem:[#allocation6_spill] sm:$0xff]  ;;  %v11186_v57 = vld [vmem:[#allocation20_spill] sm:$0xff] }
 0x13c   : > { %v1082_v39 = vmax.f32 %v1050_v38, 0.0  ;;  %v1013_v43 = vadd.f32 %v981_v58, %v817_v12  ;;  %v820_v60 = vadd.f32 %v788_v20, %v624_v47  ;;  %5505 = vmatprep.mubr.msk.bf16.mxu0 %vm1154_vm0, %v1105_v18  ;;  %v825_v47 = vadd.f32 %v793_v11, %v629_v25  ;;  %v11182_v11 = vld [vmem:[#allocation18_spill] sm:$0xff] }
 0x13d   : > { %v910_v14 = vpop.permute.xlu1 %909  ;;  %v553_v6 = vpop.permute.xlu0 %552  ;;  %v1053_v3 = vadd.f32 %v6463_v36, %v1014_v42  ;;  %v631_v20 = vmul.f32 %v6443_v5, %v11176_v59  ;;  %v11177_v42 = vld [vmem:[#allocation7_spill] sm:$0xff] }
 0x13e   : > { %v983_v61 = vmul.f32 %v6453_v0, %v910_v14  ;;  %v626_v26 = vmul.f32 %v6443_v5, %v553_v6  ;;  %v1106_v21 = vpack.c.bf16 %v1082_v39, %v1081_v41  ;;  %v1052_v23 = vadd.f32 %v6463_v36, %v1013_v43  ;;  %v11178_v14 = vld [vmem:[#allocation15_spill] sm:$0xff] }
 0x13f   : > { %v1016_v8 = vadd.f32 %v984_v29, %v820_v60  ;;  %v1085_v62 = vmax.f32 %v1053_v3, 0.0  ;;  %v795_v60 = vmul.f32 %v6448_v48, %v11177_v42  ;;  %v990_v6 = vmul.f32 %v6453_v0, %v11178_v14  ;;  %v11179_v29 = vld [vmem:[#allocation19_spill] sm:$0xff] }
 0x140   : > { %v1015_v7 = vadd.f32 %v983_v61, %v819_v19  ;;  %v822_v9 = vadd.f32 %v790_v13, %v626_v26  ;;  %5506 = vmatmul.mubr.msk.bf16.gmra.mrb[12].mxu0 %vm1154_vm0, %v1106_v21  ;;  %v1084_v31 = vmax.f32 %v1052_v23, 0.0  ;;  %v796_v13 = vmul.f32 %v6448_v48, %v11179_v29 }
 0x141   : > { %v918_v28 = vpop.permute.xlu1 %917  ;;  %v563_v63 = vpop.permute.xlu0 %562  ;;  %v1055_v24 = vadd.f32 %v6463_v36, %v1016_v8  ;;  %v11180_v8 = vld [vmem:[#allocation8_spill] sm:$0xff]  ;;  %v827_v16 = vadd.f32 %v795_v60, %v631_v20 }
 0x142   : > { %v1054_v17 = vadd.f32 %v6463_v36, %v1015_v7  ;;  %v985_v30 = vmul.f32 %v6453_v0, %v918_v28  ;;  %v628_v51 = vmul.f32 %v6443_v5, %v563_v63  ;;  %v1107_v12 = vpack.c.bf16 %v1084_v31, %v1083_v10  ;;  %v11181_v28 = vld [vmem:[#allocation9_spill] sm:$0xff] }
 0x143   : > { %v1018_v34 = vadd.f32 %v986_v55, %v822_v9  ;;  %v1087_v19 = vmax.f32 %v1055_v24, 0.0  ;;  %v633_v9 = vmul.f32 %v6443_v5, %v11180_v8  ;;  %v797_v63 = vmul.f32 %v6448_v48, %v11181_v28  ;;  %v11183_v55 = vld [vmem:[#allocation21_spill] sm:$0xff] }
 0x144   : > { %v1086_v33 = vmax.f32 %v1054_v17, 0.0  ;;  %v1017_v45 = vadd.f32 %v985_v30, %v821_v4  ;;  %v824_v52 = vadd.f32 %v792_v22, %v628_v51  ;;  %5509 = vmatprep.mubr.msk.bf16.mxu1 %vm1154_vm0, %v1107_v12  ;;  %v992_v17 = vmul.f32 %v6453_v0, %v11182_v11 }
 0x145   : > { %v926_v35 = vpop.permute.xlu1 %925  ;;  %v573_v40 = vpop.permute.xlu0 %572  ;;  %v1057_v4 = vadd.f32 %v6463_v36, %v1018_v34  ;;  %v798_v56 = vmul.f32 %v6448_v48, %v11183_v55  ;;  %v11185_v34 = vld [vmem:[#allocation11_spill] sm:$0xff] }
 0x146   : > { %v1056_v27 = vadd.f32 %v6463_v36, %v1017_v45  ;;  %v987_v38 = vmul.f32 %v6453_v0, %v926_v35  ;;  %v630_v58 = vmul.f32 %v6443_v5, %v573_v40  ;;  %v1108_v18 = vpack.c.bf16 %v1086_v33, %v1085_v62  ;;  %v11184_v62 = vld [vmem:[#allocation10_spill] sm:$0xff] }
 0x147   : > { %v1020_v43 = vadd.f32 %v988_v44, %v824_v52  ;;  %v1089_v31 = vmax.f32 %v1057_v4, 0.0  ;;  %v829_v45 = vadd.f32 %v797_v63, %v633_v9  ;;  %v635_v24 = vmul.f32 %v6443_v5, %v11184_v62 }
 0x148   : > { %v1088_v39 = vmax.f32 %v1056_v27, 0.0  ;;  %v1019_v1 = vadd.f32 %v987_v38, %v823_v15  ;;  %v826_v41 = vadd.f32 %v794_v46, %v630_v58  ;;  %5510 = vmatmul.mubr.msk.bf16.vlgmr.msra.gmra.mrb[0].mxu1 %vm1154_vm0, %v1108_v18  ;;  %v799_v52 = vmul.f32 %v6448_v48, %v11185_v34 }
 0x149   : > { %v934_v61 = vpop.permute.xlu1 %933  ;;  %v583_v26 = vpop.permute.xlu0 %582  ;;  %v1059_v54 = vadd.f32 %v6463_v36, %v1020_v43  ;;  %v994_v46 = vmul.f32 %v6453_v0, %v11186_v57 }
 0x14a   : > { %v1058_v21 = vadd.f32 %v6463_v36, %v1019_v1  ;;  %v989_v23 = vmul.f32 %v6453_v0, %v934_v61  ;;  %v632_v37 = vmul.f32 %v6443_v5, %v583_v26  ;;  %v1022_v2 = vadd.f32 %v990_v6, %v826_v41 }
 0x14b   : > { %v1109_v53 = vpack.c.bf16 %v1088_v39, %v1087_v19  ;;  %v1091_v15 = vmax.f32 %v1059_v54, 0.0  ;;  %v831_v39 = vadd.f32 %v799_v52, %v635_v24 }
 0x14c   : > { %v1090_v7 = vmax.f32 %v1058_v21, 0.0  ;;  %v1021_v10 = vadd.f32 %v989_v23, %v825_v47  ;;  %v828_v3 = vadd.f32 %v796_v13, %v632_v37  ;;  %v1061_v22 = vadd.f32 %v6463_v36, %v1022_v2 }
 0x14d   : > { %5513 = vmatprep.mubr.msk.bf16.mxu1 %vm1154_vm0, %v1109_v53  ;;  %v942_v49 = vpop.permute.xlu1 %941  ;;  %v593_v25 = vpop.permute.xlu0 %592 }
 0x14e   : > { %v1060_v30 = vadd.f32 %v6463_v36, %v1021_v10  ;;  %v991_v50 = vmul.f32 %v6453_v0, %v942_v49  ;;  %v634_v51 = vmul.f32 %v6443_v5, %v593_v25  ;;  %v1110_v12 = vpack.c.bf16 %v1090_v7, %v1089_v31 }
 0x14f   : > { %v1024_v44 = vadd.f32 %v992_v17, %v828_v3  ;;  %v1093_v47 = vmax.f32 %v1061_v22, 0.0 }
 0x150   : > { %v1092_v32 = vmax.f32 %v1060_v30, 0.0  ;;  %v1023_v33 = vadd.f32 %v991_v50, %v827_v16  ;;  %v830_v35 = vadd.f32 %v798_v56, %v634_v51  ;;  %5514 = vmatmul.mubr.msk.bf16.gmra.mrb[4].mxu1 %vm1154_vm0, %v1110_v12 }
 0x151   : > { %v950_v40 = vpop.permute.xlu1 %949  ;;  %v1063_v59 = vadd.f32 %v6463_v36, %v1024_v44 }
 0x152   : > { %v1062_v27 = vadd.f32 %v6463_v36, %v1023_v33  ;;  %v993_v38 = vmul.f32 %v6453_v0, %v950_v40  ;;  %v1111_v58 = vpack.c.bf16 %v1092_v32, %v1091_v15  ;;  %v1026_v5 = vadd.f32 %v994_v46, %v830_v35 }
 0x153   : > { %v1095_v42 = vmax.f32 %v1063_v59, 0.0 }
 0x154   : > { %v1094_v20 = vmax.f32 %v1062_v27, 0.0  ;;  %v1025_v18 = vadd.f32 %v993_v38, %v829_v45  ;;  %5517 = vmatprep.mubr.msk.bf16.mxu1 %vm1154_vm0, %v1111_v58  ;;  %v1065_v60 = vadd.f32 %v6463_v36, %v1026_v5 }
 0x155   : > { %v958_v48 = vpop.permute.xlu1 %957 }
 0x156   : > { %v1064_v43 = vadd.f32 %v6463_v36, %v1025_v18  ;;  %v995_v1 = vmul.f32 %v6453_v0, %v958_v48  ;;  %v1112_v41 = vpack.c.bf16 %v1094_v20, %v1093_v47  ;;  %v1097_v61 = vmax.f32 %v1065_v60, 0.0  ;;  %v6663_v0 = vld [vmem:[%s10727_s5] ss:$0 sm:$0xff] }
 0x158   : > { %v1096_v14 = vmax.f32 %v1064_v43, 0.0  ;;  %v1027_v6 = vadd.f32 %v995_v1, %v831_v39  ;;  %5518 = vmatmul.mubr.msk.bf16.gmra.mrb[8].mxu1 %vm1154_vm0, %v1112_v41 }
 0x15a   : > { %v1066_v19 = vadd.f32 %v6463_v36, %v1027_v6  ;;  %v1113_v4 = vpack.c.bf16 %v1096_v14, %v1095_v42 }
 0x15c   : > { %v1098_v26 = vmax.f32 %v1066_v19, 0.0  ;;  %5521 = vmatprep.mubr.msk.bf16.mxu1 %vm1154_vm0, %v1113_v4 }
 0x15e   : > { %v1114_v29 = vpack.c.bf16 %v1098_v26, %v1097_v61 }
 0x160   : > { %5522 = vmatmul.mubr.msk.bf16.gmra.mrb[12].mxu1 %vm1154_vm0, %v1114_v29 }
 0x1fb   : > { %v5495_v13 = vpop.f32.mrb[0].mxu0 }
 0x1fc   : > { %v6666_v21 = vadd.f32 %v5495_v13, %v6663_v0  ;;  %v1237_v23 = vpop.f32.mrb[1].mxu0 }
 0x1fd   : > { %v5496_v37 = vpop.f32.mrb[2].mxu0  ;;  %v6674_v53 = vadd.f32 %v6663_v0, %v1237_v23 }
 0x1fe   : > { %11187 = vst [vmem:[#allocation2_spill] sm:$0xff] %v6666_v21  ;;  %v6669_v36 = vadd.f32 %v5496_v37, %v6663_v0  ;;  %1520 = vrot.lane.b32.xlu1 %v6666_v21, %s6035_s10  ;;  %v1240_v2 = vpop.f32.mrb[3].mxu0 }
 0x1ff   : > { %11189 = vst [vmem:[#allocation4_spill] sm:$0xff] %v6674_v53  ;;  %v6677_v54 = vadd.f32 %v6663_v0, %v1240_v2 }
 0x200   : > { %11188 = vst [vmem:[#allocation3_spill] sm:$0xff] %v6669_v36  ;;  %v6681_v7 = vpack.c.bf16 %v6669_v36, %v6666_v21 }
 0x201   : > { %11190 = vst [vmem:[#allocation5_spill] sm:$0xff] %v6677_v54  ;;  %v6685_v10 = vpack.c.bf16 %v6677_v54, %v6674_v53 }
 0x202   : > { %v1664_v3 = vunpack.c.h.bf16 %v6681_v7 }
 0x203   : > { %v5499_v8 = vpop.f32.mrb[4].mxu0  ;;  %v10756_v60 = vunpack.c.h.bf16 %v6685_v10 }
 0x204   : > { %v6689_v9 = vadd.f32 %v5499_v8, %v6663_v0  ;;  %v1253_v28 = vpop.f32.mrb[5].mxu0  ;;  %v1702_v63 = vsel %vm1154_vm0, %v1664_v3, -inf }
 0x205   : > { %v6695_v31 = vadd.f32 %v6663_v0, %v1253_v28  ;;  %1703 = vmax.xlane.f32.xlu0 %v1702_v63  ;;  %v5500_v49 = vpop.f32.mrb[6].mxu0  ;;  %v1696_v26 = vsel %vm1154_vm0, %v10756_v60, -inf }
 0x206   : > { %11191 = vst [vmem:[#allocation12_spill] sm:$0xff] %v6689_v9  ;;  %v6698_v25 = vadd.f32 %v5500_v49, %v6663_v0  ;;  %v1256_v16 = vpop.f32.mrb[7].mxu0 }
 0x207   : > { %11192 = vst [vmem:[#allocation14_spill] sm:$0xff] %v6695_v31  ;;  %v6701_v11 = vadd.f32 %v6663_v0, %v1256_v16 }
 0x208   : > { %11193 = vst [vmem:[#allocation13_spill] sm:$0xff] %v6698_v25 }
 0x209   : > { %11194 = vst [vmem:[#allocation17_spill] sm:$0xff] %v6701_v11 }
 0x20b   : > { %v5503_v17 = vpop.f32.mrb[8].mxu0 }
 0x20c   : > { %v6704_v30 = vadd.f32 %v5503_v17, %v6663_v0  ;;  %v1269_v50 = vpop.f32.mrb[9].mxu0 }
 0x20d   : > { %v6707_v55 = vadd.f32 %v6663_v0, %v1269_v50  ;;  %v5504_v56 = vpop.f32.mrb[10].mxu0 }
 0x20e   : > { %11195 = vst [vmem:[#allocation6_spill] sm:$0xff] %v6704_v30  ;;  %v6710_v22 = vadd.f32 %v5504_v56, %v6663_v0  ;;  %v1272_v51 = vpop.f32.mrb[11].mxu0 }
 0x20f   : > { %11196 = vst [vmem:[#allocation7_spill] sm:$0xff] %v6707_v55  ;;  %v6713_v12 = vadd.f32 %v6663_v0, %v1272_v51 }
 0x210   : > { %11197 = vst [vmem:[#allocation15_spill] sm:$0xff] %v6710_v22 }
 0x211   : > { %11198 = vst [vmem:[#allocation19_spill] sm:$0xff] %v6713_v12 }
 0x213   : > { %v5507_v15 = vpop.f32.mrb[12].mxu0 }
 0x214   : > { %v6716_v32 = vadd.f32 %v5507_v15, %v6663_v0  ;;  %v1285_v44 = vpop.f32.mrb[13].mxu0 }
 0x215   : > { %v6719_v33 = vadd.f32 %v6663_v0, %v1285_v44  ;;  %v5508_v45 = vpop.f32.mrb[14].mxu0 }
 0x216   : > { %11199 = vst [vmem:[#allocation8_spill] sm:$0xff] %v6716_v32  ;;  %v6722_v62 = vadd.f32 %v5508_v45, %v6663_v0  ;;  %v1288_v24 = vpop.f32.mrb[15].mxu0 }
 0x217   : > { %11200 = vst [vmem:[#allocation9_spill] sm:$0xff] %v6719_v33  ;;  %v6725_v34 = vadd.f32 %v6663_v0, %v1288_v24 }
 0x218   : > { %11201 = vst [vmem:[#allocation18_spill] sm:$0xff] %v6722_v62 }
 0x219   : > { %11202 = vst [vmem:[#allocation21_spill] sm:$0xff] %v6725_v34 }
 0x21b   : > { %v5511_v52 = vpop.f32.mrb[0].mxu1 }
 0x21c   : > { %v6728_v35 = vadd.f32 %v5511_v52, %v6663_v0  ;;  %v1301_v40 = vpop.f32.mrb[1].mxu1  ;;  %v10739_v52 = vunpack.c.l.bf16 %v6681_v7 }
 0x21d   : > { %v6731_v57 = vadd.f32 %v6663_v0, %v1301_v40  ;;  %v5512_v46 = vpop.f32.mrb[2].mxu1 }
 0x21e   : > { %11203 = vst [vmem:[#allocation10_spill] sm:$0xff] %v6728_v35  ;;  %v6734_v27 = vadd.f32 %v5512_v46, %v6663_v0  ;;  %1552 = vrot.lane.b32.xlu1 %v6728_v35, %s6035_s10  ;;  %v1304_v38 = vpop.f32.mrb[3].mxu1  ;;  %v5581_v48 = vpack.i.bf16 %v6728_v35, %v6666_v21  ;;  %v1699_v40 = vsel %vm1154_vm0, %v10739_v52, -inf }
 0x21f   : > { %11204 = vst [vmem:[#allocation11_spill] sm:$0xff] %v6731_v57  ;;  %v6739_v58 = vadd.f32 %v6663_v0, %v1304_v38  ;;  %v5577_v59 = vpack.i.bf16 %v6731_v57, %v6674_v53  ;;  %v6826_v38 = vpack.c.bf16 %v6698_v25, %v6689_v9 }
 0x220   : > { %11205 = vst [vmem:[#allocation20_spill] sm:$0xff] %v6734_v27  ;;  %v6743_v47 = vpack.c.bf16 %v6734_v27, %v6728_v35  ;;  %v5583_v43 = vpack.i.bf16 %v6734_v27, %v6669_v36 }
 0x221   : > { %11206 = vst [vmem:[#allocation22_spill] sm:$0xff] %v6739_v58  ;;  %v6749_v20 = vpack.c.bf16 %v6739_v58, %v6731_v57  ;;  %v5579_v5 = vpack.i.bf16 %v6739_v58, %v6677_v54 }
 0x222   : > { %1516 = vrot.lane.b32.xlu1 %v6674_v53, %s6035_s10  ;;  %v1680_v18 = vunpack.c.h.bf16 %v6743_v47  ;;  %v10738_v46 = vunpack.c.l.bf16 %v6743_v47 }
 0x223   : > { %v5515_v39 = vpop.f32.mrb[4].mxu1  ;;  %v10755_v29 = vunpack.c.h.bf16 %v6749_v20 }
 0x224   : > { %v6761_v1 = vadd.f32 %v5515_v39, %v6663_v0  ;;  %v1317_v41 = vpop.f32.mrb[5].mxu1  ;;  %v1750_v42 = vsel %vm1154_vm0, %v1680_v18, -inf  ;;  %v10751_v39 = vunpack.c.h.bf16 %v6826_v38 }
 0x225   : > { %v6768_v14 = vadd.f32 %v6663_v0, %v1317_v41  ;;  %1751 = vmax.xlane.f32.xlu0 %v1750_v42  ;;  %v5516_v6 = vpop.f32.mrb[6].mxu1  ;;  %v1744_v2 = vsel %vm1154_vm0, %v10755_v29, -inf  ;;  %v6834_v41 = vpack.c.bf16 %v6701_v11, %v6695_v31 }
 0x226   : > { %11207 = vst [vmem:[#allocation23_spill] sm:$0xff] %v6761_v1  ;;  %v6771_v19 = vadd.f32 %v5516_v6, %v6663_v0  ;;  %1548 = vrot.lane.b32.xlu1 %v6731_v57, %s6035_s10  ;;  %v1320_v4 = vpop.f32.mrb[7].mxu1  ;;  %v1714_v42 = vsel %vm1154_vm0, %v10751_v39, -inf }
 0x227   : > { %11208 = vst [vmem:[#allocation24_spill] sm:$0xff] %v6768_v14  ;;  %v6776_v61 = vadd.f32 %v6663_v0, %v1320_v4  ;;  %v10746_v6 = vunpack.c.h.bf16 %v6834_v41 }
 0x228   : > { %11209 = vst [vmem:[#allocation25_spill] sm:$0xff] %v6771_v19 }
 0x229   : > { %11210 = vst [vmem:[#allocation26_spill] sm:$0xff] %v6776_v61  ;;  %1697 = vmax.xlane.f32.xlu0 %v1696_v26  ;;  %v6842_v4 = vpack.c.bf16 %v6776_v61, %v6768_v14  ;;  %v1708_v26 = vsel %vm1154_vm0, %v10746_v6, -inf }
 0x22a   : > { %1522 = vrot.lane.b32.xlu1 %v6669_v36, %s6035_s10  ;;  %v7305_v36 = vld [vmem:[%s7293_s20] ss:$0 sm:$0xff] }
 0x22b   : > { %v5519_v13 = vpop.f32.mrb[8].mxu1  ;;  %v10766_v35 = vunpack.c.l.bf16 %v6842_v4 }
 0x22c   : > { %v6785_v23 = vadd.f32 %v5519_v13, %v6663_v0  ;;  %v1333_v37 = vpop.f32.mrb[9].mxu1  ;;  %v10744_v13 = vunpack.c.h.bf16 %v6842_v4 }
 0x22d   : > { %v6791_v8 = vadd.f32 %v6663_v0, %v1333_v37  ;;  %1745 = vmax.xlane.f32.xlu0 %v1744_v2  ;;  %v5520_v28 = vpop.f32.mrb[10].mxu1  ;;  %v6850_v37 = vpack.c.bf16 %v6710_v22, %v6704_v30 }
 0x22e   : > { %11211 = vst [vmem:[#allocation27_spill] sm:$0xff] %v6785_v23  ;;  %v6794_v63 = vadd.f32 %v5520_v28, %v6663_v0  ;;  %1554 = vrot.lane.b32.xlu1 %v6734_v27, %s6035_s10  ;;  %v1336_v49 = vpop.f32.mrb[11].mxu1  ;;  %v1756_v2 = vsel %vm1154_vm0, %v10744_v13, -inf }
 0x22f   : > { %11212 = vst [vmem:[#allocation28_spill] sm:$0xff] %v6791_v8  ;;  %v6799_v16 = vadd.f32 %v6663_v0, %v1336_v49  ;;  %v10742_v28 = vunpack.c.h.bf16 %v6850_v37  ;;  %v6858_v49 = vpack.c.bf16 %v6713_v12, %v6707_v55 }
 0x230   : > { %11213 = vst [vmem:[#allocation29_spill] sm:$0xff] %v6794_v63 }
 0x231   : > { %11214 = vst [vmem:[#allocation30_spill] sm:$0xff] %v6799_v16 }
 0x232   : > { %1518 = vrot.lane.b32.xlu1 %v6677_v54, %s6035_s10 }
 0x233   : > { %v5523_v17 = vpop.f32.mrb[12].mxu1 }
 0x234   : > { %v6804_v50 = vadd.f32 %v5523_v17, %v6663_v0  ;;  %v1349_v56 = vpop.f32.mrb[13].mxu1  ;;  %v1726_v17 = vsel %vm1154_vm0, %v10742_v28, -inf }
 0x235   : > { %v6807_v51 = vadd.f32 %v6663_v0, %v1349_v56  ;;  %v5524_v15 = vpop.f32.mrb[14].mxu1  ;;  %v10741_v56 = vunpack.c.h.bf16 %v6858_v49 }
 0x236   : > { %11215 = vst [vmem:[#allocation31_spill] sm:$0xff] %v6804_v50  ;;  %v6810_v44 = vadd.f32 %v5524_v15, %v6663_v0  ;;  %1550 = vrot.lane.b32.xlu1 %v6739_v58, %s6035_s10  ;;  %v1352_v45 = vpop.f32.mrb[15].mxu1  ;;  %v6866_v15 = vpack.c.bf16 %v6722_v62, %v6716_v32 }
 0x237   : > { %11216 = vst [vmem:[#allocation32_spill] sm:$0xff] %v6807_v51  ;;  %v6815_v24 = vadd.f32 %v6663_v0, %v1352_v45  ;;  %v1747_v0 = vsel %vm1154_vm0, %v10738_v46, -inf  ;;  %v6902_v46 = vpack.c.bf16 %v6794_v63, %v6785_v23 }
 0x238   : > { %11217 = vst [vmem:[#allocation33_spill] sm:$0xff] %v6810_v44 }
 0x239   : > { %11218 = vst [vmem:[#allocation34_spill] sm:$0xff] %v6815_v24 }
 0x243   : > { %1562 = vrot.lane.b32.xlu0 %v6771_v19, %s6035_s10 }
 0x25a   : > { %1700 = vmax.xlane.f32.xlu1 %v1699_v40  ;;  %v1720_v40 = vsel %vm1154_vm0, %v10741_v56, -inf }
 0x25e   : > { %1748 = vmax.xlane.f32.xlu1 %v1747_v0  ;;  %v10740_v0 = vunpack.c.h.bf16 %v6866_v15 }
 0x262   : > { %1715 = vmax.xlane.f32.xlu0 %v1714_v42  ;;  %v6884_v42 = vpack.c.bf16 %v6771_v19, %v6761_v1 }
 0x266   : > { %1709 = vmax.xlane.f32.xlu0 %v1708_v26  ;;  %v1738_v26 = vsel %vm1154_vm0, %v10740_v0, -inf  ;;  %v10745_v0 = vunpack.c.h.bf16 %v6902_v46 }
 0x268   : > { %v1774_v56 = vsel %vm1154_vm0, %v10745_v0, -inf }
 0x26a   : > { %1757 = vmax.xlane.f32.xlu0 %v1756_v2  ;;  %v10748_v2 = vunpack.c.h.bf16 %v6884_v42 }
 0x26e   : > { %1727 = vmax.xlane.f32.xlu0 %v1726_v17  ;;  %v6894_v17 = vpack.c.bf16 %v6799_v16, %v6791_v8 }
 0x26f   : > { %1528 = vrot.lane.b32.xlu1 %v6689_v9, %s6035_s10 }
 0x270   : > { %v1521_v45 = vpop.permute.xlu1 %1520 }
 0x271   : > { %1615 = vst.msk [vmem:[%s6872_s13 + $0x10] sm:$0xff] %vm1612_vm1, %v1521_v45  ;;  %v1762_v45 = vsel %vm1154_vm0, %v10748_v2, -inf }
 0x272   : > { %1721 = vmax.xlane.f32.xlu0 %v1720_v40  ;;  %v10743_v40 = vunpack.c.h.bf16 %v6894_v17 }
 0x273   : > { %1560 = vrot.lane.b32.xlu1 %v6761_v1, %s6035_s10 }
 0x274   : > { %v1768_v52 = vsel %vm1154_vm0, %v10743_v40, -inf }
 0x276   : > { %1739 = vmax.xlane.f32.xlu0 %v1738_v26  ;;  %v6910_v26 = vpack.c.bf16 %v6725_v34, %v6719_v33 }
 0x278   : > { %v10747_v28 = vunpack.c.h.bf16 %v6910_v26 }
 0x27a   : > { %1763 = vmax.xlane.f32.xlu0 %v1762_v45  ;;  %v6918_v45 = vpack.c.bf16 %v6810_v44, %v6804_v50  ;;  %v1732_v40 = vsel %vm1154_vm0, %v10747_v28, -inf }
 0x27c   : > { %v10749_v13 = vunpack.c.h.bf16 %v6918_v45 }
 0x27e   : > { %1769 = vmax.xlane.f32.xlu0 %v1768_v52  ;;  %v6926_v52 = vpack.c.bf16 %v6815_v24, %v6807_v51  ;;  %v1786_v0 = vsel %vm1154_vm0, %v10749_v13, -inf  ;;  %v10754_v13 = vunpack.c.l.bf16 %v6749_v20 }
 0x280   : > { %v10750_v6 = vunpack.c.h.bf16 %v6926_v52 }
 0x282   : > { %1775 = vmax.xlane.f32.xlu0 %v1774_v56  ;;  %v1780_v56 = vsel %vm1154_vm0, %v10750_v6, -inf }
 0x286   : > { %1733 = vmax.xlane.f32.xlu0 %v1732_v40  ;;  %v10752_v40 = vunpack.c.l.bf16 %v6685_v10 }
 0x28a   : > { %1787 = vmax.xlane.f32.xlu0 %v1786_v0  ;;  %v1693_v0 = vsel %vm1154_vm0, %v10752_v40, -inf }
 0x28e   : > { %1781 = vmax.xlane.f32.xlu0 %v1780_v56 }
 0x290   : > { %v1553_v28 = vpop.permute.xlu1 %1552 }
 0x291   : > { %1631 = vst.msk [vmem:[%s6872_s13 + $0x90] sm:$0xff] %vm1612_vm1, %v1553_v28  ;;  %v1741_v28 = vsel %vm1154_vm0, %v10754_v13, -inf }
 0x294   : > { %v1517_v2 = vpop.permute.xlu1 %1516 }
 0x295   : > { %1613 = vst.msk [vmem:[%s6872_s13] sm:$0xff] %vm1612_vm1, %v1517_v2 }
 0x297   : > { %1694 = vmax.xlane.f32.xlu1 %v1693_v0 }
 0x298   : > { %v1549_v6 = vpop.permute.xlu1 %1548 }
 0x299   : > { %1629 = vst.msk [vmem:[%s6872_s13 + $0x80] sm:$0xff] %vm1612_vm1, %v1549_v6  ;;  %v1704_v6 = vpop.xlane.xlu0 %1703 }
 0x29b   : > { %1742 = vmax.xlane.f32.xlu1 %v1741_v28 }
 0x29c   : > { %v1523_v56 = vpop.permute.xlu1 %1522 }
 0x29d   : > { %1616 = vst.msk [vmem:[%s6872_s13 + $0x18] sm:$0xff] %vm1612_vm1, %v1523_v56  ;;  %v5587_v56 = vpack.i.bf16 %v6776_v61, %v6701_v11 }
 0x2a0   : > { %v1555_v39 = vpop.permute.xlu1 %1554 }
 0x2a1   : > { %1632 = vst.msk [vmem:[%s6872_s13 + $0x98] sm:$0xff] %vm1612_vm1, %v1555_v39 }
 0x2a4   : > { %v1519_v2 = vpop.permute.xlu1 %1518 }
 0x2a5   : > { %1614 = vst.msk [vmem:[%s6872_s13 + $0x8] sm:$0xff] %vm1612_vm1, %v1519_v2  ;;  %v5589_v2 = vpack.i.bf16 %v6761_v1, %v6689_v9  ;;  %v10765_v1 = vunpack.c.l.bf16 %v6834_v41 }
 0x2a7   : > { %v1705_v27 = vsel %vm1154_vm0, %v10765_v1, -inf }
 0x2a8   : > { %v1551_v40 = vpop.permute.xlu1 %1550 }
 0x2a9   : > { %1630 = vst.msk [vmem:[%s6872_s13 + $0x88] sm:$0xff] %vm1612_vm1, %v1551_v40 }
 0x2ac   : > { %1524 = vrot.lane.b32.xlu1 %v6695_v31, %s6035_s10 }
 0x2b0   : > { %1556 = vrot.lane.b32.xlu1 %v6768_v14, %s6035_s10 }
 0x2b2   : > { %v1752_v0 = vpop.xlane.xlu0 %1751 }
 0x2b4   : > { %1530 = vrot.lane.b32.xlu1 %v6698_v25, %s6035_s10 }
 0x2b6   : > { %v1698_v28 = vpop.xlane.xlu0 %1697 }
 0x2b8   : > { %1526 = vrot.lane.b32.xlu1 %v6701_v11, %s6035_s10 }
 0x2ba   : > { %v1746_v39 = vpop.xlane.xlu0 %1745 }
 0x2bb   : > { %5578 = vxpose.xlu0.b32.start [1/16] (narrow) %v5577_v59, 64  ;;  %v5585_v59 = vpack.i.bf16 %v6768_v14, %v6695_v31 }
 0x2bc   : > { %1558 = vrot.lane.b32.xlu1 %v6776_v61, %s6035_s10  ;;  %v11219_v61 = vunpack.c.h.bf16 %v6685_v10 }
 0x2be   : > { %v1563_v40 = vpop.permute.xlu0 %1562  ;;  %v1790_v14 = vsub.f32 %v11219_v61, %v1698_v28 }
 0x2bf   : > { %1636 = vst.msk [vmem:[%s6872_s13 + $0xb8] sm:$0xff] %vm1612_vm1, %v1563_v40  ;;  %5580 = vxpose.xlu0.b32.cont [2/16] (narrow) %v5579_v5, 64  ;;  %v5591_v5 = vpack.i.bf16 %v6771_v19, %v6698_v25  ;;  %v5595_v40 = vpack.i.bf16 %v6799_v16, %v6713_v12  ;;  %v1808_v19 = vsub.f32 %v1680_v18, %v1752_v0  ;;  %v11220_v18 = vunpack.c.h.bf16 %v6749_v20 }
 0x2c1   : > { %v1806_v0 = vsub.f32 %v11220_v18, %v1746_v39 }
 0x2c3   : > { %5582 = vxpose.xlu0.b32.cont [3/16] (narrow) %v5581_v48, 64  ;;  %v5593_v48 = vpack.i.bf16 %v6791_v8, %v6707_v55  ;;  %v1855_v61 = vmul.f32 1.442695, %v1806_v0 }
 0x2c7   : > { %5584 = vxpose.xlu0.b32.cont [4/16] (narrow) %v5583_v43, 64  ;;  %v10753_v43 = vunpack.c.l.bf16 %v6826_v38 }
 0x2cb   : > { %5586 = vxpose.xlu0.b32.cont [5/16] (narrow) %v5585_v59, 64  ;;  %v1711_v59 = vsel %vm1154_vm0, %v10753_v43, -inf }
 0x2cf   : > { %5588 = vxpose.xlu0.b32.cont [6/16] (narrow) %v5587_v56, 64  ;;  %v5597_v56 = vpack.i.bf16 %v6785_v23, %v6704_v30 }
 0x2d3   : > { %5590 = vxpose.xlu0.b32.cont [7/16] (narrow) %v5589_v2, 64  ;;  %v5599_v2 = vpack.i.bf16 %v6794_v63, %v6710_v22 }
 0x2d7   : > { %5592 = vxpose.xlu0.b32.cont [8/16] (narrow) %v5591_v5, 64 }
 0x2db   : > { %5594 = vxpose.xlu0.b32.cont [9/16] (narrow) %v5593_v48, 64  ;;  %v5601_v48 = vpack.i.bf16 %v6807_v51, %v6719_v33 }
 0x2df   : > { %5596 = vxpose.xlu0.b32.cont [10/16] (narrow) %v5595_v40, 64 }
 0x2e0   : > { %1712 = vmax.xlane.f32.xlu1 %v1711_v59  ;;  %v5603_v59 = vpack.i.bf16 %v6815_v24, %v6725_v34 }
 0x2e3   : > { %5598 = vxpose.xlu0.b32.cont [11/16] (narrow) %v5597_v56, 64  ;;  %v5605_v56 = vpack.i.bf16 %v6804_v50, %v6716_v32 }
 0x2e7   : > { %v7001_v5 = vpop.xlane.xlu1 %1700  ;;  %5600 = vxpose.xlu0.b32.cont [12/16] (narrow) %v5599_v2, 64 }
 0x2eb   : > { %v7005_v40 = vpop.xlane.xlu1 %1748  ;;  %5602 = vxpose.xlu0.b32.cont [13/16] (narrow) %v5601_v48, 64  ;;  %v5607_v48 = vpack.i.bf16 %v6810_v44, %v6722_v62 }
 0x2ef   : > { %v1529_v43 = vpop.permute.xlu1 %1528  ;;  %5604 = vxpose.xlu0.b32.cont [14/16] (narrow) %v5603_v59, 64  ;;  %v1716_v13 = vpop.xlane.xlu0 %1715 }
 0x2f0   : > { %1619 = vst.msk [vmem:[%s6872_s13 + $0x30] sm:$0xff] %vm1612_vm1, %v1529_v43 }
 0x2f1   : > { %1536 = vrot.lane.b32.xlu1 %v6704_v30, %s6035_s10 }
 0x2f3   : > { %v1561_v2 = vpop.permute.xlu1 %1560  ;;  %5606 = vxpose.xlu0.b32.cont [15/16] (narrow) %v5605_v56, 64  ;;  %v7021_v59 = vpop.xlane.xlu0 %1709  ;;  %v1792_v56 = vsub.f32 %v1664_v3, %v1704_v6  ;;  %v1823_v6 = vmul.f32 1.442695, %v1790_v14 }
 0x2f4   : > { %1635 = vst.msk [vmem:[%s6872_s13 + $0xb0] sm:$0xff] %vm1612_vm1, %v1561_v2 }
 0x2f5   : > { %1568 = vrot.lane.b32.xlu1 %v6785_v23, %s6035_s10  ;;  %v1827_v2 = vmul.f32 1.442695, %v1792_v56  ;;  %v11221_v56 = vlaneseq }
 0x2f7   : > { %5608 = vxpose.xlu0.b32.end [16/16] (narrow) %v5607_v48, 64  ;;  %v7023_v43 = vpop.xlane.xlu0 %1757  ;;  %5686 = vpow2.f32 %v1827_v2  ;;  %v1859_v48 = vmul.f32 1.442695, %v1808_v19  ;;  %v2110_v58 = vand.u32 127, %v11221_v56  ;;  %v1753_v19 = vsel %vm1154_vm0, %v10766_v35, -inf }
 0x2f9   : > { %5688 = vpow2.f32 %v1859_v48  ;;  %v2111_v28 = vcvt.s32.f32 %v2110_v58 }
 0x2fa   : > { %5690 = vpow2.f32 %v1823_v6 }
 0x2fb   : > { %v7025_v29 = vpop.xlane.xlu0 %1727  ;;  %5692 = vpow2.f32 %v1855_v61  ;;  %v2113_v14 = vadd.f32 1.0, %v2111_v28 }
 0x2ff   : > { %v7027_v60 = vpop.xlane.xlu0 %1721 }
 0x301   : > { %v7050_v1 = vpop.eup %5686 }
 0x302   : > { %11222 = vst [vmem:[#allocation35_spill] sm:$0xff] %v7050_v1  ;;  %v1894_v39 = vsel %vm1154_vm0, %v7050_v1, 0.0 }
 0x303   : > { %v7033_v23 = vpop.xlane.xlu0 %1739  ;;  %v7054_v48 = vpop.eup %5688 }
 0x304   : > { %11223 = vst [vmem:[#allocation36_spill] sm:$0xff] %v7054_v48  ;;  %v1942_v58 = vsel %vm1154_vm0, %v7054_v48, 0.0  ;;  %v7062_v0 = vpop.eup %5690 }
 0x305   : > { %11224 = vst [vmem:[#allocation37_spill] sm:$0xff] %v7062_v0  ;;  %v1888_v35 = vsel %vm1154_vm0, %v7062_v0, 0.0 }
 0x307   : > { %v1764_v3 = vpop.xlane.xlu0 %1763 }
 0x30b   : > { %v7048_v2 = vpop.xlane.xlu0 %1769 }
 0x30f   : > { %v7058_v56 = vpop.xlane.xlu0 %1775 }
 0x319   : > { %1706 = vmax.xlane.f32.xlu1 %v1705_v27  ;;  %v2112_v27 = vmul.f32 0.014423077, %v2111_v28  ;;  %v7068_v28 = vpop.xlane.xlu0 %1733 }
 0x31b   : > { %v2114_v6 = vmul.f32 %v2113_v14, %v2112_v27  ;;  %v11227_v27 = vunpack.c.h.bf16 %v6826_v38 }
 0x31d   : > { %1754 = vmax.xlane.f32.xlu1 %v1753_v19  ;;  %v7066_v61 = vadd.f32 1.0, %v2114_v6  ;;  %v1796_v14 = vsub.f32 %v11227_v27, %v1716_v13  ;;  %v7084_v25 = vpop.xlane.xlu0 %1787 }
 0x31f   : > { %11225 = vst [vmem:[#allocation38_spill] sm:$0xff] %v7066_v61  ;;  %v2135_v27 = vmul.f32 %v7054_v48, %v7066_v61 }
 0x324   : > { %v7056_v18 = vpop.xlane.xlu1 %1694  ;;  %1895 = vadd.xlane.f32.xlu0 %v1894_v39  ;;  %v7072_v39 = vpop.eup %5692 }
 0x325   : > { %11226 = vst [vmem:[#allocation39_spill] sm:$0xff] %v7072_v39  ;;  %v1936_v6 = vsel %vm1154_vm0, %v7072_v39, 0.0 }
 0x328   : > { %v7064_v19 = vpop.xlane.xlu1 %1742  ;;  %1943 = vadd.xlane.f32.xlu0 %v1942_v58  ;;  %v2119_v58 = vmul.f32 %v7050_v1, %v7066_v61 }
 0x32a   : > { %v2157_v13 = vsel %vm1154_vm0, %v2119_v58, 0.0  ;;  %v2205_v58 = vsel %vm1154_vm0, %v2135_v27, 0.0  ;;  %v2133_v27 = vmul.f32 %v7072_v39, %v7066_v61 }
 0x32c   : > { %v1525_v57 = vpop.permute.xlu1 %1524  ;;  %1889 = vadd.xlane.f32.xlu0 %v1888_v35  ;;  %v1835_v35 = vmul.f32 1.442695, %v1796_v14 }
 0x32d   : > { %1617 = vst.msk [vmem:[%s6872_s13 + $0x20] sm:$0xff] %vm1612_vm1, %v1525_v57  ;;  %v11228_v57 = vunpack.c.h.bf16 %v6884_v42 }
 0x32e   : > { %1532 = vrot.lane.b32.xlu1 %v6707_v55, %s6035_s10  ;;  %5694 = vpow2.f32 %v1835_v35 }
 0x32f   : > { %v1812_v11 = vsub.f32 %v11228_v57, %v1764_v3  ;;  %v2117_v57 = vmul.f32 %v7062_v0, %v7066_v61 }
 0x330   : > { %v1557_v30 = vpop.permute.xlu1 %1556  ;;  %1937 = vadd.xlane.f32.xlu0 %v1936_v6  ;;  %v7102_v6 = vpop.xlane.xlu0 %1781 }
 0x331   : > { %1633 = vst.msk [vmem:[%s6872_s13 + $0xa0] sm:$0xff] %vm1612_vm1, %v1557_v30  ;;  %v11229_v30 = vunpack.c.h.bf16 %v6834_v41  ;;  %v1867_v3 = vmul.f32 1.442695, %v1812_v11  ;;  %v2151_v35 = vsel %vm1154_vm0, %v2117_v57, 0.0 }
 0x332   : > { %1564 = vrot.lane.b32.xlu1 %v6791_v8, %s6035_s10 }
 0x333   : > { %v1794_v14 = vsub.f32 %v11229_v30, %v7021_v59  ;;  %v11230_v59 = vunpack.c.h.bf16 %v6842_v4  ;;  %5696 = vpow2.f32 %v1867_v3  ;;  %v2199_v3 = vsel %vm1154_vm0, %v2133_v27, 0.0 }
 0x334   : > { %v1531_v55 = vpop.permute.xlu1 %1530  ;;  %2158 = vadd.xlane.f32.xlu0 %v2157_v13 }
 0x335   : > { %1620 = vst.msk [vmem:[%s6872_s13 + $0x38] sm:$0xff] %vm1612_vm1, %v1531_v55  ;;  %v1831_v55 = vmul.f32 1.442695, %v1794_v14  ;;  %v1810_v11 = vsub.f32 %v11230_v59, %v7023_v43 }
 0x336   : > { %1538 = vrot.lane.b32.xlu1 %v6710_v22, %s6035_s10 }
 0x337   : > { %5698 = vpow2.f32 %v1831_v55  ;;  %v1863_v43 = vmul.f32 1.442695, %v1810_v11 }
 0x338   : > { %v1527_v13 = vpop.permute.xlu1 %1526  ;;  %2206 = vadd.xlane.f32.xlu0 %v2205_v58  ;;  %v7128_v59 = vpop.eup %5694 }
 0x339   : > { %1618 = vst.msk [vmem:[%s6872_s13 + $0x28] sm:$0xff] %vm1612_vm1, %v1527_v13  ;;  %11231 = vst [vmem:[#allocation40_spill] sm:$0xff] %v7128_v59  ;;  %5700 = vpow2.f32 %v1863_v43  ;;  %v1906_v11 = vsel %vm1154_vm0, %v7128_v59, 0.0 }
 0x33a   : > { %1570 = vrot.lane.b32.xlu1 %v6794_v63, %s6035_s10 }
 0x33b   : > { %v5609_v30 = vpop.trf.xlu0 }
 0x33c   : > { %v1559_v8 = vpop.permute.xlu1 %1558  ;;  %2152 = vadd.xlane.f32.xlu0 %v2151_v35  ;;  %v5613_v58 = vunpack.i.h.bf16 %v5609_v30  ;;  %v5610_v13 = vunpack.i.l.bf16 %v5609_v30 }
 0x33d   : > { %1634 = vst.msk [vmem:[%s6872_s13 + $0xa8] sm:$0xff] %vm1612_vm1, %v1559_v8 }
 0x33e   : > { %1534 = vrot.lane.b32.xlu1 %v6713_v12, %s6035_s10  ;;  %v5457_v14 = vpack.c.bf16 %v5613_v58, %v5610_v13  ;;  %v7135_v58 = vpop.eup %5696 }
 0x33f   : > { %v5614_v57 = vpop.trf.xlu0  ;;  %11232 = vst [vmem:[#allocation41_spill] sm:$0xff] %v7135_v58 }
 0x340   : > { %2200 = vadd.xlane.f32.xlu0 %v2199_v3  ;;  %1476 = vst [vmem:[%s7123_s17] sm:$0xff] %v5457_v14  ;;  %v5618_v8 = vunpack.i.h.bf16 %v5614_v57  ;;  %v5615_v35 = vunpack.i.l.bf16 %v5614_v57  ;;  %v1954_v3 = vsel %vm1154_vm0, %v7135_v58, 0.0 }
 0x341   : > { %v7140_v57 = vpop.eup %5698 }
 0x342   : > { %1566 = vrot.lane.b32.xlu1 %v6799_v16, %s6035_s10  ;;  %v5458_v55 = vpack.c.bf16 %v5618_v8, %v5615_v35  ;;  %11233 = vst [vmem:[#allocation42_spill] sm:$0xff] %v7140_v57 }
 0x343   : > { %v5619_v30 = vpop.trf.xlu0  ;;  %v7145_v16 = vpop.eup %5700 }
 0x344   : > { %1907 = vadd.xlane.f32.xlu0 %v1906_v11  ;;  %1477 = vst [vmem:[%s7123_s17 + $0x8] sm:$0xff] %v5458_v55  ;;  %v5623_v27 = vunpack.i.h.bf16 %v5619_v30  ;;  %v5620_v13 = vunpack.i.l.bf16 %v5619_v30  ;;  %v1900_v11 = vsel %vm1154_vm0, %v7140_v57, 0.0  ;;  %11234 = vst [vmem:[#allocation43_spill] sm:$0xff] %v7145_v16 }
 0x346   : > { %v5459_v14 = vpack.c.bf16 %v5623_v27, %v5620_v13  ;;  %v11235_v13 = vunpack.c.h.bf16 %v6850_v37 }
 0x347   : > { %v5624_v43 = vpop.trf.xlu0 }
 0x348   : > { %1955 = vadd.xlane.f32.xlu0 %v1954_v3  ;;  %1478 = vst [vmem:[%s7123_s17 + $0x10] sm:$0xff] %v5459_v14  ;;  %v5628_v8 = vunpack.i.h.bf16 %v5624_v43  ;;  %v5625_v35 = vunpack.i.l.bf16 %v5624_v43  ;;  %v1800_v22 = vsub.f32 %v11235_v13, %v7025_v29  ;;  %v1948_v3 = vsel %vm1154_vm0, %v7145_v16, 0.0 }
 0x349   : > { %v2123_v43 = vmul.f32 %v7128_v59, %v7066_v61 }
 0x34a   : > { %v5460_v63 = vpack.c.bf16 %v5628_v8, %v5625_v35 }
 0x34b   : > { %v5629_v55 = vpop.trf.xlu0  ;;  %v2169_v29 = vsel %vm1154_vm0, %v2123_v43, 0.0  ;;  %v2121_v43 = vmul.f32 %v7140_v57, %v7066_v61 }
 0x34c   : > { %1901 = vadd.xlane.f32.xlu0 %v1900_v11  ;;  %1479 = vst [vmem:[%s7123_s17 + $0x18] sm:$0xff] %v5460_v63  ;;  %v5633_v30 = vunpack.i.h.bf16 %v5629_v55  ;;  %v5630_v27 = vunpack.i.l.bf16 %v5629_v55  ;;  %v1843_v63 = vmul.f32 1.442695, %v1800_v22  ;;  %v11236_v55 = vunpack.c.h.bf16 %v6902_v46 }
 0x34d   : > { %v11237_v22 = vunpack.c.h.bf16 %v6858_v49 }
 0x34e   : > { %v5461_v14 = vpack.c.bf16 %v5633_v30, %v5630_v27  ;;  %v1816_v12 = vsub.f32 %v11236_v55, %v7058_v56  ;;  %v2139_v30 = vmul.f32 %v7135_v58, %v7066_v61  ;;  %5702 = vpow2.f32 %v1843_v63 }
 0x34f   : > { %v5634_v8 = vpop.trf.xlu0  ;;  %v11238_v63 = vunpack.c.h.bf16 %v6894_v17 }
 0x350   : > { %1949 = vadd.xlane.f32.xlu0 %v1948_v3  ;;  %1480 = vst [vmem:[%s7123_s17 + $0x20] sm:$0xff] %v5461_v14  ;;  %v5638_v35 = vunpack.i.h.bf16 %v5634_v8  ;;  %v5635_v11 = vunpack.i.l.bf16 %v5634_v8  ;;  %v1798_v14 = vsub.f32 %v11237_v22, %v7027_v60  ;;  %v1875_v8 = vmul.f32 1.442695, %v1816_v12 }
 0x351   : > { %v2163_v12 = vsel %vm1154_vm0, %v2121_v43, 0.0 }
 0x352   : > { %v5462_v31 = vpack.c.bf16 %v5638_v35, %v5635_v11  ;;  %v2217_v35 = vsel %vm1154_vm0, %v2139_v30, 0.0  ;;  %5704 = vpow2.f32 %v1875_v8  ;;  %v2137_v30 = vmul.f32 %v7145_v16, %v7066_v61 }
 0x353   : > { %v5639_v27 = vpop.trf.xlu0 }
 0x354   : > { %2170 = vadd.xlane.f32.xlu0 %v2169_v29  ;;  %1481 = vst [vmem:[%s7123_s17 + $0x28] sm:$0xff] %v5462_v31  ;;  %v5643_v13 = vunpack.i.h.bf16 %v5639_v27  ;;  %v5640_v3 = vunpack.i.l.bf16 %v5639_v27  ;;  %v1839_v29 = vmul.f32 1.442695, %v1798_v14  ;;  %v1814_v27 = vsub.f32 %v11238_v63, %v7048_v2 }
 0x355   : > { %v10779_v14 = vunpack.c.l.bf16 %v6850_v37 }
 0x356   : > { %v5463_v56 = vpack.c.bf16 %v5643_v13, %v5640_v3  ;;  %5706 = vpow2.f32 %v1839_v29  ;;  %v1871_v13 = vmul.f32 1.442695, %v1814_v27  ;;  %v2211_v3 = vsel %vm1154_vm0, %v2137_v30, 0.0 }
 0x357   : > { %v5644_v11 = vpop.trf.xlu0  ;;  %v11243_v29 = vunpack.c.h.bf16 %v6866_v15 }
 0x358   : > { %2218 = vadd.xlane.f32.xlu0 %v2217_v35  ;;  %1482 = vst [vmem:[%s7123_s17 + $0x30] sm:$0xff] %v5463_v56  ;;  %v5648_v55 = vunpack.i.h.bf16 %v5644_v11  ;;  %v5645_v31 = vunpack.i.l.bf16 %v5644_v11  ;;  %v7178_v22 = vpop.eup %5702  ;;  %5708 = vpow2.f32 %v1871_v13  ;;  %v1723_v56 = vsel %vm1154_vm0, %v10779_v14, -inf }
 0x359   : > { %11239 = vst [vmem:[#allocation44_spill] sm:$0xff] %v7178_v22  ;;  %v1918_v2 = vsel %vm1154_vm0, %v7178_v22, 0.0  ;;  %v1804_v63 = vsub.f32 %v11243_v29, %v7033_v23  ;;  %v11244_v13 = vunpack.c.h.bf16 %v6918_v45 }
 0x35a   : > { %v5464_v60 = vpack.c.bf16 %v5648_v55, %v5645_v31 }
 0x35b   : > { %v1851_v30 = vmul.f32 1.442695, %v1804_v63 }
 0x35c   : > { %2164 = vadd.xlane.f32.xlu0 %v2163_v12  ;;  %1483 = vst [vmem:[%s7123_s17 + $0x38] sm:$0xff] %v5464_v60  ;;  %v7183_v8 = vpop.eup %5704  ;;  %v2127_v60 = vmul.f32 %v7178_v22, %v7066_v61  ;;  %v11289_v22 = vunpack.c.l.bf16 %v6834_v41 }
 0x35d   : > { %11240 = vst [vmem:[#allocation45_spill] sm:$0xff] %v7183_v8  ;;  %v1966_v35 = vsel %vm1154_vm0, %v7183_v8, 0.0  ;;  %v2143_v23 = vmul.f32 %v7183_v8, %v7066_v61  ;;  %5710 = vpow2.f32 %v1851_v30 }
 0x360   : > { %2212 = vadd.xlane.f32.xlu0 %v2211_v3  ;;  %v7190_v43 = vpop.eup %5706  ;;  %v1820_v3 = vsub.f32 %v11244_v13, %v7084_v25  ;;  %v2229_v25 = vsel %vm1154_vm0, %v2143_v23, 0.0 }
 0x361   : > { %11241 = vst [vmem:[#allocation46_spill] sm:$0xff] %v7190_v43  ;;  %v1912_v11 = vsel %vm1154_vm0, %v7190_v43, 0.0  ;;  %v2125_v63 = vmul.f32 %v7190_v43, %v7066_v61 }
 0x362   : > { %v7194_v55 = vpop.eup %5708  ;;  %v1883_v29 = vmul.f32 1.442695, %v1820_v3 }
 0x363   : > { %11242 = vst [vmem:[#allocation47_spill] sm:$0xff] %v7194_v55  ;;  %v1960_v27 = vsel %vm1154_vm0, %v7194_v55, 0.0  ;;  %v2141_v30 = vmul.f32 %v7194_v55, %v7066_v61 }
 0x364   : > { %1919 = vadd.xlane.f32.xlu0 %v1918_v2  ;;  %v2181_v2 = vsel %vm1154_vm0, %v2127_v60, 0.0  ;;  %5712 = vpow2.f32 %v1883_v29  ;;  %v11246_v60 = vunpack.c.h.bf16 %v6926_v52 }
 0x365   : > { %v2223_v3 = vsel %vm1154_vm0, %v2141_v30, 0.0  ;;  %v10778_v30 = vunpack.c.l.bf16 %v6858_v49 }
 0x366   : > { %1724 = vmax.xlane.f32.xlu1 %v1723_v56 }
 0x368   : > { %1967 = vadd.xlane.f32.xlu0 %v1966_v35  ;;  %v11245_v35 = vunpack.c.h.bf16 %v6910_v26 }
 0x36c   : > { %1913 = vadd.xlane.f32.xlu0 %v1912_v11  ;;  %v1802_v11 = vsub.f32 %v11245_v35, %v7068_v28  ;;  %v2175_v28 = vsel %vm1154_vm0, %v2125_v63, 0.0 }
 0x36d   : > { %v7196_v31 = vpop.xlane.xlu1 %1712 }
 0x370   : > { %1961 = vadd.xlane.f32.xlu0 %v1960_v27  ;;  %v1847_v27 = vmul.f32 1.442695, %v1802_v11 }
 0x371   : > { %v1537_v12 = vpop.permute.xlu1 %1536 }
 0x372   : > { %1623 = vst.msk [vmem:[%s6872_s13 + $0x50] sm:$0xff] %vm1612_vm1, %v1537_v12  ;;  %v1818_v12 = vsub.f32 %v11246_v60, %v7102_v6  ;;  %5714 = vpow2.f32 %v1847_v27 }
 0x374   : > { %2182 = vadd.xlane.f32.xlu0 %v2181_v2  ;;  %v1879_v13 = vmul.f32 1.442695, %v1818_v12  ;;  %v7232_v2 = vpop.eup %5710 }
 0x375   : > { %v1569_v56 = vpop.permute.xlu1 %1568  ;;  %11247 = vst [vmem:[#allocation48_spill] sm:$0xff] %v7232_v2  ;;  %v1930_v6 = vsel %vm1154_vm0, %v7232_v2, 0.0  ;;  %v7236_v23 = vpop.eup %5712  ;;  %v2131_v63 = vmul.f32 %v7232_v2, %v7066_v61 }
 0x376   : > { %1639 = vst.msk [vmem:[%s6872_s13 + $0xd0] sm:$0xff] %vm1612_vm1, %v1569_v56  ;;  %5716 = vpow2.f32 %v1879_v13  ;;  %11248 = vst [vmem:[#allocation49_spill] sm:$0xff] %v7236_v23  ;;  %v1978_v56 = vsel %vm1154_vm0, %v7236_v23, 0.0  ;;  %v2147_v60 = vmul.f32 %v7236_v23, %v7066_v61 }
 0x377   : > { %1544 = vrot.lane.b32.xlu1 %v6716_v32, %s6035_s10  ;;  %v2193_v27 = vsel %vm1154_vm0, %v2131_v63, 0.0 }
 0x378   : > { %2230 = vadd.xlane.f32.xlu0 %v2229_v25  ;;  %v2241_v12 = vsel %vm1154_vm0, %v2147_v60, 0.0 }
 0x37b   : > { %1576 = vrot.lane.b32.xlu1 %v6804_v50, %s6035_s10 }
 0x37c   : > { %2176 = vadd.xlane.f32.xlu0 %v2175_v28  ;;  %v7240_v35 = vpop.eup %5714 }
 0x37d   : > { %11249 = vst [vmem:[#allocation50_spill] sm:$0xff] %v7240_v35  ;;  %v1924_v11 = vsel %vm1154_vm0, %v7240_v35, 0.0  ;;  %v2129_v28 = vmul.f32 %v7240_v35, %v7066_v61 }
 0x37f   : > { %v2187_v13 = vsel %vm1154_vm0, %v2129_v28, 0.0 }
 0x380   : > { %2224 = vadd.xlane.f32.xlu0 %v2223_v3  ;;  %v7244_v29 = vpop.eup %5716 }
 0x381   : > { %11250 = vst [vmem:[#allocation51_spill] sm:$0xff] %v7244_v29  ;;  %v1972_v25 = vsel %vm1154_vm0, %v7244_v29, 0.0  ;;  %v2145_v3 = vmul.f32 %v7244_v29, %v7066_v61 }
 0x384   : > { %1931 = vadd.xlane.f32.xlu0 %v1930_v6  ;;  %v1717_v6 = vsel %vm1154_vm0, %v10778_v30, -inf }
 0x388   : > { %1979 = vadd.xlane.f32.xlu0 %v1978_v56  ;;  %v11251_v56 = vld [vmem:[#allocation16_spill] sm:$0xff] }
 0x389   : > { %v7297_v50 = vadd.s32 80, %v11251_v56  ;;  %v7355_v2 = vadd.s32 128, %v11251_v56  ;;  %v7372_v55 = vadd.s32 144, %v11251_v56  ;;  %v7866_v48 = vadd.s32 120, %v11251_v56 }
 0x38b   : > { %v10796_v54 = vcvt.s32.f32 %v7297_v50  ;;  %11252 = vst [vmem:[#allocation16_spill] sm:$0xff] %v7355_v2  ;;  %11253 = vst [vmem:[#allocation52_spill] sm:$0xff] %v7372_v55  ;;  %v10816_v43 = vcvt.s32.f32 %v7372_v55 }
 0x38c   : > { %1925 = vadd.xlane.f32.xlu0 %v1924_v11  ;;  %v7264_v11 = vadd.s32 8, %v11251_v56  ;;  %11329 = vst [vmem:[#allocation111_spill] sm:$0xff] %v7866_v48 }
 0x38e   : > { %v10780_v63 = vcvt.s32.f32 %v7264_v11 }
 0x390   : > { %1973 = vadd.xlane.f32.xlu0 %v1972_v25  ;;  %v2235_v25 = vsel %vm1154_vm0, %v2145_v3, 0.0 }
 0x394   : > { %2194 = vadd.xlane.f32.xlu0 %v2193_v27  ;;  %v7269_v27 = vadd.s32 32, %v11251_v56 }
 0x396   : > { %v10784_v28 = vcvt.s32.f32 %v7269_v27 }
 0x398   : > { %2242 = vadd.xlane.f32.xlu0 %v2241_v12  ;;  %v2600_v12 = vadd.f32 0.5, %v10780_v63  ;;  %v2603_v30 = vadd.f32 0.5, %v10784_v28 }
 0x39a   : > { %v7300_v9 = vmul.f32 0.0625, %v2603_v30 }
 0x39c   : > { %2188 = vadd.xlane.f32.xlu0 %v2187_v13  ;;  %v7277_v13 = vadd.s32 48, %v11251_v56 }
 0x39e   : > { %v10789_v14 = vcvt.s32.f32 %v7277_v13 }
 0x39f   : > { %1718 = vmax.xlane.f32.xlu1 %v1717_v6  ;;  %v7280_v6 = vadd.s32 64, %v11251_v56 }
 0x3a0   : > { %2236 = vadd.xlane.f32.xlu0 %v2235_v25  ;;  %v7284_v25 = vmul.f32 0.0625, %v2600_v12  ;;  %v2605_v28 = vadd.f32 0.5, %v10789_v14  ;;  %v10797_v14 = vfloor.f32 %v7300_v9 }
 0x3a1   : > { %v10791_v63 = vcvt.s32.f32 %v7280_v6 }
 0x3a2   : > { %v10794_v12 = vfloor.f32 %v7284_v25  ;;  %v7318_v29 = vmul.f32 0.0625, %v2605_v28  ;;  %v2802_v28 = vmul.f32 %v7305_v36, %v10797_v14 }
 0x3a3   : > { %v2607_v21 = vadd.f32 0.5, %v10791_v63 }
 0x3a4   : > { %v2799_v30 = vmul.f32 %v7305_v36, %v10794_v12  ;;  %v10800_v12 = vfloor.f32 %v7318_v29 }
 0x3a5   : > { %v7327_v63 = vmul.f32 0.0625, %v2607_v21 }
 0x3a6   : > { %v7271_v60 = vpop.xlane.xlu1 %1706  ;;  %v2804_v14 = vmul.f32 %v7305_v36, %v10800_v12 }
 0x3a7   : > { %v10804_v21 = vfloor.f32 %v7327_v63  ;;  %v1793_v16 = vsub.f32 %v11289_v22, %v7271_v60 }
 0x3aa   : > { %v7282_v3 = vpop.xlane.xlu1 %1754 }
 0x3ae   : > { %v1533_v32 = vpop.permute.xlu1 %1532 }
 0x3af   : > { %1621 = vst.msk [vmem:[%s6872_s13 + $0x40] sm:$0xff] %vm1612_vm1, %v1533_v32  ;;  %v7321_v32 = vadd.s32 96, %v11251_v56 }
 0x3b0   : > { %1540 = vrot.lane.b32.xlu1 %v6719_v33, %s6035_s10  ;;  %v2609_v33 = vadd.f32 0.5, %v10796_v54 }
 0x3b2   : > { %v1565_v53 = vpop.permute.xlu1 %1564  ;;  %v7345_v54 = vmul.f32 0.0625, %v2609_v33  ;;  %v2806_v33 = vmul.f32 %v7305_v36, %v10804_v21 }
 0x3b3   : > { %1637 = vst.msk [vmem:[%s6872_s13 + $0xc0] sm:$0xff] %vm1612_vm1, %v1565_v53  ;;  %v10801_v53 = vcvt.s32.f32 %v7321_v32 }
 0x3b4   : > { %1572 = vrot.lane.b32.xlu1 %v6807_v51, %s6035_s10  ;;  %v7338_v51 = vadd.s32 112, %v11251_v56 }
 0x3b5   : > { %v2611_v23 = vadd.f32 0.5, %v10801_v53 }
 0x3b6   : > { %v1539_v35 = vpop.permute.xlu1 %1538  ;;  %2864 = vrot.lane.b32.xlu0 %v2799_v30, %s6036_s27 }
 0x3b7   : > { %1624 = vst.msk [vmem:[%s6872_s13 + $0x58] sm:$0xff] %vm1612_vm1, %v1539_v35  ;;  %v10805_v35 = vcvt.s32.f32 %v7338_v51  ;;  %v7366_v53 = vmul.f32 0.0625, %v2611_v23 }
 0x3b8   : > { %1546 = vrot.lane.b32.xlu1 %v6722_v62, %s6035_s10 }
 0x3b9   : > { %v2613_v62 = vadd.f32 0.5, %v10805_v35  ;;  %v10812_v35 = vfloor.f32 %v7366_v53 }
 0x3ba   : > { %v1571_v30 = vpop.permute.xlu1 %1570  ;;  %2870 = vrot.lane.b32.xlu0 %v2802_v28, %s6036_s27  ;;  %v10808_v28 = vfloor.f32 %v7345_v54 }
 0x3bb   : > { %1640 = vst.msk [vmem:[%s6872_s13 + $0xd8] sm:$0xff] %vm1612_vm1, %v1571_v30  ;;  %v7386_v30 = vmul.f32 0.0625, %v2613_v62  ;;  %v2810_v62 = vmul.f32 %v7305_v36, %v10812_v35 }
 0x3bc   : > { %1578 = vrot.lane.b32.xlu1 %v6810_v44, %s6035_s10  ;;  %v2808_v21 = vmul.f32 %v7305_v36, %v10808_v28  ;;  %v11255_v44 = vcvt.s32.f32 %v7355_v2 }
 0x3be   : > { %v1535_v12 = vpop.permute.xlu1 %1534  ;;  %2874 = vrot.lane.b32.xlu0 %v2804_v14, %s6036_s27  ;;  %v7382_v14 = vadd.s32 160, %v11251_v56 }
 0x3bf   : > { %1622 = vst.msk [vmem:[%s6872_s13 + $0x48] sm:$0xff] %vm1612_vm1, %v1535_v12  ;;  %v2615_v12 = vadd.f32 0.5, %v11255_v44  ;;  %v10817_v44 = vfloor.f32 %v7386_v30 }
 0x3c0   : > { %1542 = vrot.lane.b32.xlu1 %v6725_v34, %s6035_s10  ;;  %11254 = vst [vmem:[#allocation53_spill] sm:$0xff] %v7382_v14  ;;  %v10815_v28 = vcvt.s32.f32 %v7382_v14  ;;  %v7397_v34 = vadd.s32 176, %v11251_v56 }
 0x3c2   : > { %v1567_v23 = vpop.permute.xlu1 %1566  ;;  %2878 = vrot.lane.b32.xlu0 %v2806_v33, %s6036_s27  ;;  %11256 = vst [vmem:[#allocation54_spill] sm:$0xff] %v7397_v34  ;;  %v7404_v33 = vmul.f32 0.0625, %v2615_v12  ;;  %v10819_v2 = vcvt.s32.f32 %v7397_v34  ;;  %v7419_v12 = vadd.s32 192, %v11251_v56  ;;  %v7445_v34 = vadd.s32 224, %v11251_v56 }
 0x3c3   : > { %1638 = vst.msk [vmem:[%s6872_s13 + $0xc8] sm:$0xff] %vm1612_vm1, %v1567_v23  ;;  %v2617_v23 = vadd.f32 0.5, %v10816_v43 }
 0x3c4   : > { %1574 = vrot.lane.b32.xlu1 %v6815_v24, %s6035_s10  ;;  %11257 = vst [vmem:[#allocation55_spill] sm:$0xff] %v7404_v33  ;;  %v2619_v24 = vadd.f32 0.5, %v10815_v28  ;;  %v10820_v35 = vfloor.f32 %v7404_v33  ;;  %11259 = vst [vmem:[#allocation57_spill] sm:$0xff] %v7419_v12  ;;  %v2621_v28 = vadd.f32 0.5, %v10819_v2  ;;  %s6043_s10 = smov 6  }
 0x3c5   : > { %v7416_v8 = vmul.f32 0.0625, %v2617_v23  ;;  %v7432_v23 = vadd.s32 208, %v11251_v56  ;;  %11263 = vst [vmem:[#allocation61_spill] sm:$0xff] %v7445_v34 }
 0x3c6   : > { %2882 = vrot.lane.b32.xlu0 %v2808_v21, %s6036_s27  ;;  %v2812_v21 = vmul.f32 %v7305_v36, %v10817_v44  ;;  %v7421_v55 = vmul.f32 0.0625, %v2619_v24  ;;  %v10824_v44 = vcvt.s32.f32 %v7419_v12  ;;  %v7435_v24 = vmul.f32 0.0625, %v2621_v28 }
 0x3c7   : > { %11258 = vst [vmem:[#allocation56_spill] sm:$0xff] %v7416_v8  ;;  %v10823_v43 = vfloor.f32 %v7416_v8  ;;  %11261 = vst [vmem:[#allocation59_spill] sm:$0xff] %v7432_v23  ;;  %v7458_v12 = vadd.s32 240, %v11251_v56 }
 0x3c8   : > { %11260 = vst [vmem:[#allocation58_spill] sm:$0xff] %v7421_v55  ;;  %v10827_v14 = vfloor.f32 %v7421_v55  ;;  %11262 = vst [vmem:[#allocation60_spill] sm:$0xff] %v7435_v24  ;;  %v2623_v2 = vadd.f32 0.5, %v10824_v44  ;;  %v10831_v28 = vfloor.f32 %v7435_v24  ;;  %v10832_v44 = vcvt.s32.f32 %v7445_v34 }
 0x3c9   : > { %11265 = vst [vmem:[#allocation63_spill] sm:$0xff] %v7458_v12  ;;  %v10838_v34 = vunpack.c.l.bf16 %v6866_v15 }
 0x3ca   : > { %2886 = vrot.lane.b32.xlu0 %v2810_v62, %s6036_s27  ;;  %v2814_v62 = vmul.f32 %v7305_v36, %v10820_v35  ;;  %v10829_v35 = vcvt.s32.f32 %v7432_v23  ;;  %v2818_v33 = vmul.f32 %v7305_v36, %v10827_v14  ;;  %v2820_v55 = vmul.f32 %v7305_v36, %v10831_v28 }
 0x3ce   : > { %2890 = vrot.lane.b32.xlu0 %v2812_v21, %s6036_s27  ;;  %v2816_v21 = vmul.f32 %v7305_v36, %v10823_v43  ;;  %v2625_v43 = vadd.f32 0.5, %v10829_v35 }
 0x3d0   : > { %v7465_v8 = vmul.f32 0.0625, %v2625_v43 }
 0x3d2   : > { %2894 = vrot.lane.b32.xlu0 %v2814_v62, %s6036_s27  ;;  %v7452_v62 = vmul.f32 0.0625, %v2623_v2  ;;  %11266 = vst [vmem:[#allocation64_spill] sm:$0xff] %v7465_v8  ;;  %v2627_v2 = vadd.f32 0.5, %v10832_v44  ;;  %v10837_v23 = vfloor.f32 %v7465_v8 }
 0x3d4   : > { %11264 = vst [vmem:[#allocation62_spill] sm:$0xff] %v7452_v62  ;;  %v10835_v14 = vfloor.f32 %v7452_v62  ;;  %v7475_v28 = vmul.f32 0.0625, %v2627_v2  ;;  %v2824_v43 = vmul.f32 %v7305_v36, %v10837_v23  ;;  %v11269_v23 = vunpack.c.l.bf16 %v6681_v7 }
 0x3d6   : > { %2898 = vrot.lane.b32.xlu0 %v2816_v21, %s6036_s27  ;;  %v10834_v21 = vcvt.s32.f32 %v7458_v12  ;;  %v2822_v35 = vmul.f32 %v7305_v36, %v10835_v14  ;;  %11267 = vst [vmem:[#allocation65_spill] sm:$0xff] %v7475_v28  ;;  %v10836_v44 = vfloor.f32 %v7475_v28  ;;  %v10840_v14 = vunpack.c.l.bf16 %v6910_v26 }
 0x3d8   : > { %v2826_v2 = vmul.f32 %v7305_v36, %v10836_v44  ;;  %v10846_v44 = vunpack.c.l.bf16 %v6884_v42 }
 0x3da   : > { %2902 = vrot.lane.b32.xlu0 %v2818_v33, %s6036_s27  ;;  %v2629_v33 = vadd.f32 0.5, %v10834_v21 }
 0x3de   : > { %2906 = vrot.lane.b32.xlu0 %v2820_v55, %s6036_s27  ;;  %v7484_v55 = vmul.f32 0.0625, %v2629_v33 }
 0x3e0   : > { %11268 = vst [vmem:[#allocation66_spill] sm:$0xff] %v7484_v55  ;;  %v10839_v21 = vfloor.f32 %v7484_v55 }
 0x3e2   : > { %2910 = vrot.lane.b32.xlu0 %v2822_v35, %s6036_s27  ;;  %v1735_v35 = vsel %vm1154_vm0, %v10838_v34, -inf  ;;  %v2828_v33 = vmul.f32 %v7305_v36, %v10839_v21  ;;  %v1791_v34 = vsub.f32 %v11269_v23, %v7001_v5  ;;  %v10845_v23 = vunpack.c.l.bf16 %v6902_v46 }
 0x3e4   : > { %v1825_v21 = vmul.f32 1.442695, %v1791_v34  ;;  %v11271_v34 = vunpack.c.l.bf16 %v6685_v10 }
 0x3e6   : > { %2914 = vrot.lane.b32.xlu0 %v2824_v43, %s6036_s27  ;;  %v1729_v43 = vsel %vm1154_vm0, %v10840_v14, -inf  ;;  %v11270_v14 = vunpack.c.l.bf16 %v6743_v47  ;;  %5718 = vpow2.f32 %v1825_v21  ;;  %v1789_v47 = vsub.f32 %v11271_v34, %v7056_v18 }
 0x3e7   : > { %v11272_v21 = vunpack.c.l.bf16 %v6749_v20  ;;  %v10843_v18 = vunpack.c.l.bf16 %v6918_v45 }
 0x3e8   : > { %1736 = vmax.xlane.f32.xlu1 %v1735_v35  ;;  %v10844_v35 = vunpack.c.l.bf16 %v6894_v17  ;;  %v1807_v28 = vsub.f32 %v11270_v14, %v7005_v40  ;;  %v1771_v14 = vsel %vm1154_vm0, %v10845_v23, -inf }
 0x3ea   : > { %2918 = vrot.lane.b32.xlu0 %v2826_v2, %s6036_s27  ;;  %v1759_v2 = vsel %vm1154_vm0, %v10846_v44, -inf  ;;  %v1765_v5 = vsel %vm1154_vm0, %v10844_v35, -inf }
 0x3ec   : > { %1730 = vmax.xlane.f32.xlu1 %v1729_v43  ;;  %v10842_v43 = vunpack.c.l.bf16 %v6926_v52 }
 0x3ee   : > { %2922 = vrot.lane.b32.xlu0 %v2828_v33, %s6036_s27  ;;  %v1857_v33 = vmul.f32 1.442695, %v1807_v28  ;;  %v1805_v28 = vsub.f32 %v11272_v21, %v7064_v19  ;;  %v1777_v10 = vsel %vm1154_vm0, %v10842_v43, -inf }
 0x3f0   : > { %1760 = vmax.xlane.f32.xlu1 %v1759_v2  ;;  %5720 = vpow2.f32 %v1857_v33  ;;  %v1821_v2 = vmul.f32 1.442695, %v1789_v47  ;;  %v1853_v34 = vmul.f32 1.442695, %v1805_v28  ;;  %v1783_v33 = vsel %vm1154_vm0, %v10843_v18, -inf  ;;  %v7543_v47 = vpop.eup %5718 }
 0x3f1   : > { %11273 = vst [vmem:[#allocation67_spill] sm:$0xff] %v7543_v47  ;;  %v1891_v20 = vsel %vm1154_vm0, %v7543_v47, 0.0  ;;  %v11277_v28 = vunpack.c.l.bf16 %v6826_v38 }
 0x3f2   : > { %2990 = vrot.lane.b32.xlu0 %v7305_v36, %s6037_s21  ;;  %5722 = vpow2.f32 %v1821_v2 }
 0x3f3   : > { %v7516_v7 = vpop.xlane.xlu1 %1724  ;;  %5724 = vpow2.f32 %v1853_v34  ;;  %v2118_v34 = vmul.f32 %v7543_v47, %v7066_v61 }
 0x3f4   : > { %1766 = vmax.xlane.f32.xlu1 %v1765_v5 }
 0x3f7   : > { %v1545_v40 = vpop.permute.xlu1 %1544 }
 0x3f8   : > { %1627 = vst.msk [vmem:[%s6872_s13 + $0x70] sm:$0xff] %vm1612_vm1, %v1545_v40  ;;  %1772 = vmax.xlane.f32.xlu1 %v1771_v14 }
 0x3fa   : > { %v7547_v19 = vpop.eup %5720 }
 0x3fb   : > { %v1577_v5 = vpop.permute.xlu1 %1576  ;;  %11274 = vst [vmem:[#allocation68_spill] sm:$0xff] %v7547_v19  ;;  %v1939_v40 = vsel %vm1154_vm0, %v7547_v19, 0.0 }
 0x3fc   : > { %1643 = vst.msk [vmem:[%s6872_s13 + $0xf0] sm:$0xff] %vm1612_vm1, %v1577_v5  ;;  %1778 = vmax.xlane.f32.xlu1 %v1777_v10  ;;  %v7551_v14 = vpop.eup %5722  ;;  %v1795_v5 = vsub.f32 %v11277_v28, %v7196_v31 }
 0x3fd   : > { %11275 = vst [vmem:[#allocation69_spill] sm:$0xff] %v7551_v14  ;;  %v1885_v2 = vsel %vm1154_vm0, %v7551_v14, 0.0  ;;  %v7555_v21 = vpop.eup %5724  ;;  %v2116_v38 = vmul.f32 %v7551_v14, %v7066_v61  ;;  %v11291_v14 = vunpack.c.l.bf16 %v6884_v42 }
 0x3fe   : > { %11276 = vst [vmem:[#allocation70_spill] sm:$0xff] %v7555_v21  ;;  %v1933_v10 = vsel %vm1154_vm0, %v7555_v21, 0.0  ;;  %v2132_v28 = vmul.f32 %v7555_v21, %v7066_v61 }
 0x3ff   : > { %v2148_v31 = vsel %vm1154_vm0, %v2116_v38, 0.0 }
 0x400   : > { %1784 = vmax.xlane.f32.xlu1 %v1783_v33  ;;  %v1833_v33 = vmul.f32 1.442695, %v1795_v5  ;;  %v7573_v5 = vpop.xlane.xlu0 %1895 }
 0x402   : > { %5726 = vpow2.f32 %v1833_v33 }
 0x404   : > { %1892 = vadd.xlane.f32.xlu1 %v1891_v20  ;;  %v2154_v20 = vsel %vm1154_vm0, %v2118_v34, 0.0  ;;  %v7578_v33 = vpop.xlane.xlu0 %1943 }
 0x408   : > { %1940 = vadd.xlane.f32.xlu1 %v1939_v40  ;;  %v2134_v40 = vmul.f32 %v7547_v19, %v7066_v61  ;;  %v1829_v19 = vmul.f32 1.442695, %v1793_v16 }
 0x40c   : > { %1886 = vadd.xlane.f32.xlu1 %v1885_v2  ;;  %v2202_v2 = vsel %vm1154_vm0, %v2134_v40, 0.0  ;;  %v7576_v34 = vpop.eup %5726  ;;  %v7582_v40 = vpop.xlane.xlu0 %1889 }
 0x40d   : > { %11278 = vst [vmem:[#allocation71_spill] sm:$0xff] %v7576_v34 }
 0x410   : > { %1934 = vadd.xlane.f32.xlu1 %v1933_v10  ;;  %v2196_v10 = vsel %vm1154_vm0, %v2132_v28, 0.0  ;;  %v7586_v38 = vpop.xlane.xlu0 %1937 }
 0x414   : > { %2155 = vadd.xlane.f32.xlu1 %v2154_v20  ;;  %v1903_v20 = vsel %vm1154_vm0, %v7576_v34, 0.0  ;;  %v7590_v28 = vpop.xlane.xlu0 %2158 }
 0x415   : > { %11279 = vst [vmem:[#allocation72_spill] sm:$0xff] %v7590_v28  ;;  %v7919_v28 = vadd.s32 184, %v11251_v56 }
 0x417   : > { %11338 = vst [vmem:[#allocation120_spill] sm:$0xff] %v7919_v28 }
 0x418   : > { %2203 = vadd.xlane.f32.xlu1 %v2202_v2 }
 0x41c   : > { %2149 = vadd.xlane.f32.xlu1 %v2148_v31 }
 0x420   : > { %2197 = vadd.xlane.f32.xlu1 %v2196_v10 }
 0x424   : > { %1904 = vadd.xlane.f32.xlu1 %v1903_v20  ;;  %v7596_v20 = vpop.xlane.xlu0 %2206 }
 0x425   : > { %11280 = vst [vmem:[#allocation73_spill] sm:$0xff] %v7596_v20 }
 0x428   : > { %v7600_v35 = vpop.xlane.xlu0 %2152 }
 0x429   : > { %11281 = vst [vmem:[#allocation74_spill] sm:$0xff] %v7600_v35 }
 0x42c   : > { %v7584_v2 = vpop.xlane.xlu1 %1718 }
 0x430   : > { %v1541_v31 = vpop.permute.xlu1 %1540 }
 0x431   : > { %1625 = vst.msk [vmem:[%s6872_s13 + $0x60] sm:$0xff] %vm1612_vm1, %v1541_v31  ;;  %v7606_v31 = vpop.xlane.xlu0 %2200 }
 0x432   : > { %11282 = vst [vmem:[#allocation75_spill] sm:$0xff] %v7606_v31 }
 0x434   : > { %v1573_v10 = vpop.permute.xlu1 %1572 }
 0x435   : > { %1641 = vst.msk [vmem:[%s6872_s13 + $0xe0] sm:$0xff] %vm1612_vm1, %v1573_v10  ;;  %v7608_v12 = vpop.xlane.xlu0 %1907 }
 0x438   : > { %v1547_v43 = vpop.permute.xlu1 %1546 }
 0x439   : > { %1628 = vst.msk [vmem:[%s6872_s13 + $0x78] sm:$0xff] %vm1612_vm1, %v1547_v43  ;;  %v7610_v10 = vpop.xlane.xlu0 %1955 }
 0x43c   : > { %v1579_v18 = vpop.permute.xlu1 %1578 }
 0x43d   : > { %1644 = vst.msk [vmem:[%s6872_s13 + $0xf8] sm:$0xff] %vm1612_vm1, %v1579_v18  ;;  %v7612_v43 = vpop.xlane.xlu0 %1901 }
 0x43e   : > { %11283 = vst [vmem:[#allocation76_spill] sm:$0xff] %v7612_v43 }
 0x440   : > { %v1543_v23 = vpop.permute.xlu1 %1542 }
 0x441   : > { %1626 = vst.msk [vmem:[%s6872_s13 + $0x68] sm:$0xff] %vm1612_vm1, %v1543_v23  ;;  %v7614_v55 = vpop.xlane.xlu0 %1949 }
 0x442   : > { %11284 = vst [vmem:[#allocation77_spill] sm:$0xff] %v7614_v55 }
 0x444   : > { %v1575_v44 = vpop.permute.xlu1 %1574 }
 0x445   : > { %1642 = vst.msk [vmem:[%s6872_s13 + $0xe8] sm:$0xff] %vm1612_vm1, %v1575_v44  ;;  %v7616_v62 = vpop.xlane.xlu0 %2170 }
 0x446   : > { %11285 = vst [vmem:[#allocation78_spill] sm:$0xff] %v7616_v62 }
 0x449   : > { %v7618_v18 = vpop.xlane.xlu0 %2218 }
 0x44a   : > { %11286 = vst [vmem:[#allocation79_spill] sm:$0xff] %v7618_v18 }
 0x44d   : > { %v7620_v8 = vpop.xlane.xlu0 %2164 }
 0x44e   : > { %11287 = vst [vmem:[#allocation80_spill] sm:$0xff] %v7620_v8  ;;  %v11292_v8 = vunpack.c.l.bf16 %v6842_v4 }
 0x450   : > { %v1809_v59 = vsub.f32 %v11292_v8, %v7282_v3 }
 0x451   : > { %v7624_v24 = vpop.xlane.xlu0 %2212 }
 0x452   : > { %11288 = vst [vmem:[#allocation81_spill] sm:$0xff] %v7624_v24  ;;  %v1861_v24 = vmul.f32 1.442695, %v1809_v59  ;;  %v11299_v59 = vunpack.c.l.bf16 %v6850_v37 }
 0x454   : > { %v1799_v3 = vsub.f32 %v11299_v59, %v7516_v7  ;;  %v11303_v59 = vunpack.c.l.bf16 %v6858_v49 }
 0x455   : > { %v7631_v57 = vpop.xlane.xlu0 %1919 }
 0x456   : > { %11290 = vst [vmem:[#allocation82_spill] sm:$0xff] %v7631_v57  ;;  %v7881_v57 = vadd.s32 136, %v11251_v56 }
 0x458   : > { %11330 = vst [vmem:[#allocation112_spill] sm:$0xff] %v7881_v57  ;;  %v10905_v35 = vcvt.s32.f32 %v7881_v57 }
 0x459   : > { %v7638_v18 = vpop.xlane.xlu0 %1967 }
 0x45a   : > { %11293 = vst [vmem:[#allocation83_spill] sm:$0xff] %v7638_v18 }
 0x45d   : > { %v7640_v41 = vpop.xlane.xlu0 %1913 }
 0x45e   : > { %11294 = vst [vmem:[#allocation84_spill] sm:$0xff] %v7640_v41 }
 0x461   : > { %v7648_v16 = vpop.xlane.xlu0 %1961 }
 0x462   : > { %11297 = vst [vmem:[#allocation87_spill] sm:$0xff] %v7648_v16 }
 0x475   : > { %v7622_v23 = vpop.xlane.xlu1 %1736 }
 0x479   : > { %v7626_v44 = vpop.xlane.xlu1 %1730 }
 0x47d   : > { %v1761_v21 = vpop.xlane.xlu1 %1760 }
 0x47e   : > { %v1811_v58 = vsub.f32 %v11291_v14, %v1761_v21  ;;  %v2122_v14 = vmul.f32 %v7576_v34, %v7066_v61  ;;  %v1841_v21 = vmul.f32 1.442695, %v1799_v3 }
 0x480   : > { %v1865_v47 = vmul.f32 1.442695, %v1811_v58 }
 0x481   : > { %v1767_v4 = vpop.xlane.xlu1 %1766 }
 0x482   : > { %5728 = vpow2.f32 %v1865_v47 }
 0x483   : > { %5730 = vpow2.f32 %v1829_v19 }
 0x484   : > { %5732 = vpow2.f32 %v1861_v24  ;;  %v7657_v24 = vpop.xlane.xlu0 %2182 }
 0x485   : > { %11300 = vst [vmem:[#allocation89_spill] sm:$0xff] %v7657_v24  ;;  %v1773_v47 = vpop.xlane.xlu1 %1772  ;;  %5734 = vpow2.f32 %v1841_v21  ;;  %v1797_v24 = vsub.f32 %v11303_v59, %v7584_v2 }
 0x488   : > { %v7668_v7 = vpop.xlane.xlu0 %2230 }
 0x489   : > { %11302 = vst [vmem:[#allocation90_spill] sm:$0xff] %v7668_v7 }
 0x48c   : > { %v7642_v22 = vpop.eup %5728  ;;  %v7676_v3 = vpop.xlane.xlu0 %2176 }
 0x48d   : > { %11295 = vst [vmem:[#allocation85_spill] sm:$0xff] %v7642_v22  ;;  %v1951_v42 = vsel %vm1154_vm0, %v7642_v22, 0.0  ;;  %v7646_v60 = vpop.eup %5730  ;;  %v2138_v37 = vmul.f32 %v7642_v22, %v7066_v61  ;;  %11304 = vst [vmem:[#allocation91_spill] sm:$0xff] %v7676_v3 }
 0x48e   : > { %11296 = vst [vmem:[#allocation86_spill] sm:$0xff] %v7646_v60  ;;  %1952 = vadd.xlane.f32.xlu1 %v1951_v42  ;;  %v1897_v58 = vsel %vm1154_vm0, %v7646_v60, 0.0  ;;  %v7652_v8 = vpop.eup %5732  ;;  %v11301_v42 = vunpack.c.l.bf16 %v6902_v46  ;;  %v2120_v46 = vmul.f32 %v7646_v60, %v7066_v61 }
 0x48f   : > { %11298 = vst [vmem:[#allocation88_spill] sm:$0xff] %v7652_v8  ;;  %v1945_v19 = vsel %vm1154_vm0, %v7652_v8, 0.0  ;;  %v2136_v49 = vmul.f32 %v7652_v8, %v7066_v61 }
 0x490   : > { %v1815_v16 = vsub.f32 %v11301_v42, %v1773_v47  ;;  %v1837_v47 = vmul.f32 1.442695, %v1797_v24  ;;  %v2160_v21 = vsel %vm1154_vm0, %v2120_v46, 0.0 }
 0x492   : > { %1898 = vadd.xlane.f32.xlu1 %v1897_v58  ;;  %v2166_v58 = vsel %vm1154_vm0, %v2122_v14, 0.0  ;;  %v1873_v41 = vmul.f32 1.442695, %v1815_v16  ;;  %v11305_v14 = vunpack.c.l.bf16 %v6894_v17  ;;  %v2208_v16 = vsel %vm1154_vm0, %v2136_v49, 0.0 }
 0x494   : > { %v1813_v42 = vsub.f32 %v11305_v14, %v1767_v4  ;;  %5736 = vpow2.f32 %v1873_v41 }
 0x495   : > { %5738 = vpow2.f32 %v1837_v47 }
 0x496   : > { %1946 = vadd.xlane.f32.xlu1 %v1945_v19  ;;  %v2214_v19 = vsel %vm1154_vm0, %v2138_v37, 0.0  ;;  %v1869_v2 = vmul.f32 1.442695, %v1813_v42  ;;  %v7686_v37 = vpop.xlane.xlu0 %2224  ;;  %v11313_v42 = vunpack.c.l.bf16 %v6866_v15 }
 0x497   : > { %11307 = vst [vmem:[#allocation93_spill] sm:$0xff] %v7686_v37  ;;  %v11315_v37 = vunpack.c.l.bf16 %v6918_v45 }
 0x498   : > { %5740 = vpow2.f32 %v1869_v2 }
 0x49a   : > { %2167 = vadd.xlane.f32.xlu1 %v2166_v58  ;;  %v7684_v58 = vpop.eup %5734  ;;  %v7692_v4 = vpop.xlane.xlu0 %1931 }
 0x49b   : > { %11306 = vst [vmem:[#allocation92_spill] sm:$0xff] %v7684_v58  ;;  %v1915_v17 = vsel %vm1154_vm0, %v7684_v58, 0.0  ;;  %11309 = vst [vmem:[#allocation95_spill] sm:$0xff] %v7692_v4 }
 0x49e   : > { %2215 = vadd.xlane.f32.xlu1 %v2214_v19  ;;  %v7690_v41 = vpop.eup %5736  ;;  %v1779_v19 = vpop.xlane.xlu1 %1778 }
 0x49f   : > { %11308 = vst [vmem:[#allocation94_spill] sm:$0xff] %v7690_v41  ;;  %v1963_v24 = vsel %vm1154_vm0, %v7690_v41, 0.0  ;;  %v7696_v59 = vpop.eup %5738  ;;  %v7702_v14 = vpop.xlane.xlu0 %1979  ;;  %v2142_v15 = vmul.f32 %v7690_v41, %v7066_v61  ;;  %v7811_v41 = vadd.s32 72, %v11251_v56 }
 0x4a0   : > { %11310 = vst [vmem:[#allocation96_spill] sm:$0xff] %v7696_v59  ;;  %v1909_v46 = vsel %vm1154_vm0, %v7696_v59, 0.0  ;;  %11312 = vst [vmem:[#allocation98_spill] sm:$0xff] %v7702_v14 }
 0x4a1   : > { %v10889_v22 = vcvt.s32.f32 %v7811_v41 }
 0x4a2   : > { %2161 = vadd.xlane.f32.xlu1 %v2160_v21  ;;  %v7700_v47 = vpop.eup %5740  ;;  %v1803_v21 = vsub.f32 %v11313_v42, %v7622_v23  ;;  %v1785_v49 = vpop.xlane.xlu1 %1784  ;;  %v11316_v23 = vunpack.c.l.bf16 %v6910_v26 }
 0x4a3   : > { %11311 = vst [vmem:[#allocation97_spill] sm:$0xff] %v7700_v47  ;;  %v1957_v2 = vsel %vm1154_vm0, %v7700_v47, 0.0  ;;  %v1819_v8 = vsub.f32 %v11315_v37, %v1785_v49  ;;  %v11318_v37 = vunpack.c.l.bf16 %v6926_v52  ;;  %v2140_v26 = vmul.f32 %v7700_v47, %v7066_v61 }
 0x4a4   : > { %v1801_v42 = vsub.f32 %v11316_v23, %v7626_v44  ;;  %v2608_v39 = vadd.f32 0.5, %v10889_v22 }
 0x4a5   : > { %v1881_v3 = vmul.f32 1.442695, %v1819_v8  ;;  %v1817_v49 = vsub.f32 %v11318_v37, %v1779_v19 }
 0x4a6   : > { %2209 = vadd.xlane.f32.xlu1 %v2208_v16  ;;  %v2126_v16 = vmul.f32 %v7684_v58, %v7066_v61  ;;  %v1845_v45 = vmul.f32 1.442695, %v1801_v42  ;;  %v7853_v18 = vmul.f32 0.0625, %v2608_v39 }
 0x4a7   : > { %v1877_v8 = vmul.f32 1.442695, %v1817_v49 }
 0x4a8   : > { %v10901_v1 = vfloor.f32 %v7853_v18 }
 0x4aa   : > { %1916 = vadd.xlane.f32.xlu1 %v1915_v17  ;;  %v7711_v17 = vpop.xlane.xlu0 %1925 }
 0x4ab   : > { %11314 = vst [vmem:[#allocation99_spill] sm:$0xff] %v7711_v17 }
 0x4ae   : > { %1964 = vadd.xlane.f32.xlu1 %v1963_v24  ;;  %v1849_v24 = vmul.f32 1.442695, %v1803_v21  ;;  %v2124_v21 = vmul.f32 %v7696_v59, %v7066_v61  ;;  %v7724_v58 = vpop.xlane.xlu0 %1973 }
 0x4af   : > { %11317 = vst [vmem:[#allocation100_spill] sm:$0xff] %v7724_v58 }
 0x4b0   : > { %5742 = vpow2.f32 %v1849_v24  ;;  %v2220_v24 = vsel %vm1154_vm0, %v2140_v26, 0.0 }
 0x4b1   : > { %5744 = vpow2.f32 %v1881_v3 }
 0x4b2   : > { %1910 = vadd.xlane.f32.xlu1 %v1909_v46  ;;  %v2178_v46 = vsel %vm1154_vm0, %v2126_v16, 0.0  ;;  %v2172_v16 = vsel %vm1154_vm0, %v2124_v21, 0.0  ;;  %v7731_v44 = vpop.xlane.xlu0 %2194  ;;  %5746 = vpow2.f32 %v1845_v45 }
 0x4b3   : > { %11319 = vst [vmem:[#allocation101_spill] sm:$0xff] %v7731_v44  ;;  %5748 = vpow2.f32 %v1877_v8 }
 0x4b4   : > { %5750 = vrcp.f32 %v7573_v5 }
 0x4b5   : > { %5752 = vrcp.f32 %v7578_v33 }
 0x4b6   : > { %1958 = vadd.xlane.f32.xlu1 %v1957_v2  ;;  %v2226_v2 = vsel %vm1154_vm0, %v2142_v15, 0.0  ;;  %v7740_v19 = vpop.xlane.xlu0 %2242  ;;  %5754 = vrcp.f32 %v7582_v40 }
 0x4b7   : > { %11322 = vst [vmem:[#allocation104_spill] sm:$0xff] %v7740_v19  ;;  %5756 = vrcp.f32 %v7586_v38 }
 0x4ba   : > { %2179 = vadd.xlane.f32.xlu1 %v2178_v46  ;;  %v7734_v46 = vpop.eup %5742  ;;  %v7746_v42 = vpop.xlane.xlu0 %2188 }
 0x4bb   : > { %11320 = vst [vmem:[#allocation102_spill] sm:$0xff] %v7734_v46  ;;  %v1927_v52 = vsel %vm1154_vm0, %v7734_v46, 0.0  ;;  %v7738_v3 = vpop.eup %5744  ;;  %11324 = vst [vmem:[#allocation106_spill] sm:$0xff] %v7746_v42  ;;  %v2130_v37 = vmul.f32 %v7734_v46, %v7066_v61 }
 0x4bc   : > { %11321 = vst [vmem:[#allocation103_spill] sm:$0xff] %v7738_v3  ;;  %v1975_v15 = vsel %vm1154_vm0, %v7738_v3, 0.0  ;;  %v7744_v23 = vpop.eup %5746  ;;  %v2146_v26 = vmul.f32 %v7738_v3, %v7066_v61 }
 0x4bd   : > { %11323 = vst [vmem:[#allocation105_spill] sm:$0xff] %v7744_v23  ;;  %v7750_v21 = vpop.eup %5748 }
 0x4be   : > { %2227 = vadd.xlane.f32.xlu1 %v2226_v2  ;;  %v1921_v2 = vsel %vm1154_vm0, %v7744_v23, 0.0  ;;  %11325 = vst [vmem:[#allocation107_spill] sm:$0xff] %v7750_v21  ;;  %v1969_v45 = vsel %vm1154_vm0, %v7750_v21, 0.0  ;;  %v7756_v49 = vpop.xlane.xlu0 %2236 }
 0x4bf   : > { %11326 = vst [vmem:[#allocation108_spill] sm:$0xff] %v7756_v49 }
 0x4c2   : > { %2173 = vadd.xlane.f32.xlu1 %v2172_v16  ;;  %v2190_v16 = vsel %vm1154_vm0, %v2130_v37, 0.0  ;;  %v7761_v8 = vpop.permute.xlu0 %2864  ;;  %v10869_v37 = vcvt.s32.f32 %v11251_v56 }
 0x4c6   : > { %2221 = vadd.xlane.f32.xlu1 %v2220_v24  ;;  %v2238_v24 = vsel %vm1154_vm0, %v2146_v26, 0.0  ;;  %v2599_v26 = vadd.f32 0.5, %v10869_v37 }
 0x4ca   : > { %1928 = vadd.xlane.f32.xlu1 %v1927_v52  ;;  %v2128_v52 = vmul.f32 %v7744_v23, %v7066_v61 }
 0x4ce   : > { %1976 = vadd.xlane.f32.xlu1 %v1975_v15  ;;  %v2184_v15 = vsel %vm1154_vm0, %v2128_v52, 0.0 }
 0x4d2   : > { %1922 = vadd.xlane.f32.xlu1 %v1921_v2  ;;  %v2144_v2 = vmul.f32 %v7750_v21, %v7066_v61  ;;  %v7782_v21 = vadd.s32 24, %v11251_v56  ;;  %v7898_v61 = vadd.s32 152, %v11251_v56 }
 0x4d4   : > { %v2232_v3 = vsel %vm1154_vm0, %v2144_v2, 0.0  ;;  %v10875_v2 = vcvt.s32.f32 %v7782_v21  ;;  %11333 = vst [vmem:[#allocation115_spill] sm:$0xff] %v7898_v61 }
 0x4d6   : > { %1970 = vadd.xlane.f32.xlu1 %v1969_v45  ;;  %v7769_v45 = vpop.permute.xlu0 %2870 }
 0x4da   : > { %2191 = vadd.xlane.f32.xlu1 %v2190_v16  ;;  %v7773_v16 = vadd.s32 16, %v11251_v56  ;;  %v7784_v23 = vpop.permute.xlu0 %2874 }
 0x4dc   : > { %v10872_v52 = vcvt.s32.f32 %v7773_v16 }
 0x4de   : > { %2239 = vadd.xlane.f32.xlu1 %v2238_v24  ;;  %v7778_v24 = vpop.xlane.xlu1 %1892  ;;  %v2601_v46 = vadd.f32 0.5, %v10872_v52  ;;  %v7796_v49 = vpop.permute.xlu0 %2878  ;;  %v7805_v52 = vadd.s32 56, %v11251_v56 }
 0x4df   : > { %5758 = vrcp.f32 %v7778_v24 }
 0x4e0   : > { %v7799_v42 = vmul.f32 0.0625, %v2601_v46  ;;  %v10887_v58 = vcvt.s32.f32 %v7805_v52  ;;  %5760 = vrcp.f32 %v7608_v12 }
 0x4e2   : > { %2185 = vadd.xlane.f32.xlu1 %v2184_v15  ;;  %v7786_v15 = vmul.f32 0.0625, %v2599_v26  ;;  %v7794_v37 = vpop.xlane.xlu1 %1940  ;;  %v2602_v26 = vadd.f32 0.5, %v10875_v2  ;;  %v10885_v46 = vfloor.f32 %v7799_v42  ;;  %v7821_v7 = vpop.permute.xlu0 %2882 }
 0x4e3   : > { %5762 = vrcp.f32 %v7794_v37 }
 0x4e4   : > { %v10878_v47 = vfloor.f32 %v7786_v15  ;;  %v7816_v60 = vmul.f32 0.0625, %v2602_v26  ;;  %v2800_v17 = vmul.f32 %v7305_v36, %v10885_v46  ;;  %5764 = vrcp.f32 %v7610_v10 }
 0x4e6   : > { %2233 = vadd.xlane.f32.xlu1 %v2232_v3  ;;  %v7792_v3 = vadd.s32 40, %v11251_v56  ;;  %v2798_v19 = vmul.f32 %v7305_v36, %v10878_v47  ;;  %v7813_v44 = vpop.xlane.xlu1 %1886  ;;  %v7825_v47 = vadd.s32 88, %v11251_v56  ;;  %v10890_v26 = vfloor.f32 %v7816_v60  ;;  %v7838_v4 = vpop.permute.xlu0 %2886 }
 0x4e7   : > { %5766 = vrcp.f32 %v7813_v44 }
 0x4e8   : > { %v10881_v59 = vcvt.s32.f32 %v7792_v3  ;;  %v2801_v46 = vmul.f32 %v7305_v36, %v10890_v26 }
 0x4ea   : > { %v2604_v2 = vadd.f32 0.5, %v10881_v59  ;;  %v2606_v59 = vadd.f32 0.5, %v10887_v58  ;;  %v7836_v14 = vpop.xlane.xlu1 %1934  ;;  %v7851_v58 = vadd.s32 104, %v11251_v56  ;;  %v7868_v39 = vpop.permute.xlu0 %2890 }
 0x4eb   : > { %11327 = vst [vmem:[#allocation109_spill] sm:$0xff] %v7836_v14 }
 0x4ec   : > { %v7832_v34 = vmul.f32 0.0625, %v2604_v2  ;;  %v7848_v0 = vmul.f32 0.0625, %v2606_v59  ;;  %v10898_v59 = vcvt.s32.f32 %v7851_v58 }
 0x4ee   : > { %v10894_v2 = vfloor.f32 %v7832_v34  ;;  %v7857_v62 = vpop.xlane.xlu1 %2155  ;;  %v10897_v26 = vfloor.f32 %v7848_v0  ;;  %v7885_v55 = vpop.permute.xlu0 %2894 }
 0x4ef   : > { %11328 = vst [vmem:[#allocation110_spill] sm:$0xff] %v7857_v62  ;;  %v10902_v62 = vcvt.s32.f32 %v7866_v48  ;;  %11332 = vst [vmem:[#allocation114_spill] sm:$0xff] %v7885_v55  ;;  %v10910_v48 = vcvt.s32.f32 %v7898_v61 }
 0x4f2   : > { %v7883_v31 = vpop.xlane.xlu1 %2203  ;;  %v7915_v20 = vpop.permute.xlu0 %2898 }
 0x4f3   : > { %11331 = vst [vmem:[#allocation113_spill] sm:$0xff] %v7883_v31  ;;  %11337 = vst [vmem:[#allocation119_spill] sm:$0xff] %v7915_v20 }
 0x4f6   : > { %v7906_v31 = vpop.xlane.xlu1 %2149  ;;  %v7932_v20 = vpop.permute.xlu0 %2902 }
 0x4f7   : > { %2862 = vrot.lane.b32.xlu1 %v2798_v19, %s6036_s27  ;;  %v10893_v19 = vcvt.s32.f32 %v7825_v47  ;;  %11335 = vst [vmem:[#allocation117_spill] sm:$0xff] %v7906_v31  ;;  %11341 = vst [vmem:[#allocation123_spill] sm:$0xff] %v7932_v20 }
 0x4f9   : > { %v2610_v22 = vadd.f32 0.5, %v10893_v19 }
 0x4fa   : > { %v7930_v57 = vpop.xlane.xlu1 %2197 }
 0x4fb   : > { %2866 = vrot.lane.b32.xlu1 %v2800_v17, %s6036_s27  ;;  %v2803_v17 = vmul.f32 %v7305_v36, %v10894_v2  ;;  %v7871_v19 = vmul.f32 0.0625, %v2610_v22  ;;  %v2612_v2 = vadd.f32 0.5, %v10898_v59  ;;  %v2807_v22 = vmul.f32 %v7305_v36, %v10901_v1  ;;  %11340 = vst [vmem:[#allocation122_spill] sm:$0xff] %v7930_v57 }
 0x4fc   : > { %v2614_v59 = vadd.f32 0.5, %v10902_v62  ;;  %v7904_v1 = vadd.s32 168, %v11251_v56  ;;  %v2616_v62 = vadd.f32 0.5, %v10905_v35  ;;  %v2618_v35 = vadd.f32 0.5, %v10910_v48 }
 0x4fd   : > { %v7945_v48 = vadd.s32 200, %v11251_v56  ;;  %v7977_v57 = vadd.s32 232, %v11251_v56 }
 0x4fe   : > { %11334 = vst [vmem:[#allocation116_spill] sm:$0xff] %v7904_v1  ;;  %v7926_v31 = vmul.f32 0.0625, %v2616_v62  ;;  %v7942_v14 = vmul.f32 0.0625, %v2618_v35  ;;  %v7951_v20 = vpop.xlane.xlu1 %1904 }
 0x4ff   : > { %2868 = vrot.lane.b32.xlu1 %v2801_v46, %s6036_s27  ;;  %v2805_v46 = vmul.f32 %v7305_v36, %v10897_v26  ;;  %v7892_v26 = vmul.f32 0.0625, %v2612_v2  ;;  %11343 = vst [vmem:[#allocation125_spill] sm:$0xff] %v7945_v48  ;;  %v10922_v35 = vcvt.s32.f32 %v7945_v48  ;;  %11349 = vst [vmem:[#allocation131_spill] sm:$0xff] %v7977_v57  ;;  %v10932_v48 = vcvt.s32.f32 %v7977_v57 }
 0x500   : > { %11339 = vst [vmem:[#allocation121_spill] sm:$0xff] %v7926_v31  ;;  %v10918_v62 = vfloor.f32 %v7926_v31  ;;  %11342 = vst [vmem:[#allocation124_spill] sm:$0xff] %v7942_v14 }
 0x501   : > { %v10908_v2 = vfloor.f32 %v7892_v26 }
 0x503   : > { %2872 = vrot.lane.b32.xlu1 %v2803_v17, %s6036_s27  ;;  %v10904_v17 = vfloor.f32 %v7871_v19 }
 0x505   : > { %v2809_v55 = vmul.f32 %v7305_v36, %v10904_v17  ;;  %v10912_v17 = vcvt.s32.f32 %v7904_v1  ;;  %v7960_v1 = vadd.s32 216, %v11251_v56 }
 0x507   : > { %2876 = vrot.lane.b32.xlu1 %v2805_v46, %s6036_s27  ;;  %v7910_v46 = vmul.f32 0.0625, %v2614_v59  ;;  %v2620_v43 = vadd.f32 0.5, %v10912_v17  ;;  %11345 = vst [vmem:[#allocation127_spill] sm:$0xff] %v7960_v1  ;;  %v10926_v31 = vcvt.s32.f32 %v7960_v1 }
 0x509   : > { %11336 = vst [vmem:[#allocation118_spill] sm:$0xff] %v7910_v46  ;;  %v10913_v59 = vfloor.f32 %v7910_v46  ;;  %v7947_v61 = vmul.f32 0.0625, %v2620_v43  ;;  %v7962_v43 = vpop.permute.xlu0 %2906 }
 0x50a   : > { %11346 = vst [vmem:[#allocation128_spill] sm:$0xff] %v7962_v43 }
 0x50b   : > { %2880 = vrot.lane.b32.xlu1 %v2807_v22, %s6036_s27  ;;  %v2811_v22 = vmul.f32 %v7305_v36, %v10908_v2  ;;  %v2813_v2 = vmul.f32 %v7305_v36, %v10913_v59  ;;  %11344 = vst [vmem:[#allocation126_spill] sm:$0xff] %v7947_v61  ;;  %v10921_v59 = vfloor.f32 %v7942_v14  ;;  %v7994_v14 = vadd.s32 248, %v11251_v56 }
 0x50d   : > { %v7979_v43 = vpop.permute.xlu0 %2910  ;;  %11353 = vst [vmem:[#allocation135_spill] sm:$0xff] %v7994_v14  ;;  %v10937_v1 = vcvt.s32.f32 %v7994_v14  ;;  %v11362_v14 = vcvt.s32.f32 %v7264_v11 }
 0x50e   : > { %11350 = vst [vmem:[#allocation132_spill] sm:$0xff] %v7979_v43 }
 0x50f   : > { %2884 = vrot.lane.b32.xlu1 %v2809_v55, %s6036_s27  ;;  %v10916_v55 = vcvt.s32.f32 %v7919_v28  ;;  %v10925_v28 = vfloor.f32 %v7947_v61 }
 0x511   : > { %v2622_v17 = vadd.f32 0.5, %v10916_v55  ;;  %v8008_v61 = vpop.permute.xlu0 %2914 }
 0x512   : > { %11356 = vst [vmem:[#allocation138_spill] sm:$0xff] %v8008_v61 }
 0x513   : > { %2888 = vrot.lane.b32.xlu1 %v2811_v22, %s6036_s27  ;;  %v2815_v22 = vmul.f32 %v7305_v36, %v10918_v62  ;;  %v7965_v55 = vmul.f32 0.0625, %v2622_v17  ;;  %v2624_v62 = vadd.f32 0.5, %v10922_v35  ;;  %v2819_v17 = vmul.f32 %v7305_v36, %v10925_v28 }
 0x514   : > { %v2626_v35 = vadd.f32 0.5, %v10926_v31  ;;  %v2628_v31 = vadd.f32 0.5, %v10932_v48  ;;  %v11358_v48 = vfloor.f32 %v7284_v25 }
 0x515   : > { %11347 = vst [vmem:[#allocation129_spill] sm:$0xff] %v7965_v55 }
 0x516   : > { %v2696_v57 = vmul.f32 16.0, %v11358_v48 }
 0x517   : > { %2892 = vrot.lane.b32.xlu1 %v2813_v2, %s6036_s27  ;;  %v2817_v2 = vmul.f32 %v7305_v36, %v10921_v59  ;;  %v7988_v59 = vmul.f32 0.0625, %v2624_v62  ;;  %v8003_v62 = vmul.f32 0.0625, %v2626_v35  ;;  %v2630_v35 = vadd.f32 0.5, %v10937_v1 }
 0x518   : > { %v2728_v1 = vsub.f32 %v11362_v14, %v2696_v57 }
 0x519   : > { %11352 = vst [vmem:[#allocation134_spill] sm:$0xff] %v7988_v59  ;;  %11355 = vst [vmem:[#allocation137_spill] sm:$0xff] %v8003_v62 }
 0x51b   : > { %v7967_v46 = vpop.xlane.xlu1 %1952  ;;  %2896 = vrot.lane.b32.xlu1 %v2815_v22, %s6036_s27  ;;  %v10930_v22 = vfloor.f32 %v7965_v55  ;;  %v8017_v55 = vmul.f32 0.0625, %v2628_v31  ;;  %v8032_v31 = vmul.f32 0.0625, %v2630_v35 }
 0x51c   : > { %11348 = vst [vmem:[#allocation130_spill] sm:$0xff] %v7967_v46 }
 0x51d   : > { %v2821_v28 = vmul.f32 %v7305_v36, %v10930_v22  ;;  %11357 = vst [vmem:[#allocation139_spill] sm:$0xff] %v8017_v55  ;;  %11361 = vst [vmem:[#allocation142_spill] sm:$0xff] %v8032_v31  ;;  %v10941_v25 = vfloor.f32 %v8032_v31 }
 0x51f   : > { %v7985_v46 = vpop.xlane.xlu1 %1898  ;;  %2900 = vrot.lane.b32.xlu1 %v2817_v2, %s6036_s27  ;;  %v10935_v2 = vfloor.f32 %v7988_v59  ;;  %v2829_v57 = vmul.f32 %v7305_v36, %v10941_v25 }
 0x520   : > { %11351 = vst [vmem:[#allocation133_spill] sm:$0xff] %v7985_v46 }
 0x521   : > { %v2823_v22 = vmul.f32 %v7305_v36, %v10935_v2  ;;  %v10940_v2 = vfloor.f32 %v8017_v55 }
 0x523   : > { %v7999_v43 = vpop.xlane.xlu1 %1946  ;;  %2904 = vrot.lane.b32.xlu1 %v2819_v17, %s6036_s27  ;;  %v10939_v17 = vfloor.f32 %v8003_v62  ;;  %v2827_v48 = vmul.f32 %v7305_v36, %v10940_v2 }
 0x524   : > { %11354 = vst [vmem:[#allocation136_spill] sm:$0xff] %v7999_v43  ;;  %v8023_v43 = vpop.permute.xlu0 %2918 }
 0x525   : > { %11359 = vst [vmem:[#allocation140_spill] sm:$0xff] %v8023_v43 }
 0x527   : > { %v8010_v46 = vpop.xlane.xlu1 %2167  ;;  %2908 = vrot.lane.b32.xlu1 %v2821_v28, %s6036_s27  ;;  %v2825_v28 = vmul.f32 %v7305_v36, %v10939_v17  ;;  %v2767_v17 = vmul.f32 %v7305_v36, %v2728_v1 }
 0x529   : > { %v2959_v11 = vadd.f32 %v7761_v8, %v2767_v17 }
 0x52b   : > { %v8025_v61 = vpop.xlane.xlu1 %2215  ;;  %2912 = vrot.lane.b32.xlu1 %v2823_v22, %s6036_s27  ;;  %v8043_v22 = vpop.permute.xlu0 %2922 }
 0x52c   : > { %11360 = vst [vmem:[#allocation141_spill] sm:$0xff] %v8025_v61  ;;  %11364 = vst [vmem:[#allocation144_spill] sm:$0xff] %v8043_v22 }
 0x52f   : > { %v8036_v59 = vpop.xlane.xlu1 %2161  ;;  %2916 = vrot.lane.b32.xlu1 %v2825_v28, %s6036_s27  ;;  %v8053_v14 = vpop.permute.xlu0 %2990 }
 0x530   : > { %11363 = vst [vmem:[#allocation143_spill] sm:$0xff] %v8036_v59  ;;  %v8059_v28 = vadd.f32 %v8053_v14, %v2959_v11 }
 0x532   : > { %11366 = vst [vmem:[#allocation146_spill] sm:$0xff] %v8059_v28 }
 0x533   : > { %v8046_v43 = vpop.xlane.xlu1 %2209  ;;  %2920 = vrot.lane.b32.xlu1 %v2827_v48, %s6036_s27  ;;  %v8066_v48 = vmul.f32 %v8059_v28, %v8059_v28  ;;  %v11378_v28 = vfloor.f32 %v7786_v15 }
 0x534   : > { %11365 = vst [vmem:[#allocation145_spill] sm:$0xff] %v8046_v43  ;;  %v11381_v43 = vfloor.f32 %v7799_v42  ;;  %v11387_v42 = vfloor.f32 %v7318_v29 }
 0x535   : > { %11367 = vst [vmem:[#allocation147_spill] sm:$0xff] %v8066_v48 }
 0x536   : > { %v2697_v59 = vmul.f32 16.0, %v11381_v43  ;;  %v2701_v43 = vmul.f32 16.0, %v11387_v42 }
 0x537   : > { %v8055_v35 = vpop.xlane.xlu1 %1916  ;;  %2924 = vrot.lane.b32.xlu1 %v2829_v57, %s6036_s27 }
 0x53b   : > { %v8061_v1 = vpop.xlane.xlu1 %1964  ;;  %3057 = vrot.lane.b32.xlu1 %v7305_v36, %s6038_s22 }
 0x53f   : > { %v8068_v2 = vpop.xlane.xlu1 %1910  ;;  %3606 = vrot.lane.b32.xlu1 %v8066_v48, %s6039_s23 }
 0x543   : > { %v8072_v8 = vpop.xlane.xlu1 %1958 }
 0x547   : > { %v8074_v17 = vpop.xlane.xlu1 %2179 }
 0x548   : > { %11368 = vst [vmem:[#allocation148_spill] sm:$0xff] %v8074_v17 }
 0x54b   : > { %v8076_v57 = vpop.xlane.xlu1 %2227 }
 0x54c   : > { %11369 = vst [vmem:[#allocation149_spill] sm:$0xff] %v8076_v57  ;;  %v2695_v57 = vmul.f32 16.0, %v11378_v28  ;;  %v11385_v28 = vcvt.s32.f32 %v7773_v16 }
 0x54f   : > { %v8078_v11 = vpop.xlane.xlu1 %2173 }
 0x550   : > { %11370 = vst [vmem:[#allocation150_spill] sm:$0xff] %v8078_v11  ;;  %v11380_v11 = vcvt.s32.f32 %v11251_v56  ;;  %v11386_v56 = vcvt.s32.f32 %v7269_v27  ;;  %v11391_v27 = vcvt.s32.f32 %v7277_v13  ;;  %v11396_v13 = vfloor.f32 %v7848_v0 }
 0x553   : > { %v8080_v36 = vpop.xlane.xlu1 %2221 }
 0x554   : > { %11371 = vst [vmem:[#allocation151_spill] sm:$0xff] %v8080_v36  ;;  %v2727_v36 = vsub.f32 %v11380_v11, %v2695_v57 }
 0x557   : > { %v8082_v25 = vpop.xlane.xlu1 %1928 }
 0x558   : > { %11372 = vst [vmem:[#allocation152_spill] sm:$0xff] %v8082_v25 }
 0x55b   : > { %v8084_v22 = vpop.xlane.xlu1 %1976 }
 0x55c   : > { %11373 = vst [vmem:[#allocation153_spill] sm:$0xff] %v8084_v22  ;;  %v11382_v22 = vfloor.f32 %v7300_v9  ;;  %v11388_v9 = vfloor.f32 %v7327_v63  ;;  %v11393_v63 = vcvt.s32.f32 %v7280_v6  ;;  %v11397_v6 = vfloor.f32 %v7345_v54 }
 0x55f   : > { %v8086_v55 = vpop.xlane.xlu1 %1922 }
 0x560   : > { %11374 = vst [vmem:[#allocation154_spill] sm:$0xff] %v8086_v55  ;;  %v2699_v55 = vmul.f32 16.0, %v11382_v22  ;;  %v2703_v22 = vmul.f32 16.0, %v11388_v9 }
 0x562   : > { %v2731_v57 = vsub.f32 %v11386_v56, %v2699_v55  ;;  %v2733_v55 = vsub.f32 %v11391_v27, %v2701_v43  ;;  %v2705_v43 = vmul.f32 16.0, %v11397_v6  ;;  %v11403_v27 = vcvt.s32.f32 %v7297_v50 }
 0x563   : > { %v8088_v31 = vpop.xlane.xlu1 %1970 }
 0x564   : > { %11375 = vst [vmem:[#allocation155_spill] sm:$0xff] %v8088_v31 }
 0x567   : > { %v8090_v48 = vpop.xlane.xlu1 %2191 }
 0x568   : > { %11376 = vst [vmem:[#allocation156_spill] sm:$0xff] %v8090_v48  ;;  %v11384_v48 = vfloor.f32 %v7816_v60  ;;  %v11389_v60 = vcvt.s32.f32 %v7782_v21 }
 0x56a   : > { %v2698_v31 = vmul.f32 16.0, %v11384_v48 }
 0x56b   : > { %v8092_v62 = vpop.xlane.xlu1 %2239 }
 0x56c   : > { %11377 = vst [vmem:[#allocation157_spill] sm:$0xff] %v8092_v62  ;;  %v8109_v62 = vld [vmem:[%s7293_s20] ss:$0 sm:$0xff]  ;;  %v2730_v48 = vsub.f32 %v11389_v60, %v2698_v31 }
 0x56d   : > { %v2766_v15 = vmul.f32 %v8109_v62, %v2727_v36  ;;  %v11390_v36 = vfloor.f32 %v7832_v34  ;;  %v11395_v34 = vcvt.s32.f32 %v7792_v3  ;;  %v2772_v42 = vmul.f32 %v8109_v62, %v2733_v55 }
 0x56e   : > { %v2769_v21 = vmul.f32 %v8109_v62, %v2730_v48  ;;  %v11399_v3 = vfloor.f32 %v7366_v53  ;;  %v2737_v53 = vsub.f32 %v11403_v27, %v2705_v43 }
 0x56f   : > { %v8096_v17 = vpop.xlane.xlu1 %2185  ;;  %v2700_v16 = vmul.f32 16.0, %v11390_v36  ;;  %v11402_v36 = vcvt.s32.f32 %v7805_v52 }
 0x570   : > { %11379 = vst [vmem:[#allocation158_spill] sm:$0xff] %v8096_v17  ;;  %v2729_v17 = vsub.f32 %v11385_v28, %v2697_v59  ;;  %v2770_v59 = vmul.f32 %v8109_v62, %v2731_v57  ;;  %v2735_v28 = vsub.f32 %v11393_v63, %v2703_v22  ;;  %v2702_v57 = vmul.f32 16.0, %v11396_v13 }
 0x571   : > { %v2707_v22 = vmul.f32 16.0, %v11399_v3 }
 0x572   : > { %v2768_v61 = vmul.f32 %v8109_v62, %v2729_v17 }
 0x573   : > { %v8104_v25 = vpop.xlane.xlu1 %2233 }
 0x574   : > { %11383 = vst [vmem:[#allocation159_spill] sm:$0xff] %v8104_v25 }
 0x577   : > { %v2863_v11 = vpop.permute.xlu1 %2862 }
 0x578   : > { %v2958_v25 = vadd.f32 %v2863_v11, %v2766_v15  ;;  %v2732_v15 = vsub.f32 %v11395_v34, %v2700_v16  ;;  %v11400_v11 = vfloor.f32 %v7853_v18  ;;  %v2734_v16 = vsub.f32 %v11402_v36, %v2702_v57 }
 0x579   : > { %v11405_v18 = vfloor.f32 %v7386_v30 }
 0x57a   : > { %v8129_v29 = vadd.f32 %v8053_v14, %v2958_v25  ;;  %v2962_v25 = vadd.f32 %v7769_v45, %v2770_v59  ;;  %v2704_v45 = vmul.f32 16.0, %v11400_v11  ;;  %v2771_v48 = vmul.f32 %v8109_v62, %v2732_v15 }
 0x57b   : > { %v2867_v56 = vpop.permute.xlu1 %2866  ;;  %v2964_v59 = vadd.f32 %v7784_v23, %v2772_v42  ;;  %v2709_v63 = vmul.f32 16.0, %v11405_v18  ;;  %v2773_v13 = vmul.f32 %v8109_v62, %v2734_v16  ;;  %v11413_v42 = vcvt.s32.f32 %v7338_v51 }
 0x57c   : > { %11392 = vst [vmem:[#allocation160_spill] sm:$0xff] %v8129_v29  ;;  %v2960_v31 = vadd.f32 %v2867_v56, %v2768_v61  ;;  %v8136_v17 = vmul.f32 %v8129_v29, %v8129_v29  ;;  %v2774_v61 = vmul.f32 %v8109_v62, %v2735_v28  ;;  %v8167_v55 = vadd.f32 %v8053_v14, %v2962_v25 }
 0x57d   : > { %v11407_v56 = vcvt.s32.f32 %v7321_v32  ;;  %v2776_v32 = vmul.f32 %v8109_v62, %v2737_v53  ;;  %v8194_v25 = vadd.f32 %v8053_v14, %v2964_v59  ;;  %v2741_v6 = vsub.f32 %v11413_v42, %v2709_v63 }
 0x57e   : > { %11394 = vst [vmem:[#allocation161_spill] sm:$0xff] %v8136_v17  ;;  %v8147_v9 = vadd.f32 %v8053_v14, %v2960_v31  ;;  %3604 = vrot.lane.b32.xlu0 %v8136_v17, %s6039_s23  ;;  %11404 = vst [vmem:[#allocation164_spill] sm:$0xff] %v8167_v55  ;;  %v2966_v52 = vadd.f32 %v7796_v49, %v2774_v61  ;;  %v8181_v50 = vmul.f32 %v8167_v55, %v8167_v55 }
 0x57f   : > { %v2869_v0 = vpop.permute.xlu1 %2868  ;;  %v2739_v23 = vsub.f32 %v11407_v56, %v2707_v22  ;;  %v11409_v31 = vcvt.s32.f32 %v7811_v41  ;;  %v11411_v49 = vfloor.f32 %v7871_v19  ;;  %11412 = vst [vmem:[#allocation168_spill] sm:$0xff] %v8194_v25  ;;  %v8211_v3 = vmul.f32 %v8194_v25, %v8194_v25 }
 0x580   : > { %11398 = vst [vmem:[#allocation162_spill] sm:$0xff] %v8147_v9  ;;  %v2961_v60 = vadd.f32 %v2869_v0, %v2769_v21  ;;  %v8158_v54 = vmul.f32 %v8147_v9, %v8147_v9  ;;  %11408 = vst [vmem:[#allocation166_spill] sm:$0xff] %v8181_v50  ;;  %v8207_v43 = vadd.f32 %v8053_v14, %v2966_v52  ;;  %v11418_v11 = vcvt.s32.f32 %v7825_v47 }
 0x581   : > { %v2736_v30 = vsub.f32 %v11409_v31, %v2704_v45  ;;  %v2706_v57 = vmul.f32 16.0, %v11411_v49  ;;  %v2778_v19 = vmul.f32 %v8109_v62, %v2739_v23  ;;  %11416 = vst [vmem:[#allocation171_spill] sm:$0xff] %v8211_v3  ;;  %v2968_v36 = vadd.f32 %v7821_v7, %v2776_v32 }
 0x582   : > { %11401 = vst [vmem:[#allocation163_spill] sm:$0xff] %v8158_v54  ;;  %v8172_v28 = vadd.f32 %v8053_v14, %v2961_v60  ;;  %3608 = vrot.lane.b32.xlu0 %v8158_v54, %s6039_s23  ;;  %11415 = vst [vmem:[#allocation170_spill] sm:$0xff] %v8207_v43  ;;  %v11419_v60 = vfloor.f32 %v7892_v26  ;;  %v2780_v26 = vmul.f32 %v8109_v62, %v2741_v6  ;;  %v11423_v63 = vcvt.s32.f32 %v7851_v58 }
 0x583   : > { %v2873_v21 = vpop.permute.xlu1 %2872  ;;  %v2775_v51 = vmul.f32 %v8109_v62, %v2736_v30  ;;  %v2738_v45 = vsub.f32 %v11418_v11, %v2706_v57  ;;  %v2970_v47 = vadd.f32 %v7838_v4, %v2778_v19  ;;  %v8236_v7 = vmul.f32 %v8207_v43, %v8207_v43  ;;  %v5751_v57 = vpop.eup %5750 }
 0x584   : > { %11406 = vst [vmem:[#allocation165_spill] sm:$0xff] %v8172_v28  ;;  %v2963_v34 = vadd.f32 %v2873_v21, %v2771_v48  ;;  %v8187_v15 = vmul.f32 %v8172_v28, %v8172_v28  ;;  %v2708_v48 = vmul.f32 16.0, %v11419_v60  ;;  %v8246_v56 = vadd.f32 %v8053_v14, %v2968_v36 }
 0x585   : > { %11421 = vst [vmem:[#allocation174_spill] sm:$0xff] %v8236_v7  ;;  %v2777_v18 = vmul.f32 %v8109_v62, %v2738_v45  ;;  %v2972_v23 = vadd.f32 %v7868_v39, %v2780_v26  ;;  %v8262_v31 = vadd.f32 %v8053_v14, %v2970_v47 }
 0x586   : > { %11410 = vst [vmem:[#allocation167_spill] sm:$0xff] %v8187_v15  ;;  %v8199_v41 = vadd.f32 %v8053_v14, %v2963_v34  ;;  %3610 = vrot.lane.b32.xlu1 %v8187_v15, %s6039_s23  ;;  %3612 = vrot.lane.b32.xlu0 %v8181_v50, %s6039_s23  ;;  %v2740_v52 = vsub.f32 %v11423_v63, %v2708_v48  ;;  %11424 = vst [vmem:[#allocation176_spill] sm:$0xff] %v8246_v56  ;;  %v11453_v15 = vld [vmem:[#allocation133_spill] sm:$0xff] }
 0x587   : > { %v2877_v61 = vpop.permute.xlu1 %2876  ;;  %v8259_v58 = vmul.f32 %v8246_v56, %v8246_v56  ;;  %11427 = vst [vmem:[#allocation179_spill] sm:$0xff] %v8262_v31  ;;  %v8279_v32 = vadd.f32 %v8053_v14, %v2972_v23  ;;  %v8287_v19 = vmul.f32 %v8262_v31, %v8262_v31  ;;  %v11461_v50 = vld [vmem:[#allocation37_spill] sm:$0xff]  ;;  %v11470_v56 = vld [vmem:[#allocation40_spill] sm:$0xff] }
 0x588   : > { %11414 = vst [vmem:[#allocation169_spill] sm:$0xff] %v8199_v41  ;;  %v2965_v22 = vadd.f32 %v2877_v61, %v2773_v13  ;;  %v8216_v0 = vmul.f32 %v8199_v41, %v8199_v41  ;;  %v2779_v13 = vmul.f32 %v8109_v62, %v2740_v52  ;;  %v5753_v61 = vpop.eup %5752  ;;  %v11436_v52 = vld [vmem:[#allocation109_spill] sm:$0xff] }
 0x589   : > { %11426 = vst [vmem:[#allocation178_spill] sm:$0xff] %v8259_v58  ;;  %11430 = vst [vmem:[#allocation182_spill] sm:$0xff] %v8279_v32  ;;  %v8305_v45 = vmul.f32 %v8279_v32, %v8279_v32  ;;  %v5755_v60 = vpop.eup %5754  ;;  %v2032_v48 = vmul.f32 %v5753_v61, %v7578_v33  ;;  %5768 = vrcp.f32 %v11436_v52 }
 0x58a   : > { %11417 = vst [vmem:[#allocation172_spill] sm:$0xff] %v8216_v0  ;;  %v8225_v16 = vadd.f32 %v8053_v14, %v2965_v22  ;;  %3614 = vrot.lane.b32.xlu1 %v8216_v0, %s6039_s23  ;;  %3616 = vrot.lane.b32.xlu0 %v8211_v3, %s6039_s23  ;;  %11432 = vst [vmem:[#allocation184_spill] sm:$0xff] %v8287_v19  ;;  %v2016_v22 = vmul.f32 %v5751_v57, %v7573_v5  ;;  %v5757_v5 = vpop.eup %5756 }
 0x58b   : > { %v2881_v59 = vpop.permute.xlu1 %2880  ;;  %11435 = vst [vmem:[#allocation187_spill] sm:$0xff] %v8305_v45  ;;  %v5759_v47 = vpop.eup %5758  ;;  %v2064_v26 = vsub.f32 2.0, %v2032_v48 }
 0x58c   : > { %11420 = vst [vmem:[#allocation173_spill] sm:$0xff] %v8225_v16  ;;  %v2967_v27 = vadd.f32 %v2881_v59, %v2775_v51  ;;  %v8240_v53 = vmul.f32 %v8225_v16, %v8225_v16  ;;  %v2048_v36 = vsub.f32 2.0, %v2016_v22  ;;  %v2014_v59 = vmul.f32 %v5755_v60, %v7582_v40  ;;  %v11438_v40 = vld [vmem:[#allocation72_spill] sm:$0xff] }
 0x58d   : > { %v2015_v63 = vmul.f32 %v5759_v47, %v7778_v24 }
 0x58e   : > { %11422 = vst [vmem:[#allocation175_spill] sm:$0xff] %v8240_v53  ;;  %v8249_v4 = vadd.f32 %v8053_v14, %v2967_v27  ;;  %3618 = vrot.lane.b32.xlu1 %v8240_v53, %s6039_s23  ;;  %3620 = vrot.lane.b32.xlu0 %v8236_v7, %s6039_s23  ;;  %v2030_v27 = vmul.f32 %v5757_v5, %v7586_v38 }
 0x58f   : > { %v2885_v21 = vpop.permute.xlu1 %2884  ;;  %v8316_v33 = vmul.f32 %v5751_v57, %v2048_v36  ;;  %v2047_v38 = vsub.f32 2.0, %v2015_v63  ;;  %v11440_v36 = vld [vmem:[#allocation73_spill] sm:$0xff] }
 0x590   : > { %11425 = vst [vmem:[#allocation177_spill] sm:$0xff] %v8249_v4  ;;  %v2969_v30 = vadd.f32 %v2885_v21, %v2777_v18  ;;  %v8266_v34 = vmul.f32 %v8249_v4, %v8249_v4  ;;  %v5761_v18 = vpop.eup %5760  ;;  %v2046_v21 = vsub.f32 2.0, %v2014_v59 }
 0x591   : > { %v5763_v23 = vpop.eup %5762  ;;  %v8326_v22 = vmul.f32 %v11438_v40, %v8316_v33  ;;  %v8341_v40 = vmul.f32 %v5759_v47, %v2047_v38  ;;  %v11449_v38 = vld [vmem:[#allocation82_spill] sm:$0xff] }
 0x592   : > { %11428 = vst [vmem:[#allocation180_spill] sm:$0xff] %v8266_v34  ;;  %v8272_v39 = vadd.f32 %v8053_v14, %v2969_v30  ;;  %3622 = vrot.lane.b32.xlu1 %v8266_v34, %s6039_s23  ;;  %3624 = vrot.lane.b32.xlu0 %v8259_v58, %s6039_s23  ;;  %v8320_v30 = vmul.f32 %v5753_v61, %v2064_v26  ;;  %v5765_v57 = vpop.eup %5764  ;;  %v11443_v34 = vld [vmem:[#allocation130_spill] sm:$0xff] }
 0x593   : > { %v2889_v49 = vpop.permute.xlu1 %2888  ;;  %11439 = vst [vmem:[#allocation109_spill] sm:$0xff] %v8326_v22  ;;  %v2031_v48 = vmul.f32 %v5763_v23, %v7794_v37  ;;  %v5767_v24 = vpop.eup %5766  ;;  %v8333_v61 = vmul.f32 %v5755_v60, %v2046_v21  ;;  %v2036_v63 = vmul.f32 %v5765_v57, %v7610_v10  ;;  %v11455_v58 = vld [vmem:[#allocation78_spill] sm:$0xff] }
 0x594   : > { %11429 = vst [vmem:[#allocation181_spill] sm:$0xff] %v8272_v39  ;;  %v2971_v42 = vadd.f32 %v2889_v49, %v2779_v13  ;;  %v8283_v6 = vmul.f32 %v8272_v39, %v8272_v39  ;;  %v11437_v13 = vld [vmem:[#allocation76_spill] sm:$0xff]  ;;  %v2062_v49 = vsub.f32 2.0, %v2030_v27 }
 0x595   : > { %5770 = vrcp.f32 %v11437_v13  ;;  %v2063_v37 = vsub.f32 2.0, %v2031_v48  ;;  %v2068_v48 = vsub.f32 2.0, %v2036_v63 }
 0x596   : > { %11431 = vst [vmem:[#allocation183_spill] sm:$0xff] %v8283_v6  ;;  %v8291_v51 = vadd.f32 %v8053_v14, %v2971_v42  ;;  %3626 = vrot.lane.b32.xlu1 %v8283_v6, %s6039_s23  ;;  %3628 = vrot.lane.b32.xlu0 %v8287_v19, %s6039_s23  ;;  %v2020_v42 = vmul.f32 %v5761_v18, %v7608_v12  ;;  %5772 = vrcp.f32 %v7951_v20  ;;  %v11442_v12 = vld [vmem:[#allocation38_spill] sm:$0xff] }
 0x597   : > { %v8335_v26 = vmul.f32 %v5757_v5, %v2062_v49  ;;  %v2279_v27 = vsub.f32 %v11442_v12, %v8326_v22  ;;  %v2013_v6 = vmul.f32 %v5767_v24, %v7813_v44  ;;  %5774 = vrcp.f32 %v11443_v34  ;;  %v11444_v5 = vld [vmem:[#allocation74_spill] sm:$0xff]  ;;  %v11446_v49 = vld [vmem:[#allocation77_spill] sm:$0xff] }
 0x598   : > { %11433 = vst [vmem:[#allocation185_spill] sm:$0xff] %v8291_v51  ;;  %v8301_v11 = vmul.f32 %v8291_v51, %v8291_v51  ;;  %v2052_v59 = vsub.f32 2.0, %v2020_v42  ;;  %v8349_v21 = vmul.f32 %v11444_v5, %v8333_v61  ;;  %5776 = vrcp.f32 %v11446_v49  ;;  %v11447_v42 = vld [vmem:[#allocation75_spill] sm:$0xff]  ;;  %v11450_v22 = vld [vmem:[#allocation110_spill] sm:$0xff]  ;;  %v11468_v51 = vld [vmem:[#allocation84_spill] sm:$0xff] }
 0x599   : > { %v8354_v10 = vmul.f32 %v11447_v42, %v8335_v26  ;;  %5778 = vrcp.f32 %v11449_v38  ;;  %v8361_v53 = vmul.f32 %v11450_v22, %v8341_v40  ;;  %v2045_v5 = vsub.f32 2.0, %v2013_v6 }
 0x59a   : > { %11434 = vst [vmem:[#allocation186_spill] sm:$0xff] %v8301_v11  ;;  %3630 = vrot.lane.b32.xlu1 %v8301_v11, %s6039_s23  ;;  %3632 = vrot.lane.b32.xlu0 %v8305_v45, %s6039_s23  ;;  %v8331_v11 = vmul.f32 %v11440_v36, %v8320_v30  ;;  %v5769_v36 = vpop.eup %5768  ;;  %11445 = vst [vmem:[#allocation72_spill] sm:$0xff] %v8349_v21  ;;  %v8356_v47 = vmul.f32 %v5761_v18, %v2052_v59  ;;  %5780 = vrcp.f32 %v11453_v15  ;;  %v11454_v59 = vld [vmem:[#allocation36_spill] sm:$0xff] }
 0x59b   : > { %11448 = vst [vmem:[#allocation73_spill] sm:$0xff] %v8354_v10  ;;  %11451 = vst [vmem:[#allocation38_spill] sm:$0xff] %v8361_v53  ;;  %v2029_v0 = vmul.f32 %v5769_v36, %v11436_v52  ;;  %v8365_v19 = vmul.f32 %v5763_v23, %v2063_v37  ;;  %v2277_v18 = vsub.f32 %v11442_v12, %v8349_v21  ;;  %v11457_v21 = vld [vmem:[#allocation113_spill] sm:$0xff] }
 0x59c   : > { %11441 = vst [vmem:[#allocation76_spill] sm:$0xff] %v8331_v11  ;;  %v2295_v60 = vsub.f32 %v11442_v12, %v8331_v11  ;;  %v11452_v11 = vld [vmem:[#allocation35_spill] sm:$0xff]  ;;  %v2293_v63 = vsub.f32 %v11442_v12, %v8354_v10  ;;  %v8378_v6 = vmul.f32 %v5765_v57, %v2068_v48  ;;  %v2278_v52 = vsub.f32 %v11442_v12, %v8361_v53  ;;  %v11459_v10 = vld [vmem:[#allocation136_spill] sm:$0xff] }
 0x59d   : > { %v2311_v45 = vmul.f32 %v11452_v11, %v2279_v27  ;;  %v8376_v11 = vmul.f32 %v11455_v58, %v8356_v47  ;;  %v2061_v7 = vsub.f32 2.0, %v2029_v0  ;;  %v8386_v3 = vmul.f32 %v5767_v24, %v2045_v5  ;;  %v11462_v0 = vld [vmem:[#allocation39_spill] sm:$0xff] }
 0x59e   : > { %v2327_v42 = vmul.f32 %v11454_v59, %v2295_v60  ;;  %v8384_v59 = vmul.f32 %v11457_v21, %v8365_v19  ;;  %5782 = vrcp.f32 %v11459_v10  ;;  %v2309_v57 = vmul.f32 %v11461_v50, %v2277_v18  ;;  %v11463_v24 = vld [vmem:[#allocation79_spill] sm:$0xff] }
 0x59f   : > { %v5771_v44 = vpop.eup %5770  ;;  %11456 = vst [vmem:[#allocation130_spill] sm:$0xff] %v8376_v11  ;;  %v2343_v23 = vmul.f32 %v2311_v45, %v2279_v27  ;;  %v2283_v45 = vsub.f32 %v11442_v12, %v8376_v11  ;;  %v2325_v27 = vmul.f32 %v11462_v0, %v2293_v63  ;;  %v8397_v5 = vmul.f32 %v11463_v24, %v8378_v6  ;;  %v11467_v0 = vld [vmem:[#allocation67_spill] sm:$0xff] }
 0x5a0   : > { %v2018_v22 = vmul.f32 %v5771_v44, %v11437_v13  ;;  %v5773_v37 = vpop.eup %5772  ;;  %11458 = vst [vmem:[#allocation74_spill] sm:$0xff] %v8384_v59  ;;  %v11460_v13 = vld [vmem:[#allocation83_spill] sm:$0xff]  ;;  %v2359_v58 = vmul.f32 %v2327_v42, %v2295_v60  ;;  %v2294_v50 = vsub.f32 %v11442_v12, %v8384_v59  ;;  %v8407_v17 = vmul.f32 %v5769_v36, %v2061_v7 }
 0x5a1   : > { %5784 = vrcp.f32 %v11460_v13  ;;  %v5775_v48 = vpop.eup %5774  ;;  %11464 = vst [vmem:[#allocation77_spill] sm:$0xff] %v8397_v5  ;;  %v2019_v53 = vmul.f32 %v5773_v37, %v7951_v20  ;;  %v2381_v60 = vsel %vm1154_vm0, %v2343_v23, 0.0  ;;  %v2310_v31 = vmul.f32 %v11467_v0, %v2278_v52 }
 0x5a2   : > { %v2050_v54 = vsub.f32 2.0, %v2018_v22  ;;  %5786 = vrcp.f32 %v8055_v35  ;;  %v5777_v21 = vpop.eup %5776  ;;  %v11465_v22 = vld [vmem:[#allocation117_spill] sm:$0xff]  ;;  %v2035_v24 = vmul.f32 %v5775_v48, %v11443_v34  ;;  %v2429_v20 = vsel %vm1154_vm0, %v2359_v58, 0.0 }
 0x5a3   : > { %v5779_v42 = vpop.eup %5778  ;;  %v8405_v11 = vmul.f32 %v11465_v22, %v8386_v3  ;;  %5788 = vrcp.f32 %v11468_v51  ;;  %v2341_v32 = vmul.f32 %v2309_v57, %v2277_v18  ;;  %v2034_v43 = vmul.f32 %v5777_v21, %v11446_v49  ;;  %v11471_v18 = vld [vmem:[#allocation122_spill] sm:$0xff]  ;;  %v11473_v49 = vld [vmem:[#allocation68_spill] sm:$0xff] }
 0x5a4   : > { %v5781_v23 = vpop.eup %5780  ;;  %v8414_v4 = vmul.f32 %v5771_v44, %v2050_v54  ;;  %v2357_v59 = vmul.f32 %v2325_v27, %v2293_v63  ;;  %v2315_v22 = vmul.f32 %v11470_v56, %v2283_v45  ;;  %v2299_v7 = vsub.f32 %v11442_v12, %v8397_v5  ;;  %v11474_v63 = vld [vmem:[#allocation87_spill] sm:$0xff]  ;;  %v11475_v5 = vld [vmem:[#allocation80_spill] sm:$0xff] }
 0x5a5   : > { %11466 = vst [vmem:[#allocation75_spill] sm:$0xff] %v8405_v11  ;;  %v2024_v36 = vmul.f32 %v5779_v42, %v11449_v38  ;;  %v2051_v0 = vsub.f32 2.0, %v2019_v53  ;;  %5790 = vrcp.f32 %v8061_v1  ;;  %v2276_v34 = vsub.f32 %v11442_v12, %v8405_v11 }
 0x5a6   : > { %11469 = vst [vmem:[#allocation82_spill] sm:$0xff] %v8414_v4  ;;  %v8425_v58 = vmul.f32 %v11471_v18, %v8407_v17  ;;  %v2342_v54 = vmul.f32 %v2310_v31, %v2278_v52  ;;  %v2326_v44 = vmul.f32 %v11473_v49, %v2294_v50  ;;  %5792 = vrcp.f32 %v11474_v63 }
 0x5a7   : > { %v2067_v56 = vsub.f32 2.0, %v2035_v24  ;;  %v2017_v57 = vmul.f32 %v5781_v23, %v11453_v15  ;;  %v2375_v53 = vsel %vm1154_vm0, %v2341_v32, 0.0  ;;  %v2066_v27 = vsub.f32 2.0, %v2034_v43  ;;  %v11477_v24 = vld [vmem:[#allocation41_spill] sm:$0xff] }
 0x5a8   : > { %11472 = vst [vmem:[#allocation110_spill] sm:$0xff] %v8425_v58  ;;  %v5783_v38 = vpop.eup %5782  ;;  %v8433_v11 = vmul.f32 %v11475_v5, %v8414_v4  ;;  %v2423_v18 = vsel %vm1154_vm0, %v2357_v59, 0.0  ;;  %v2347_v39 = vmul.f32 %v2315_v22, %v2283_v45  ;;  %v2056_v52 = vsub.f32 2.0, %v2024_v36  ;;  %v11478_v5 = vld [vmem:[#allocation69_spill] sm:$0xff] }
 0x5a9   : > { %v8436_v49 = vmul.f32 %v5773_v37, %v2051_v0  ;;  %5794 = vrcp.f32 %v8068_v2  ;;  %v2331_v15 = vmul.f32 %v11477_v24, %v2299_v7  ;;  %v2292_v32 = vsub.f32 %v11442_v12, %v8425_v58 }
 0x5aa   : > { %11476 = vst [vmem:[#allocation35_spill] sm:$0xff] %v8433_v11  ;;  %v2378_v43 = vsel %vm1154_vm0, %v2342_v54, 0.0  ;;  %v2358_v55 = vmul.f32 %v2326_v44, %v2294_v50  ;;  %v2308_v41 = vmul.f32 %v11478_v5, %v2276_v34  ;;  %v2049_v4 = vsub.f32 2.0, %v2017_v57  ;;  %v11480_v50 = vld [vmem:[#allocation95_spill] sm:$0xff] }
 0x5ab   : > { %v5785_v31 = vpop.eup %5784  ;;  %v2033_v59 = vmul.f32 %v5783_v38, %v11459_v10  ;;  %v8447_v37 = vmul.f32 %v8010_v46, %v8436_v49  ;;  %v8449_v45 = vmul.f32 %v5775_v48, %v2067_v56  ;;  %v2281_v22 = vsub.f32 %v11442_v12, %v8433_v11  ;;  %v11492_v11 = vld [vmem:[#allocation143_spill] sm:$0xff] }
 0x5ac   : > { %v8453_v36 = vmul.f32 %v5777_v21, %v2066_v27  ;;  %v2040_v0 = vmul.f32 %v5785_v31, %v11460_v13  ;;  %5796 = vrcp.f32 %v11480_v50  ;;  %v8457_v44 = vmul.f32 %v5779_v42, %v2056_v52  ;;  %v11482_v21 = vld [vmem:[#allocation70_spill] sm:$0xff]  ;;  %v11483_v42 = vld [vmem:[#allocation141_spill] sm:$0xff] }
 0x5ad   : > { %11479 = vst [vmem:[#allocation133_spill] sm:$0xff] %v8447_v37  ;;  %5798 = vrcp.f32 %v8072_v8  ;;  %v2363_v46 = vmul.f32 %v2331_v15, %v2299_v7  ;;  %v2426_v48 = vsel %vm1154_vm0, %v2358_v55, 0.0  ;;  %v2393_v56 = vsel %vm1154_vm0, %v2347_v39, 0.0  ;;  %v11485_v7 = vld [vmem:[#allocation81_spill] sm:$0xff] }
 0x5ae   : > { %11481 = vst [vmem:[#allocation36_spill] sm:$0xff] %v8457_v44  ;;  %v2324_v57 = vmul.f32 %v11482_v21, %v2292_v32  ;;  %v2065_v13 = vsub.f32 2.0, %v2033_v59  ;;  %v2282_v24 = vsub.f32 %v11442_v12, %v8447_v37  ;;  %v8468_v52 = vmul.f32 %v11483_v42, %v8449_v45  ;;  %v11491_v42 = vld [vmem:[#allocation152_spill] sm:$0xff] }
 0x5af   : > { %v8474_v55 = vmul.f32 %v11485_v7, %v8453_v36 }
 0x5b0   : > { %11484 = vst [vmem:[#allocation78_spill] sm:$0xff] %v8468_v52 }
 0x5b1   : > { %11486 = vst [vmem:[#allocation113_spill] sm:$0xff] %v8474_v55 }
 0x5b9   : > { %2382 = vadd.xlane.f32.xlu0 %v2381_v60  ;;  %v5787_v60 = vpop.eup %5786 }
 0x5ba   : > { %v5789_v54 = vpop.eup %5788  ;;  %v2023_v10 = vmul.f32 %v5787_v60, %v8055_v35  ;;  %v8470_v35 = vmul.f32 %v5781_v23, %v2049_v4  ;;  %v2441_v4 = vsel %vm1154_vm0, %v2363_v46, 0.0  ;;  %v11490_v23 = vld [vmem:[#allocation42_spill] sm:$0xff]  ;;  %v11495_v46 = vld [vmem:[#allocation71_spill] sm:$0xff] }
 0x5bb   : > { %v5791_v27 = vpop.eup %5790  ;;  %v2022_v39 = vmul.f32 %v5789_v54, %v11468_v51  ;;  %v2356_v51 = vmul.f32 %v2324_v57, %v2292_v32  ;;  %v2297_v32 = vsub.f32 %v11442_v12, %v8474_v55 }
 0x5bc   : > { %v5793_v15 = vpop.eup %5792  ;;  %v2055_v59 = vsub.f32 2.0, %v2023_v10  ;;  %v2039_v21 = vmul.f32 %v5791_v27, %v8061_v1  ;;  %v8493_v10 = vmul.f32 %v5783_v38, %v2065_v13 }
 0x5bd   : > { %2430 = vadd.xlane.f32.xlu0 %v2429_v20  ;;  %v2340_v20 = vmul.f32 %v2308_v41, %v2276_v34  ;;  %v2072_v41 = vsub.f32 2.0, %v2040_v0  ;;  %v11487_v34 = vld [vmem:[#allocation98_spill] sm:$0xff]  ;;  %v5795_v7 = vpop.eup %5794  ;;  %v2054_v58 = vsub.f32 2.0, %v2022_v39  ;;  %v2038_v1 = vmul.f32 %v5793_v15, %v11474_v63 }
 0x5be   : > { %2379 = vadd.xlane.f32.xlu1 %v2378_v43  ;;  %5800 = vrcp.f32 %v11487_v34  ;;  %v11488_v43 = vld [vmem:[#allocation89_spill] sm:$0xff]  ;;  %11494 = vst [vmem:[#allocation37_spill] sm:$0xff] %v8493_v10  ;;  %v8504_v57 = vmul.f32 %v5787_v60, %v2055_v59  ;;  %v2071_v13 = vsub.f32 2.0, %v2039_v21  ;;  %v2021_v39 = vmul.f32 %v5795_v7, %v8068_v2  ;;  %v11503_v21 = vld [vmem:[#allocation90_spill] sm:$0xff] }
 0x5bf   : > { %v8480_v5 = vmul.f32 %v11488_v43, %v8457_v44  ;;  %5802 = vrcp.f32 %v11491_v42  ;;  %v2372_v0 = vsel %vm1154_vm0, %v2340_v20, 0.0  ;;  %v8491_v43 = vmul.f32 %v11492_v11, %v8470_v35  ;;  %v11497_v20 = vld [vmem:[#allocation99_spill] sm:$0xff]  ;;  %v11502_v59 = vld [vmem:[#allocation85_spill] sm:$0xff] }
 0x5c0   : > { %v8497_v37 = vmul.f32 %v5785_v31, %v2072_v41  ;;  %5804 = vrcp.f32 %v11497_v20  ;;  %11498 = vst [vmem:[#allocation79_spill] sm:$0xff] %v8504_v57  ;;  %v2420_v63 = vsel %vm1154_vm0, %v2356_v51, 0.0  ;;  %v11506_v51 = vld [vmem:[#allocation100_spill] sm:$0xff] }
 0x5c1   : > { %2376 = vadd.xlane.f32.xlu0 %v2375_v53  ;;  %11489 = vst [vmem:[#allocation136_spill] sm:$0xff] %v8480_v5  ;;  %v2313_v53 = vmul.f32 %v11490_v23, %v2281_v22  ;;  %11493 = vst [vmem:[#allocation83_spill] sm:$0xff] %v8491_v43  ;;  %v2314_v23 = vmul.f32 %v11495_v46, %v2282_v24  ;;  %v2287_v11 = vsub.f32 %v11442_v12, %v8480_v5  ;;  %v11499_v46 = vld [vmem:[#allocation153_spill] sm:$0xff] }
 0x5c2   : > { %2427 = vadd.xlane.f32.xlu1 %v2426_v48  ;;  %v2298_v48 = vsub.f32 %v11442_v12, %v8468_v52  ;;  %11496 = vst [vmem:[#allocation39_spill] sm:$0xff] %v8497_v37  ;;  %5806 = vrcp.f32 %v11499_v46  ;;  %v2280_v41 = vsub.f32 %v11442_v12, %v8491_v43  ;;  %v8518_v2 = vmul.f32 %v11503_v21, %v8497_v37  ;;  %v11507_v43 = vld [vmem:[#allocation148_spill] sm:$0xff] }
 0x5c3   : > { %v2345_v38 = vmul.f32 %v2313_v53, %v2281_v22  ;;  %v2346_v60 = vmul.f32 %v2314_v23, %v2282_v24  ;;  %v2070_v53 = vsub.f32 2.0, %v2038_v1  ;;  %v8520_v5 = vmul.f32 %v5789_v54, %v2054_v58  ;;  %v11509_v24 = vld [vmem:[#allocation43_spill] sm:$0xff]  ;;  %v11510_v58 = vld [vmem:[#allocation154_spill] sm:$0xff] }
 0x5c4   : > { %v2330_v22 = vmul.f32 %v11502_v59, %v2298_v48  ;;  %11504 = vst [vmem:[#allocation67_spill] sm:$0xff] %v8518_v2  ;;  %5808 = vrcp.f32 %v11506_v51  ;;  %v2329_v23 = vmul.f32 %v11509_v24, %v2297_v32  ;;  %v2053_v59 = vsub.f32 2.0, %v2021_v39  ;;  %v11512_v39 = vld [vmem:[#allocation91_spill] sm:$0xff] }
 0x5c5   : > { %2424 = vadd.xlane.f32.xlu0 %v2423_v18  ;;  %v5797_v18 = vpop.eup %5796  ;;  %11505 = vst [vmem:[#allocation84_spill] sm:$0xff] %v8520_v5  ;;  %v8531_v37 = vmul.f32 %v5791_v27, %v2071_v13  ;;  %5810 = vrcp.f32 %v11510_v58  ;;  %v2303_v24 = vsub.f32 %v11442_v12, %v8518_v2  ;;  %v8544_v27 = vmul.f32 %v5793_v15, %v2070_v53  ;;  %v11514_v13 = vld [vmem:[#allocation44_spill] sm:$0xff]  ;;  %v11515_v2 = vld [vmem:[#allocation149_spill] sm:$0xff]  ;;  %v11517_v15 = vld [vmem:[#allocation155_spill] sm:$0xff] }
 0x5c6   : > { %2373 = vadd.xlane.f32.xlu1 %v2372_v0  ;;  %v5799_v31 = vpop.eup %5798  ;;  %v11500_v0 = vld [vmem:[#allocation145_spill] sm:$0xff]  ;;  %v2028_v52 = vmul.f32 %v5797_v18, %v11480_v50  ;;  %v2390_v50 = vsel %vm1154_vm0, %v2346_v60, 0.0  ;;  %v2319_v44 = vmul.f32 %v11514_v13, %v2287_v11  ;;  %v2361_v60 = vmul.f32 %v2329_v23, %v2297_v32 }
 0x5c7   : > { %v8513_v55 = vmul.f32 %v11500_v0, %v8493_v10  ;;  %v8526_v0 = vmul.f32 %v11507_v43, %v8504_v57  ;;  %v2037_v21 = vmul.f32 %v5799_v31, %v8072_v8  ;;  %v2362_v43 = vmul.f32 %v2330_v22, %v2298_v48  ;;  %v11519_v23 = vld [vmem:[#allocation93_spill] sm:$0xff] }
 0x5c8   : > { %v5801_v1 = vpop.eup %5800  ;;  %v8542_v8 = vmul.f32 %v11512_v39, %v8520_v5  ;;  %v8552_v10 = vmul.f32 %v11515_v2, %v8531_v37  ;;  %v8554_v39 = vmul.f32 %v5795_v7, %v2053_v59  ;;  %5812 = vrcp.f32 %v11517_v15  ;;  %v11521_v59 = vld [vmem:[#allocation45_spill] sm:$0xff] }
 0x5c9   : > { %11501 = vst [vmem:[#allocation117_spill] sm:$0xff] %v8513_v55  ;;  %2394 = vadd.xlane.f32.xlu0 %v2393_v56  ;;  %11508 = vst [vmem:[#allocation40_spill] sm:$0xff] %v8526_v0  ;;  %v2387_v56 = vsel %vm1154_vm0, %v2345_v38, 0.0  ;;  %v2296_v54 = vsub.f32 %v11442_v12, %v8513_v55  ;;  %v5803_v38 = vpop.eup %5802  ;;  %v2060_v55 = vsub.f32 2.0, %v2028_v52  ;;  %v2286_v48 = vsub.f32 %v11442_v12, %v8526_v0 }
 0x5ca   : > { %2421 = vadd.xlane.f32.xlu1 %v2420_v63  ;;  %v11511_v63 = vld [vmem:[#allocation86_spill] sm:$0xff]  ;;  %11513 = vst [vmem:[#allocation122_spill] sm:$0xff] %v8542_v8  ;;  %v5805_v22 = vpop.eup %5804  ;;  %11516 = vst [vmem:[#allocation68_spill] sm:$0xff] %v8552_v10  ;;  %v2027_v53 = vmul.f32 %v5803_v38, %v11491_v42  ;;  %v2438_v52 = vsel %vm1154_vm0, %v2362_v43, 0.0  ;;  %v2285_v32 = vsub.f32 %v11442_v12, %v8542_v8 }
 0x5cb   : > { %v2312_v57 = vmul.f32 %v11511_v63, %v2280_v41  ;;  %v2069_v63 = vsub.f32 2.0, %v2037_v21  ;;  %v8564_v2 = vmul.f32 %v11519_v23, %v8544_v27  ;;  %v2351_v7 = vmul.f32 %v2319_v44, %v2287_v11  ;;  %v11524_v44 = vld [vmem:[#allocation92_spill] sm:$0xff] }
 0x5cc   : > { %v5807_v0 = vpop.eup %5806  ;;  %v2335_v21 = vmul.f32 %v11521_v59, %v2303_v24  ;;  %v2026_v42 = vmul.f32 %v5805_v22, %v11497_v20  ;;  %v2302_v43 = vsub.f32 %v11442_v12, %v8552_v10  ;;  %v2318_v11 = vmul.f32 %v11524_v44, %v2286_v48  ;;  %v11525_v10 = vld [vmem:[#allocation46_spill] sm:$0xff] }
 0x5cd   : > { %2442 = vadd.xlane.f32.xlu0 %v2441_v4  ;;  %v2044_v4 = vmul.f32 %v5801_v1, %v11487_v34  ;;  %v2344_v34 = vmul.f32 %v2312_v57, %v2280_v41  ;;  %11520 = vst [vmem:[#allocation87_spill] sm:$0xff] %v8564_v2  ;;  %v2435_v57 = vsel %vm1154_vm0, %v2361_v60, 0.0  ;;  %v8577_v23 = vmul.f32 %v5799_v31, %v2069_v63 }
 0x5ce   : > { %2391 = vadd.xlane.f32.xlu1 %v2390_v50  ;;  %v11518_v50 = vld [vmem:[#allocation88_spill] sm:$0xff]  ;;  %v5809_v41 = vpop.eup %5808  ;;  %v2301_v60 = vsub.f32 %v11442_v12, %v8564_v2  ;;  %v2405_v59 = vsel %vm1154_vm0, %v2351_v7, 0.0  ;;  %v2317_v31 = vmul.f32 %v11525_v10, %v2285_v32  ;;  %v2058_v63 = vsub.f32 2.0, %v2026_v42  ;;  %v11531_v2 = vld [vmem:[#allocation47_spill] sm:$0xff] }
 0x5cf   : > { %v2328_v13 = vmul.f32 %v11518_v50, %v2296_v54  ;;  %v2076_v5 = vsub.f32 2.0, %v2044_v4  ;;  %v11522_v50 = vld [vmem:[#allocation150_spill] sm:$0xff]  ;;  %v2043_v4 = vmul.f32 %v5807_v0, %v11499_v46  ;;  %v2042_v44 = vmul.f32 %v5809_v41, %v11506_v51 }
 0x5d0   : > { %v8575_v8 = vmul.f32 %v11522_v50, %v8554_v39  ;;  %v2367_v50 = vmul.f32 %v2335_v21, %v2303_v24  ;;  %v2350_v7 = vmul.f32 %v2318_v11, %v2286_v48  ;;  %v11530_v24 = vld [vmem:[#allocation94_spill] sm:$0xff]  ;;  %v11532_v11 = vld [vmem:[#allocation104_spill] sm:$0xff] }
 0x5d1   : > { %2388 = vadd.xlane.f32.xlu0 %v2387_v56  ;;  %v8568_v56 = vmul.f32 %v5797_v18, %v2060_v55  ;;  %v2384_v55 = vsel %vm1154_vm0, %v2344_v34, 0.0  ;;  %v2360_v20 = vmul.f32 %v2328_v13, %v2296_v54  ;;  %v5811_v18 = vpop.eup %5810  ;;  %v11528_v34 = vld [vmem:[#allocation151_spill] sm:$0xff]  ;;  %v2334_v21 = vmul.f32 %v11530_v24, %v2302_v43 }
 0x5d2   : > { %2439 = vadd.xlane.f32.xlu1 %v2438_v52  ;;  %11523 = vst [vmem:[#allocation80_spill] sm:$0xff] %v8575_v8  ;;  %v2059_v52 = vsub.f32 2.0, %v2027_v53  ;;  %v11526_v53 = vld [vmem:[#allocation101_spill] sm:$0xff]  ;;  %v2284_v54 = vsub.f32 %v11442_v12, %v8575_v8  ;;  %v8597_v13 = vmul.f32 %v11528_v34, %v8577_v23  ;;  %v2075_v10 = vsub.f32 2.0, %v2043_v4 }
 0x5d3   : > { %v8589_v46 = vmul.f32 %v11526_v53, %v8568_v56  ;;  %v2025_v42 = vmul.f32 %v5811_v18, %v11510_v58  ;;  %v2349_v53 = vmul.f32 %v2317_v31, %v2285_v32  ;;  %v2333_v8 = vmul.f32 %v11531_v2, %v2301_v60  ;;  %v11535_v31 = vld [vmem:[#allocation156_spill] sm:$0xff] }
 0x5d4   : > { %11529 = vst [vmem:[#allocation69_spill] sm:$0xff] %v8597_v13  ;;  %v8601_v51 = vmul.f32 %v5803_v38, %v2059_v52  ;;  %v2074_v34 = vsub.f32 2.0, %v2042_v44  ;;  %v8612_v58 = vmul.f32 %v5805_v22, %v2058_v63  ;;  %v2300_v38 = vsub.f32 %v11442_v12, %v8597_v13 }
 0x5d5   : > { %2436 = vadd.xlane.f32.xlu0 %v2435_v57  ;;  %11527 = vst [vmem:[#allocation41_spill] sm:$0xff] %v8589_v46  ;;  %v8591_v57 = vmul.f32 %v5801_v1, %v2076_v5  ;;  %v5813_v5 = vpop.eup %5812  ;;  %v2453_v1 = vsel %vm1154_vm0, %v2367_v50, 0.0  ;;  %v2291_v48 = vsub.f32 %v11442_v12, %v8589_v46  ;;  %v2402_v52 = vsel %vm1154_vm0, %v2350_v7, 0.0 }
 0x5d6   : > { %2385 = vadd.xlane.f32.xlu1 %v2384_v55  ;;  %v2432_v55 = vsel %vm1154_vm0, %v2360_v20, 0.0  ;;  %v2366_v20 = vmul.f32 %v2334_v21, %v2302_v43  ;;  %v2057_v50 = vsub.f32 2.0, %v2025_v42  ;;  %v2041_v2 = vmul.f32 %v5813_v5, %v11517_v15  ;;  %v11537_v43 = vld [vmem:[#allocation106_spill] sm:$0xff]  ;;  %v11539_v42 = vld [vmem:[#allocation48_spill] sm:$0xff] }
 0x5d7   : > { %v8610_v4 = vmul.f32 %v11532_v11, %v8591_v57  ;;  %v8621_v44 = vmul.f32 %v11535_v31, %v8601_v51  ;;  %v8623_v24 = vmul.f32 %v5807_v0, %v2075_v10  ;;  %v2399_v22 = vsel %vm1154_vm0, %v2349_v53, 0.0  ;;  %v11540_v10 = vld [vmem:[#allocation97_spill] sm:$0xff] }
 0x5d8   : > { %v8630_v7 = vmul.f32 %v11537_v43, %v8612_v58  ;;  %v2365_v21 = vmul.f32 %v2333_v8, %v2301_v60  ;;  %v2323_v15 = vmul.f32 %v11539_v42, %v2291_v48  ;;  %v2450_v11 = vsel %vm1154_vm0, %v2366_v20, 0.0  ;;  %v11543_v60 = vld [vmem:[#allocation49_spill] sm:$0xff]  ;;  %v11544_v20 = vld [vmem:[#allocation108_spill] sm:$0xff] }
 0x5d9   : > { %2406 = vadd.xlane.f32.xlu0 %v2405_v59  ;;  %11533 = vst [vmem:[#allocation95_spill] sm:$0xff] %v8610_v4  ;;  %v11534_v59 = vld [vmem:[#allocation96_spill] sm:$0xff]  ;;  %11536 = vst [vmem:[#allocation70_spill] sm:$0xff] %v8621_v44  ;;  %v2307_v63 = vsub.f32 %v11442_v12, %v8610_v4  ;;  %v2290_v53 = vsub.f32 %v11442_v12, %v8621_v44  ;;  %v8643_v43 = vmul.f32 %v5811_v18, %v2057_v50  ;;  %v11546_v50 = vld [vmem:[#allocation158_spill] sm:$0xff] }
 0x5da   : > { %2433 = vadd.xlane.f32.xlu1 %v2432_v55  ;;  %v2316_v32 = vmul.f32 %v11534_v59, %v2284_v54  ;;  %11538 = vst [vmem:[#allocation141_spill] sm:$0xff] %v8630_v7  ;;  %v8633_v55 = vmul.f32 %v5809_v41, %v2074_v34  ;;  %v11541_v59 = vld [vmem:[#allocation157_spill] sm:$0xff]  ;;  %v2447_v8 = vsel %vm1154_vm0, %v2365_v21, 0.0  ;;  %v2355_v41 = vmul.f32 %v2323_v15, %v2291_v48  ;;  %v11548_v21 = vld [vmem:[#allocation102_spill] sm:$0xff] }
 0x5db   : > { %v8641_v31 = vmul.f32 %v11541_v59, %v8623_v24  ;;  %v2339_v34 = vmul.f32 %v11543_v60, %v2307_v63  ;;  %v2322_v15 = vmul.f32 %v11548_v21, %v2290_v53 }
 0x5dc   : > { %v2348_v0 = vmul.f32 %v2316_v32, %v2284_v54  ;;  %v2289_v54 = vsub.f32 %v11442_v12, %v8630_v7  ;;  %v8651_v32 = vmul.f32 %v11544_v20, %v8633_v55 }
 0x5dd   : > { %2454 = vadd.xlane.f32.xlu0 %v2453_v1  ;;  %v2332_v1 = vmul.f32 %v11540_v10, %v2300_v38  ;;  %11542 = vst [vmem:[#allocation81_spill] sm:$0xff] %v8641_v31  ;;  %v2306_v18 = vsub.f32 %v11442_v12, %v8641_v31  ;;  %v2354_v20 = vmul.f32 %v2322_v15, %v2290_v53 }
 0x5de   : > { %2403 = vadd.xlane.f32.xlu1 %v2402_v52  ;;  %v2073_v52 = vsub.f32 2.0, %v2041_v2  ;;  %11545 = vst [vmem:[#allocation98_spill] sm:$0xff] %v8651_v32  ;;  %v2396_v2 = vsel %vm1154_vm0, %v2348_v0, 0.0  ;;  %v2305_v10 = vsub.f32 %v11442_v12, %v8651_v32  ;;  %v2371_v0 = vmul.f32 %v2339_v34, %v2307_v63 }
 0x5df   : > { %v2364_v42 = vmul.f32 %v2332_v1, %v2300_v38  ;;  %v11549_v1 = vld [vmem:[#allocation50_spill] sm:$0xff] }
 0x5e0   : > { %v8660_v48 = vmul.f32 %v5813_v5, %v2073_v52  ;;  %v2321_v59 = vmul.f32 %v11549_v1, %v2289_v54  ;;  %v11550_v5 = vld [vmem:[#allocation159_spill] sm:$0xff]  ;;  %v2414_v1 = vsel %vm1154_vm0, %v2354_v20, 0.0 }
 0x5e1   : > { %2400 = vadd.xlane.f32.xlu0 %v2399_v22  ;;  %v8658_v22 = vmul.f32 %v11546_v50, %v8643_v43  ;;  %v2444_v38 = vsel %vm1154_vm0, %v2364_v42, 0.0  ;;  %v2465_v50 = vsel %vm1154_vm0, %v2371_v0, 0.0  ;;  %v11553_v42 = vld [vmem:[#allocation51_spill] sm:$0xff] }
 0x5e2   : > { %2451 = vadd.xlane.f32.xlu1 %v2450_v11  ;;  %v2417_v11 = vsel %vm1154_vm0, %v2355_v41, 0.0  ;;  %v8672_v52 = vmul.f32 %v11550_v5, %v8660_v48  ;;  %v2353_v21 = vmul.f32 %v2321_v59, %v2289_v54  ;;  %v2337_v63 = vmul.f32 %v11553_v42, %v2305_v10  ;;  %v11554_v5 = vld [vmem:[#allocation105_spill] sm:$0xff]  ;;  %v11555_v0 = vld [vmem:[#allocation107_spill] sm:$0xff] }
 0x5e3   : > { %11547 = vst [vmem:[#allocation89_spill] sm:$0xff] %v8658_v22  ;;  %v2288_v60 = vsub.f32 %v11442_v12, %v8658_v22 }
 0x5e4   : > { %11551 = vst [vmem:[#allocation42_spill] sm:$0xff] %v8672_v52  ;;  %v2304_v34 = vsub.f32 %v11442_v12, %v8672_v52  ;;  %v2411_v53 = vsel %vm1154_vm0, %v2353_v21, 0.0  ;;  %v2369_v15 = vmul.f32 %v2337_v63, %v2305_v10  ;;  %v11560_v63 = vld [vmem:[#allocation111_spill] sm:$0xff]  ;;  %v11578_v52 = vld [vmem:[#allocation126_spill] sm:$0xff] }
 0x5e5   : > { %2448 = vadd.xlane.f32.xlu0 %v2447_v8  ;;  %v2893_v8 = vpop.permute.xlu1 %2892  ;;  %v2320_v46 = vmul.f32 %v11554_v5, %v2288_v60 }
 0x5e6   : > { %2397 = vadd.xlane.f32.xlu1 %v2396_v2  ;;  %v11552_v2 = vld [vmem:[#allocation103_spill] sm:$0xff]  ;;  %v2336_v59 = vmul.f32 %v11555_v0, %v2304_v34  ;;  %v2459_v12 = vsel %vm1154_vm0, %v2369_v15, 0.0 }
 0x5e7   : > { %v2338_v41 = vmul.f32 %v11552_v2, %v2306_v18  ;;  %v2352_v54 = vmul.f32 %v2320_v46, %v2288_v60  ;;  %v11556_v2 = vld [vmem:[#allocation118_spill] sm:$0xff]  ;;  %v11562_v60 = vld [vmem:[#allocation121_spill] sm:$0xff] }
 0x5e8   : > { %v2368_v42 = vmul.f32 %v2336_v59, %v2304_v34  ;;  %v11563_v5 = vfloor.f32 %v11562_v60 }
 0x5e9   : > { %2418 = vadd.xlane.f32.xlu0 %v2417_v11  ;;  %v2370_v32 = vmul.f32 %v2338_v41, %v2306_v18  ;;  %v2897_v11 = vpop.permute.xlu1 %2896  ;;  %v2408_v41 = vsel %vm1154_vm0, %v2352_v54, 0.0 }
 0x5ea   : > { %2445 = vadd.xlane.f32.xlu1 %v2444_v38  ;;  %v2456_v15 = vsel %vm1154_vm0, %v2368_v42, 0.0 }
 0x5eb   : > { %v2462_v38 = vsel %vm1154_vm0, %v2370_v32, 0.0  ;;  %v11561_v32 = vcvt.s32.f32 %v11560_v63  ;;  %v11570_v63 = vld [vmem:[#allocation124_spill] sm:$0xff] }
 0x5ed   : > { %2466 = vadd.xlane.f32.xlu0 %v2465_v50  ;;  %v11557_v50 = vfloor.f32 %v11556_v2  ;;  %v2901_v18 = vpop.permute.xlu1 %2900 }
 0x5ee   : > { %2415 = vadd.xlane.f32.xlu1 %v2414_v1  ;;  %v11558_v1 = vld [vmem:[#allocation55_spill] sm:$0xff] }
 0x5ef   : > { %v2710_v20 = vmul.f32 16.0, %v11557_v50  ;;  %v11559_v21 = vfloor.f32 %v11558_v1  ;;  %v11568_v1 = vld [vmem:[#allocation112_spill] sm:$0xff] }
 0x5f1   : > { %2412 = vadd.xlane.f32.xlu0 %v2411_v53  ;;  %v2711_v10 = vmul.f32 16.0, %v11559_v21  ;;  %v2742_v46 = vsub.f32 %v11561_v32, %v2710_v20  ;;  %v2712_v53 = vmul.f32 16.0, %v11563_v5  ;;  %v2905_v34 = vpop.permute.xlu1 %2904  ;;  %v11571_v20 = vfloor.f32 %v11570_v63  ;;  %v11572_v5 = vld [vmem:[#allocation52_spill] sm:$0xff]  ;;  %v11580_v63 = vld [vmem:[#allocation114_spill] sm:$0xff] }
 0x5f2   : > { %2463 = vadd.xlane.f32.xlu1 %v2462_v38  ;;  %v11564_v38 = vld [vmem:[#allocation16_spill] sm:$0xff]  ;;  %v11573_v42 = vcvt.s32.f32 %v11572_v5  ;;  %v11581_v5 = vld [vmem:[#allocation53_spill] sm:$0xff] }
 0x5f3   : > { %v11565_v0 = vcvt.s32.f32 %v11564_v38  ;;  %v2781_v59 = vmul.f32 %v8109_v62, %v2742_v46  ;;  %v2714_v32 = vmul.f32 16.0, %v11571_v20  ;;  %v11574_v38 = vld [vmem:[#allocation58_spill] sm:$0xff] }
 0x5f5   : > { %2460 = vadd.xlane.f32.xlu0 %v2459_v12  ;;  %v2743_v2 = vsub.f32 %v11565_v0, %v2711_v10  ;;  %v11566_v12 = vld [vmem:[#allocation56_spill] sm:$0xff]  ;;  %v11575_v10 = vfloor.f32 %v11574_v38  ;;  %v2973_v0 = vadd.f32 %v2893_v8, %v2781_v59 }
 0x5f6   : > { %2409 = vadd.xlane.f32.xlu1 %v2408_v41  ;;  %v11567_v50 = vfloor.f32 %v11566_v12  ;;  %v11569_v41 = vcvt.s32.f32 %v11568_v1  ;;  %v11579_v1 = vfloor.f32 %v11578_v52  ;;  %v11583_v38 = vld [vmem:[#allocation60_spill] sm:$0xff] }
 0x5f7   : > { %v2782_v60 = vmul.f32 %v8109_v62, %v2743_v2  ;;  %v8723_v59 = vadd.f32 %v8053_v14, %v2973_v0  ;;  %v11586_v52 = vld [vmem:[#allocation116_spill] sm:$0xff] }
 0x5f8   : > { %v2713_v54 = vmul.f32 16.0, %v11567_v50  ;;  %v2744_v21 = vsub.f32 %v11569_v41, %v2712_v53  ;;  %v11576_v50 = vld [vmem:[#allocation115_spill] sm:$0xff]  ;;  %v2716_v53 = vmul.f32 16.0, %v11579_v1  ;;  %v8714_v41 = vpop.permute.xlu1 %2908 }
 0x5f9   : > { %v11577_v4 = vcvt.s32.f32 %v11576_v50  ;;  %v2974_v20 = vadd.f32 %v11580_v63, %v2782_v60  ;;  %11585 = vst [vmem:[#allocation152_spill] sm:$0xff] %v8723_v59  ;;  %v11589_v60 = vld [vmem:[#allocation119_spill] sm:$0xff] }
 0x5fa   : > { %2457 = vadd.xlane.f32.xlu1 %v2456_v15  ;;  %v2745_v7 = vsub.f32 %v11573_v42, %v2713_v54  ;;  %v2715_v15 = vmul.f32 16.0, %v11575_v10  ;;  %v2783_v12 = vmul.f32 %v8109_v62, %v2744_v21  ;;  %v11582_v54 = vcvt.s32.f32 %v11581_v5 }
 0x5fb   : > { %v2746_v46 = vsub.f32 %v11577_v4, %v2714_v32  ;;  %v11584_v10 = vfloor.f32 %v11583_v38  ;;  %v11587_v32 = vcvt.s32.f32 %v11586_v52  ;;  %v8729_v1 = vadd.f32 %v8053_v14, %v2974_v20  ;;  %v11593_v20 = vld [vmem:[#allocation123_spill] sm:$0xff]  ;;  %v11596_v52 = vld [vmem:[#allocation128_spill] sm:$0xff] }
 0x5fc   : > { %v2784_v2 = vmul.f32 %v8109_v62, %v2745_v7  ;;  %v2747_v42 = vsub.f32 %v11582_v54, %v2715_v15  ;;  %v2975_v21 = vadd.f32 %v2897_v11, %v2783_v12  ;;  %v11590_v15 = vld [vmem:[#allocation54_spill] sm:$0xff]  ;;  %v8735_v38 = vpop.permute.xlu1 %2912 }
 0x5fd   : > { %v2717_v8 = vmul.f32 16.0, %v11584_v10  ;;  %v2785_v4 = vmul.f32 %v8109_v62, %v2746_v46  ;;  %v2748_v50 = vsub.f32 %v11587_v32, %v2716_v53  ;;  %11588 = vst [vmem:[#allocation143_spill] sm:$0xff] %v8729_v1  ;;  %v11591_v5 = vcvt.s32.f32 %v11590_v15 }
 0x5fe   : > { %v2976_v7 = vadd.f32 %v11589_v60, %v2784_v2  ;;  %v2786_v63 = vmul.f32 %v8109_v62, %v2747_v42  ;;  %v8739_v11 = vmul.f32 %v8729_v1, %v8729_v1  ;;  %v8742_v0 = vadd.f32 %v8053_v14, %v2975_v21 }
 0x5ff   : > { %v2749_v54 = vsub.f32 %v11591_v5, %v2717_v8  ;;  %v2977_v12 = vadd.f32 %v2901_v18, %v2785_v4  ;;  %v2787_v46 = vmul.f32 %v8109_v62, %v2748_v50  ;;  %v8747_v53 = vmul.f32 %v8723_v59, %v8723_v59 }
 0x600   : > { %11592 = vst [vmem:[#allocation71_spill] sm:$0xff] %v8742_v0  ;;  %v2978_v2 = vadd.f32 %v11593_v20, %v2786_v63  ;;  %v8752_v10 = vadd.f32 %v8053_v14, %v2976_v7  ;;  %v8761_v21 = vpop.permute.xlu1 %2916  ;;  %v8765_v4 = vmul.f32 %v8742_v0, %v8742_v0 }
 0x601   : > { %v2788_v42 = vmul.f32 %v8109_v62, %v2749_v54  ;;  %v8759_v18 = vadd.f32 %v8053_v14, %v2977_v12  ;;  %v2979_v8 = vadd.f32 %v2905_v34, %v2787_v46  ;;  %v8811_v12 = vpop.permute.xlu0 %3604 }
 0x602   : > { %11594 = vst [vmem:[#allocation99_spill] sm:$0xff] %v8752_v10  ;;  %v8769_v62 = vmul.f32 %v8752_v10, %v8752_v10  ;;  %v8773_v50 = vadd.f32 %v8053_v14, %v2978_v2  ;;  %11601 = vst [vmem:[#allocation148_spill] sm:$0xff] %v8811_v12 }
 0x603   : > { %11595 = vst [vmem:[#allocation153_spill] sm:$0xff] %v8759_v18  ;;  %v2980_v32 = vadd.f32 %v11596_v52, %v2788_v42  ;;  %v8780_v34 = vadd.f32 %v8053_v14, %v2979_v8  ;;  %v8784_v60 = vmul.f32 %v8759_v18, %v8759_v18 }
 0x604   : > { %11597 = vst [vmem:[#allocation145_spill] sm:$0xff] %v8773_v50  ;;  %v8788_v7 = vmul.f32 %v8773_v50, %v8773_v50  ;;  %v8793_v15 = vpop.permute.xlu1 %2920 }
 0x605   : > { %11598 = vst [vmem:[#allocation85_spill] sm:$0xff] %v8780_v34  ;;  %v8791_v63 = vadd.f32 %v8053_v14, %v2980_v32  ;;  %v8801_v5 = vmul.f32 %v8780_v34, %v8780_v34  ;;  %v8815_v20 = vpop.permute.xlu0 %3608 }
 0x606   : > { %11602 = vst [vmem:[#allocation43_spill] sm:$0xff] %v8815_v20 }
 0x607   : > { %11599 = vst [vmem:[#allocation90_spill] sm:$0xff] %v8791_v63  ;;  %11600 = vst [vmem:[#allocation100_spill] sm:$0xff] %v8801_v5  ;;  %v8805_v54 = vmul.f32 %v8791_v63, %v8791_v63 }
 0x608   : > { %v8813_v46 = vpop.permute.xlu1 %2924 }
 0x609   : > { %v8819_v42 = vpop.permute.xlu0 %3612 }
 0x60a   : > { %11604 = vst [vmem:[#allocation86_spill] sm:$0xff] %v8819_v42 }
 0x60b   : > { %3634 = vrot.lane.b32.xlu1 %v8747_v53, %s6039_s23  ;;  %3636 = vrot.lane.b32.xlu0 %v8739_v11, %s6039_s23 }
 0x60c   : > { %v8817_v2 = vpop.permute.xlu1 %3057 }
 0x60d   : > { %11603 = vst [vmem:[#allocation154_spill] sm:$0xff] %v8817_v2  ;;  %v8825_v32 = vpop.permute.xlu0 %3616 }
 0x60e   : > { %11607 = vst [vmem:[#allocation149_spill] sm:$0xff] %v8825_v32 }
 0x60f   : > { %3638 = vrot.lane.b32.xlu1 %v8765_v4, %s6039_s23  ;;  %3640 = vrot.lane.b32.xlu0 %v8769_v62, %s6039_s23 }
 0x610   : > { %v8821_v8 = vpop.permute.xlu1 %3606 }
 0x611   : > { %11605 = vst [vmem:[#allocation91_spill] sm:$0xff] %v8821_v8  ;;  %v8829_v44 = vpop.permute.xlu0 %3620 }
 0x612   : > { %11609 = vst [vmem:[#allocation88_spill] sm:$0xff] %v8829_v44 }
 0x613   : > { %3642 = vrot.lane.b32.xlu1 %v8784_v60, %s6039_s23  ;;  %3644 = vrot.lane.b32.xlu0 %v8788_v7, %s6039_s23 }
 0x614   : > { %v8823_v52 = vpop.permute.xlu1 %3610 }
 0x615   : > { %11606 = vst [vmem:[#allocation44_spill] sm:$0xff] %v8823_v52  ;;  %v8833_v31 = vpop.permute.xlu0 %3624 }
 0x616   : > { %11611 = vst [vmem:[#allocation45_spill] sm:$0xff] %v8833_v31 }
 0x617   : > { %3646 = vrot.lane.b32.xlu1 %v8801_v5, %s6039_s23  ;;  %3648 = vrot.lane.b32.xlu0 %v8805_v54, %s6039_s23 }
 0x618   : > { %v8827_v13 = vpop.permute.xlu1 %3614 }
 0x619   : > { %11608 = vst [vmem:[#allocation155_spill] sm:$0xff] %v8827_v13  ;;  %v8837_v20 = vpop.permute.xlu0 %3628 }
 0x61a   : > { %11613 = vst [vmem:[#allocation92_spill] sm:$0xff] %v8837_v20 }
 0x61c   : > { %v8831_v22 = vpop.permute.xlu1 %3618 }
 0x61d   : > { %11610 = vst [vmem:[#allocation93_spill] sm:$0xff] %v8831_v22  ;;  %v8841_v42 = vpop.permute.xlu0 %3632 }
 0x61e   : > { %11615 = vst [vmem:[#allocation101_spill] sm:$0xff] %v8841_v42 }
 0x620   : > { %v8835_v12 = vpop.permute.xlu1 %3622 }
 0x621   : > { %11612 = vst [vmem:[#allocation150_spill] sm:$0xff] %v8835_v12 }
 0x624   : > { %v8839_v2 = vpop.permute.xlu1 %3626 }
 0x625   : > { %11614 = vst [vmem:[#allocation46_spill] sm:$0xff] %v8839_v2 }
 0x628   : > { %v8843_v52 = vpop.permute.xlu1 %3630 }
 0x646   : > { %v2383_v8 = vpop.xlane.xlu0 %2382 }
 0x647   : > { %v2471_v32 = vmul.f32 %v2383_v8, %v8316_v33 }
 0x649   : > { %v8846_v13 = vmul.f32 0.11111111, %v2471_v32 }
 0x64a   : > { %v2431_v44 = vpop.xlane.xlu0 %2430 }
 0x64b   : > { %11616 = vst [vmem:[#allocation151_spill] sm:$0xff] %v8846_v13  ;;  %v3127_v22 = vmul.f32 %v8846_v13, %v8172_v28  ;;  %v2487_v31 = vmul.f32 %v2431_v44, %v8320_v30  ;;  %v2380_v12 = vpop.xlane.xlu1 %2379  ;;  %v11806_v28 = vld [vmem:[#allocation43_spill] sm:$0xff] }
 0x64c   : > { %v2470_v20 = vmul.f32 %v2380_v12, %v8341_v40 }
 0x64d   : > { %v8852_v5 = vmul.f32 0.11111111, %v2487_v31  ;;  %3173 = vperm.xlu0 %5576, %v3127_v22  }
 0x64e   : > { %v8854_v42 = vmul.f32 0.11111111, %v2470_v20  ;;  %v2377_v2 = vpop.xlane.xlu0 %2376 }
 0x64f   : > { %11617 = vst [vmem:[#allocation94_spill] sm:$0xff] %v8852_v5  ;;  %v3143_v33 = vmul.f32 %v8852_v5, %v8759_v18  ;;  %v2428_v8 = vpop.xlane.xlu1 %2427  ;;  %v11620_v5 = vmov 1  }
 0x650   : > { %11618 = vst [vmem:[#allocation47_spill] sm:$0xff] %v8854_v42  ;;  %v3126_v32 = vmul.f32 %v8854_v42, %v8147_v9  ;;  %v2486_v13 = vmul.f32 %v2428_v8, %v8365_v19  ;;  %v2469_v8 = vmul.f32 %v2377_v2, %v8333_v61  ;;  %v11627_v61 = vld [vmem:[#allocation120_spill] sm:$0xff] }
 0x651   : > { %3253 = vperm.xlu0 %5576, %v3143_v33   ;;  %v11628_v2 = vcvt.s32.f32 %v11627_v61 }
 0x652   : > { %v8861_v30 = vmul.f32 0.11111111, %v2486_v13  ;;  %3168 = vperm.xlu1 %5649, %v3126_v32   ;;  %v2425_v40 = vpop.xlane.xlu0 %2424 }
 0x653   : > { %v2374_v44 = vpop.xlane.xlu1 %2373  ;;  %v2485_v20 = vmul.f32 %v2425_v40, %v8335_v26  ;;  %v11624_v26 = vld [vmem:[#allocation129_spill] sm:$0xff] }
 0x654   : > { %11619 = vst [vmem:[#allocation104_spill] sm:$0xff] %v8861_v30  ;;  %v3142_v31 = vmul.f32 %v8861_v30, %v8752_v10  ;;  %v2468_v12 = vmul.f32 %v2374_v44, %v8386_v3  ;;  %v11623_v30 = vmov 0   ;;  %v11625_v40 = vfloor.f32 %v11624_v26  ;;  %v11629_v10 = vld [vmem:[#allocation146_spill] sm:$0xff] }
 0x655   : > { %5651 = vset.pattern.permute.xlu0 %v11620_v5  ;;  %v8872_v13 = vmul.f32 0.11111111, %v2485_v20 }
 0x656   : > { %v8868_v18 = vmul.f32 0.11111111, %v2468_v12  ;;  %3248 = vperm.xlu1 %5649, %v3142_v31   ;;  %3421 = vperm.xlu0 %5651, %v3142_v31   ;;  %v2718_v44 = vmul.f32 16.0, %v11625_v40  ;;  %v8881_v12 = vmul.f32 0.11111111, %v2469_v8  ;;  %v2395_v20 = vpop.xlane.xlu0 %2394 }
 0x657   : > { %11622 = vst [vmem:[#allocation156_spill] sm:$0xff] %v8872_v13  ;;  %v2422_v3 = vpop.xlane.xlu1 %2421  ;;  %v3141_v31 = vmul.f32 %v8872_v13, %v8742_v0  ;;  %v2475_v26 = vmul.f32 %v2395_v20, %v8356_v47  ;;  %v8893_v40 = vld [vmem:[%s7293_s20] ss:$0 sm:$0xff]  ;;  %v11761_v0 = vld [vmem:[#allocation180_spill] sm:$0xff] }
 0x658   : > { %11621 = vst [vmem:[#allocation96_spill] sm:$0xff] %v8868_v18  ;;  %v3124_v19 = vmul.f32 %v8868_v18, %v8129_v29  ;;  %11626 = vst [vmem:[#allocation106_spill] sm:$0xff] %v8881_v12  ;;  %v2484_v42 = vmul.f32 %v2422_v3, %v8407_v17  ;;  %v2750_v18 = vsub.f32 %v11628_v2, %v2718_v44  ;;  %v11809_v29 = vld [vmem:[#allocation44_spill] sm:$0xff] }
 0x659   : > { %v8898_v3 = vmul.f32 0.11111111, %v2475_v26 }
 0x65a   : > { %5650 = vset.pattern.permute.xlu1 %v11620_v5  ;;  %5652 = vset.pattern.permute.xlu0 %v11623_v30  ;;  %v8888_v9 = vmul.f32 0.11111111, %v2484_v42  ;;  %v2443_v8 = vpop.xlane.xlu0 %2442  ;;  %v2789_v17 = vmul.f32 %v8893_v40, %v2750_v18 }
 0x65b   : > { %3357 = vperm.xlu1 %5650, %v3126_v32   ;;  %3158 = vperm.xlu0 %5652, %v3124_v19   ;;  %v3125_v32 = vmul.f32 %v8881_v12, %v11629_v10  ;;  %11631 = vst [vmem:[#allocation97_spill] sm:$0xff] %v8898_v3  ;;  %v2491_v44 = vmul.f32 %v2443_v8, %v8378_v6  ;;  %v2392_v42 = vpop.xlane.xlu1 %2391  ;;  %v11665_v12 = vld [vmem:[#allocation176_spill] sm:$0xff]  ;;  %v11808_v10 = vld [vmem:[#allocation86_spill] sm:$0xff] }
 0x65c   : > { %11630 = vst [vmem:[#allocation48_spill] sm:$0xff] %v8888_v9  ;;  %v2981_v47 = vadd.f32 %v8714_v41, %v2789_v17  ;;  %v2474_v18 = vmul.f32 %v2392_v42, %v8436_v49  ;;  %v11636_v17 = vld [vmem:[#allocation82_spill] sm:$0xff] }
 0x65d   : > { %v8905_v20 = vmul.f32 0.11111111, %v2491_v44 }
 0x65e   : > { %v8910_v61 = vadd.f32 %v8053_v14, %v2981_v47  ;;  %v2389_v41 = vpop.xlane.xlu0 %2388 }
 0x65f   : > { %3361 = vperm.xlu1 %5650, %v3127_v22   ;;  %3243 = vperm.xlu0 %5652, %v3141_v31   ;;  %v3140_v22 = vmul.f32 %v8888_v9, %v8729_v1  ;;  %11632 = vst [vmem:[#allocation157_spill] sm:$0xff] %v8905_v20  ;;  %v2440_v6 = vpop.xlane.xlu1 %2439  ;;  %v11758_v1 = vld [vmem:[#allocation175_spill] sm:$0xff] }
 0x660   : > { %11633 = vst [vmem:[#allocation49_spill] sm:$0xff] %v8910_v61  ;;  %v3147_v2 = vmul.f32 %v8905_v20, %v8910_v61  ;;  %v2490_v26 = vmul.f32 %v2440_v6, %v8449_v45  ;;  %v11643_v20 = vld [vmem:[#allocation37_spill] sm:$0xff] }
 0x662   : > { %v8920_v8 = vmul.f32 0.11111111, %v2490_v26  ;;  %v2437_v44 = vpop.xlane.xlu0 %2436 }
 0x663   : > { %3425 = vperm.xlu1 %5650, %v3143_v33   ;;  %5655 = vset.pattern.permute.xlu0 %v11620_v5  ;;  %v3131_v33 = vmul.f32 %v8898_v3, %v8225_v16  ;;  %v2386_v47 = vpop.xlane.xlu1 %2385 }
 0x664   : > { %3353 = vperm.xlu0 %5655, %v3125_v32   ;;  %11635 = vst [vmem:[#allocation158_spill] sm:$0xff] %v8920_v8  ;;  %v3146_v42 = vmul.f32 %v8920_v8, %v8791_v63 }
 0x666   : > { %v2407_v8 = vpop.xlane.xlu0 %2406 }
 0x667   : > { %5653 = vset.pattern.permute.xlu1 %v11623_v30  ;;  %v2434_v26 = vpop.xlane.xlu1 %2433 }
 0x668   : > { %3163 = vperm.xlu1 %5653, %v3125_v32   ;;  %3413 = vperm.xlu0 %5655, %v3140_v22   ;;  %v8914_v32 = vmul.f32 0.11111111, %v2474_v18  ;;  %v11638_v18 = vld [vmem:[#allocation169_spill] sm:$0xff]  ;;  %v2488_v9 = vmul.f32 %v2434_v26, %v11643_v20  ;;  %v11649_v26 = vld [vmem:[#allocation64_spill] sm:$0xff] }
 0x66a   : > { %11634 = vst [vmem:[#allocation108_spill] sm:$0xff] %v8914_v32  ;;  %v3130_v49 = vmul.f32 %v8914_v32, %v8194_v25 }
 0x66b   : > { %v2404_v3 = vpop.xlane.xlu1 %2403 }
 0x66c   : > { %3238 = vperm.xlu1 %5653, %v3140_v22   ;;  %5657 = vset.pattern.permute.xlu0 %v11623_v30  ;;  %v2473_v22 = vmul.f32 %v2389_v41, %v11636_v17  ;;  %v2472_v41 = vmul.f32 %v2386_v47, %v8470_v35  ;;  %v11640_v17 = vld [vmem:[#allocation137_spill] sm:$0xff]  ;;  %v11644_v35 = vld [vmem:[#allocation127_spill] sm:$0xff]  ;;  %v11646_v47 = vld [vmem:[#allocation164_spill] sm:$0xff] }
 0x66d   : > { %3193 = vperm.xlu0 %5657, %v3131_v33  }
 0x66e   : > { %v8926_v45 = vmul.f32 0.11111111, %v2473_v22  ;;  %v11641_v22 = vfloor.f32 %v11640_v17  ;;  %v8948_v17 = vmul.f32 0.11111111, %v2488_v9 }
 0x670   : > { %5654 = vset.pattern.permute.xlu1 %v11620_v5  ;;  %11637 = vst [vmem:[#allocation102_spill] sm:$0xff] %v8926_v45  ;;  %v3129_v6 = vmul.f32 %v8926_v45, %v11638_v18  ;;  %11647 = vst [vmem:[#allocation103_spill] sm:$0xff] %v8948_v17 }
 0x671   : > { %3349 = vperm.xlu1 %5654, %v3124_v19   ;;  %3273 = vperm.xlu0 %5657, %v3147_v2   ;;  %v2489_v19 = vmul.f32 %v2437_v44, %v8453_v36  ;;  %v2722_v36 = vmul.f32 16.0, %v11641_v22  ;;  %v11648_v22 = vld [vmem:[#allocation36_spill] sm:$0xff] }
 0x672   : > { %v2479_v32 = vmul.f32 %v2407_v8, %v11648_v22  ;;  %v11653_v8 = vld [vmem:[#allocation59_spill] sm:$0xff] }
 0x673   : > { %v11654_v22 = vcvt.s32.f32 %v11653_v8 }
 0x675   : > { %3417 = vperm.xlu1 %5654, %v3141_v31   ;;  %5658 = vset.pattern.permute.xlu0 %v11620_v5  ;;  %v8932_v31 = vmul.f32 0.11111111, %v2489_v19 }
 0x676   : > { %3373 = vperm.xlu0 %5658, %v3130_v49  }
 0x677   : > { %11639 = vst [vmem:[#allocation50_spill] sm:$0xff] %v8932_v31  ;;  %v3145_v44 = vmul.f32 %v8932_v31, %v8780_v34 }
 0x679   : > { %5656 = vset.pattern.permute.xlu1 %v11623_v30 }
 0x67a   : > { %3188 = vperm.xlu1 %5656, %v3130_v49   ;;  %3437 = vperm.xlu0 %5658, %v3146_v42   ;;  %v8940_v49 = vmul.f32 0.11111111, %v2472_v41  ;;  %v2455_v41 = vpop.xlane.xlu0 %2454 }
 0x67c   : > { %11642 = vst [vmem:[#allocation159_spill] sm:$0xff] %v8940_v49  ;;  %v3128_v13 = vmul.f32 %v8940_v49, %v11646_v47  ;;  %v11655_v49 = vld [vmem:[#allocation181_spill] sm:$0xff] }
 0x67e   : > { %3268 = vperm.xlu1 %5656, %v3146_v42   ;;  %5661 = vset.pattern.permute.xlu0 %v11623_v30  ;;  %v11645_v42 = vcvt.s32.f32 %v11644_v35  ;;  %v8957_v35 = vmul.f32 0.11111111, %v2479_v32 }
 0x67f   : > { %3183 = vperm.xlu0 %5661, %v3129_v6  }
 0x680   : > { %v2754_v19 = vsub.f32 %v11645_v42, %v2722_v36  ;;  %v3144_v36 = vmul.f32 %v8948_v17, %v8773_v50  ;;  %11651 = vst [vmem:[#allocation51_spill] sm:$0xff] %v8957_v35  ;;  %v11652_v42 = vld [vmem:[#allocation39_spill] sm:$0xff]  ;;  %v11683_v50 = vld [vmem:[#allocation170_spill] sm:$0xff] }
 0x681   : > { %v2495_v9 = vmul.f32 %v2455_v41, %v11652_v42  ;;  %v11657_v17 = vld [vmem:[#allocation79_spill] sm:$0xff]  ;;  %v11659_v42 = vld [vmem:[#allocation134_spill] sm:$0xff] }
 0x682   : > { %5659 = vset.pattern.permute.xlu1 %v11620_v5  ;;  %v2793_v20 = vmul.f32 %v8893_v40, %v2754_v19  ;;  %v2478_v32 = vmul.f32 %v2404_v3, %v11657_v17  ;;  %v11662_v17 = vld [vmem:[#allocation138_spill] sm:$0xff] }
 0x683   : > { %3377 = vperm.xlu1 %5659, %v3131_v33   ;;  %3263 = vperm.xlu0 %5661, %v3145_v44   ;;  %v11650_v33 = vfloor.f32 %v11649_v26  ;;  %v3135_v26 = vmul.f32 %v8957_v35, %v11655_v49 }
 0x685   : > { %v2721_v31 = vmul.f32 16.0, %v11650_v33  ;;  %v8966_v33 = vmul.f32 0.11111111, %v2495_v9 }
 0x687   : > { %3441 = vperm.xlu1 %5659, %v3147_v2   ;;  %5662 = vset.pattern.permute.xlu0 %v11620_v5  ;;  %v2985_v2 = vadd.f32 %v8761_v21, %v2793_v20  ;;  %v2753_v19 = vsub.f32 %v11654_v22, %v2721_v31  ;;  %11656 = vst [vmem:[#allocation105_spill] sm:$0xff] %v8966_v33  ;;  %v2401_v20 = vpop.xlane.xlu0 %2400  ;;  %v11660_v31 = vfloor.f32 %v11659_v42  ;;  %v8978_v22 = vmul.f32 0.11111111, %v2478_v32  ;;  %v11667_v32 = vld [vmem:[#allocation84_spill] sm:$0xff] }
 0x688   : > { %3365 = vperm.xlu0 %5662, %v3128_v13   ;;  %v2477_v63 = vmul.f32 %v2401_v20, %v11667_v32 }
 0x689   : > { %v8971_v41 = vadd.f32 %v8053_v14, %v2985_v2  ;;  %v2792_v21 = vmul.f32 %v8893_v40, %v2753_v19  ;;  %v2720_v8 = vmul.f32 16.0, %v11660_v31  ;;  %11661 = vst [vmem:[#allocation118_spill] sm:$0xff] %v8978_v22  ;;  %v11663_v2 = vld [vmem:[#allocation125_spill] sm:$0xff]  ;;  %v3134_v42 = vmul.f32 %v8978_v22, %v11665_v12 }
 0x68a   : > { %v11664_v35 = vcvt.s32.f32 %v11663_v2  ;;  %v11672_v2 = vld [vmem:[#allocation57_spill] sm:$0xff] }
 0x68b   : > { %5660 = vset.pattern.permute.xlu1 %v11623_v30  ;;  %11658 = vst [vmem:[#allocation107_spill] sm:$0xff] %v8971_v41  ;;  %v3151_v9 = vmul.f32 %v8966_v33, %v8971_v41  ;;  %v2449_v33 = vpop.xlane.xlu0 %2448 }
 0x68c   : > { %3178 = vperm.xlu1 %5660, %v3128_v13   ;;  %3429 = vperm.xlu0 %5662, %v3144_v36   ;;  %v2452_v13 = vpop.xlane.xlu1 %2451  ;;  %v2752_v19 = vsub.f32 %v11664_v35, %v2720_v8 }
 0x68d   : > { %v2494_v3 = vmul.f32 %v2452_v13, %v8531_v37  ;;  %v11669_v13 = vld [vmem:[#allocation62_spill] sm:$0xff] }
 0x68e   : > { %v11670_v35 = vfloor.f32 %v11669_v13  ;;  %v11674_v13 = vld [vmem:[#allocation177_spill] sm:$0xff] }
 0x68f   : > { %v8987_v31 = vmul.f32 0.11111111, %v2494_v3  ;;  %v8999_v3 = vmul.f32 0.11111111, %v2477_v63 }
 0x690   : > { %3258 = vperm.xlu1 %5660, %v3144_v36   ;;  %5665 = vset.pattern.permute.xlu0 %v11623_v30  ;;  %v2984_v36 = vadd.f32 %v11662_v17, %v2792_v21  ;;  %v2398_v45 = vpop.xlane.xlu1 %2397  ;;  %v2719_v21 = vmul.f32 16.0, %v11670_v35  ;;  %v2493_v17 = vmul.f32 %v2449_v33, %v8544_v27 }
 0x691   : > { %3213 = vperm.xlu0 %5665, %v3135_v26   ;;  %11666 = vst [vmem:[#allocation55_spill] sm:$0xff] %v8987_v31  ;;  %11671 = vst [vmem:[#allocation121_spill] sm:$0xff] %v8999_v3  ;;  %v3133_v35 = vmul.f32 %v8999_v3, %v11674_v13  ;;  %v2476_v63 = vmul.f32 %v2398_v45, %v8554_v39  ;;  %v11680_v45 = vld [vmem:[#allocation132_spill] sm:$0xff] }
 0x692   : > { %v8992_v37 = vadd.f32 %v8053_v14, %v2984_v36  ;;  %v9008_v22 = vmul.f32 0.11111111, %v2493_v17 }
 0x694   : > { %5663 = vset.pattern.permute.xlu1 %v11620_v5  ;;  %11668 = vst [vmem:[#allocation111_spill] sm:$0xff] %v8992_v37  ;;  %v3150_v8 = vmul.f32 %v8987_v31, %v8992_v37  ;;  %v2446_v20 = vpop.xlane.xlu1 %2445  ;;  %11675 = vst [vmem:[#allocation16_spill] sm:$0xff] %v9008_v22 }
 0x695   : > { %3369 = vperm.xlu1 %5663, %v3129_v6   ;;  %3293 = vperm.xlu0 %5665, %v3151_v9   ;;  %v2791_v6 = vmul.f32 %v8893_v40, %v2752_v19  ;;  %v11673_v19 = vcvt.s32.f32 %v11672_v2  ;;  %v2492_v39 = vmul.f32 %v2446_v20, %v8577_v23  ;;  %v11686_v20 = vld [vmem:[#allocation66_spill] sm:$0xff] }
 0x697   : > { %v2983_v36 = vadd.f32 %v8735_v38, %v2791_v6  ;;  %v2751_v32 = vsub.f32 %v11673_v19, %v2719_v21  ;;  %v11677_v6 = vld [vmem:[#allocation142_spill] sm:$0xff]  ;;  %v9020_v19 = vmul.f32 0.11111111, %v2476_v63 }
 0x698   : > { %v2416_v33 = vpop.xlane.xlu1 %2415  ;;  %v11678_v21 = vfloor.f32 %v11677_v6 }
 0x699   : > { %3433 = vperm.xlu1 %5663, %v3145_v44   ;;  %5666 = vset.pattern.permute.xlu0 %v11620_v5  ;;  %v2419_v44 = vpop.xlane.xlu0 %2418  ;;  %v9013_v27 = vadd.f32 %v8053_v14, %v2983_v36  ;;  %v2790_v38 = vmul.f32 %v8893_v40, %v2751_v32  ;;  %11679 = vst [vmem:[#allocation112_spill] sm:$0xff] %v9020_v19  ;;  %v11681_v36 = vld [vmem:[#allocation135_spill] sm:$0xff] }
 0x69a   : > { %3389 = vperm.xlu0 %5666, %v3134_v42   ;;  %v2726_v2 = vmul.f32 16.0, %v11678_v21  ;;  %v11682_v31 = vcvt.s32.f32 %v11681_v36  ;;  %v3132_v6 = vmul.f32 %v9020_v19, %v11683_v50  ;;  %v9029_v21 = vmul.f32 0.11111111, %v2492_v39 }
 0x69b   : > { %11676 = vst [vmem:[#allocation56_spill] sm:$0xff] %v9013_v27  ;;  %v3149_v17 = vmul.f32 %v9008_v22, %v9013_v27  ;;  %v2483_v63 = vmul.f32 %v2419_v44, %v8568_v56 }
 0x69c   : > { %v2758_v32 = vsub.f32 %v11682_v31, %v2726_v2  ;;  %v2464_v3 = vpop.xlane.xlu1 %2463  ;;  %11684 = vst [vmem:[#allocation124_spill] sm:$0xff] %v9029_v21  ;;  %v11687_v31 = vfloor.f32 %v11686_v20 }
 0x69d   : > { %5664 = vset.pattern.permute.xlu1 %v11623_v30  ;;  %v9041_v39 = vmul.f32 0.11111111, %v2483_v63  ;;  %v2482_v63 = vmul.f32 %v2416_v33, %v8601_v51  ;;  %v2498_v51 = vmul.f32 %v2464_v3, %v8623_v24  ;;  %v11696_v33 = vld [vmem:[#allocation144_spill] sm:$0xff] }
 0x69e   : > { %3208 = vperm.xlu1 %5664, %v3134_v42   ;;  %3453 = vperm.xlu0 %5666, %v3150_v8   ;;  %v2467_v42 = vpop.xlane.xlu0 %2466 }
 0x69f   : > { %11688 = vst [vmem:[#allocation58_spill] sm:$0xff] %v9041_v39  ;;  %v3139_v20 = vmul.f32 %v9041_v39, %v8723_v59  ;;  %v9075_v19 = vmul.f32 0.11111111, %v2498_v51 }
 0x6a0   : > { %v2410_v56 = vpop.xlane.xlu1 %2409 }
 0x6a1   : > { %11700 = vst [vmem:[#allocation53_spill] sm:$0xff] %v9075_v19 }
 0x6a2   : > { %3288 = vperm.xlu1 %5664, %v3150_v8   ;;  %5669 = vset.pattern.permute.xlu0 %v11623_v30  ;;  %v2982_v8 = vadd.f32 %v11680_v45, %v2790_v38  ;;  %v2413_v22 = vpop.xlane.xlu0 %2412  ;;  %v2725_v38 = vmul.f32 16.0, %v11687_v31  ;;  %v2499_v45 = vmul.f32 %v2467_v42, %v8591_v57 }
 0x6a3   : > { %3203 = vperm.xlu0 %5669, %v3133_v35   ;;  %v2481_v24 = vmul.f32 %v2413_v22, %v8612_v58 }
 0x6a4   : > { %v9034_v23 = vadd.f32 %v8053_v14, %v2982_v8  ;;  %v11689_v8 = vld [vmem:[#allocation63_spill] sm:$0xff]  ;;  %v9050_v31 = vmul.f32 0.11111111, %v2499_v45  ;;  %v2458_v42 = vpop.xlane.xlu1 %2457 }
 0x6a5   : > { %v11690_v36 = vcvt.s32.f32 %v11689_v8 }
 0x6a6   : > { %5667 = vset.pattern.permute.xlu1 %v11620_v5  ;;  %11685 = vst [vmem:[#allocation52_spill] sm:$0xff] %v9034_v23  ;;  %v3148_v2 = vmul.f32 %v9029_v21, %v9034_v23  ;;  %11691 = vst [vmem:[#allocation115_spill] sm:$0xff] %v9050_v31 }
 0x6a7   : > { %3393 = vperm.xlu1 %5667, %v3135_v26   ;;  %3283 = vperm.xlu0 %5669, %v3149_v17   ;;  %v2797_v26 = vmul.f32 %v8893_v40, %v2758_v32  ;;  %v2757_v32 = vsub.f32 %v11690_v36, %v2725_v38  ;;  %v9064_v36 = vmul.f32 0.11111111, %v2482_v63 }
 0x6a8   : > { %v9071_v39 = vpop.permute.xlu1 %3634 }
 0x6a9   : > { %v2989_v44 = vadd.f32 %v8813_v46, %v2797_v26  ;;  %v2796_v46 = vmul.f32 %v8893_v40, %v2757_v32  ;;  %v11693_v26 = vld [vmem:[#allocation139_spill] sm:$0xff]  ;;  %11695 = vst [vmem:[#allocation114_spill] sm:$0xff] %v9064_v36 }
 0x6aa   : > { %v11694_v38 = vfloor.f32 %v11693_v26  ;;  %v11699_v26 = vld [vmem:[#allocation182_spill] sm:$0xff] }
 0x6ab   : > { %3457 = vperm.xlu1 %5667, %v3151_v9   ;;  %5670 = vset.pattern.permute.xlu0 %v11620_v5  ;;  %v2461_v9 = vpop.xlane.xlu0 %2460  ;;  %v9055_v57 = vadd.f32 %v8053_v14, %v2989_v44  ;;  %v11697_v44 = vld [vmem:[#allocation131_spill] sm:$0xff] }
 0x6ac   : > { %3381 = vperm.xlu0 %5670, %v3132_v6   ;;  %v2724_v8 = vmul.f32 16.0, %v11694_v38  ;;  %v11698_v32 = vcvt.s32.f32 %v11697_v44  ;;  %v3138_v38 = vmul.f32 %v9064_v36, %v11699_v26  ;;  %v9089_v44 = vmul.f32 0.11111111, %v2481_v24  ;;  %v9092_v58 = vpop.permute.xlu1 %3638 }
 0x6ad   : > { %11692 = vst [vmem:[#allocation126_spill] sm:$0xff] %v9055_v57  ;;  %v3155_v45 = vmul.f32 %v9050_v31, %v9055_v57 }
 0x6ae   : > { %v2756_v21 = vsub.f32 %v11698_v32, %v2724_v8  ;;  %11704 = vst [vmem:[#allocation116_spill] sm:$0xff] %v9089_v44  ;;  %v2497_v32 = vmul.f32 %v2461_v9, %v8633_v55  ;;  %v2480_v55 = vmul.f32 %v2410_v56, %v8643_v43  ;;  %v2496_v43 = vmul.f32 %v2458_v42, %v8660_v48  ;;  %v11711_v56 = vld [vmem:[#allocation140_spill] sm:$0xff] }
 0x6af   : > { %5668 = vset.pattern.permute.xlu1 %v11623_v30 }
 0x6b0   : > { %3198 = vperm.xlu1 %5668, %v3132_v6   ;;  %3445 = vperm.xlu0 %5670, %v3148_v2   ;;  %v9058_v6 = vpop.permute.xlu0 %3636  ;;  %v9102_v24 = vmul.f32 0.11111111, %v2497_v32  ;;  %v9116_v32 = vmul.f32 0.11111111, %v2480_v55 }
 0x6b2   : > { %11708 = vst [vmem:[#allocation119_spill] sm:$0xff] %v9102_v24  ;;  %11710 = vst [vmem:[#allocation123_spill] sm:$0xff] %v9116_v32 }
 0x6b4   : > { %3278 = vperm.xlu1 %5668, %v3148_v2   ;;  %5673 = vset.pattern.permute.xlu0 %v11623_v30  ;;  %v2988_v2 = vadd.f32 %v11696_v33, %v2796_v46  ;;  %v9077_v63 = vpop.permute.xlu0 %3640  ;;  %v11702_v46 = vld [vmem:[#allocation65_spill] sm:$0xff] }
 0x6b5   : > { %3233 = vperm.xlu0 %5673, %v3139_v20   ;;  %v11703_v8 = vfloor.f32 %v11702_v46 }
 0x6b6   : > { %v9082_v3 = vadd.f32 %v8053_v14, %v2988_v2 }
 0x6b7   : > { %v2723_v33 = vmul.f32 16.0, %v11703_v8  ;;  %v11707_v8 = vld [vmem:[#allocation185_spill] sm:$0xff] }
 0x6b8   : > { %5671 = vset.pattern.permute.xlu1 %v11620_v5  ;;  %11701 = vst [vmem:[#allocation60_spill] sm:$0xff] %v9082_v3  ;;  %v3154_v51 = vmul.f32 %v9075_v19, %v9082_v3  ;;  %v9095_v22 = vpop.permute.xlu0 %3644  ;;  %v3137_v19 = vmul.f32 %v9089_v44, %v11707_v8  ;;  %v11732_v44 = vld [vmem:[#allocation161_spill] sm:$0xff] }
 0x6b9   : > { %3385 = vperm.xlu1 %5671, %v3133_v35   ;;  %3313 = vperm.xlu0 %5673, %v3155_v45   ;;  %v2795_v35 = vmul.f32 %v8893_v40, %v2756_v21  ;;  %v11705_v21 = vld [vmem:[#allocation61_spill] sm:$0xff] }
 0x6ba   : > { %v11706_v2 = vcvt.s32.f32 %v11705_v21 }
 0x6bc   : > { %v2755_v46 = vsub.f32 %v11706_v2, %v2723_v33 }
 0x6bd   : > { %3449 = vperm.xlu1 %5671, %v3149_v17   ;;  %5674 = vset.pattern.permute.xlu0 %v11620_v5  ;;  %v2987_v17 = vadd.f32 %v8793_v15, %v2795_v35  ;;  %v9112_v35 = vpop.permute.xlu0 %3648 }
 0x6be   : > { %3405 = vperm.xlu0 %5674, %v3138_v38   ;;  %v2794_v15 = vmul.f32 %v8893_v40, %v2755_v46  ;;  %v11713_v40 = vld [vmem:[#allocation179_spill] sm:$0xff]  ;;  %v9127_v46 = vmul.f32 0.11111111, %v2496_v43  ;;  %v9153_v43 = vmul.f32 %v8992_v37, %v8992_v37 }
 0x6bf   : > { %v9107_v9 = vadd.f32 %v8053_v14, %v2987_v17  ;;  %v3136_v2 = vmul.f32 %v9116_v32, %v11713_v40 }
 0x6c0   : > { %11714 = vst [vmem:[#allocation129_spill] sm:$0xff] %v9127_v46  ;;  %11721 = vst [vmem:[#allocation64_spill] sm:$0xff] %v9153_v43 }
 0x6c1   : > { %5672 = vset.pattern.permute.xlu1 %v11623_v30  ;;  %11709 = vst [vmem:[#allocation54_spill] sm:$0xff] %v9107_v9  ;;  %v3153_v33 = vmul.f32 %v9102_v24, %v9107_v9 }
 0x6c2   : > { %3228 = vperm.xlu1 %5672, %v3138_v38   ;;  %3469 = vperm.xlu0 %5674, %v3154_v51   ;;  %v9109_v38 = vpop.permute.xlu1 %3642 }
 0x6c6   : > { %3308 = vperm.xlu1 %5672, %v3154_v51   ;;  %5677 = vset.pattern.permute.xlu0 %v11623_v30  ;;  %v2986_v51 = vadd.f32 %v11711_v56, %v2794_v15  ;;  %v9123_v21 = vpop.permute.xlu1 %3646 }
 0x6c7   : > { %3223 = vperm.xlu0 %5677, %v3137_v19  }
 0x6c8   : > { %v9131_v48 = vadd.f32 %v8053_v14, %v2986_v51  ;;  %v9146_v14 = vmul.f32 %v9034_v23, %v9034_v23  ;;  %v11746_v23 = vld [vmem:[#allocation147_spill] sm:$0xff] }
 0x6ca   : > { %5675 = vset.pattern.permute.xlu1 %v11620_v5  ;;  %11715 = vst [vmem:[#allocation120_spill] sm:$0xff] %v9131_v48  ;;  %v3152_v55 = vmul.f32 %v9127_v46, %v9131_v48  ;;  %11720 = vst [vmem:[#allocation36_spill] sm:$0xff] %v9146_v14  ;;  %v9174_v46 = vmul.f32 %v9082_v3, %v9082_v3 }
 0x6cb   : > { %3409 = vperm.xlu1 %5675, %v3139_v20   ;;  %3303 = vperm.xlu0 %5677, %v3153_v33  }
 0x6cc   : > { %v9121_v17 = vpop.permute.xlu0 %3173  ;;  %11727 = vst [vmem:[#allocation125_spill] sm:$0xff] %v9174_v46 }
 0x6cd   : > { %11712 = vst [vmem:[#allocation128_spill] sm:$0xff] %v9121_v17 }
 0x6cf   : > { %3473 = vperm.xlu1 %5675, %v3155_v45   ;;  %5678 = vset.pattern.permute.xlu0 %v11620_v5 }
 0x6d0   : > { %v9133_v42 = vpop.permute.xlu0 %3253  ;;  %3397 = vperm.xlu0 %5678, %v3136_v2  }
 0x6d1   : > { %11716 = vst [vmem:[#allocation82_spill] sm:$0xff] %v9133_v42  ;;  %v9135_v20 = vpop.permute.xlu1 %3168 }
 0x6d2   : > { %11717 = vst [vmem:[#allocation137_spill] sm:$0xff] %v9135_v20 }
 0x6d3   : > { %5676 = vset.pattern.permute.xlu1 %v11623_v30 }
 0x6d4   : > { %3218 = vperm.xlu1 %5676, %v3136_v2   ;;  %3461 = vperm.xlu0 %5678, %v3152_v55   ;;  %v9164_v2 = vmul.f32 %v9131_v48, %v9131_v48  ;;  %v9227_v48 = vmul.f32 %v9055_v57, %v9055_v57 }
 0x6d5   : > { %v9140_v15 = vpop.permute.xlu1 %3248  ;;  %v9142_v45 = vpop.permute.xlu0 %3421 }
 0x6d6   : > { %11718 = vst [vmem:[#allocation37_spill] sm:$0xff] %v9140_v15  ;;  %11719 = vst [vmem:[#allocation127_spill] sm:$0xff] %v9142_v45  ;;  %v11735_v45 = vld [vmem:[#allocation163_spill] sm:$0xff]  ;;  %v11754_v15 = vld [vmem:[#allocation172_spill] sm:$0xff] }
 0x6d7   : > { %11724 = vst [vmem:[#allocation79_spill] sm:$0xff] %v9164_v2  ;;  %11741 = vst [vmem:[#allocation131_spill] sm:$0xff] %v9227_v48 }
 0x6d8   : > { %3298 = vperm.xlu1 %5676, %v3152_v55   ;;  %3652 = vrot.lane.b32.xlu0 %v9146_v14, %s6039_s23 }
 0x6d9   : > { %5680 = vset.pattern.permute.xlu0 %v11623_v30 }
 0x6da   : > { %v9155_v56 = vpop.permute.xlu1 %3357  ;;  %v9157_v51 = vpop.permute.xlu0 %3158 }
 0x6db   : > { %11722 = vst [vmem:[#allocation39_spill] sm:$0xff] %v9155_v56  ;;  %11723 = vst [vmem:[#allocation59_spill] sm:$0xff] %v9157_v51 }
 0x6dc   : > { %5679 = vset.pattern.permute.xlu1 %v11620_v5  ;;  %3656 = vrot.lane.b32.xlu0 %v9153_v43, %s6039_s23 }
 0x6dd   : > { %3401 = vperm.xlu1 %5679, %v3137_v19   ;;  %v9180_v19 = vmul.f32 %v8910_v61, %v8910_v61 }
 0x6de   : > { %v9166_v55 = vpop.permute.xlu1 %3361  ;;  %v9168_v31 = vpop.permute.xlu0 %3243 }
 0x6df   : > { %11725 = vst [vmem:[#allocation134_spill] sm:$0xff] %v9166_v55  ;;  %11726 = vst [vmem:[#allocation138_spill] sm:$0xff] %v9168_v31 }
 0x6e0   : > { %3660 = vrot.lane.b32.xlu0 %v9164_v2, %s6039_s23 }
 0x6e1   : > { %3465 = vperm.xlu1 %5679, %v3153_v33   ;;  %v9191_v33 = vmul.f32 %v9013_v27, %v9013_v27 }
 0x6e2   : > { %v9176_v5 = vpop.permute.xlu1 %3425 }
 0x6e3   : > { %11728 = vst [vmem:[#allocation84_spill] sm:$0xff] %v9176_v5  ;;  %v9182_v24 = vpop.permute.xlu0 %3353  ;;  %v9203_v5 = vmul.f32 %v8971_v41, %v8971_v41  ;;  %v11743_v41 = vld [vmem:[#allocation171_spill] sm:$0xff] }
 0x6e4   : > { %11729 = vst [vmem:[#allocation62_spill] sm:$0xff] %v9182_v24  ;;  %3664 = vrot.lane.b32.xlu0 %v9174_v46, %s6039_s23  ;;  %v11739_v24 = vld [vmem:[#allocation166_spill] sm:$0xff] }
 0x6e5   : > { %3650 = vrot.lane.b32.xlu1 %v9180_v19, %s6039_s23  ;;  %11733 = vst [vmem:[#allocation132_spill] sm:$0xff] %v9203_v5  ;;  %v3704_v51 = vadd.f32 %v11808_v10, %v11739_v24 }
 0x6e6   : > { %5681 = vset.pattern.permute.xlu1 %v11623_v30 }
 0x6e7   : > { %v9193_v36 = vpop.permute.xlu1 %3163  ;;  %v9195_v32 = vpop.permute.xlu0 %3413 }
 0x6e8   : > { %11730 = vst [vmem:[#allocation57_spill] sm:$0xff] %v9193_v36  ;;  %11731 = vst [vmem:[#allocation142_spill] sm:$0xff] %v9195_v32  ;;  %3732 = vrot.lane.b32.xlu0 %v11732_v44, %s6040_s24  ;;  %v9215_v32 = vmul.f32 %v9107_v9, %v9107_v9  ;;  %v11745_v9 = vld [vmem:[#allocation174_spill] sm:$0xff]  ;;  %v3702_v36 = vadd.f32 %v11806_v28, %v11735_v45 }
 0x6e9   : > { %3654 = vrot.lane.b32.xlu1 %v9191_v33, %s6039_s23 }
 0x6ea   : > { %11737 = vst [vmem:[#allocation63_spill] sm:$0xff] %v9215_v32 }
 0x6eb   : > { %v9205_v30 = vpop.permute.xlu1 %3238 }
 0x6ec   : > { %11734 = vst [vmem:[#allocation135_spill] sm:$0xff] %v9205_v30  ;;  %3736 = vrot.lane.b32.xlu0 %v11735_v45, %s6040_s24  ;;  %v9209_v55 = vpop.permute.xlu0 %3193 }
 0x6ed   : > { %11736 = vst [vmem:[#allocation66_spill] sm:$0xff] %v9209_v55  ;;  %3658 = vrot.lane.b32.xlu1 %v9203_v5, %s6039_s23 }
 0x6f0   : > { %v9217_v56 = vpop.permute.xlu1 %3349  ;;  %3740 = vrot.lane.b32.xlu0 %v11739_v24, %s6040_s24  ;;  %v9221_v3 = vpop.permute.xlu0 %3273 }
 0x6f1   : > { %11738 = vst [vmem:[#allocation139_spill] sm:$0xff] %v9217_v56  ;;  %11740 = vst [vmem:[#allocation144_spill] sm:$0xff] %v9221_v3  ;;  %3662 = vrot.lane.b32.xlu1 %v9215_v32, %s6039_s23  ;;  %v11750_v3 = vld [vmem:[#allocation167_spill] sm:$0xff] }
 0x6f4   : > { %v9229_v37 = vpop.permute.xlu1 %3417  ;;  %3744 = vrot.lane.b32.xlu0 %v11743_v41, %s6040_s24 }
 0x6f5   : > { %11742 = vst [vmem:[#allocation65_spill] sm:$0xff] %v9229_v37  ;;  %3666 = vrot.lane.b32.xlu1 %v9227_v48, %s6039_s23  ;;  %v9235_v56 = vpop.permute.xlu0 %3373  ;;  %v11749_v37 = vld [vmem:[#allocation178_spill] sm:$0xff] }
 0x6f6   : > { %11744 = vst [vmem:[#allocation61_spill] sm:$0xff] %v9235_v56  ;;  %v11753_v56 = vld [vmem:[#allocation184_spill] sm:$0xff] }
 0x6f8   : > { %3748 = vrot.lane.b32.xlu0 %v11745_v9, %s6040_s24 }
 0x6f9   : > { %3734 = vrot.lane.b32.xlu1 %v11746_v23, %s6040_s24  ;;  %v9241_v27 = vpop.permute.xlu1 %3188  ;;  %v9243_v57 = vpop.permute.xlu0 %3437 }
 0x6fa   : > { %11747 = vst [vmem:[#allocation140_spill] sm:$0xff] %v9241_v27  ;;  %11748 = vst [vmem:[#allocation171_spill] sm:$0xff] %v9243_v57  ;;  %v11757_v57 = vld [vmem:[#allocation187_spill] sm:$0xff] }
 0x6fc   : > { %3752 = vrot.lane.b32.xlu0 %v11749_v37, %s6040_s24 }
 0x6fd   : > { %3738 = vrot.lane.b32.xlu1 %v11750_v3, %s6040_s24  ;;  %v9249_v61 = vpop.permute.xlu1 %3268 }
 0x6fe   : > { %11751 = vst [vmem:[#allocation174_spill] sm:$0xff] %v9249_v61  ;;  %v9251_v34 = vpop.permute.xlu0 %3183 }
 0x6ff   : > { %11752 = vst [vmem:[#allocation147_spill] sm:$0xff] %v9251_v34 }
 0x700   : > { %3756 = vrot.lane.b32.xlu0 %v11753_v56, %s6040_s24 }
 0x701   : > { %3742 = vrot.lane.b32.xlu1 %v11754_v15, %s6040_s24 }
 0x702   : > { %v9257_v42 = vpop.permute.xlu1 %3377  ;;  %v9259_v30 = vpop.permute.xlu0 %3263 }
 0x703   : > { %11755 = vst [vmem:[#allocation167_spill] sm:$0xff] %v9257_v42  ;;  %11756 = vst [vmem:[#allocation184_spill] sm:$0xff] %v9259_v30  ;;  %v11764_v30 = vld [vmem:[#allocation183_spill] sm:$0xff] }
 0x704   : > { %3760 = vrot.lane.b32.xlu0 %v11757_v57, %s6040_s24 }
 0x705   : > { %3746 = vrot.lane.b32.xlu1 %v11758_v1, %s6040_s24 }
 0x706   : > { %v9265_v31 = vpop.permute.xlu1 %3441 }
 0x707   : > { %11759 = vst [vmem:[#allocation172_spill] sm:$0xff] %v9265_v31  ;;  %v9267_v61 = vpop.permute.xlu0 %3365 }
 0x708   : > { %11760 = vst [vmem:[#allocation187_spill] sm:$0xff] %v9267_v61  ;;  %3764 = vrot.lane.b32.xlu0 %v8739_v11, %s6040_s24  ;;  %v11767_v61 = vld [vmem:[#allocation186_spill] sm:$0xff] }
 0x709   : > { %3750 = vrot.lane.b32.xlu1 %v11761_v0, %s6040_s24 }
 0x70b   : > { %v9273_v26 = vpop.permute.xlu1 %3178  ;;  %v9275_v42 = vpop.permute.xlu0 %3429 }
 0x70c   : > { %11762 = vst [vmem:[#allocation175_spill] sm:$0xff] %v9273_v26  ;;  %11763 = vst [vmem:[#allocation180_spill] sm:$0xff] %v9275_v42  ;;  %3768 = vrot.lane.b32.xlu0 %v8769_v62, %s6040_s24 }
 0x70d   : > { %3754 = vrot.lane.b32.xlu1 %v11764_v30, %s6040_s24 }
 0x70f   : > { %v9281_v59 = vpop.permute.xlu1 %3258 }
 0x710   : > { %11765 = vst [vmem:[#allocation183_spill] sm:$0xff] %v9281_v59  ;;  %3772 = vrot.lane.b32.xlu0 %v8788_v7, %s6040_s24  ;;  %v9285_v31 = vpop.permute.xlu0 %3213 }
 0x711   : > { %11766 = vst [vmem:[#allocation188_spill] sm:$0xff] %v9285_v31  ;;  %3758 = vrot.lane.b32.xlu1 %v11767_v61, %s6040_s24 }
 0x714   : > { %v9289_v40 = vpop.permute.xlu1 %3369  ;;  %3776 = vrot.lane.b32.xlu0 %v8805_v54, %s6040_s24  ;;  %v9293_v42 = vpop.permute.xlu0 %3293 }
 0x715   : > { %11768 = vst [vmem:[#allocation186_spill] sm:$0xff] %v9289_v40  ;;  %11769 = vst [vmem:[#allocation189_spill] sm:$0xff] %v9293_v42  ;;  %3762 = vrot.lane.b32.xlu1 %v8747_v53, %s6040_s24 }
 0x718   : > { %v9297_v8 = vpop.permute.xlu1 %3433  ;;  %3780 = vrot.lane.b32.xlu0 %v9146_v14, %s6040_s24 }
 0x719   : > { %11770 = vst [vmem:[#allocation190_spill] sm:$0xff] %v9297_v8  ;;  %3766 = vrot.lane.b32.xlu1 %v8765_v4, %s6040_s24  ;;  %v9303_v59 = vpop.permute.xlu0 %3389  ;;  %v11774_v8 = vld [vmem:[#allocation100_spill] sm:$0xff] }
 0x71a   : > { %11771 = vst [vmem:[#allocation191_spill] sm:$0xff] %v9303_v59 }
 0x71c   : > { %3784 = vrot.lane.b32.xlu0 %v9153_v43, %s6040_s24 }
 0x71d   : > { %3770 = vrot.lane.b32.xlu1 %v8784_v60, %s6040_s24  ;;  %v9309_v40 = vpop.permute.xlu1 %3208  ;;  %v9311_v42 = vpop.permute.xlu0 %3453 }
 0x71e   : > { %11772 = vst [vmem:[#allocation192_spill] sm:$0xff] %v9309_v40  ;;  %11773 = vst [vmem:[#allocation193_spill] sm:$0xff] %v9311_v42 }
 0x720   : > { %3788 = vrot.lane.b32.xlu0 %v9164_v2, %s6040_s24 }
 0x721   : > { %3774 = vrot.lane.b32.xlu1 %v11774_v8, %s6040_s24  ;;  %v9317_v12 = vpop.permute.xlu1 %3288 }
 0x722   : > { %11775 = vst [vmem:[#allocation100_spill] sm:$0xff] %v9317_v12  ;;  %v9319_v31 = vpop.permute.xlu0 %3203 }
 0x723   : > { %11776 = vst [vmem:[#allocation194_spill] sm:$0xff] %v9319_v31 }
 0x724   : > { %3792 = vrot.lane.b32.xlu0 %v9174_v46, %s6040_s24 }
 0x725   : > { %3778 = vrot.lane.b32.xlu1 %v9180_v19, %s6040_s24 }
 0x726   : > { %v9325_v59 = vpop.permute.xlu1 %3393  ;;  %v9327_v40 = vpop.permute.xlu0 %3283 }
 0x727   : > { %11777 = vst [vmem:[#allocation195_spill] sm:$0xff] %v9325_v59  ;;  %11778 = vst [vmem:[#allocation196_spill] sm:$0xff] %v9327_v40 }
 0x729   : > { %3782 = vrot.lane.b32.xlu1 %v9191_v33, %s6040_s24 }
 0x72a   : > { %v9331_v42 = vpop.permute.xlu1 %3457 }
 0x72b   : > { %11779 = vst [vmem:[#allocation197_spill] sm:$0xff] %v9331_v42  ;;  %v9333_v49 = vpop.permute.xlu0 %3381 }
 0x72c   : > { %11780 = vst [vmem:[#allocation198_spill] sm:$0xff] %v9333_v49 }
 0x72d   : > { %3786 = vrot.lane.b32.xlu1 %v9203_v5, %s6040_s24 }
 0x72f   : > { %v9337_v12 = vpop.permute.xlu1 %3198  ;;  %v9339_v50 = vpop.permute.xlu0 %3445 }
 0x730   : > { %11781 = vst [vmem:[#allocation199_spill] sm:$0xff] %v9337_v12  ;;  %11782 = vst [vmem:[#allocation200_spill] sm:$0xff] %v9339_v50 }
 0x731   : > { %3790 = vrot.lane.b32.xlu1 %v9215_v32, %s6040_s24 }
 0x733   : > { %v9343_v59 = vpop.permute.xlu1 %3278 }
 0x734   : > { %11783 = vst [vmem:[#allocation201_spill] sm:$0xff] %v9343_v59  ;;  %v9345_v40 = vpop.permute.xlu0 %3233 }
 0x735   : > { %11784 = vst [vmem:[#allocation202_spill] sm:$0xff] %v9345_v40  ;;  %3794 = vrot.lane.b32.xlu1 %v9227_v48, %s6040_s24  ;;  %v3703_v48 = vadd.f32 %v11809_v29, %v11750_v3 }
 0x738   : > { %v9349_v42 = vpop.permute.xlu1 %3385  ;;  %v9351_v49 = vpop.permute.xlu0 %3313 }
 0x739   : > { %11785 = vst [vmem:[#allocation203_spill] sm:$0xff] %v9349_v42  ;;  %11786 = vst [vmem:[#allocation204_spill] sm:$0xff] %v9351_v49 }
 0x73c   : > { %v9353_v31 = vpop.permute.xlu1 %3449 }
 0x73d   : > { %11787 = vst [vmem:[#allocation205_spill] sm:$0xff] %v9353_v31  ;;  %v9355_v13 = vpop.permute.xlu0 %3405 }
 0x73e   : > { %11788 = vst [vmem:[#allocation206_spill] sm:$0xff] %v9355_v13 }
 0x741   : > { %v9357_v12 = vpop.permute.xlu1 %3228  ;;  %v9359_v50 = vpop.permute.xlu0 %3469 }
 0x742   : > { %11789 = vst [vmem:[#allocation207_spill] sm:$0xff] %v9357_v12  ;;  %11790 = vst [vmem:[#allocation208_spill] sm:$0xff] %v9359_v50 }
 0x745   : > { %v9361_v27 = vpop.permute.xlu1 %3308 }
 0x746   : > { %11791 = vst [vmem:[#allocation209_spill] sm:$0xff] %v9361_v27  ;;  %v9363_v59 = vpop.permute.xlu0 %3223 }
 0x747   : > { %11792 = vst [vmem:[#allocation210_spill] sm:$0xff] %v9363_v59 }
 0x74a   : > { %v9365_v40 = vpop.permute.xlu1 %3409  ;;  %v9367_v25 = vpop.permute.xlu0 %3303 }
 0x74b   : > { %11793 = vst [vmem:[#allocation211_spill] sm:$0xff] %v9365_v40  ;;  %11794 = vst [vmem:[#allocation212_spill] sm:$0xff] %v9367_v25 }
 0x74e   : > { %v9369_v55 = vpop.permute.xlu1 %3473 }
 0x74f   : > { %11795 = vst [vmem:[#allocation213_spill] sm:$0xff] %v9369_v55  ;;  %v9371_v42 = vpop.permute.xlu0 %3397 }
 0x750   : > { %11796 = vst [vmem:[#allocation214_spill] sm:$0xff] %v9371_v42  ;;  %v11803_v42 = vld [vmem:[#allocation148_spill] sm:$0xff] }
 0x753   : > { %v9373_v49 = vpop.permute.xlu1 %3218  ;;  %v9375_v31 = vpop.permute.xlu0 %3461 }
 0x754   : > { %11797 = vst [vmem:[#allocation215_spill] sm:$0xff] %v9373_v49  ;;  %11798 = vst [vmem:[#allocation216_spill] sm:$0xff] %v9375_v31  ;;  %v3700_v49 = vadd.f32 %v11803_v42, %v11732_v44  ;;  %v11807_v42 = vld [vmem:[#allocation91_spill] sm:$0xff] }
 0x757   : > { %v9377_v13 = vpop.permute.xlu1 %3298  ;;  %v9379_v12 = vpop.permute.xlu0 %3652 }
 0x758   : > { %11799 = vst [vmem:[#allocation217_spill] sm:$0xff] %v9377_v13 }
 0x75b   : > { %v9381_v50 = vpop.permute.xlu0 %3656 }
 0x75c   : > { %v9383_v27 = vpop.permute.xlu1 %3401 }
 0x75d   : > { %11800 = vst [vmem:[#allocation218_spill] sm:$0xff] %v9383_v27 }
 0x75f   : > { %v9385_v59 = vpop.permute.xlu0 %3660 }
 0x760   : > { %v9387_v40 = vpop.permute.xlu1 %3465 }
 0x761   : > { %11801 = vst [vmem:[#allocation219_spill] sm:$0xff] %v9387_v40 }
 0x763   : > { %v9389_v25 = vpop.permute.xlu0 %3664 }
 0x764   : > { %11802 = vst [vmem:[#allocation220_spill] sm:$0xff] %v9389_v25  ;;  %v9391_v55 = vpop.permute.xlu1 %3650 }
 0x767   : > { %v3733_v31 = vpop.permute.xlu0 %3732 }
 0x768   : > { %v3828_v16 = vadd.f32 %v3733_v31, %v3700_v49  ;;  %v9395_v13 = vpop.permute.xlu1 %3654  ;;  %v3701_v49 = vadd.f32 %v11807_v42, %v11746_v23  ;;  %v11810_v42 = vld [vmem:[#allocation149_spill] sm:$0xff] }
 0x76a   : > { %v3860_v26 = vmax.f32 %v3828_v16, 1e-24 }
 0x76b   : > { %v3737_v47 = vpop.permute.xlu0 %3736 }
 0x76c   : > { %5814 = vrsqrt.f32 %v3860_v26  ;;  %v9397_v34 = vpop.permute.xlu1 %3658  ;;  %v3830_v16 = vadd.f32 %v3737_v47, %v3702_v36  ;;  %v11811_v47 = vld [vmem:[#allocation155_spill] sm:$0xff] }
 0x76d   : > { %v3705_v36 = vadd.f32 %v11811_v47, %v11754_v15 }
 0x76e   : > { %v3862_v32 = vmax.f32 %v3830_v16, 1e-24  ;;  %v11812_v16 = vld [vmem:[#allocation88_spill] sm:$0xff] }
 0x76f   : > { %v3741_v27 = vpop.permute.xlu0 %3740 }
 0x770   : > { %v9399_v18 = vpop.permute.xlu1 %3662  ;;  %v3832_v25 = vadd.f32 %v3741_v27, %v3704_v51  ;;  %v3708_v27 = vadd.f32 %v11812_v16, %v11745_v9 }
 0x771   : > { %11804 = vst [vmem:[#allocation148_spill] sm:$0xff] %v9399_v18 }
 0x772   : > { %v3864_v10 = vmax.f32 %v3832_v25, 1e-24  ;;  %v11814_v25 = vld [vmem:[#allocation45_spill] sm:$0xff] }
 0x773   : > { %v3745_v40 = vpop.permute.xlu0 %3744 }
 0x774   : > { %v9401_v20 = vpop.permute.xlu1 %3666 }
 0x775   : > { %11805 = vst [vmem:[#allocation221_spill] sm:$0xff] %v9401_v20 }
 0x776   : > { %v5815_v17 = vpop.eup %5814 }
 0x777   : > { %3926 = vperm.xlu0 %5680, %v5815_v17   ;;  %v3749_v31 = vpop.permute.xlu0 %3748  ;;  %v3706_v17 = vadd.f32 %v11810_v42, %v11743_v41 }
 0x778   : > { %v3735_v44 = vpop.permute.xlu1 %3734  ;;  %v3836_v42 = vadd.f32 %v3749_v31, %v3708_v27 }
 0x779   : > { %v3829_v26 = vadd.f32 %v3735_v44, %v3701_v49  ;;  %v3834_v24 = vadd.f32 %v3745_v40, %v3706_v17 }
 0x77a   : > { %v3868_v16 = vmax.f32 %v3836_v42, 1e-24 }
 0x77b   : > { %v3861_v18 = vmax.f32 %v3829_v26, 1e-24  ;;  %v3753_v20 = vpop.permute.xlu0 %3752  ;;  %v3866_v26 = vmax.f32 %v3834_v24, 1e-24 }
 0x77c   : > { %v3739_v46 = vpop.permute.xlu1 %3738 }
 0x77d   : > { %5816 = vrsqrt.f32 %v3861_v18  ;;  %v3831_v28 = vadd.f32 %v3739_v46, %v3703_v48  ;;  %v11813_v18 = vld [vmem:[#allocation93_spill] sm:$0xff] }
 0x77e   : > { %5818 = vrsqrt.f32 %v3862_v32  ;;  %v3707_v46 = vadd.f32 %v11813_v18, %v11758_v1  ;;  %v3710_v32 = vadd.f32 %v11814_v25, %v11749_v37 }
 0x77f   : > { %v3863_v44 = vmax.f32 %v3831_v28, 1e-24  ;;  %v3757_v49 = vpop.permute.xlu0 %3756 }
 0x780   : > { %v3743_v45 = vpop.permute.xlu1 %3742  ;;  %v3838_v18 = vadd.f32 %v3753_v20, %v3710_v32  ;;  %v11818_v32 = vld [vmem:[#allocation101_spill] sm:$0xff] }
 0x781   : > { %5820 = vrsqrt.f32 %v3863_v44  ;;  %v3833_v29 = vadd.f32 %v3743_v45, %v3705_v36  ;;  %v11815_v45 = vld [vmem:[#allocation150_spill] sm:$0xff] }
 0x782   : > { %5822 = vrsqrt.f32 %v3864_v10  ;;  %v3709_v17 = vadd.f32 %v11815_v45, %v11761_v0  ;;  %v11816_v10 = vld [vmem:[#allocation92_spill] sm:$0xff] }
 0x783   : > { %v3865_v48 = vmax.f32 %v3833_v29, 1e-24  ;;  %v3761_v51 = vpop.permute.xlu0 %3760  ;;  %v3712_v27 = vadd.f32 %v11816_v10, %v11753_v56 }
 0x784   : > { %v3747_v47 = vpop.permute.xlu1 %3746 }
 0x785   : > { %5824 = vrsqrt.f32 %v3865_v48  ;;  %v3835_v28 = vadd.f32 %v3747_v47, %v3707_v46  ;;  %v11817_v48 = vld [vmem:[#allocation46_spill] sm:$0xff]  ;;  %v3840_v45 = vadd.f32 %v3757_v49, %v3712_v27  ;;  %v3716_v27 = vadd.f32 %v9058_v6, %v8739_v11 }
 0x786   : > { %5826 = vrsqrt.f32 %v3866_v26  ;;  %v3711_v47 = vadd.f32 %v11817_v48, %v11764_v30  ;;  %v3715_v48 = vadd.f32 %v9071_v39, %v8747_v53  ;;  %v3717_v6 = vadd.f32 %v9092_v58, %v8765_v4 }
 0x787   : > { %v5817_v40 = vpop.eup %5816  ;;  %v3867_v36 = vmax.f32 %v3835_v28, 1e-24  ;;  %v3765_v44 = vpop.permute.xlu0 %3764  ;;  %v3870_v28 = vmax.f32 %v3838_v18, 1e-24 }
 0x788   : > { %3931 = vperm.xlu1 %5681, %v5817_v40   ;;  %v3751_v29 = vpop.permute.xlu1 %3750  ;;  %v5819_v31 = vpop.eup %5818  ;;  %v3714_v40 = vadd.f32 %v11818_v32, %v11757_v57 }
 0x789   : > { %5828 = vrsqrt.f32 %v3867_v36  ;;  %v3837_v24 = vadd.f32 %v3751_v29, %v3709_v17  ;;  %v3713_v36 = vadd.f32 %v8843_v52, %v11767_v61 }
 0x78a   : > { %5830 = vrsqrt.f32 %v3868_v16  ;;  %v3842_v16 = vadd.f32 %v3761_v51, %v3714_v40 }
 0x78b   : > { %v5821_v46 = vpop.eup %5820  ;;  %v3869_v25 = vmax.f32 %v3837_v24, 1e-24  ;;  %v3769_v37 = vpop.permute.xlu0 %3768  ;;  %v3872_v24 = vmax.f32 %v3840_v45, 1e-24 }
 0x78c   : > { %v3755_v26 = vpop.permute.xlu1 %3754  ;;  %3941 = vperm.xlu0 %5680, %v5821_v46   ;;  %3936 = vperm.xlu1 %5681, %v5819_v31   ;;  %v5823_v42 = vpop.eup %5822  ;;  %v3874_v52 = vmax.f32 %v3842_v16, 1e-24 }
 0x78d   : > { %5832 = vrsqrt.f32 %v3869_v25  ;;  %v3839_v20 = vadd.f32 %v3755_v26, %v3711_v47  ;;  %v3844_v25 = vadd.f32 %v3765_v44, %v3716_v27 }
 0x78e   : > { %5834 = vrsqrt.f32 %v3870_v28 }
 0x78f   : > { %v5825_v17 = vpop.eup %5824  ;;  %v3871_v29 = vmax.f32 %v3839_v20, 1e-24  ;;  %v3773_v10 = vpop.permute.xlu0 %3772  ;;  %v3718_v20 = vadd.f32 %v9077_v63, %v8769_v62  ;;  %v3876_v39 = vmax.f32 %v3844_v25, 1e-24  ;;  %v3719_v63 = vadd.f32 %v9109_v38, %v8784_v60 }
 0x790   : > { %v3759_v18 = vpop.permute.xlu1 %3758  ;;  %3951 = vperm.xlu0 %5680, %v5825_v17   ;;  %3946 = vperm.xlu1 %5681, %v5823_v42   ;;  %v5827_v31 = vpop.eup %5826 }
 0x791   : > { %5836 = vrsqrt.f32 %v3871_v29  ;;  %v3841_v49 = vadd.f32 %v3759_v18, %v3713_v36  ;;  %v3846_v40 = vadd.f32 %v3769_v37, %v3718_v20  ;;  %v3720_v29 = vadd.f32 %v9095_v22, %v8788_v7 }
 0x792   : > { %5838 = vrsqrt.f32 %v3872_v24  ;;  %v3721_v22 = vadd.f32 %v9123_v21, %v11774_v8 }
 0x793   : > { %v5829_v46 = vpop.eup %5828  ;;  %v3873_v47 = vmax.f32 %v3841_v49, 1e-24  ;;  %v3777_v51 = vpop.permute.xlu0 %3776  ;;  %v3878_v58 = vmax.f32 %v3846_v40, 1e-24  ;;  %v3848_v49 = vadd.f32 %v3773_v10, %v3720_v29  ;;  %v3726_v40 = vadd.f32 %v9381_v50, %v9153_v43  ;;  %v11887_v43 = vld [vmem:[#allocation60_spill] sm:$0xff] }
 0x794   : > { %v3763_v28 = vpop.permute.xlu1 %3762  ;;  %3961 = vperm.xlu0 %5680, %v5829_v46   ;;  %3956 = vperm.xlu1 %5681, %v5827_v31   ;;  %v5831_v26 = vpop.eup %5830  ;;  %v3722_v46 = vadd.f32 %v9112_v35, %v8805_v54  ;;  %v3723_v35 = vadd.f32 %v9391_v55, %v9180_v19  ;;  %v3727_v50 = vadd.f32 %v9397_v34, %v9203_v5  ;;  %v11888_v5 = vld [vmem:[#allocation209_spill] sm:$0xff] }
 0x795   : > { %5840 = vrsqrt.f32 %v3873_v47  ;;  %v3843_v45 = vadd.f32 %v3763_v28, %v3715_v48  ;;  %v3880_v38 = vmax.f32 %v3848_v49, 1e-24 }
 0x796   : > { %5842 = vrsqrt.f32 %v3874_v52  ;;  %v3850_v52 = vadd.f32 %v3777_v51, %v3722_v46 }
 0x797   : > { %v5833_v42 = vpop.eup %5832  ;;  %v3875_v32 = vmax.f32 %v3843_v45, 1e-24  ;;  %v3781_v16 = vpop.permute.xlu0 %3780 }
 0x798   : > { %v3767_v17 = vpop.permute.xlu1 %3766  ;;  %3971 = vperm.xlu0 %5680, %v5833_v42   ;;  %3966 = vperm.xlu1 %5681, %v5831_v26   ;;  %v5835_v36 = vpop.eup %5834  ;;  %v3724_v26 = vadd.f32 %v9379_v12, %v9146_v14  ;;  %v3882_v21 = vmax.f32 %v3850_v52, 1e-24  ;;  %v3725_v12 = vadd.f32 %v9395_v13, %v9191_v33 }
 0x799   : > { %5844 = vrsqrt.f32 %v3875_v32  ;;  %v3845_v44 = vadd.f32 %v3767_v17, %v3717_v6 }
 0x79a   : > { %5846 = vrsqrt.f32 %v3876_v39  ;;  %v3852_v6 = vadd.f32 %v3781_v16, %v3724_v26 }
 0x79b   : > { %v5837_v24 = vpop.eup %5836  ;;  %v3877_v18 = vmax.f32 %v3845_v44, 1e-24  ;;  %v3785_v10 = vpop.permute.xlu0 %3784 }
 0x79c   : > { %v3771_v31 = vpop.permute.xlu1 %3770  ;;  %3981 = vperm.xlu0 %5680, %v5837_v24   ;;  %3976 = vperm.xlu1 %5681, %v5835_v36   ;;  %v5839_v27 = vpop.eup %5838  ;;  %v3884_v55 = vmax.f32 %v3852_v6, 1e-24  ;;  %v3854_v29 = vadd.f32 %v3785_v10, %v3726_v40  ;;  %v11824_v6 = vld [vmem:[#allocation221_spill] sm:$0xff] }
 0x79d   : > { %5848 = vrsqrt.f32 %v3877_v18  ;;  %v3847_v37 = vadd.f32 %v3771_v31, %v3719_v63  ;;  %v3728_v18 = vadd.f32 %v9385_v59, %v9164_v2  ;;  %v11821_v59 = vld [vmem:[#allocation63_spill] sm:$0xff]  ;;  %v11883_v2 = vld [vmem:[#allocation120_spill] sm:$0xff] }
 0x79e   : > { %5850 = vrsqrt.f32 %v3878_v58  ;;  %v3886_v13 = vmax.f32 %v3854_v29, 1e-24 }
 0x79f   : > { %v5841_v48 = vpop.eup %5840  ;;  %v3879_v47 = vmax.f32 %v3847_v37, 1e-24  ;;  %v3789_v44 = vpop.permute.xlu0 %3788 }
 0x7a0   : > { %v3775_v25 = vpop.permute.xlu1 %3774  ;;  %3991 = vperm.xlu0 %5680, %v5841_v48   ;;  %3986 = vperm.xlu1 %5681, %v5839_v27   ;;  %v5843_v45 = vpop.eup %5842  ;;  %v3856_v31 = vadd.f32 %v3789_v44, %v3728_v18 }
 0x7a1   : > { %5852 = vrsqrt.f32 %v3879_v47  ;;  %v3849_v28 = vadd.f32 %v3775_v25, %v3721_v22  ;;  %v11819_v22 = vld [vmem:[#allocation125_spill] sm:$0xff]  ;;  %v11820_v47 = vld [vmem:[#allocation220_spill] sm:$0xff] }
 0x7a2   : > { %5854 = vrsqrt.f32 %v3880_v38  ;;  %v3730_v38 = vadd.f32 %v11820_v47, %v11819_v22  ;;  %v11822_v25 = vld [vmem:[#allocation148_spill] sm:$0xff]  ;;  %v3888_v34 = vmax.f32 %v3856_v31, 1e-24  ;;  %v11828_v31 = vld [vmem:[#allocation57_spill] sm:$0xff]  ;;  %v11831_v47 = vld [vmem:[#allocation162_spill] sm:$0xff] }
 0x7a3   : > { %v5845_v20 = vpop.eup %5844  ;;  %v3881_v42 = vmax.f32 %v3849_v28, 1e-24  ;;  %v3793_v27 = vpop.permute.xlu0 %3792  ;;  %v3729_v10 = vadd.f32 %v11822_v25, %v11821_v59  ;;  %v11833_v25 = vld [vmem:[#allocation169_spill] sm:$0xff]  ;;  %v11879_v22 = vld [vmem:[#allocation111_spill] sm:$0xff] }
 0x7a4   : > { %v3779_v32 = vpop.permute.xlu1 %3778  ;;  %4001 = vperm.xlu0 %5680, %v5845_v20   ;;  %3996 = vperm.xlu1 %5681, %v5843_v45   ;;  %v5847_v39 = vpop.eup %5846  ;;  %v3858_v45 = vadd.f32 %v3793_v27, %v3730_v38  ;;  %v11829_v27 = vld [vmem:[#allocation165_spill] sm:$0xff] }
 0x7a5   : > { %5856 = vrsqrt.f32 %v3881_v42  ;;  %v3851_v51 = vadd.f32 %v3779_v32, %v3723_v35  ;;  %v11832_v38 = vld [vmem:[#allocation137_spill] sm:$0xff] }
 0x7a6   : > { %5858 = vrsqrt.f32 %v3882_v21  ;;  %v11823_v21 = vld [vmem:[#allocation131_spill] sm:$0xff]  ;;  %v11884_v59 = vld [vmem:[#allocation217_spill] sm:$0xff] }
 0x7a7   : > { %v5849_v17 = vpop.eup %5848  ;;  %v3883_v36 = vmax.f32 %v3851_v51, 1e-24  ;;  %v3731_v32 = vadd.f32 %v11824_v6, %v11823_v21  ;;  %v11839_v6 = vld [vmem:[#allocation168_spill] sm:$0xff] }
 0x7a8   : > { %v3783_v24 = vpop.permute.xlu1 %3782  ;;  %4011 = vperm.xlu0 %5680, %v5849_v17   ;;  %4006 = vperm.xlu1 %5681, %v5847_v39   ;;  %v5851_v16 = vpop.eup %5850  ;;  %v3890_v39 = vmax.f32 %v3858_v45, 1e-24  ;;  %v11836_v45 = vld [vmem:[#allocation175_spill] sm:$0xff]  ;;  %v11880_v21 = vld [vmem:[#allocation100_spill] sm:$0xff] }
 0x7a9   : > { %5860 = vrsqrt.f32 %v3883_v36  ;;  %v3853_v63 = vadd.f32 %v3783_v24, %v3725_v12 }
 0x7aa   : > { %5862 = vrsqrt.f32 %v3884_v55 }
 0x7ab   : > { %v5853_v58 = vpop.eup %5852  ;;  %v3885_v49 = vmax.f32 %v3853_v63, 1e-24 }
 0x7ac   : > { %v3787_v37 = vpop.permute.xlu1 %3786  ;;  %4021 = vperm.xlu0 %5680, %v5853_v58   ;;  %4016 = vperm.xlu1 %5681, %v5851_v16   ;;  %v5855_v48 = vpop.eup %5854  ;;  %v11825_v58 = vld [vmem:[#allocation160_spill] sm:$0xff] }
 0x7ad   : > { %5864 = vrsqrt.f32 %v3885_v49  ;;  %v3855_v46 = vadd.f32 %v3787_v37, %v3727_v50  ;;  %v11826_v50 = vld [vmem:[#allocation59_spill] sm:$0xff] }
 0x7ae   : > { %5866 = vrsqrt.f32 %v3886_v13  ;;  %v3316_v49 = vmul.f32 %v11826_v50, %v11825_v58  ;;  %v11827_v13 = vld [vmem:[#allocation146_spill] sm:$0xff]  ;;  %v11849_v50 = vld [vmem:[#allocation185_spill] sm:$0xff] }
 0x7af   : > { %v5857_v52 = vpop.eup %5856  ;;  %v3887_v28 = vmax.f32 %v3855_v46, 1e-24  ;;  %v3317_v37 = vmul.f32 %v11828_v31, %v11827_v13  ;;  %v11830_v46 = vld [vmem:[#allocation128_spill] sm:$0xff] }
 0x7b0   : > { %v3791_v26 = vpop.permute.xlu1 %3790  ;;  %4031 = vperm.xlu0 %5680, %v5857_v52   ;;  %4026 = vperm.xlu1 %5681, %v5855_v48   ;;  %v5859_v35 = vpop.eup %5858  ;;  %v3319_v48 = vmul.f32 %v11830_v46, %v11829_v27  ;;  %v3318_v52 = vmul.f32 %v11832_v38, %v11831_v47  ;;  %v11852_v46 = vld [vmem:[#allocation215_spill] sm:$0xff]  ;;  %v11853_v38 = vld [vmem:[#allocation152_spill] sm:$0xff] }
 0x7b1   : > { %5868 = vrsqrt.f32 %v3887_v28  ;;  %v3857_v20 = vadd.f32 %v3791_v26, %v3729_v10  ;;  %v11834_v10 = vld [vmem:[#allocation147_spill] sm:$0xff] }
 0x7b2   : > { %5870 = vrsqrt.f32 %v3888_v34  ;;  %v3321_v28 = vmul.f32 %v11834_v10, %v11833_v25  ;;  %v11835_v34 = vld [vmem:[#allocation164_spill] sm:$0xff] }
 0x7b3   : > { %v5861_v42 = vpop.eup %5860  ;;  %v3889_v51 = vmax.f32 %v3857_v20, 1e-24  ;;  %v3320_v26 = vmul.f32 %v11836_v45, %v11835_v34  ;;  %v11837_v20 = vld [vmem:[#allocation173_spill] sm:$0xff]  ;;  %v11856_v45 = vld [vmem:[#allocation207_spill] sm:$0xff] }
 0x7b4   : > { %v3795_v40 = vpop.permute.xlu1 %3794  ;;  %4041 = vperm.xlu0 %5680, %v5861_v42   ;;  %4036 = vperm.xlu1 %5681, %v5859_v35   ;;  %v5863_v12 = vpop.eup %5862  ;;  %v11838_v35 = vld [vmem:[#allocation66_spill] sm:$0xff] }
 0x7b5   : > { %5872 = vrsqrt.f32 %v3889_v51  ;;  %v3859_v17 = vadd.f32 %v3795_v40, %v3731_v32  ;;  %v3323_v42 = vmul.f32 %v11838_v35, %v11837_v20  ;;  %v11840_v32 = vld [vmem:[#allocation140_spill] sm:$0xff]  ;;  %v11842_v40 = vld [vmem:[#allocation194_spill] sm:$0xff]  ;;  %v11857_v35 = vld [vmem:[#allocation71_spill] sm:$0xff] }
 0x7b6   : > { %5874 = vrsqrt.f32 %v3890_v39  ;;  %v3322_v51 = vmul.f32 %v11840_v32, %v11839_v6  ;;  %v11841_v39 = vld [vmem:[#allocation177_spill] sm:$0xff] }
 0x7b7   : > { %v5865_v44 = vpop.eup %5864  ;;  %v3891_v36 = vmax.f32 %v3859_v17, 1e-24  ;;  %v3325_v17 = vmul.f32 %v11842_v40, %v11841_v39  ;;  %v11860_v40 = vld [vmem:[#allocation135_spill] sm:$0xff] }
 0x7b8   : > { %4051 = vperm.xlu0 %5680, %v5865_v44   ;;  %4046 = vperm.xlu1 %5681, %v5863_v12   ;;  %v5867_v55 = vpop.eup %5866  ;;  %v11843_v12 = vld [vmem:[#allocation170_spill] sm:$0xff]  ;;  %v11844_v44 = vld [vmem:[#allocation199_spill] sm:$0xff] }
 0x7b9   : > { %5876 = vrsqrt.f32 %v3891_v36  ;;  %v3324_v36 = vmul.f32 %v11844_v44, %v11843_v12  ;;  %v11861_v44 = vld [vmem:[#allocation153_spill] sm:$0xff] }
 0x7bb   : > { %v5869_v29 = vpop.eup %5868 }
 0x7bc   : > { %4061 = vperm.xlu0 %5680, %v5869_v29   ;;  %4056 = vperm.xlu1 %5681, %v5867_v55   ;;  %v5871_v24 = vpop.eup %5870  ;;  %v11845_v55 = vld [vmem:[#allocation181_spill] sm:$0xff]  ;;  %v11846_v29 = vld [vmem:[#allocation188_spill] sm:$0xff] }
 0x7bf   : > { %v5873_v63 = vpop.eup %5872 }
 0x7c0   : > { %4071 = vperm.xlu0 %5680, %v5873_v63   ;;  %4066 = vperm.xlu1 %5681, %v5871_v24   ;;  %v5875_v16 = vpop.eup %5874  ;;  %v3327_v24 = vmul.f32 %v11846_v29, %v11845_v55  ;;  %v11847_v63 = vld [vmem:[#allocation176_spill] sm:$0xff] }
 0x7c3   : > { %v5877_v18 = vpop.eup %5876 }
 0x7c4   : > { %4081 = vperm.xlu0 %5680, %v5877_v18   ;;  %4076 = vperm.xlu1 %5681, %v5875_v16   ;;  %v11848_v16 = vld [vmem:[#allocation192_spill] sm:$0xff] }
 0x7c5   : > { %v3326_v18 = vmul.f32 %v11848_v16, %v11847_v63  ;;  %v11864_v16 = vld [vmem:[#allocation37_spill] sm:$0xff] }
 0x7c8   : > { %4342 = vrot.lane.b32.xlu0 %v3317_v37, %s6041_s25  ;;  %4340 = vrot.lane.b32.xlu1 %v3316_v49, %s6041_s25  ;;  %v11850_v49 = vld [vmem:[#allocation210_spill] sm:$0xff]  ;;  %v11851_v37 = vld [vmem:[#allocation179_spill] sm:$0xff] }
 0x7c9   : > { %v3329_v31 = vmul.f32 %v11850_v49, %v11849_v50  ;;  %v11865_v49 = vld [vmem:[#allocation85_spill] sm:$0xff] }
 0x7cc   : > { %4346 = vrot.lane.b32.xlu0 %v3319_v48, %s6041_s25  ;;  %4344 = vrot.lane.b32.xlu1 %v3318_v52, %s6041_s25  ;;  %v3328_v48 = vmul.f32 %v11852_v46, %v11851_v37  ;;  %v11854_v52 = vld [vmem:[#allocation202_spill] sm:$0xff] }
 0x7cd   : > { %v3331_v10 = vmul.f32 %v11854_v52, %v11853_v38  ;;  %v11868_v52 = vld [vmem:[#allocation183_spill] sm:$0xff] }
 0x7d0   : > { %4350 = vrot.lane.b32.xlu0 %v3321_v28, %s6041_s25  ;;  %4348 = vrot.lane.b32.xlu1 %v3320_v26, %s6041_s25  ;;  %v11855_v28 = vld [vmem:[#allocation182_spill] sm:$0xff] }
 0x7d1   : > { %v3330_v26 = vmul.f32 %v11856_v45, %v11855_v28  ;;  %v11869_v45 = vld [vmem:[#allocation49_spill] sm:$0xff] }
 0x7d4   : > { %4354 = vrot.lane.b32.xlu0 %v3323_v42, %s6041_s25  ;;  %4352 = vrot.lane.b32.xlu1 %v3322_v51, %s6041_s25  ;;  %v11858_v42 = vld [vmem:[#allocation138_spill] sm:$0xff]  ;;  %v11859_v51 = vld [vmem:[#allocation143_spill] sm:$0xff] }
 0x7d5   : > { %v3333_v32 = vmul.f32 %v11858_v42, %v11857_v35 }
 0x7d8   : > { %4358 = vrot.lane.b32.xlu0 %v3325_v17, %s6041_s25  ;;  %4356 = vrot.lane.b32.xlu1 %v3324_v36, %s6041_s25  ;;  %v3332_v17 = vmul.f32 %v11860_v40, %v11859_v51  ;;  %v11862_v36 = vld [vmem:[#allocation82_spill] sm:$0xff] }
 0x7d9   : > { %v3335_v29 = vmul.f32 %v11862_v36, %v11861_v44  ;;  %v11872_v40 = vld [vmem:[#allocation174_spill] sm:$0xff]  ;;  %v11873_v36 = vld [vmem:[#allocation56_spill] sm:$0xff] }
 0x7dc   : > { %4362 = vrot.lane.b32.xlu0 %v3327_v24, %s6041_s25  ;;  %4360 = vrot.lane.b32.xlu1 %v3326_v18, %s6041_s25  ;;  %v11863_v24 = vld [vmem:[#allocation99_spill] sm:$0xff] }
 0x7dd   : > { %v3334_v18 = vmul.f32 %v11864_v16, %v11863_v24 }
 0x7e0   : > { %4366 = vrot.lane.b32.xlu0 %v3329_v31, %s6041_s25  ;;  %4364 = vrot.lane.b32.xlu1 %v3328_v48, %s6041_s25  ;;  %v11866_v31 = vld [vmem:[#allocation184_spill] sm:$0xff]  ;;  %v11867_v48 = vld [vmem:[#allocation145_spill] sm:$0xff] }
 0x7e1   : > { %v3337_v46 = vmul.f32 %v11866_v31, %v11865_v49  ;;  %v11876_v31 = vld [vmem:[#allocation201_spill] sm:$0xff] }
 0x7e4   : > { %4370 = vrot.lane.b32.xlu0 %v3331_v10, %s6041_s25  ;;  %4368 = vrot.lane.b32.xlu1 %v3330_v26, %s6041_s25  ;;  %v3336_v10 = vmul.f32 %v11868_v52, %v11867_v48  ;;  %v11870_v26 = vld [vmem:[#allocation144_spill] sm:$0xff] }
 0x7e5   : > { %v3339_v42 = vmul.f32 %v11870_v26, %v11869_v45 }
 0x7e8   : > { %4374 = vrot.lane.b32.xlu0 %v3333_v32, %s6041_s25  ;;  %4372 = vrot.lane.b32.xlu1 %v3332_v17, %s6041_s25  ;;  %v11871_v32 = vld [vmem:[#allocation90_spill] sm:$0xff] }
 0x7e9   : > { %v3338_v17 = vmul.f32 %v11872_v40, %v11871_v32  ;;  %v3342_v40 = vmul.f32 %v11880_v21, %v11879_v22  ;;  %v3346_v21 = vmul.f32 %v11888_v5, %v11887_v43  ;;  %v11892_v5 = vld [vmem:[#allocation39_spill] sm:$0xff] }
 0x7ec   : > { %4378 = vrot.lane.b32.xlu0 %v3335_v29, %s6041_s25  ;;  %4376 = vrot.lane.b32.xlu1 %v3334_v18, %s6041_s25  ;;  %v11874_v29 = vld [vmem:[#allocation196_spill] sm:$0xff] }
 0x7ed   : > { %v3341_v16 = vmul.f32 %v11874_v29, %v11873_v36  ;;  %v11875_v18 = vld [vmem:[#allocation52_spill] sm:$0xff] }
 0x7ee   : > { %v3340_v52 = vmul.f32 %v11876_v31, %v11875_v18  ;;  %v3344_v31 = vmul.f32 %v11884_v59, %v11883_v2 }
 0x7f0   : > { %4382 = vrot.lane.b32.xlu0 %v3337_v46, %s6041_s25  ;;  %4380 = vrot.lane.b32.xlu1 %v3336_v10, %s6041_s25  ;;  %v11877_v46 = vld [vmem:[#allocation107_spill] sm:$0xff]  ;;  %v11878_v10 = vld [vmem:[#allocation189_spill] sm:$0xff] }
 0x7f1   : > { %v3343_v26 = vmul.f32 %v11878_v10, %v11877_v46 }
 0x7f4   : > { %4386 = vrot.lane.b32.xlu0 %v3339_v42, %s6041_s25  ;;  %4384 = vrot.lane.b32.xlu1 %v3338_v17, %s6041_s25  ;;  %v11881_v42 = vld [vmem:[#allocation54_spill] sm:$0xff]  ;;  %v11882_v17 = vld [vmem:[#allocation212_spill] sm:$0xff] }
 0x7f5   : > { %v3345_v29 = vmul.f32 %v11882_v17, %v11881_v42  ;;  %v11890_v17 = vld [vmem:[#allocation139_spill] sm:$0xff] }
 0x7f6   : > { %v3476_v59 = vmul.f32 %v11890_v17, %v11825_v58  ;;  %v9565_v14 = vpop.permute.xlu0 %3926  ;;  %v11895_v17 = vld [vmem:[#allocation187_spill] sm:$0xff] }
 0x7f8   : > { %4390 = vrot.lane.b32.xlu0 %v3341_v16, %s6041_s25  ;;  %4388 = vrot.lane.b32.xlu1 %v3340_v52, %s6041_s25  ;;  %v11885_v16 = vld [vmem:[#allocation126_spill] sm:$0xff]  ;;  %v11886_v52 = vld [vmem:[#allocation204_spill] sm:$0xff] }
 0x7f9   : > { %v3347_v10 = vmul.f32 %v11886_v52, %v11885_v16  ;;  %v11893_v52 = vld [vmem:[#allocation134_spill] sm:$0xff] }
 0x7fc   : > { %4394 = vrot.lane.b32.xlu0 %v3343_v26, %s6041_s25  ;;  %4392 = vrot.lane.b32.xlu1 %v3342_v40, %s6041_s25  ;;  %v11889_v26 = vld [vmem:[#allocation62_spill] sm:$0xff] }
 0x7fd   : > { %v3477_v40 = vmul.f32 %v11889_v26, %v11827_v13 }
 0x800   : > { %4398 = vrot.lane.b32.xlu0 %v3345_v29, %s6041_s25  ;;  %4396 = vrot.lane.b32.xlu1 %v3344_v31, %s6041_s25  ;;  %v3478_v31 = vmul.f32 %v11892_v5, %v11831_v47 }
 0x804   : > { %4402 = vrot.lane.b32.xlu0 %v3347_v10, %s6041_s25  ;;  %4400 = vrot.lane.b32.xlu1 %v3346_v21, %s6041_s25  ;;  %v3479_v10 = vmul.f32 %v11893_v52, %v11829_v27  ;;  %v11898_v52 = vld [vmem:[#allocation61_spill] sm:$0xff] }
 0x807   : > { %v9567_v29 = vpop.permute.xlu1 %3931 }
 0x808   : > { %11891 = vst [vmem:[#allocation43_spill] sm:$0xff] %v9567_v29  ;;  %4470 = vrot.lane.b32.xlu0 %v3477_v40, %s6042_s26  ;;  %4468 = vrot.lane.b32.xlu1 %v3476_v59, %s6042_s26  ;;  %v3480_v29 = vmul.f32 %v11895_v17, %v11835_v34  ;;  %v11896_v40 = vld [vmem:[#allocation186_spill] sm:$0xff] }
 0x809   : > { %v3481_v59 = vmul.f32 %v11896_v40, %v11833_v25  ;;  %v11901_v40 = vld [vmem:[#allocation198_spill] sm:$0xff] }
 0x80b   : > { %v9575_v21 = vpop.permute.xlu1 %3936  ;;  %v9577_v26 = vpop.permute.xlu0 %3941 }
 0x80c   : > { %11894 = vst [vmem:[#allocation91_spill] sm:$0xff] %v9577_v26  ;;  %4474 = vrot.lane.b32.xlu0 %v3479_v10, %s6042_s26  ;;  %4472 = vrot.lane.b32.xlu1 %v3478_v31, %s6042_s26  ;;  %v3482_v26 = vmul.f32 %v11898_v52, %v11839_v6  ;;  %v11899_v10 = vld [vmem:[#allocation167_spill] sm:$0xff] }
 0x80d   : > { %v3483_v31 = vmul.f32 %v11899_v10, %v11837_v20  ;;  %v11904_v10 = vld [vmem:[#allocation191_spill] sm:$0xff] }
 0x80f   : > { %v9585_v13 = vpop.permute.xlu1 %3946  ;;  %v9587_v5 = vpop.permute.xlu0 %3951 }
 0x810   : > { %11897 = vst [vmem:[#allocation86_spill] sm:$0xff] %v9587_v5  ;;  %4478 = vrot.lane.b32.xlu0 %v3481_v59, %s6042_s26  ;;  %4476 = vrot.lane.b32.xlu1 %v3480_v29, %s6042_s26  ;;  %v3484_v5 = vmul.f32 %v11901_v40, %v11843_v12  ;;  %v11902_v59 = vld [vmem:[#allocation203_spill] sm:$0xff] }
 0x811   : > { %v3485_v29 = vmul.f32 %v11902_v59, %v11841_v39  ;;  %v11907_v59 = vld [vmem:[#allocation214_spill] sm:$0xff] }
 0x813   : > { %v9595_v27 = vpop.permute.xlu1 %3956  ;;  %v9597_v17 = vpop.permute.xlu0 %3961 }
 0x814   : > { %11900 = vst [vmem:[#allocation44_spill] sm:$0xff] %v9597_v17  ;;  %4482 = vrot.lane.b32.xlu0 %v3483_v31, %s6042_s26  ;;  %4480 = vrot.lane.b32.xlu1 %v3482_v26, %s6042_s26  ;;  %v3486_v17 = vmul.f32 %v11904_v10, %v11847_v63  ;;  %v11905_v31 = vld [vmem:[#allocation195_spill] sm:$0xff] }
 0x815   : > { %v3487_v26 = vmul.f32 %v11905_v31, %v11845_v55  ;;  %v11910_v31 = vld [vmem:[#allocation206_spill] sm:$0xff] }
 0x817   : > { %v9605_v25 = vpop.permute.xlu1 %3966  ;;  %v9607_v52 = vpop.permute.xlu0 %3971 }
 0x818   : > { %11903 = vst [vmem:[#allocation149_spill] sm:$0xff] %v9607_v52  ;;  %4486 = vrot.lane.b32.xlu0 %v3485_v29, %s6042_s26  ;;  %4484 = vrot.lane.b32.xlu1 %v3484_v5, %s6042_s26  ;;  %v3488_v52 = vmul.f32 %v11907_v59, %v11851_v37  ;;  %v11908_v29 = vld [vmem:[#allocation218_spill] sm:$0xff] }
 0x819   : > { %v3489_v5 = vmul.f32 %v11908_v29, %v11849_v50  ;;  %v11913_v29 = vld [vmem:[#allocation142_spill] sm:$0xff] }
 0x81b   : > { %v9615_v20 = vpop.permute.xlu1 %3976  ;;  %v9617_v40 = vpop.permute.xlu0 %3981 }
 0x81c   : > { %11906 = vst [vmem:[#allocation155_spill] sm:$0xff] %v9617_v40  ;;  %4490 = vrot.lane.b32.xlu0 %v3487_v26, %s6042_s26  ;;  %4488 = vrot.lane.b32.xlu1 %v3486_v17, %s6042_s26  ;;  %v3490_v40 = vmul.f32 %v11910_v31, %v11855_v28  ;;  %v11911_v26 = vld [vmem:[#allocation211_spill] sm:$0xff] }
 0x81d   : > { %v3491_v17 = vmul.f32 %v11911_v26, %v11853_v38  ;;  %v11916_v26 = vld [vmem:[#allocation127_spill] sm:$0xff] }
 0x81f   : > { %v9625_v39 = vpop.permute.xlu1 %3986  ;;  %v9627_v10 = vpop.permute.xlu0 %3991 }
 0x820   : > { %11909 = vst [vmem:[#allocation88_spill] sm:$0xff] %v9627_v10  ;;  %4494 = vrot.lane.b32.xlu0 %v3489_v5, %s6042_s26  ;;  %4492 = vrot.lane.b32.xlu1 %v3488_v52, %s6042_s26  ;;  %v3492_v10 = vmul.f32 %v11913_v29, %v11859_v51  ;;  %v11914_v5 = vld [vmem:[#allocation65_spill] sm:$0xff] }
 0x821   : > { %v3493_v52 = vmul.f32 %v11914_v5, %v11857_v35  ;;  %v11919_v5 = vld [vmem:[#allocation180_spill] sm:$0xff] }
 0x823   : > { %v9635_v55 = vpop.permute.xlu1 %3996  ;;  %v9637_v59 = vpop.permute.xlu0 %4001 }
 0x824   : > { %11912 = vst [vmem:[#allocation93_spill] sm:$0xff] %v9637_v59  ;;  %4498 = vrot.lane.b32.xlu0 %v3491_v17, %s6042_s26  ;;  %4496 = vrot.lane.b32.xlu1 %v3490_v40, %s6042_s26  ;;  %v3494_v59 = vmul.f32 %v11916_v26, %v11863_v24  ;;  %v11917_v17 = vld [vmem:[#allocation84_spill] sm:$0xff] }
 0x825   : > { %v3495_v40 = vmul.f32 %v11917_v17, %v11861_v44  ;;  %v11922_v17 = vld [vmem:[#allocation171_spill] sm:$0xff] }
 0x827   : > { %v9645_v50 = vpop.permute.xlu1 %4006  ;;  %v9647_v31 = vpop.permute.xlu0 %4011 }
 0x828   : > { %11915 = vst [vmem:[#allocation45_spill] sm:$0xff] %v9647_v31  ;;  %4502 = vrot.lane.b32.xlu0 %v3493_v52, %s6042_s26  ;;  %4500 = vrot.lane.b32.xlu1 %v3492_v10, %s6042_s26  ;;  %v3496_v31 = vmul.f32 %v11919_v5, %v11867_v48  ;;  %v11920_v52 = vld [vmem:[#allocation190_spill] sm:$0xff] }
 0x829   : > { %v3497_v10 = vmul.f32 %v11920_v52, %v11865_v49  ;;  %v11925_v52 = vld [vmem:[#allocation200_spill] sm:$0xff] }
 0x82b   : > { %v9655_v38 = vpop.permute.xlu1 %4016  ;;  %v9657_v29 = vpop.permute.xlu0 %4021 }
 0x82c   : > { %11918 = vst [vmem:[#allocation150_spill] sm:$0xff] %v9657_v29  ;;  %4506 = vrot.lane.b32.xlu0 %v3495_v40, %s6042_s26  ;;  %4504 = vrot.lane.b32.xlu1 %v3494_v59, %s6042_s26  ;;  %v3498_v29 = vmul.f32 %v11922_v17, %v11871_v32  ;;  %v11923_v40 = vld [vmem:[#allocation172_spill] sm:$0xff] }
 0x82d   : > { %v3499_v59 = vmul.f32 %v11923_v40, %v11869_v45  ;;  %v11928_v40 = vld [vmem:[#allocation193_spill] sm:$0xff] }
 0x82f   : > { %v9665_v35 = vpop.permute.xlu1 %4026  ;;  %v9667_v26 = vpop.permute.xlu0 %4031 }
 0x830   : > { %11921 = vst [vmem:[#allocation92_spill] sm:$0xff] %v9667_v26  ;;  %4510 = vrot.lane.b32.xlu0 %v3497_v10, %s6042_s26  ;;  %4508 = vrot.lane.b32.xlu1 %v3496_v31, %s6042_s26  ;;  %v3500_v26 = vmul.f32 %v11925_v52, %v11875_v18  ;;  %v11926_v10 = vld [vmem:[#allocation205_spill] sm:$0xff] }
 0x831   : > { %v3501_v31 = vmul.f32 %v11926_v10, %v11873_v36  ;;  %v11931_v10 = vld [vmem:[#allocation216_spill] sm:$0xff] }
 0x833   : > { %v9675_v44 = vpop.permute.xlu1 %4036  ;;  %v9677_v5 = vpop.permute.xlu0 %4041 }
 0x834   : > { %11924 = vst [vmem:[#allocation46_spill] sm:$0xff] %v9677_v5  ;;  %4514 = vrot.lane.b32.xlu0 %v3499_v59, %s6042_s26  ;;  %4512 = vrot.lane.b32.xlu1 %v3498_v29, %s6042_s26  ;;  %v3502_v5 = vmul.f32 %v11928_v40, %v11879_v22  ;;  %v11929_v59 = vld [vmem:[#allocation197_spill] sm:$0xff] }
 0x835   : > { %v3503_v29 = vmul.f32 %v11929_v59, %v11877_v46  ;;  %v11935_v59 = vld [vmem:[#allocation208_spill] sm:$0xff] }
 0x837   : > { %v9685_v49 = vpop.permute.xlu1 %4046  ;;  %v9687_v17 = vpop.permute.xlu0 %4051 }
 0x838   : > { %11927 = vst [vmem:[#allocation101_spill] sm:$0xff] %v9687_v17  ;;  %4518 = vrot.lane.b32.xlu0 %v3501_v31, %s6042_s26  ;;  %4516 = vrot.lane.b32.xlu1 %v3500_v26, %s6042_s26  ;;  %v3504_v17 = vmul.f32 %v11931_v10, %v11883_v2  ;;  %v11932_v31 = vld [vmem:[#allocation219_spill] sm:$0xff] }
 0x839   : > { %v3505_v26 = vmul.f32 %v11932_v31, %v11881_v42  ;;  %v11939_v31 = vld [vmem:[#allocation106_spill] sm:$0xff]  ;;  %v11941_v42 = vld [vmem:[#allocation161_spill] sm:$0xff] }
 0x83b   : > { %v9695_v45 = vpop.permute.xlu1 %4056  ;;  %v9697_v52 = vpop.permute.xlu0 %4061 }
 0x83c   : > { %11930 = vst [vmem:[#allocation220_spill] sm:$0xff] %v9697_v52  ;;  %4522 = vrot.lane.b32.xlu0 %v3503_v29, %s6042_s26  ;;  %4520 = vrot.lane.b32.xlu1 %v3502_v5, %s6042_s26  ;;  %v3506_v52 = vmul.f32 %v11935_v59, %v11887_v43  ;;  %v11936_v29 = vld [vmem:[#allocation213_spill] sm:$0xff] }
 0x83d   : > { %v3507_v5 = vmul.f32 %v11936_v29, %v11885_v16  ;;  %v11944_v29 = vld [vmem:[#allocation151_spill] sm:$0xff] }
 0x83f   : > { %v9705_v36 = vpop.permute.xlu1 %4066  ;;  %v9707_v40 = vpop.permute.xlu0 %4071 }
 0x840   : > { %11933 = vst [vmem:[#allocation148_spill] sm:$0xff] %v9705_v36  ;;  %11934 = vst [vmem:[#allocation221_spill] sm:$0xff] %v9707_v40  ;;  %4526 = vrot.lane.b32.xlu0 %v3505_v26, %s6042_s26  ;;  %4524 = vrot.lane.b32.xlu1 %v3504_v17, %s6042_s26  ;;  %v3541_v40 = vmul.f32 %v11746_v23, %v11939_v31  ;;  %v11940_v26 = vld [vmem:[#allocation96_spill] sm:$0xff] }
 0x841   : > { %v3540_v17 = vmul.f32 %v11941_v42, %v11940_v26  ;;  %v11949_v42 = vld [vmem:[#allocation102_spill] sm:$0xff]  ;;  %v11950_v26 = vld [vmem:[#allocation159_spill] sm:$0xff] }
 0x842   : > { %v3545_v31 = vmul.f32 %v11754_v15, %v11949_v42  ;;  %v11956_v42 = vld [vmem:[#allocation121_spill] sm:$0xff] }
 0x843   : > { %v9715_v46 = vpop.permute.xlu1 %4076  ;;  %v9717_v10 = vpop.permute.xlu0 %4081 }
 0x844   : > { %11937 = vst [vmem:[#allocation59_spill] sm:$0xff] %v9715_v46  ;;  %11938 = vst [vmem:[#allocation57_spill] sm:$0xff] %v9717_v10  ;;  %4530 = vrot.lane.b32.xlu0 %v3507_v5, %s6042_s26  ;;  %4528 = vrot.lane.b32.xlu1 %v3506_v52, %s6042_s26  ;;  %v3543_v5 = vmul.f32 %v11750_v3, %v11944_v29  ;;  %v11945_v10 = vld [vmem:[#allocation47_spill] sm:$0xff] }
 0x845   : > { %v11946_v52 = vld [vmem:[#allocation163_spill] sm:$0xff] }
 0x846   : > { %v3542_v16 = vmul.f32 %v11946_v52, %v11945_v10  ;;  %v11953_v10 = vld [vmem:[#allocation97_spill] sm:$0xff] }
 0x847   : > { %v9725_v36 = vpop.permute.xlu1 %4340  ;;  %v9727_v59 = vpop.permute.xlu0 %4342  ;;  %v3547_v29 = vmul.f32 %v11758_v1, %v11953_v10 }
 0x848   : > { %11942 = vst [vmem:[#allocation128_spill] sm:$0xff] %v9725_v36  ;;  %11943 = vst [vmem:[#allocation137_spill] sm:$0xff] %v9727_v59  ;;  %4596 = vrot.lane.b32.xlu1 %v3540_v17, %s6043_s10  ;;  %4598 = vrot.lane.b32.xlu0 %v3541_v40, %s6043_s10  ;;  %v11951_v17 = vld [vmem:[#allocation166_spill] sm:$0xff] }
 0x849   : > { %v3544_v40 = vmul.f32 %v11951_v17, %v11950_v26  ;;  %v3549_v26 = vmul.f32 %v11761_v0, %v11956_v42  ;;  %v11957_v17 = vld [vmem:[#allocation112_spill] sm:$0xff] }
 0x84b   : > { %v9735_v46 = vpop.permute.xlu1 %4344  ;;  %v9737_v23 = vpop.permute.xlu0 %4346 }
 0x84c   : > { %11947 = vst [vmem:[#allocation147_spill] sm:$0xff] %v9735_v46  ;;  %11948 = vst [vmem:[#allocation164_spill] sm:$0xff] %v9737_v23  ;;  %4600 = vrot.lane.b32.xlu1 %v3542_v16, %s6043_s10  ;;  %4602 = vrot.lane.b32.xlu0 %v3543_v5, %s6043_s10  ;;  %v11954_v16 = vld [vmem:[#allocation108_spill] sm:$0xff] }
 0x84d   : > { %v3546_v5 = vmul.f32 %v11743_v41, %v11954_v16  ;;  %v11959_v41 = vld [vmem:[#allocation51_spill] sm:$0xff]  ;;  %v11960_v16 = vld [vmem:[#allocation118_spill] sm:$0xff] }
 0x84e   : > { %v3551_v10 = vmul.f32 %v11764_v30, %v11959_v41  ;;  %v11966_v41 = vld [vmem:[#allocation58_spill] sm:$0xff] }
 0x84f   : > { %v9745_v59 = vpop.permute.xlu1 %4348  ;;  %v9747_v3 = vpop.permute.xlu0 %4350 }
 0x850   : > { %11952 = vst [vmem:[#allocation175_spill] sm:$0xff] %v9747_v3  ;;  %4604 = vrot.lane.b32.xlu1 %v3544_v40, %s6043_s10  ;;  %4606 = vrot.lane.b32.xlu0 %v3545_v31, %s6043_s10  ;;  %v3548_v31 = vmul.f32 %v11745_v9, %v11957_v17  ;;  %v11963_v9 = vld [vmem:[#allocation116_spill] sm:$0xff]  ;;  %v11964_v17 = vld [vmem:[#allocation123_spill] sm:$0xff] }
 0x851   : > { %v3553_v42 = vmul.f32 %v11767_v61, %v11963_v9 }
 0x853   : > { %v9755_v52 = vpop.permute.xlu1 %4352  ;;  %v9757_v15 = vpop.permute.xlu0 %4354 }
 0x854   : > { %11955 = vst [vmem:[#allocation66_spill] sm:$0xff] %v9757_v15  ;;  %4608 = vrot.lane.b32.xlu1 %v3546_v5, %s6043_s10  ;;  %4610 = vrot.lane.b32.xlu0 %v3547_v29, %s6043_s10  ;;  %v11961_v5 = vld [vmem:[#allocation178_spill] sm:$0xff] }
 0x855   : > { %v3550_v29 = vmul.f32 %v11961_v5, %v11960_v16  ;;  %v3555_v16 = vmul.f32 %v8747_v53, %v11966_v41  ;;  %v11967_v5 = vld [vmem:[#allocation114_spill] sm:$0xff] }
 0x857   : > { %v9765_v40 = vpop.permute.xlu1 %4356  ;;  %v9767_v1 = vpop.permute.xlu0 %4358 }
 0x858   : > { %11958 = vst [vmem:[#allocation168_spill] sm:$0xff] %v9767_v1  ;;  %4612 = vrot.lane.b32.xlu1 %v3548_v31, %s6043_s10  ;;  %4614 = vrot.lane.b32.xlu0 %v3549_v26, %s6043_s10  ;;  %v3552_v26 = vmul.f32 %v11753_v56, %v11964_v17  ;;  %v11969_v56 = vld [vmem:[#allocation156_spill] sm:$0xff] }
 0x859   : > { %v3557_v9 = vmul.f32 %v8765_v4, %v11969_v56  ;;  %v11970_v17 = vld [vmem:[#allocation48_spill] sm:$0xff] }
 0x85b   : > { %v9775_v15 = vpop.permute.xlu1 %4360  ;;  %v9777_v0 = vpop.permute.xlu0 %4362 }
 0x85c   : > { %11962 = vst [vmem:[#allocation140_spill] sm:$0xff] %v9777_v0  ;;  %4616 = vrot.lane.b32.xlu1 %v3550_v29, %s6043_s10  ;;  %4618 = vrot.lane.b32.xlu0 %v3551_v10, %s6043_s10  ;;  %v3554_v10 = vmul.f32 %v11757_v57, %v11967_v5  ;;  %v11972_v57 = vld [vmem:[#allocation94_spill] sm:$0xff]  ;;  %v11973_v5 = vld [vmem:[#allocation104_spill] sm:$0xff] }
 0x85d   : > { %v3559_v41 = vmul.f32 %v8784_v60, %v11972_v57  ;;  %v12011_v0 = vld [vmem:[#allocation44_spill] sm:$0xff] }
 0x85f   : > { %v9785_v31 = vpop.permute.xlu1 %4364  ;;  %v9787_v30 = vpop.permute.xlu0 %4366 }
 0x860   : > { %11965 = vst [vmem:[#allocation194_spill] sm:$0xff] %v9787_v30  ;;  %4620 = vrot.lane.b32.xlu1 %v3552_v26, %s6043_s10  ;;  %4622 = vrot.lane.b32.xlu0 %v3553_v42, %s6043_s10  ;;  %v3556_v42 = vmul.f32 %v8739_v11, %v11970_v17  ;;  %v11975_v11 = vld [vmem:[#allocation50_spill] sm:$0xff]  ;;  %v11976_v17 = vld [vmem:[#allocation103_spill] sm:$0xff] }
 0x861   : > { %v3561_v56 = vmul.f32 %v11774_v8, %v11975_v11 }
 0x863   : > { %v9795_v29 = vpop.permute.xlu1 %4368  ;;  %v9797_v61 = vpop.permute.xlu0 %4370 }
 0x864   : > { %11968 = vst [vmem:[#allocation170_spill] sm:$0xff] %v9797_v61  ;;  %4624 = vrot.lane.b32.xlu1 %v3554_v10, %s6043_s10  ;;  %4626 = vrot.lane.b32.xlu0 %v3555_v16, %s6043_s10  ;;  %v3558_v16 = vmul.f32 %v8769_v62, %v11973_v5  ;;  %v11978_v62 = vld [vmem:[#allocation157_spill] sm:$0xff]  ;;  %v11979_v5 = vld [vmem:[#allocation158_spill] sm:$0xff] }
 0x865   : > { %v3563_v57 = vmul.f32 %v9180_v19, %v11978_v62  ;;  %v11986_v62 = vld [vmem:[#allocation132_spill] sm:$0xff] }
 0x867   : > { %v9805_v26 = vpop.permute.xlu1 %4372  ;;  %v9807_v53 = vpop.permute.xlu0 %4374 }
 0x868   : > { %11971 = vst [vmem:[#allocation199_spill] sm:$0xff] %v9807_v53  ;;  %4628 = vrot.lane.b32.xlu1 %v3556_v42, %s6043_s10  ;;  %4630 = vrot.lane.b32.xlu0 %v3557_v9, %s6043_s10  ;;  %v3560_v9 = vmul.f32 %v8788_v7, %v11976_v17  ;;  %v11981_v7 = vld [vmem:[#allocation16_spill] sm:$0xff] }
 0x869   : > { %v3565_v11 = vmul.f32 %v9191_v33, %v11981_v7  ;;  %v11982_v17 = vld [vmem:[#allocation124_spill] sm:$0xff]  ;;  %v11990_v7 = vld [vmem:[#allocation119_spill] sm:$0xff] }
 0x86b   : > { %v9815_v10 = vpop.permute.xlu1 %4376  ;;  %v9817_v4 = vpop.permute.xlu0 %4378 }
 0x86c   : > { %11974 = vst [vmem:[#allocation188_spill] sm:$0xff] %v9817_v4  ;;  %4632 = vrot.lane.b32.xlu1 %v3558_v16, %s6043_s10  ;;  %4634 = vrot.lane.b32.xlu0 %v3559_v41, %s6043_s10  ;;  %v3562_v41 = vmul.f32 %v8805_v54, %v11979_v5  ;;  %v11985_v54 = vld [vmem:[#allocation105_spill] sm:$0xff] }
 0x86d   : > { %v3567_v5 = vmul.f32 %v11986_v62, %v11985_v54  ;;  %v11996_v62 = vld [vmem:[#allocation131_spill] sm:$0xff] }
 0x86f   : > { %v9825_v42 = vpop.permute.xlu1 %4380  ;;  %v9827_v60 = vpop.permute.xlu0 %4382 }
 0x870   : > { %11977 = vst [vmem:[#allocation176_spill] sm:$0xff] %v9827_v60  ;;  %4636 = vrot.lane.b32.xlu1 %v3560_v9, %s6043_s10  ;;  %4638 = vrot.lane.b32.xlu0 %v3561_v56, %s6043_s10  ;;  %v11983_v9 = vld [vmem:[#allocation36_spill] sm:$0xff] }
 0x871   : > { %v3564_v56 = vmul.f32 %v11983_v9, %v11982_v17  ;;  %v11991_v17 = vld [vmem:[#allocation63_spill] sm:$0xff] }
 0x872   : > { %v3569_v9 = vmul.f32 %v11991_v17, %v11990_v7  ;;  %v11999_v17 = vld [vmem:[#allocation146_spill] sm:$0xff] }
 0x873   : > { %v9835_v16 = vpop.permute.xlu1 %4384  ;;  %v9837_v8 = vpop.permute.xlu0 %4386 }
 0x874   : > { %11980 = vst [vmem:[#allocation192_spill] sm:$0xff] %v9837_v8  ;;  %4640 = vrot.lane.b32.xlu1 %v3562_v41, %s6043_s10  ;;  %4642 = vrot.lane.b32.xlu0 %v3563_v57, %s6043_s10  ;;  %v11987_v41 = vld [vmem:[#allocation55_spill] sm:$0xff]  ;;  %v11988_v8 = vld [vmem:[#allocation64_spill] sm:$0xff] }
 0x875   : > { %v3566_v57 = vmul.f32 %v11988_v8, %v11987_v41  ;;  %v11995_v8 = vld [vmem:[#allocation115_spill] sm:$0xff] }
 0x876   : > { %v3571_v41 = vmul.f32 %v11996_v62, %v11995_v8  ;;  %v12003_v62 = vld [vmem:[#allocation165_spill] sm:$0xff] }
 0x877   : > { %v9845_v60 = vpop.permute.xlu1 %4388  ;;  %v9847_v19 = vpop.permute.xlu0 %4390 }
 0x878   : > { %11984 = vst [vmem:[#allocation210_spill] sm:$0xff] %v9847_v19  ;;  %4644 = vrot.lane.b32.xlu1 %v3564_v56, %s6043_s10  ;;  %4646 = vrot.lane.b32.xlu0 %v3565_v11, %s6043_s10  ;;  %v11992_v56 = vld [vmem:[#allocation129_spill] sm:$0xff]  ;;  %v11993_v19 = vld [vmem:[#allocation79_spill] sm:$0xff] }
 0x879   : > { %v3568_v11 = vmul.f32 %v11993_v19, %v11992_v56  ;;  %v4084_v19 = vmul.f32 %v9565_v14, %v11825_v58  ;;  %v12000_v56 = vld [vmem:[#allocation43_spill] sm:$0xff]  ;;  %v12075_v58 = vld [vmem:[#allocation20_spill] sm:$0xff] }
 0x87b   : > { %v9855_v4 = vpop.permute.xlu1 %4392  ;;  %v9857_v33 = vpop.permute.xlu0 %4394 }
 0x87c   : > { %11989 = vst [vmem:[#allocation179_spill] sm:$0xff] %v9857_v33  ;;  %4648 = vrot.lane.b32.xlu1 %v3566_v57, %s6043_s10  ;;  %4650 = vrot.lane.b32.xlu0 %v3567_v5, %s6043_s10  ;;  %v11997_v57 = vld [vmem:[#allocation53_spill] sm:$0xff] }
 0x87d   : > { %v11998_v33 = vld [vmem:[#allocation125_spill] sm:$0xff] }
 0x87e   : > { %v3570_v5 = vmul.f32 %v11998_v33, %v11997_v57  ;;  %v4086_v33 = vmul.f32 %v9575_v21, %v11831_v47 }
 0x87f   : > { %v9865_v53 = vpop.permute.xlu1 %4396  ;;  %v9867_v54 = vpop.permute.xlu0 %4398 }
 0x880   : > { %11994 = vst [vmem:[#allocation215_spill] sm:$0xff] %v9867_v54  ;;  %4652 = vrot.lane.b32.xlu1 %v3568_v11, %s6043_s10  ;;  %4654 = vrot.lane.b32.xlu0 %v3569_v9, %s6043_s10  ;;  %v4085_v9 = vmul.f32 %v12000_v56, %v11999_v17  ;;  %v4088_v56 = vmul.f32 %v9585_v13, %v11835_v34  ;;  %v12008_v54 = vld [vmem:[#allocation86_spill] sm:$0xff]  ;;  %v12066_v17 = vld [vmem:[#allocation57_spill] sm:$0xff] }
 0x883   : > { %v9875_v61 = vpop.permute.xlu1 %4400  ;;  %v9877_v7 = vpop.permute.xlu0 %4402 }
 0x884   : > { %4656 = vrot.lane.b32.xlu1 %v3570_v5, %s6043_s10  ;;  %4658 = vrot.lane.b32.xlu0 %v3571_v41, %s6043_s10  ;;  %v12004_v41 = vld [vmem:[#allocation91_spill] sm:$0xff] }
 0x885   : > { %v4087_v57 = vmul.f32 %v12004_v41, %v12003_v62  ;;  %v4090_v41 = vmul.f32 %v9595_v27, %v11839_v6 }
 0x887   : > { %v9885_v11 = vpop.permute.xlu1 %4468  ;;  %v9887_v8 = vpop.permute.xlu0 %4470 }
 0x888   : > { %12001 = vst [vmem:[#allocation202_spill] sm:$0xff] %v9885_v11  ;;  %12002 = vst [vmem:[#allocation182_spill] sm:$0xff] %v9887_v8  ;;  %4724 = vrot.lane.b32.xlu1 %v4084_v19, %s6044_s11  ;;  %4726 = vrot.lane.b32.xlu0 %v4085_v9, %s6044_s11  ;;  %v12007_v19 = vld [vmem:[#allocation169_spill] sm:$0xff] }
 0x889   : > { %v4089_v9 = vmul.f32 %v12008_v54, %v12007_v19  ;;  %v4092_v54 = vmul.f32 %v9605_v25, %v11843_v12 }
 0x88b   : > { %v9895_v5 = vpop.permute.xlu1 %4472  ;;  %v9897_v14 = vpop.permute.xlu0 %4474 }
 0x88c   : > { %12005 = vst [vmem:[#allocation207_spill] sm:$0xff] %v9895_v5  ;;  %12006 = vst [vmem:[#allocation138_spill] sm:$0xff] %v9897_v14  ;;  %4728 = vrot.lane.b32.xlu1 %v4086_v33, %s6044_s11  ;;  %4730 = vrot.lane.b32.xlu0 %v4087_v57, %s6044_s11  ;;  %v12010_v33 = vld [vmem:[#allocation173_spill] sm:$0xff] }
 0x88d   : > { %v4091_v57 = vmul.f32 %v12011_v0, %v12010_v33  ;;  %v4094_v0 = vmul.f32 %v9615_v20, %v11847_v63 }
 0x88f   : > { %v9905_v30 = vpop.permute.xlu1 %4476  ;;  %v9907_v21 = vpop.permute.xlu0 %4478 }
 0x890   : > { %12009 = vst [vmem:[#allocation143_spill] sm:$0xff] %v9907_v21  ;;  %4732 = vrot.lane.b32.xlu1 %v4088_v56, %s6044_s11  ;;  %4734 = vrot.lane.b32.xlu0 %v4089_v9, %s6044_s11  ;;  %v12013_v56 = vld [vmem:[#allocation177_spill] sm:$0xff] }
 0x891   : > { %v12014_v21 = vld [vmem:[#allocation149_spill] sm:$0xff] }
 0x892   : > { %v4093_v9 = vmul.f32 %v12014_v21, %v12013_v56  ;;  %v4096_v21 = vmul.f32 %v9625_v39, %v11851_v37 }
 0x893   : > { %v9915_v1 = vpop.permute.xlu1 %4480  ;;  %v9917_v13 = vpop.permute.xlu0 %4482 }
 0x894   : > { %12012 = vst [vmem:[#allocation135_spill] sm:$0xff] %v9917_v13  ;;  %4736 = vrot.lane.b32.xlu1 %v4090_v41, %s6044_s11  ;;  %4738 = vrot.lane.b32.xlu0 %v4091_v57, %s6044_s11  ;;  %v12016_v41 = vld [vmem:[#allocation181_spill] sm:$0xff]  ;;  %v12017_v13 = vld [vmem:[#allocation155_spill] sm:$0xff] }
 0x895   : > { %v4095_v57 = vmul.f32 %v12017_v13, %v12016_v41  ;;  %v4098_v13 = vmul.f32 %v9635_v55, %v11855_v28  ;;  %v12028_v55 = vld [vmem:[#allocation5_spill] sm:$0xff] }
 0x896   : > { %v5420_v5 = vmul.f32 -1.442695, %v12028_v55 }
 0x897   : > { %v9925_v3 = vpop.permute.xlu1 %4484  ;;  %v9927_v27 = vpop.permute.xlu0 %4486 }
 0x898   : > { %12015 = vst [vmem:[#allocation82_spill] sm:$0xff] %v9927_v27  ;;  %4740 = vrot.lane.b32.xlu1 %v4092_v54, %s6044_s11  ;;  %4742 = vrot.lane.b32.xlu0 %v4093_v9, %s6044_s11  ;;  %v12019_v54 = vld [vmem:[#allocation185_spill] sm:$0xff]  ;;  %v12020_v27 = vld [vmem:[#allocation88_spill] sm:$0xff] }
 0x899   : > { %v4097_v9 = vmul.f32 %v12020_v27, %v12019_v54  ;;  %v12025_v27 = vld [vmem:[#allocation4_spill] sm:$0xff]  ;;  %v12027_v54 = vld [vmem:[#allocation45_spill] sm:$0xff] }
 0x89b   : > { %v9935_v33 = vpop.permute.xlu1 %4488  ;;  %v9937_v25 = vpop.permute.xlu0 %4490 }
 0x89c   : > { %12018 = vst [vmem:[#allocation99_spill] sm:$0xff] %v9937_v25  ;;  %4744 = vrot.lane.b32.xlu1 %v4094_v0, %s6044_s11  ;;  %4746 = vrot.lane.b32.xlu0 %v4095_v57, %s6044_s11  ;;  %v12022_v0 = vld [vmem:[#allocation152_spill] sm:$0xff]  ;;  %v12023_v25 = vld [vmem:[#allocation93_spill] sm:$0xff] }
 0x89d   : > { %v4099_v57 = vmul.f32 %v12023_v25, %v12022_v0 }
 0x89f   : > { %v9945_v56 = vpop.permute.xlu1 %4492  ;;  %v9947_v20 = vpop.permute.xlu0 %4494 }
 0x8a0   : > { %12021 = vst [vmem:[#allocation37_spill] sm:$0xff] %v9947_v20  ;;  %4748 = vrot.lane.b32.xlu1 %v4096_v21, %s6044_s11  ;;  %4750 = vrot.lane.b32.xlu0 %v4097_v9, %s6044_s11  ;;  %v5419_v20 = vmul.f32 -1.442695, %v12025_v27  ;;  %v4100_v21 = vmul.f32 %v9645_v50, %v11859_v51  ;;  %v12026_v9 = vld [vmem:[#allocation71_spill] sm:$0xff]  ;;  %v4102_v27 = vmul.f32 %v9655_v38, %v11863_v24  ;;  %v12031_v50 = vld [vmem:[#allocation153_spill] sm:$0xff] }
 0x8a1   : > { %v4101_v14 = vmul.f32 %v12027_v54, %v12026_v9  ;;  %v12033_v54 = vld [vmem:[#allocation3_spill] sm:$0xff]  ;;  %v4104_v38 = vmul.f32 %v9665_v35, %v11867_v48  ;;  %v4106_v35 = vmul.f32 %v9675_v44, %v11871_v32 }
 0x8a2   : > { %5878 = vpow2.f32 %v5419_v20  ;;  %v5422_v9 = vmul.f32 -1.442695, %v12033_v54  ;;  %v12038_v54 = vld [vmem:[#allocation14_spill] sm:$0xff] }
 0x8a3   : > { %v9955_v41 = vpop.permute.xlu1 %4496  ;;  %v9957_v39 = vpop.permute.xlu0 %4498  ;;  %5880 = vpow2.f32 %v5420_v5  ;;  %v5423_v5 = vmul.f32 -1.442695, %v12038_v54 }
 0x8a4   : > { %12024 = vst [vmem:[#allocation184_spill] sm:$0xff] %v9957_v39  ;;  %4752 = vrot.lane.b32.xlu1 %v4098_v13, %s6044_s11  ;;  %4754 = vrot.lane.b32.xlu0 %v4099_v57, %s6044_s11  ;;  %v12030_v13 = vld [vmem:[#allocation2_spill] sm:$0xff] }
 0x8a5   : > { %v5421_v57 = vmul.f32 -1.442695, %v12030_v13  ;;  %v12032_v39 = vld [vmem:[#allocation150_spill] sm:$0xff]  ;;  %v12037_v13 = vld [vmem:[#allocation92_spill] sm:$0xff] }
 0x8a6   : > { %v4103_v0 = vmul.f32 %v12032_v39, %v12031_v50 }
 0x8a7   : > { %v9967_v23 = vpop.permute.xlu1 %4500  ;;  %v9969_v25 = vpop.permute.xlu0 %4502  ;;  %5882 = vpow2.f32 %v5421_v57 }
 0x8a8   : > { %12029 = vst [vmem:[#allocation145_spill] sm:$0xff] %v9969_v25  ;;  %4756 = vrot.lane.b32.xlu1 %v4100_v21, %s6044_s11  ;;  %4758 = vrot.lane.b32.xlu0 %v4101_v14, %s6044_s11  ;;  %v12035_v14 = vld [vmem:[#allocation12_spill] sm:$0xff]  ;;  %v12036_v21 = vld [vmem:[#allocation85_spill] sm:$0xff]  ;;  %5884 = vpow2.f32 %v5422_v9  ;;  %v12043_v9 = vld [vmem:[#allocation46_spill] sm:$0xff] }
 0x8a9   : > { %v5425_v20 = vmul.f32 -1.442695, %v12035_v14  ;;  %v4105_v39 = vmul.f32 %v12037_v13, %v12036_v21  ;;  %v12042_v14 = vld [vmem:[#allocation49_spill] sm:$0xff] }
 0x8aa   : > { %v4107_v13 = vmul.f32 %v12043_v9, %v12042_v14  ;;  %v12048_v9 = vld [vmem:[#allocation101_spill] sm:$0xff] }
 0x8ab   : > { %v9979_v55 = vpop.permute.xlu1 %4504  ;;  %v9981_v46 = vpop.permute.xlu0 %4506  ;;  %5886 = vpow2.f32 %v5425_v20  ;;  %v12045_v20 = vld [vmem:[#allocation7_spill] sm:$0xff] }
 0x8ac   : > { %12034 = vst [vmem:[#allocation183_spill] sm:$0xff] %v9981_v46  ;;  %4760 = vrot.lane.b32.xlu1 %v4102_v27, %s6044_s11  ;;  %4762 = vrot.lane.b32.xlu0 %v4103_v0, %s6044_s11  ;;  %v12040_v46 = vld [vmem:[#allocation17_spill] sm:$0xff]  ;;  %5888 = vpow2.f32 %v5423_v5  ;;  %v12047_v5 = vld [vmem:[#allocation56_spill] sm:$0xff] }
 0x8ad   : > { %v5424_v27 = vmul.f32 -1.442695, %v12040_v46  ;;  %v12041_v0 = vld [vmem:[#allocation13_spill] sm:$0xff]  ;;  %v4109_v14 = vmul.f32 %v12048_v9, %v12047_v5  ;;  %v12052_v9 = vld [vmem:[#allocation107_spill] sm:$0xff]  ;;  %v12053_v5 = vld [vmem:[#allocation220_spill] sm:$0xff] }
 0x8ae   : > { %v5426_v57 = vmul.f32 -1.442695, %v12041_v0  ;;  %v4108_v0 = vmul.f32 %v9685_v49, %v11875_v18  ;;  %v4111_v11 = vmul.f32 %v12053_v5, %v12052_v9  ;;  %v12056_v5 = vld [vmem:[#allocation21_spill] sm:$0xff]  ;;  %v12058_v9 = vld [vmem:[#allocation54_spill] sm:$0xff] }
 0x8af   : > { %v9991_v25 = vpop.permute.xlu1 %4508  ;;  %v9993_v50 = vpop.permute.xlu0 %4510  ;;  %5890 = vpow2.f32 %v5424_v27 }
 0x8b0   : > { %12039 = vst [vmem:[#allocation144_spill] sm:$0xff] %v9993_v50  ;;  %4764 = vrot.lane.b32.xlu1 %v4104_v38, %s6044_s11  ;;  %4766 = vrot.lane.b32.xlu0 %v4105_v39, %s6044_s11  ;;  %v5879_v50 = vpop.eup %5878  ;;  %v5427_v38 = vmul.f32 -1.442695, %v12045_v20  ;;  %5892 = vpow2.f32 %v5426_v57  ;;  %v12046_v39 = vld [vmem:[#allocation19_spill] sm:$0xff] }
 0x8b1   : > { %v5881_v46 = vpop.eup %5880  ;;  %v5428_v44 = vmul.f32 -1.442695, %v12046_v39  ;;  %v4212_v19 = vadd.f32 1.0, %v5879_v50  ;;  %v12051_v39 = vld [vmem:[#allocation15_spill] sm:$0xff]  ;;  %v4110_v50 = vmul.f32 %v9695_v45, %v11879_v22 }
 0x8b2   : > { %v4213_v8 = vadd.f32 1.0, %v5881_v46  ;;  %5894 = vpow2.f32 %v5427_v38  ;;  %v5430_v49 = vmul.f32 -1.442695, %v12051_v39 }
 0x8b3   : > { %v10003_v54 = vpop.permute.xlu1 %4512  ;;  %v10005_v21 = vpop.permute.xlu0 %4514  ;;  %5896 = vpow2.f32 %v5428_v44  ;;  %v12055_v44 = vld [vmem:[#allocation9_spill] sm:$0xff] }
 0x8b4   : > { %12044 = vst [vmem:[#allocation90_spill] sm:$0xff] %v10005_v21  ;;  %4768 = vrot.lane.b32.xlu1 %v4106_v35, %s6044_s11  ;;  %4770 = vrot.lane.b32.xlu0 %v4107_v13, %s6044_s11  ;;  %v5883_v35 = vpop.eup %5882  ;;  %v12050_v13 = vld [vmem:[#allocation6_spill] sm:$0xff]  ;;  %5898 = vrcp.f32 %v4212_v19  ;;  %v5431_v45 = vmul.f32 -1.442695, %v12055_v44  ;;  %v12057_v19 = vld [vmem:[#allocation148_spill] sm:$0xff] }
 0x8b5   : > { %v5885_v57 = vpop.eup %5884  ;;  %v5429_v20 = vmul.f32 -1.442695, %v12050_v13  ;;  %5900 = vrcp.f32 %v4213_v8  ;;  %v4112_v39 = vmul.f32 %v12057_v19, %v11883_v2  ;;  %v12062_v19 = vld [vmem:[#allocation8_spill] sm:$0xff] }
 0x8b6   : > { %v4215_v62 = vadd.f32 1.0, %v5885_v57  ;;  %v12060_v57 = vld [vmem:[#allocation81_spill] sm:$0xff]  ;;  %v5433_v47 = vmul.f32 -1.442695, %v12062_v19 }
 0x8b7   : > { %v10015_v21 = vpop.permute.xlu1 %4516  ;;  %v10017_v27 = vpop.permute.xlu0 %4518  ;;  %5902 = vpow2.f32 %v5429_v20 }
 0x8b8   : > { %12049 = vst [vmem:[#allocation174_spill] sm:$0xff] %v10017_v27  ;;  %4772 = vrot.lane.b32.xlu1 %v4108_v0, %s6044_s11  ;;  %4774 = vrot.lane.b32.xlu0 %v4109_v14, %s6044_s11  ;;  %v4214_v27 = vadd.f32 1.0, %v5883_v35  ;;  %v5887_v14 = vpop.eup %5886  ;;  %5904 = vpow2.f32 %v5430_v49  ;;  %v5432_v35 = vmul.f32 -1.442695, %v12056_v5 }
 0x8b9   : > { %v5889_v38 = vpop.eup %5888  ;;  %v4218_v8 = vadd.f32 1.0, %v5887_v14  ;;  %v12064_v14 = vld [vmem:[#allocation59_spill] sm:$0xff] }
 0x8ba   : > { %v5891_v13 = vpop.eup %5890  ;;  %5906 = vrcp.f32 %v4214_v27  ;;  %v4216_v49 = vadd.f32 1.0, %v5889_v38  ;;  %v12063_v27 = vld [vmem:[#allocation154_spill] sm:$0xff] }
 0x8bb   : > { %v10027_v46 = vpop.permute.xlu1 %4520  ;;  %v10029_v0 = vpop.permute.xlu0 %4522  ;;  %5908 = vrcp.f32 %v4215_v62  ;;  %v4217_v5 = vadd.f32 1.0, %v5891_v13 }
 0x8bc   : > { %12054 = vst [vmem:[#allocation196_spill] sm:$0xff] %v10029_v0  ;;  %4776 = vrot.lane.b32.xlu1 %v4110_v50, %s6044_s11  ;;  %4778 = vrot.lane.b32.xlu0 %v4111_v11, %s6044_s11  ;;  %v12059_v0 = vld [vmem:[#allocation221_spill] sm:$0xff]  ;;  %v3055_v50 = vmul.f32 %v11887_v43, %v12060_v57  ;;  %v5893_v44 = vpop.eup %5892  ;;  %5910 = vpow2.f32 %v5431_v45  ;;  %v4114_v57 = vmul.f32 %v12064_v14, %v11887_v43 }
 0x8bd   : > { %v4113_v36 = vmul.f32 %v12059_v0, %v12058_v9  ;;  %5912 = vpow2.f32 %v5432_v35  ;;  %v12065_v9 = vld [vmem:[#allocation126_spill] sm:$0xff]  ;;  %v5895_v62 = vpop.eup %5894  ;;  %v4219_v38 = vadd.f32 1.0, %v5893_v44 }
 0x8be   : > { %v3090_v0 = vadd.f32 %v12063_v27, %v3055_v50  ;;  %5914 = vrcp.f32 %v4218_v8  ;;  %v5897_v45 = vpop.eup %5896  ;;  %v12067_v35 = vld [vmem:[#allocation18_spill] sm:$0xff]  ;;  %v12068_v8 = vld [vmem:[#allocation11_spill] sm:$0xff]  ;;  %v4220_v19 = vadd.f32 1.0, %v5895_v62 }
 0x8bf   : > { %v10041_v11 = vpop.permute.xlu1 %4524  ;;  %v10043_v20 = vpop.permute.xlu0 %4526  ;;  %5916 = vrcp.f32 %v4216_v49  ;;  %v5434_v50 = vmul.f32 -1.442695, %v12067_v35  ;;  %v5435_v44 = vmul.f32 -1.442695, %v12068_v8  ;;  %v4221_v14 = vadd.f32 1.0, %v5897_v45  ;;  %v12073_v45 = vld [vmem:[#allocation83_spill] sm:$0xff] }
 0x8c0   : > { %12061 = vst [vmem:[#allocation52_spill] sm:$0xff] %v10043_v20  ;;  %4780 = vrot.lane.b32.xlu1 %v4112_v39, %s6044_s11  ;;  %4782 = vrot.lane.b32.xlu0 %v4113_v36, %s6044_s11  ;;  %v4115_v20 = vmul.f32 %v12066_v17, %v12065_v9  ;;  %v4979_v36 = vsel %vm4948_vm2, %v3090_v0, %v9875_v61  ;;  %v5899_v17 = vpop.eup %5898  ;;  %5918 = vrcp.f32 %v4217_v5  ;;  %v12072_v5 = vld [vmem:[#allocation10_spill] sm:$0xff] }
 0x8c1   : > { %v5901_v61 = vpop.eup %5900  ;;  %5920 = vpow2.f32 %v5433_v47  ;;  %v5437_v62 = vmul.f32 -1.442695, %v12072_v5  ;;  %v3029_v8 = vmul.f32 %v11835_v34, %v12073_v45  ;;  %v12076_v34 = vld [vmem:[#allocation24_spill] sm:$0xff] }
 0x8c2   : > { %v5903_v0 = vpop.eup %5902  ;;  %5922 = vrcp.f32 %v4219_v38 }
 0x8c3   : > { %v4529_v13 = vpop.permute.xlu1 %4528  ;;  %v10055_v39 = vpop.permute.xlu0 %4530  ;;  %5924 = vpow2.f32 %v5434_v50  ;;  %v4222_v38 = vadd.f32 1.0, %v5903_v0  ;;  %v3064_v5 = vadd.f32 %v12063_v27, %v3029_v8 }
 0x8c4   : > { %v10059_v43 = vsel %vm4981_vm3, %v4979_v36, %v4529_v13  ;;  %4784 = vrot.lane.b32.xlu1 %v4114_v57, %s6044_s11  ;;  %4786 = vrot.lane.b32.xlu0 %v4115_v20, %s6044_s11  ;;  %v5905_v36 = vpop.eup %5904  ;;  %v12071_v13 = vld [vmem:[#allocation22_spill] sm:$0xff]  ;;  %5926 = vpow2.f32 %v5435_v44 }
 0x8c5   : > { %v5436_v57 = vmul.f32 -1.442695, %v12071_v13  ;;  %v5907_v20 = vpop.eup %5906  ;;  %5928 = vrcp.f32 %v4220_v19  ;;  %v5439_v19 = vmul.f32 -1.442695, %v12076_v34 }
 0x8c6   : > { %v5909_v47 = vpop.eup %5908  ;;  %5930 = vrcp.f32 %v4221_v14 }
 0x8c7   : > { %v10064_v49 = vpop.permute.xlu1 %4596  ;;  %v10066_v35 = vpop.permute.xlu0 %4598  ;;  %5932 = vpow2.f32 %v5436_v57 }
 0x8c8   : > { %12069 = vst [vmem:[#allocation201_spill] sm:$0xff] %v10064_v49  ;;  %12070 = vst [vmem:[#allocation189_spill] sm:$0xff] %v10066_v35  ;;  %4852 = vrot.lane.b32.xlu1 %v5899_v17, %s6045_s12  ;;  %4854 = vrot.lane.b32.xlu0 %v5901_v61, %s6045_s12  ;;  %v5911_v35 = vpop.eup %5910  ;;  %v4223_v49 = vadd.f32 1.0, %v5905_v36  ;;  %v5438_v61 = vmul.f32 -1.442695, %v12075_v58  ;;  %5934 = vpow2.f32 %v5437_v62  ;;  %v12077_v36 = vld [vmem:[#allocation133_spill] sm:$0xff]  ;;  %v4953_v58 = vsel %vm4948_vm2, %v3064_v5, %v9745_v59 }
 0x8c9   : > { %v5913_v17 = vpop.eup %5912  ;;  %5936 = vrcp.f32 %v4222_v38  ;;  %v4224_v14 = vadd.f32 1.0, %v5911_v35  ;;  %v3031_v45 = vmul.f32 %v11839_v6, %v12077_v36  ;;  %v12078_v38 = vld [vmem:[#allocation26_spill] sm:$0xff]  ;;  %v12080_v5 = vld [vmem:[#allocation80_spill] sm:$0xff] }
 0x8ca   : > { %v5915_v44 = vpop.eup %5914  ;;  %5938 = vrcp.f32 %v4223_v49  ;;  %v4225_v8 = vadd.f32 1.0, %v5913_v17  ;;  %v5440_v35 = vmul.f32 -1.442695, %v12078_v38  ;;  %v12079_v49 = vld [vmem:[#allocation23_spill] sm:$0xff]  ;;  %v12081_v38 = vld [vmem:[#allocation25_spill] sm:$0xff] }
 0x8cb   : > { %v10074_v50 = vpop.permute.xlu1 %4600  ;;  %v10076_v13 = vpop.permute.xlu0 %4602  ;;  %5940 = vpow2.f32 %v5438_v61  ;;  %v3033_v61 = vmul.f32 %v11843_v12, %v12080_v5 }
 0x8cc   : > { %12074 = vst [vmem:[#allocation111_spill] sm:$0xff] %v10076_v13  ;;  %4856 = vrot.lane.b32.xlu1 %v5907_v20, %s6045_s12  ;;  %4858 = vrot.lane.b32.xlu0 %v5909_v47, %s6045_s12  ;;  %v5917_v0 = vpop.eup %5916  ;;  %v4986_v20 = vsel %vm4981_vm3, %v4953_v58, %v9905_v30  ;;  %v3066_v13 = vadd.f32 %v12063_v27, %v3031_v45  ;;  %v5441_v30 = vmul.f32 -1.442695, %v12079_v49  ;;  %5942 = vpow2.f32 %v5439_v19 }
 0x8cd   : > { %v5919_v57 = vpop.eup %5918  ;;  %5944 = vrcp.f32 %v4224_v14  ;;  %v5442_v19 = vmul.f32 -1.442695, %v12081_v38  ;;  %v3068_v14 = vadd.f32 %v12063_v27, %v3033_v61  ;;  %v12083_v61 = vld [vmem:[#allocation28_spill] sm:$0xff] }
 0x8ce   : > { %v5921_v34 = vpop.eup %5920  ;;  %v4955_v36 = vsel %vm4948_vm2, %v3066_v13, %v9755_v52  ;;  %5946 = vrcp.f32 %v4225_v8 }
 0x8cf   : > { %v4605_v47 = vpop.permute.xlu1 %4604  ;;  %v10089_v62 = vpop.permute.xlu0 %4606  ;;  %v4226_v58 = vadd.f32 1.0, %v5921_v34  ;;  %5948 = vpow2.f32 %v5440_v35  ;;  %v12082_v34 = vld [vmem:[#allocation40_spill] sm:$0xff]  ;;  %v4957_v35 = vsel %vm4948_vm2, %v3068_v14, %v9765_v40  ;;  %v12085_v14 = vld [vmem:[#allocation89_spill] sm:$0xff] }
 0x8d0   : > { %v10094_v6 = vsel %vm5014_vm4, %v4986_v20, %v4605_v47  ;;  %4860 = vrot.lane.b32.xlu1 %v5917_v0, %s6045_s12  ;;  %4862 = vrot.lane.b32.xlu0 %v5919_v57, %s6045_s12  ;;  %v5923_v59 = vpop.eup %5922  ;;  %v4988_v0 = vsel %vm4981_vm3, %v4955_v36, %v9915_v1  ;;  %5950 = vpow2.f32 %v5441_v30  ;;  %v3035_v49 = vmul.f32 %v11847_v63, %v12082_v34  ;;  %v12084_v30 = vld [vmem:[#allocation30_spill] sm:$0xff] }
 0x8d1   : > { %v5925_v17 = vpop.eup %5924  ;;  %5952 = vrcp.f32 %v4226_v58  ;;  %v5443_v36 = vmul.f32 -1.442695, %v12083_v61 }
 0x8d2   : > { %v5927_v45 = vpop.eup %5926  ;;  %v4227_v13 = vadd.f32 1.0, %v5925_v17  ;;  %5954 = vpow2.f32 %v5442_v19  ;;  %v3037_v19 = vmul.f32 %v11851_v37, %v12085_v14 }
 0x8d3   : > { %v4609_v20 = vpop.permute.xlu1 %4608  ;;  %v10105_v57 = vpop.permute.xlu0 %4610  ;;  %v4228_v8 = vadd.f32 1.0, %v5927_v45  ;;  %v5444_v45 = vmul.f32 -1.442695, %v12084_v30  ;;  %v12088_v30 = vld [vmem:[#allocation70_spill] sm:$0xff] }
 0x8d4   : > { %v5929_v47 = vpop.eup %5928  ;;  %v10110_v12 = vsel %vm5014_vm4, %v4988_v0, %v4609_v20  ;;  %4864 = vrot.lane.b32.xlu1 %v5915_v44, %s6045_s12  ;;  %4866 = vrot.lane.b32.xlu0 %v5923_v59, %s6045_s12  ;;  %v4990_v44 = vsel %vm4981_vm3, %v4957_v35, %v9925_v3  ;;  %v3070_v20 = vadd.f32 %v12063_v27, %v3035_v49  ;;  %5956 = vrcp.f32 %v4227_v13  ;;  %v12086_v35 = vld [vmem:[#allocation27_spill] sm:$0xff] }
 0x8d5   : > { %v5931_v52 = vpop.eup %5930  ;;  %5958 = vrcp.f32 %v4228_v8  ;;  %v5445_v61 = vmul.f32 -1.442695, %v12086_v35  ;;  %v3072_v8 = vadd.f32 %v12063_v27, %v3037_v19  ;;  %v12089_v19 = vld [vmem:[#allocation32_spill] sm:$0xff] }
 0x8d6   : > { %v5933_v1 = vpop.eup %5932  ;;  %v4959_v34 = vsel %vm4948_vm2, %v3070_v20, %v9775_v15  ;;  %5960 = vpow2.f32 %v5443_v36  ;;  %v3039_v20 = vmul.f32 %v11855_v28, %v12088_v30 }
 0x8d7   : > { %v5935_v5 = vpop.eup %5934  ;;  %v4613_v0 = vpop.permute.xlu1 %4612  ;;  %v4229_v58 = vadd.f32 1.0, %v5933_v1  ;;  %v12087_v1 = vld [vmem:[#allocation29_spill] sm:$0xff]  ;;  %5962 = vpow2.f32 %v5444_v45  ;;  %v4961_v45 = vsel %vm4948_vm2, %v3072_v8, %v9785_v31  ;;  %v12092_v8 = vld [vmem:[#allocation31_spill] sm:$0xff] }
 0x8d8   : > { %v10121_v59 = vpop.permute.xlu0 %4614  ;;  %v5937_v17 = vpop.eup %5936  ;;  %v10126_v63 = vsel %vm5014_vm4, %v4990_v44, %v4613_v0  ;;  %4868 = vrot.lane.b32.xlu1 %v5929_v47, %s6045_s12  ;;  %4870 = vrot.lane.b32.xlu0 %v5931_v52, %s6045_s12  ;;  %v4230_v38 = vadd.f32 1.0, %v5935_v5  ;;  %v4992_v47 = vsel %vm4981_vm3, %v4959_v34, %v9935_v33  ;;  %v5446_v5 = vmul.f32 -1.442695, %v12087_v1 }
 0x8d9   : > { %v5939_v40 = vpop.eup %5938  ;;  %5964 = vrcp.f32 %v4229_v58  ;;  %v5447_v34 = vmul.f32 -1.442695, %v12089_v19  ;;  %v12090_v58 = vld [vmem:[#allocation34_spill] sm:$0xff]  ;;  %v5449_v30 = vmul.f32 -1.442695, %v12092_v8 }
 0x8da   : > { %v5941_v3 = vpop.eup %5940  ;;  %5966 = vrcp.f32 %v4230_v38  ;;  %v3074_v38 = vadd.f32 %v12063_v27, %v3039_v20  ;;  %v12094_v19 = vld [vmem:[#allocation74_spill] sm:$0xff] }
 0x8db   : > { %v5943_v49 = vpop.eup %5942  ;;  %v4617_v52 = vpop.permute.xlu1 %4616  ;;  %v4231_v36 = vadd.f32 1.0, %v5941_v3  ;;  %5968 = vpow2.f32 %v5445_v61  ;;  %v5448_v3 = vmul.f32 -1.442695, %v12090_v58 }
 0x8dc   : > { %v10137_v44 = vpop.permute.xlu0 %4618  ;;  %v5945_v13 = vpop.eup %5944  ;;  %v10142_v37 = vsel %vm5014_vm4, %v4992_v47, %v4617_v52  ;;  %4872 = vrot.lane.b32.xlu1 %v5937_v17, %s6045_s12  ;;  %4874 = vrot.lane.b32.xlu0 %v5939_v40, %s6045_s12  ;;  %v4232_v0 = vadd.f32 1.0, %v5943_v49  ;;  %v4994_v17 = vsel %vm4981_vm3, %v4961_v45, %v9945_v56  ;;  %5970 = vpow2.f32 %v5446_v5  ;;  %v12091_v47 = vld [vmem:[#allocation110_spill] sm:$0xff] }
 0x8dd   : > { %v5947_v15 = vpop.eup %5946  ;;  %5972 = vrcp.f32 %v4231_v36  ;;  %v3041_v52 = vmul.f32 %v11859_v51, %v12091_v47  ;;  %v4963_v1 = vsel %vm4948_vm2, %v3074_v38, %v9795_v29 }
 0x8de   : > { %v5949_v33 = vpop.eup %5948  ;;  %5974 = vrcp.f32 %v4232_v0 }
 0x8df   : > { %v5951_v14 = vpop.eup %5950  ;;  %v4621_v40 = vpop.permute.xlu1 %4620  ;;  %v4233_v49 = vadd.f32 1.0, %v5949_v33  ;;  %5976 = vpow2.f32 %v5447_v34  ;;  %v12093_v33 = vld [vmem:[#allocation33_spill] sm:$0xff]  ;;  %v3076_v0 = vadd.f32 %v12063_v27, %v3041_v52  ;;  %v3043_v34 = vmul.f32 %v11863_v24, %v12094_v19 }
 0x8e0   : > { %v10153_v35 = vpop.permute.xlu0 %4622  ;;  %v10158_v28 = vsel %vm5014_vm4, %v4994_v17, %v4621_v40  ;;  %4876 = vrot.lane.b32.xlu1 %v5945_v13, %s6045_s12  ;;  %4878 = vrot.lane.b32.xlu0 %v5947_v15, %s6045_s12  ;;  %v5953_v31 = vpop.eup %5952  ;;  %v4234_v56 = vadd.f32 1.0, %v5951_v14  ;;  %v4996_v13 = vsel %vm4981_vm3, %v4963_v1, %v9955_v41  ;;  %v5450_v45 = vmul.f32 -1.442695, %v12093_v33 }
 0x8e1   : > { %v5955_v61 = vpop.eup %5954  ;;  %5978 = vpow2.f32 %v5448_v3  ;;  %v4965_v17 = vsel %vm4948_vm2, %v3076_v0, %v9805_v26 }
 0x8e2   : > { %v5957_v5 = vpop.eup %5956  ;;  %v4235_v14 = vadd.f32 1.0, %v5955_v61  ;;  %5980 = vrcp.f32 %v4233_v49  ;;  %v4998_v58 = vsel %vm4981_vm3, %v4965_v17, %v9967_v23  ;;  %v3078_v49 = vadd.f32 %v12063_v27, %v3043_v34  ;;  %v12095_v23 = vld [vmem:[#allocation117_spill] sm:$0xff] }
 0x8e3   : > { %v4625_v15 = vpop.permute.xlu1 %4624  ;;  %v5959_v36 = vpop.eup %5958  ;;  %5982 = vrcp.f32 %v4234_v56  ;;  %v3045_v52 = vmul.f32 %v11867_v48, %v12095_v23 }
 0x8e4   : > { %v10169_v20 = vpop.permute.xlu0 %4626  ;;  %v10174_v51 = vsel %vm5014_vm4, %v4996_v13, %v4625_v15  ;;  %4880 = vrot.lane.b32.xlu1 %v5953_v31, %s6045_s12  ;;  %4882 = vrot.lane.b32.xlu0 %v5957_v5, %s6045_s12  ;;  %v5961_v29 = vpop.eup %5960  ;;  %5984 = vpow2.f32 %v5449_v30  ;;  %v4967_v1 = vsel %vm4948_vm2, %v3078_v49, %v9815_v10 }
 0x8e5   : > { %v5963_v41 = vpop.eup %5962  ;;  %v4236_v47 = vadd.f32 1.0, %v5961_v29  ;;  %5986 = vpow2.f32 %v5450_v45  ;;  %v5000_v8 = vsel %vm4981_vm3, %v4967_v1, %v9979_v55  ;;  %v3080_v33 = vadd.f32 %v12063_v27, %v3045_v52  ;;  %v12096_v55 = vld [vmem:[#allocation78_spill] sm:$0xff] }
 0x8e6   : > { %v5965_v40 = vpop.eup %5964  ;;  %5988 = vrcp.f32 %v4235_v14  ;;  %v4237_v26 = vadd.f32 1.0, %v5963_v41  ;;  %v3047_v29 = vmul.f32 %v11871_v32, %v12096_v55 }
 0x8e7   : > { %v4629_v3 = vpop.permute.xlu1 %4628  ;;  %v5967_v31 = vpop.eup %5966  ;;  %5990 = vrcp.f32 %v4236_v47  ;;  %v4969_v14 = vsel %vm4948_vm2, %v3080_v33, %v9825_v42 }
 0x8e8   : > { %v10184_v38 = vpop.permute.xlu0 %4630  ;;  %v10188_v61 = vsel %vm5014_vm4, %v4998_v58, %v4629_v3  ;;  %4884 = vrot.lane.b32.xlu1 %v5959_v36, %s6045_s12  ;;  %4886 = vrot.lane.b32.xlu0 %v5965_v40, %s6045_s12  ;;  %v5969_v24 = vpop.eup %5968  ;;  %5992 = vrcp.f32 %v4237_v26  ;;  %v5002_v19 = vsel %vm4981_vm3, %v4969_v14, %v9991_v25  ;;  %v3082_v3 = vadd.f32 %v12063_v27, %v3047_v29  ;;  %v12097_v25 = vld [vmem:[#allocation69_spill] sm:$0xff] }
 0x8e9   : > { %v5971_v56 = vpop.eup %5970  ;;  %v4238_v36 = vadd.f32 1.0, %v5969_v24  ;;  %v3049_v49 = vmul.f32 %v11875_v18, %v12097_v25 }
 0x8ea   : > { %v5973_v5 = vpop.eup %5972  ;;  %v4239_v10 = vadd.f32 1.0, %v5971_v56  ;;  %v4971_v24 = vsel %vm4948_vm2, %v3082_v3, %v9835_v16 }
 0x8eb   : > { %v4633_v30 = vpop.permute.xlu1 %4632  ;;  %v5975_v15 = vpop.eup %5974  ;;  %5994 = vrcp.f32 %v4238_v36  ;;  %v5004_v56 = vsel %vm4981_vm3, %v4971_v24, %v10003_v54 }
 0x8ec   : > { %v10198_v13 = vpop.permute.xlu0 %4634  ;;  %v10202_v45 = vsel %vm5014_vm4, %v5000_v8, %v4633_v30  ;;  %4888 = vrot.lane.b32.xlu1 %v5967_v31, %s6045_s12  ;;  %4890 = vrot.lane.b32.xlu0 %v5973_v5, %s6045_s12  ;;  %v5977_v48 = vpop.eup %5976  ;;  %5996 = vrcp.f32 %v4239_v10  ;;  %v3084_v5 = vadd.f32 %v12063_v27, %v3049_v49  ;;  %v12098_v30 = vld [vmem:[#allocation68_spill] sm:$0xff] }
 0x8ed   : > { %v5979_v0 = vpop.eup %5978  ;;  %v4240_v58 = vadd.f32 1.0, %v5977_v48  ;;  %v3051_v54 = vmul.f32 %v11879_v22, %v12098_v30 }
 0x8ee   : > { %v5981_v41 = vpop.eup %5980  ;;  %v4241_v42 = vadd.f32 1.0, %v5979_v0 }
 0x8ef   : > { %v4637_v34 = vpop.permute.xlu1 %4636  ;;  %v5983_v40 = vpop.eup %5982  ;;  %5998 = vrcp.f32 %v4240_v58  ;;  %v3086_v0 = vadd.f32 %v12063_v27, %v3051_v54  ;;  %v12103_v58 = vld [vmem:[#allocation95_spill] sm:$0xff] }
 0x8f0   : > { %v10212_v17 = vpop.permute.xlu0 %4638  ;;  %v10216_v31 = vsel %vm5014_vm4, %v5002_v19, %v4637_v34  ;;  %4892 = vrot.lane.b32.xlu1 %v5975_v15, %s6045_s12  ;;  %4894 = vrot.lane.b32.xlu0 %v5981_v41, %s6045_s12  ;;  %v5985_v32 = vpop.eup %5984  ;;  %6000 = vrcp.f32 %v4241_v42  ;;  %v4973_v15 = vsel %vm4948_vm2, %v3084_v5, %v9845_v60  ;;  %v12101_v60 = vld [vmem:[#allocation42_spill] sm:$0xff]  ;;  %v3056_v3 = vmul.f32 %v12065_v9, %v12103_v58 }
 0x8f1   : > { %v5987_v47 = vpop.eup %5986  ;;  %v4242_v1 = vadd.f32 1.0, %v5985_v32  ;;  %v5006_v33 = vsel %vm4981_vm3, %v4973_v15, %v10015_v21  ;;  %v3053_v29 = vmul.f32 %v11883_v2, %v12101_v60  ;;  %v4975_v21 = vsel %vm4948_vm2, %v3086_v0, %v9855_v4 }
 0x8f2   : > { %v5989_v26 = vpop.eup %5988  ;;  %v4243_v18 = vadd.f32 1.0, %v5987_v47  ;;  %v5008_v41 = vsel %vm4981_vm3, %v4975_v21, %v10027_v46  ;;  %v3091_v9 = vadd.f32 %v12063_v27, %v3056_v3 }
 0x8f3   : > { %v4641_v23 = vpop.permute.xlu1 %4640  ;;  %v5991_v16 = vpop.eup %5990  ;;  %6002 = vrcp.f32 %v4242_v1 }
 0x8f4   : > { %v10226_v52 = vpop.permute.xlu0 %4642  ;;  %v10230_v8 = vsel %vm5014_vm4, %v5004_v56, %v4641_v23  ;;  %4896 = vrot.lane.b32.xlu1 %v5983_v40, %s6045_s12  ;;  %4898 = vrot.lane.b32.xlu0 %v5989_v26, %s6045_s12  ;;  %v5993_v36 = vpop.eup %5992  ;;  %6004 = vrcp.f32 %v4243_v18  ;;  %v3088_v40 = vadd.f32 %v12063_v27, %v3053_v29 }
 0x8f5   : > { %v5995_v22 = vpop.eup %5994 }
 0x8f6   : > { %v5997_v14 = vpop.eup %5996  ;;  %v4977_v4 = vsel %vm4948_vm2, %v3088_v40, %v9865_v53  ;;  %v4980_v53 = vsel %vm4948_vm2, %v3091_v9, %v9877_v7 }
 0x8f7   : > { %v4645_v48 = vpop.permute.xlu1 %4644  ;;  %v5010_v42 = vsel %vm4981_vm3, %v4977_v4, %v10041_v11  ;;  %v5013_v11 = vsel %vm4981_vm3, %v4980_v53, %v10055_v39 }
 0x8f8   : > { %v10240_v10 = vpop.permute.xlu0 %4646  ;;  %v10244_v55 = vsel %vm5014_vm4, %v5006_v33, %v4645_v48  ;;  %4900 = vrot.lane.b32.xlu1 %v5991_v16, %s6045_s12  ;;  %4902 = vrot.lane.b32.xlu0 %v5993_v36, %s6045_s12 }
 0x8f9   : > { %12099 = vst [vmem:[#allocation100_spill] sm:$0xff] %v10240_v10  ;;  %12100 = vst [vmem:[#allocation212_spill] sm:$0xff] %v10244_v55  ;;  %v5999_v2 = vpop.eup %5998  ;;  %v12124_v55 = vld [vmem:[#allocation137_spill] sm:$0xff] }
 0x8fa   : > { %v6001_v46 = vpop.eup %6000 }
 0x8fb   : > { %v4649_v19 = vpop.permute.xlu1 %4648 }
 0x8fc   : > { %v10254_v34 = vpop.permute.xlu0 %4650  ;;  %v10260_v32 = vsel %vm5014_vm4, %v5008_v41, %v4649_v19  ;;  %4904 = vrot.lane.b32.xlu1 %v5995_v22, %s6045_s12  ;;  %4906 = vrot.lane.b32.xlu0 %v5997_v14, %s6045_s12 }
 0x8fd   : > { %12102 = vst [vmem:[#allocation120_spill] sm:$0xff] %v10254_v34  ;;  %12104 = vst [vmem:[#allocation217_spill] sm:$0xff] %v10260_v32  ;;  %v6003_v24 = vpop.eup %6002  ;;  %v12119_v32 = vld [vmem:[#allocation38_spill] sm:$0xff] }
 0x8fe   : > { %v6005_v26 = vpop.eup %6004  ;;  %v12120_v34 = vld [vmem:[#allocation162_spill] sm:$0xff] }
 0x8ff   : > { %v4653_v47 = vpop.permute.xlu1 %4652 }
 0x900   : > { %v10268_v25 = vpop.permute.xlu0 %4654  ;;  %v10272_v49 = vsel %vm5014_vm4, %v5010_v42, %v4653_v47  ;;  %4908 = vrot.lane.b32.xlu1 %v5999_v2, %s6045_s12  ;;  %4910 = vrot.lane.b32.xlu0 %v6001_v46, %s6045_s12 }
 0x901   : > { %12105 = vst [vmem:[#allocation204_spill] sm:$0xff] %v10268_v25  ;;  %12106 = vst [vmem:[#allocation60_spill] sm:$0xff] %v10272_v49 }
 0x903   : > { %v4657_v56 = vpop.permute.xlu1 %4656 }
 0x904   : > { %v4659_v23 = vpop.permute.xlu0 %4658  ;;  %v10282_v1 = vsel %vm5014_vm4, %v10059_v43, %v4657_v56  ;;  %4912 = vrot.lane.b32.xlu1 %v6003_v24, %s6045_s12  ;;  %4914 = vrot.lane.b32.xlu0 %v6005_v26, %s6045_s12  ;;  %v12115_v26 = vld [vmem:[#allocation75_spill] sm:$0xff] }
 0x905   : > { %12107 = vst [vmem:[#allocation209_spill] sm:$0xff] %v10282_v1  ;;  %v10285_v5 = vsel %vm5014_vm4, %v5013_v11, %v4659_v23  ;;  %v12116_v11 = vld [vmem:[#allocation160_spill] sm:$0xff] }
 0x906   : > { %12108 = vst [vmem:[#allocation62_spill] sm:$0xff] %v10285_v5  ;;  %v3025_v56 = vmul.f32 %v12116_v11, %v12115_v26  ;;  %v12117_v23 = vld [vmem:[#allocation72_spill] sm:$0xff]  ;;  %v12118_v5 = vld [vmem:[#allocation146_spill] sm:$0xff]  ;;  %v12125_v11 = vld [vmem:[#allocation109_spill] sm:$0xff] }
 0x907   : > { %v4725_v18 = vpop.permute.xlu1 %4724  ;;  %v3026_v1 = vmul.f32 %v12118_v5, %v12117_v23  ;;  %v12126_v5 = vld [vmem:[#allocation165_spill] sm:$0xff] }
 0x908   : > { %v4727_v16 = vpop.permute.xlu0 %4726  ;;  %v3060_v49 = vadd.f32 %v12063_v27, %v3025_v56  ;;  %v3028_v23 = vmul.f32 %v12126_v5, %v12125_v11  ;;  %v12127_v56 = vld [vmem:[#allocation202_spill] sm:$0xff]  ;;  %v12132_v11 = vld [vmem:[#allocation169_spill] sm:$0xff] }
 0x909   : > { %v3061_v25 = vadd.f32 %v12063_v27, %v3026_v1 }
 0x90b   : > { %v10289_v7 = vpop.permute.xlu1 %4728  ;;  %v4950_v26 = vsel %vm4948_vm2, %v3061_v25, %v12124_v55  ;;  %v12131_v25 = vld [vmem:[#allocation35_spill] sm:$0xff] }
 0x90c   : > { %v10291_v30 = vpop.permute.xlu0 %4730  ;;  %v3030_v5 = vmul.f32 %v12132_v11, %v12131_v25 }
 0x90e   : > { %v3065_v10 = vadd.f32 %v12063_v27, %v3030_v5 }
 0x90f   : > { %v10293_v39 = vpop.permute.xlu1 %4732 }
 0x910   : > { %v10295_v54 = vpop.permute.xlu0 %4734 }
 0x913   : > { %v10297_v15 = vpop.permute.xlu1 %4736 }
 0x914   : > { %v10299_v43 = vpop.permute.xlu0 %4738 }
 0x917   : > { %v10301_v36 = vpop.permute.xlu1 %4740 }
 0x918   : > { %v10303_v33 = vpop.permute.xlu0 %4742 }
 0x91b   : > { %v10305_v48 = vpop.permute.xlu1 %4744 }
 0x91c   : > { %v10307_v0 = vpop.permute.xlu0 %4746 }
 0x91f   : > { %v10309_v22 = vpop.permute.xlu1 %4748 }
 0x920   : > { %v10311_v60 = vpop.permute.xlu0 %4750 }
 0x923   : > { %v10313_v29 = vpop.permute.xlu1 %4752 }
 0x924   : > { %v10315_v21 = vpop.permute.xlu0 %4754 }
 0x927   : > { %v10317_v14 = vpop.permute.xlu1 %4756 }
 0x928   : > { %v10319_v41 = vpop.permute.xlu0 %4758 }
 0x92b   : > { %v10321_v19 = vpop.permute.xlu1 %4760 }
 0x92c   : > { %v10323_v40 = vpop.permute.xlu0 %4762 }
 0x92f   : > { %v10325_v58 = vpop.permute.xlu1 %4764 }
 0x930   : > { %v10327_v3 = vpop.permute.xlu0 %4766 }
 0x933   : > { %v10329_v2 = vpop.permute.xlu1 %4768 }
 0x934   : > { %v10331_v4 = vpop.permute.xlu0 %4770 }
 0x937   : > { %v10333_v46 = vpop.permute.xlu1 %4772 }
 0x938   : > { %12109 = vst [vmem:[#allocation139_spill] sm:$0xff] %v10333_v46  ;;  %v10335_v42 = vpop.permute.xlu0 %4774  ;;  %v12129_v46 = vld [vmem:[#allocation201_spill] sm:$0xff] }
 0x939   : > { %12110 = vst [vmem:[#allocation39_spill] sm:$0xff] %v10335_v42  ;;  %v3027_v42 = vmul.f32 %v12120_v34, %v12119_v32  ;;  %v12128_v32 = vld [vmem:[#allocation182_spill] sm:$0xff] }
 0x93b   : > { %v10337_v47 = vpop.permute.xlu1 %4776  ;;  %v3062_v1 = vadd.f32 %v12063_v27, %v3027_v42 }
 0x93c   : > { %12111 = vst [vmem:[#allocation134_spill] sm:$0xff] %v10337_v47  ;;  %v10339_v9 = vpop.permute.xlu0 %4778 }
 0x93d   : > { %12112 = vst [vmem:[#allocation187_spill] sm:$0xff] %v10339_v9 }
 0x93f   : > { %v10341_v24 = vpop.permute.xlu1 %4780 }
 0x940   : > { %12113 = vst [vmem:[#allocation186_spill] sm:$0xff] %v10341_v24  ;;  %v10343_v53 = vpop.permute.xlu0 %4782  ;;  %v12123_v24 = vld [vmem:[#allocation128_spill] sm:$0xff] }
 0x941   : > { %12114 = vst [vmem:[#allocation61_spill] sm:$0xff] %v10343_v53  ;;  %v4949_v53 = vsel %vm4948_vm2, %v3060_v49, %v12123_v24  ;;  %v12130_v24 = vld [vmem:[#allocation189_spill] sm:$0xff] }
 0x942   : > { %v4982_v34 = vsel %vm4981_vm3, %v4949_v53, %v12127_v56  ;;  %v12134_v56 = vld [vmem:[#allocation164_spill] sm:$0xff] }
 0x943   : > { %v10353_v47 = vpop.permute.xlu1 %4784  ;;  %v5015_v49 = vsel %vm5014_vm4, %v4982_v34, %v12129_v46 }
 0x944   : > { %12121 = vst [vmem:[#allocation167_spill] sm:$0xff] %v10353_v47  ;;  %v10355_v9 = vpop.permute.xlu0 %4786  ;;  %v4983_v47 = vsel %vm4981_vm3, %v4950_v26, %v12128_v32  ;;  %v5048_v42 = vsel %vm5047_vm5, %v5015_v49, %v4725_v18  ;;  %v12135_v32 = vld [vmem:[#allocation207_spill] sm:$0xff] }
 0x945   : > { %12122 = vst [vmem:[#allocation198_spill] sm:$0xff] %v10355_v9  ;;  %v3063_v9 = vadd.f32 %v12063_v27, %v3028_v23  ;;  %v5016_v55 = vsel %vm5014_vm4, %v4983_v47, %v12130_v24  ;;  %v12133_v23 = vld [vmem:[#allocation147_spill] sm:$0xff]  ;;  %v12136_v24 = vld [vmem:[#allocation138_spill] sm:$0xff] }
 0x946   : > { %v5049_v53 = vsel %vm5047_vm5, %v5016_v55, %v4727_v16  ;;  %v4951_v47 = vsel %vm4948_vm2, %v3062_v1, %v12133_v23  ;;  %v12138_v23 = vld [vmem:[#allocation175_spill] sm:$0xff] }
 0x947   : > { %v4853_v46 = vpop.permute.xlu1 %4852  ;;  %v4952_v34 = vsel %vm4948_vm2, %v3063_v9, %v12134_v56  ;;  %v4984_v49 = vsel %vm4981_vm3, %v4951_v47, %v12135_v32  ;;  %v12137_v9 = vld [vmem:[#allocation111_spill] sm:$0xff]  ;;  %v12139_v47 = vld [vmem:[#allocation130_spill] sm:$0xff]  ;;  %v12140_v56 = vld [vmem:[#allocation173_spill] sm:$0xff] }
 0x948   : > { %v4855_v26 = vpop.permute.xlu0 %4854  ;;  %v5081_v18 = vsel %vm5080_vm6, %v5048_v42, %v4853_v46  ;;  %v4985_v55 = vsel %vm4981_vm3, %v4952_v34, %v12136_v24  ;;  %v5017_v1 = vsel %vm5014_vm4, %v4984_v49, %v10074_v50  ;;  %v4954_v50 = vsel %vm4948_vm2, %v3065_v10, %v12138_v23  ;;  %v12141_v32 = vld [vmem:[#allocation143_spill] sm:$0xff] }
 0x949   : > { %v5082_v16 = vsel %vm5080_vm6, %v5049_v53, %v4855_v26  ;;  %v5114_v25 = vsel %vm5113_vm7, %v5081_v18, 0.0  ;;  %v5018_v42 = vsel %vm5014_vm4, %v4985_v55, %v12137_v9  ;;  %v5050_v53 = vsel %vm5047_vm5, %v5017_v1, %v10289_v7  ;;  %v12142_v9 = vld [vmem:[#allocation66_spill] sm:$0xff]  ;;  %v12145_v23 = vld [vmem:[#allocation135_spill] sm:$0xff] }
 0x94a   : > { %v5115_v11 = vsel %vm5113_vm7, %v5082_v16, 0.0  ;;  %5147 = vst.msk [vmem:[%s10381_s15] sm:$0xff] %vm5146_vm8, %v5114_v25  ;;  %v5051_v46 = vsel %vm5047_vm5, %v5018_v42, %v10291_v30  ;;  %v3032_v34 = vmul.f32 %v12140_v56, %v12139_v47  ;;  %v4987_v49 = vsel %vm4981_vm3, %v4954_v50, %v12141_v32  ;;  %v12146_v32 = vld [vmem:[#allocation168_spill] sm:$0xff] }
 0x94b   : > { %5148 = vst.msk [vmem:[%s10381_s15 + $0x8] sm:$0xff] %vm5146_vm8, %v5115_v11  ;;  %v4857_v26 = vpop.permute.xlu1 %4856  ;;  %v5020_v55 = vsel %vm5014_vm4, %v4987_v49, %v10089_v62  ;;  %v5052_v10 = vsel %vm5047_vm5, %v10094_v6, %v10293_v39  ;;  %v12144_v62 = vld [vmem:[#allocation177_spill] sm:$0xff]  ;;  %v5054_v56 = vsel %vm5047_vm5, %v10110_v12, %v10297_v15 }
 0x94c   : > { %v4859_v5 = vpop.permute.xlu0 %4858  ;;  %v5083_v18 = vsel %vm5080_vm6, %v5050_v53, %v4857_v26  ;;  %v3067_v30 = vadd.f32 %v12063_v27, %v3032_v34  ;;  %v5053_v25 = vsel %vm5047_vm5, %v5020_v55, %v10295_v54  ;;  %v12143_v53 = vld [vmem:[#allocation122_spill] sm:$0xff] }
 0x94d   : > { %v5084_v16 = vsel %vm5080_vm6, %v5051_v46, %v4859_v5  ;;  %v5116_v7 = vsel %vm5113_vm7, %v5083_v18, 0.0  ;;  %v3034_v46 = vmul.f32 %v12144_v62, %v12143_v53  ;;  %v12150_v62 = vld [vmem:[#allocation140_spill] sm:$0xff] }
 0x94e   : > { %v5117_v24 = vsel %vm5113_vm7, %v5084_v16, 0.0  ;;  %5149 = vst.msk [vmem:[%s10381_s15 + $0x10] sm:$0xff] %vm5146_vm8, %v5116_v7  ;;  %v4956_v42 = vsel %vm4948_vm2, %v3067_v30, %v12142_v9  ;;  %v12147_v7 = vld [vmem:[#allocation136_spill] sm:$0xff] }
 0x94f   : > { %5150 = vst.msk [vmem:[%s10381_s15 + $0x18] sm:$0xff] %vm5146_vm8, %v5117_v24  ;;  %v4861_v11 = vpop.permute.xlu1 %4860  ;;  %v4989_v50 = vsel %vm4981_vm3, %v4956_v42, %v12145_v23  ;;  %v3069_v54 = vadd.f32 %v12063_v27, %v3034_v46 }
 0x950   : > { %v4863_v1 = vpop.permute.xlu0 %4862  ;;  %v5085_v26 = vsel %vm5080_vm6, %v5052_v10, %v4861_v11  ;;  %v5022_v47 = vsel %vm5014_vm4, %v4989_v50, %v10105_v57  ;;  %v12148_v57 = vld [vmem:[#allocation181_spill] sm:$0xff]  ;;  %v12149_v10 = vld [vmem:[#allocation82_spill] sm:$0xff] }
 0x951   : > { %v5086_v5 = vsel %vm5080_vm6, %v5053_v25, %v4863_v1  ;;  %v5118_v6 = vsel %vm5113_vm7, %v5085_v26, 0.0  ;;  %v5055_v34 = vsel %vm5047_vm5, %v5022_v47, %v10299_v43  ;;  %v4958_v49 = vsel %vm4948_vm2, %v3069_v54, %v12146_v32  ;;  %v12151_v26 = vld [vmem:[#allocation141_spill] sm:$0xff] }
 0x952   : > { %v5119_v39 = vsel %vm5113_vm7, %v5086_v5, 0.0  ;;  %5151 = vst.msk [vmem:[%s10381_s15 + $0x20] sm:$0xff] %vm5146_vm8, %v5118_v6  ;;  %v3036_v24 = vmul.f32 %v12148_v57, %v12147_v7  ;;  %v4991_v25 = vsel %vm4981_vm3, %v4958_v49, %v12149_v10  ;;  %v5056_v1 = vsel %vm5047_vm5, %v10126_v63, %v10301_v36  ;;  %v12153_v6 = vld [vmem:[#allocation99_spill] sm:$0xff]  ;;  %v12155_v49 = vld [vmem:[#allocation41_spill] sm:$0xff] }
 0x953   : > { %5152 = vst.msk [vmem:[%s10381_s15 + $0x28] sm:$0xff] %vm5146_vm8, %v5119_v39  ;;  %v4865_v18 = vpop.permute.xlu1 %4864  ;;  %v5024_v11 = vsel %vm5014_vm4, %v4991_v25, %v10121_v59  ;;  %v12152_v59 = vld [vmem:[#allocation185_spill] sm:$0xff]  ;;  %v5058_v47 = vsel %vm5047_vm5, %v10142_v37, %v10305_v48  ;;  %v5060_v25 = vsel %vm5047_vm5, %v10158_v28, %v10309_v22 }
 0x954   : > { %v4867_v16 = vpop.permute.xlu0 %4866  ;;  %v5087_v30 = vsel %vm5080_vm6, %v5054_v56, %v4865_v18  ;;  %v3071_v43 = vadd.f32 %v12063_v27, %v3036_v24  ;;  %v5057_v9 = vsel %vm5047_vm5, %v5024_v11, %v10303_v33  ;;  %v3038_v5 = vmul.f32 %v12152_v59, %v12151_v26  ;;  %v12158_v11 = vld [vmem:[#allocation170_spill] sm:$0xff] }
 0x955   : > { %v5088_v55 = vsel %vm5080_vm6, %v5055_v34, %v4867_v16  ;;  %v5120_v12 = vsel %vm5113_vm7, %v5087_v30, 0.0  ;;  %v12154_v16 = vld [vmem:[#allocation194_spill] sm:$0xff]  ;;  %v12157_v30 = vld [vmem:[#allocation37_spill] sm:$0xff] }
 0x956   : > { %v5121_v15 = vsel %vm5113_vm7, %v5088_v55, 0.0  ;;  %5153 = vst.msk [vmem:[%s10381_s15 + $0x30] sm:$0xff] %vm5146_vm8, %v5120_v12  ;;  %v4960_v46 = vsel %vm4948_vm2, %v3071_v43, %v12150_v62  ;;  %v3073_v33 = vadd.f32 %v12063_v27, %v3038_v5  ;;  %v5062_v5 = vsel %vm5047_vm5, %v10174_v51, %v10313_v29 }
 0x957   : > { %5154 = vst.msk [vmem:[%s10381_s15 + $0x38] sm:$0xff] %vm5146_vm8, %v5121_v15  ;;  %v4869_v42 = vpop.permute.xlu1 %4868  ;;  %v4993_v39 = vsel %vm4981_vm3, %v4960_v46, %v12153_v6  ;;  %v12161_v46 = vld [vmem:[#allocation184_spill] sm:$0xff] }
 0x958   : > { %v4871_v53 = vpop.permute.xlu0 %4870  ;;  %v5089_v23 = vsel %vm5080_vm6, %v5056_v1, %v4869_v42  ;;  %v5026_v54 = vsel %vm5014_vm4, %v4993_v39, %v10137_v44  ;;  %v4962_v32 = vsel %vm4948_vm2, %v3073_v33, %v12154_v16  ;;  %v12156_v44 = vld [vmem:[#allocation152_spill] sm:$0xff]  ;;  %v12162_v39 = vld [vmem:[#allocation199_spill] sm:$0xff]  ;;  %v5064_v16 = vsel %vm5047_vm5, %v10188_v61, %v10317_v14 }
 0x959   : > { %v5090_v50 = vsel %vm5080_vm6, %v5057_v9, %v4871_v53  ;;  %v5122_v63 = vsel %vm5113_vm7, %v5089_v23, 0.0  ;;  %v5059_v56 = vsel %vm5047_vm5, %v5026_v54, %v10307_v0  ;;  %v3040_v7 = vmul.f32 %v12156_v44, %v12155_v49  ;;  %v12159_v9 = vld [vmem:[#allocation73_spill] sm:$0xff] }
 0x95a   : > { %v5123_v36 = vsel %vm5113_vm7, %v5090_v50, 0.0  ;;  %5155 = vst.msk [vmem:[%s10381_s15 + $0x40] sm:$0xff] %vm5146_vm8, %v5122_v63  ;;  %v4995_v55 = vsel %vm4981_vm3, %v4962_v32, %v12157_v30 }
 0x95b   : > { %5156 = vst.msk [vmem:[%s10381_s15 + $0x48] sm:$0xff] %vm5146_vm8, %v5123_v36  ;;  %v4873_v34 = vpop.permute.xlu1 %4872  ;;  %v3075_v0 = vadd.f32 %v12063_v27, %v3040_v7  ;;  %v5028_v10 = vsel %vm5014_vm4, %v4995_v55, %v10153_v35  ;;  %v12160_v35 = vld [vmem:[#allocation71_spill] sm:$0xff]  ;;  %v12163_v36 = vld [vmem:[#allocation76_spill] sm:$0xff] }
 0x95c   : > { %v4875_v18 = vpop.permute.xlu0 %4874  ;;  %v5091_v57 = vsel %vm5080_vm6, %v5058_v47, %v4873_v34  ;;  %v5061_v12 = vsel %vm5047_vm5, %v5028_v10, %v10311_v60  ;;  %v3042_v42 = vmul.f32 %v12160_v35, %v12159_v9  ;;  %v12166_v7 = vld [vmem:[#allocation188_spill] sm:$0xff]  ;;  %v12171_v9 = vld [vmem:[#allocation77_spill] sm:$0xff] }
 0x95d   : > { %v5092_v24 = vsel %vm5080_vm6, %v5059_v56, %v4875_v18  ;;  %v5124_v37 = vsel %vm5113_vm7, %v5091_v57, 0.0  ;;  %v4964_v1 = vsel %vm4948_vm2, %v3075_v0, %v12158_v11  ;;  %v12165_v56 = vld [vmem:[#allocation145_spill] sm:$0xff]  ;;  %v12170_v11 = vld [vmem:[#allocation176_spill] sm:$0xff] }
 0x95e   : > { %v5125_v48 = vsel %vm5113_vm7, %v5092_v24, 0.0  ;;  %5157 = vst.msk [vmem:[%s10381_s15 + $0x50] sm:$0xff] %vm5146_vm8, %v5124_v37  ;;  %v4997_v26 = vsel %vm4981_vm3, %v4964_v1, %v12161_v46  ;;  %v3077_v60 = vadd.f32 %v12063_v27, %v3042_v42  ;;  %v12167_v24 = vld [vmem:[#allocation113_spill] sm:$0xff] }
 0x95f   : > { %5158 = vst.msk [vmem:[%s10381_s15 + $0x58] sm:$0xff] %vm5146_vm8, %v5125_v48  ;;  %v4877_v15 = vpop.permute.xlu1 %4876  ;;  %v5030_v59 = vsel %vm5014_vm4, %v4997_v26, %v10169_v20  ;;  %v12164_v20 = vld [vmem:[#allocation153_spill] sm:$0xff]  ;;  %v12169_v48 = vld [vmem:[#allocation183_spill] sm:$0xff] }
 0x960   : > { %v4879_v43 = vpop.permute.xlu0 %4878  ;;  %v5093_v53 = vsel %vm5080_vm6, %v5060_v25, %v4877_v15  ;;  %v5063_v23 = vsel %vm5047_vm5, %v5030_v59, %v10315_v21  ;;  %v4966_v63 = vsel %vm4948_vm2, %v3077_v60, %v12162_v39  ;;  %v3044_v33 = vmul.f32 %v12164_v20, %v12163_v36  ;;  %v12177_v36 = vld [vmem:[#allocation90_spill] sm:$0xff] }
 0x961   : > { %v5094_v62 = vsel %vm5080_vm6, %v5061_v12, %v4879_v43  ;;  %v5126_v28 = vsel %vm5113_vm7, %v5093_v53, 0.0  ;;  %v4999_v34 = vsel %vm4981_vm3, %v4966_v63, %v12165_v56  ;;  %v5066_v25 = vsel %vm5047_vm5, %v10202_v45, %v10321_v19 }
 0x962   : > { %v5127_v22 = vsel %vm5113_vm7, %v5094_v62, 0.0  ;;  %5159 = vst.msk [vmem:[%s10381_s15 + $0x60] sm:$0xff] %vm5146_vm8, %v5126_v28  ;;  %v3079_v21 = vadd.f32 %v12063_v27, %v3044_v33  ;;  %v5032_v18 = vsel %vm5014_vm4, %v4999_v34, %v10184_v38  ;;  %v12168_v38 = vld [vmem:[#allocation85_spill] sm:$0xff]  ;;  %v12173_v62 = vld [vmem:[#allocation144_spill] sm:$0xff]  ;;  %v5068_v28 = vsel %vm5047_vm5, %v10216_v31, %v10325_v58 }
 0x963   : > { %5160 = vst.msk [vmem:[%s10381_s15 + $0x68] sm:$0xff] %vm5146_vm8, %v5127_v22  ;;  %v4881_v50 = vpop.permute.xlu1 %4880  ;;  %v5065_v32 = vsel %vm5047_vm5, %v5032_v18, %v10319_v41  ;;  %v3046_v30 = vmul.f32 %v12168_v38, %v12167_v24  ;;  %v12183_v24 = vld [vmem:[#allocation139_spill] sm:$0xff]  ;;  %v12184_v38 = vld [vmem:[#allocation212_spill] sm:$0xff] }
 0x964   : > { %v4883_v6 = vpop.permute.xlu0 %4882  ;;  %v5095_v54 = vsel %vm5080_vm6, %v5062_v5, %v4881_v50  ;;  %v4968_v57 = vsel %vm4948_vm2, %v3079_v21, %v12166_v7  ;;  %v12174_v5 = vld [vmem:[#allocation192_spill] sm:$0xff]  ;;  %v12175_v50 = vld [vmem:[#allocation87_spill] sm:$0xff] }
 0x965   : > { %v5096_v47 = vsel %vm5080_vm6, %v5063_v23, %v4883_v6  ;;  %v5128_v51 = vsel %vm5113_vm7, %v5095_v54, 0.0  ;;  %v5001_v0 = vsel %vm4981_vm3, %v4968_v57, %v12169_v48  ;;  %v3081_v41 = vadd.f32 %v12063_v27, %v3046_v30  ;;  %v12179_v21 = vld [vmem:[#allocation67_spill] sm:$0xff]  ;;  %v12182_v7 = vld [vmem:[#allocation100_spill] sm:$0xff] }
 0x966   : > { %v5129_v29 = vsel %vm5113_vm7, %v5096_v47, 0.0  ;;  %5161 = vst.msk [vmem:[%s10381_s15 + $0x70] sm:$0xff] %vm5146_vm8, %v5128_v51  ;;  %v5034_v10 = vsel %vm5014_vm4, %v5001_v0, %v10198_v13  ;;  %v12172_v13 = vld [vmem:[#allocation49_spill] sm:$0xff]  ;;  %v5070_v54 = vsel %vm5047_vm5, %v10230_v8, %v10329_v2  ;;  %v12178_v51 = vld [vmem:[#allocation210_spill] sm:$0xff]  ;;  %v5072_v30 = vsel %vm5047_vm5, %v12184_v38, %v12183_v24 }
 0x967   : > { %5162 = vst.msk [vmem:[%s10381_s15 + $0x78] sm:$0xff] %vm5146_vm8, %v5129_v29  ;;  %v4885_v49 = vpop.permute.xlu1 %4884  ;;  %v5067_v12 = vsel %vm5047_vm5, %v5034_v10, %v10323_v40  ;;  %v4970_v1 = vsel %vm4948_vm2, %v3081_v41, %v12170_v11  ;;  %v3048_v35 = vmul.f32 %v12172_v13, %v12171_v9  ;;  %v12187_v41 = vld [vmem:[#allocation98_spill] sm:$0xff] }
 0x968   : > { %v4887_v44 = vpop.permute.xlu0 %4886  ;;  %v5097_v55 = vsel %vm5080_vm6, %v5064_v16, %v4885_v49  ;;  %v5003_v46 = vsel %vm4981_vm3, %v4970_v1, %v12173_v62  ;;  %v12181_v49 = vld [vmem:[#allocation174_spill] sm:$0xff]  ;;  %v12192_v62 = vld [vmem:[#allocation217_spill] sm:$0xff] }
 0x969   : > { %v5098_v37 = vsel %vm5080_vm6, %v5065_v32, %v4887_v44  ;;  %v5130_v61 = vsel %vm5113_vm7, %v5097_v55, 0.0  ;;  %v3083_v40 = vadd.f32 %v12063_v27, %v3048_v35  ;;  %v5036_v26 = vsel %vm5014_vm4, %v5003_v46, %v10212_v17  ;;  %v12176_v17 = vld [vmem:[#allocation56_spill] sm:$0xff]  ;;  %v12185_v55 = vld [vmem:[#allocation39_spill] sm:$0xff]  ;;  %v12188_v10 = vld [vmem:[#allocation54_spill] sm:$0xff] }
 0x96a   : > { %v5131_v14 = vsel %vm5113_vm7, %v5098_v37, 0.0  ;;  %5163 = vst.msk [vmem:[%s10381_s15 + $0x80] sm:$0xff] %vm5146_vm8, %v5130_v61  ;;  %v5069_v22 = vsel %vm5047_vm5, %v5036_v26, %v10327_v3  ;;  %v3050_v6 = vmul.f32 %v12176_v17, %v12175_v50  ;;  %v12186_v61 = vld [vmem:[#allocation179_spill] sm:$0xff]  ;;  %v12190_v35 = vld [vmem:[#allocation120_spill] sm:$0xff] }
 0x96b   : > { %5164 = vst.msk [vmem:[%s10381_s15 + $0x88] sm:$0xff] %vm5146_vm8, %v5131_v14  ;;  %v4889_v15 = vpop.permute.xlu1 %4888  ;;  %v4972_v23 = vsel %vm4948_vm2, %v3083_v40, %v12174_v5  ;;  %v12196_v17 = vld [vmem:[#allocation204_spill] sm:$0xff] }
 0x96c   : > { %v4891_v43 = vpop.permute.xlu0 %4890  ;;  %v5099_v42 = vsel %vm5080_vm6, %v5066_v25, %v4889_v15  ;;  %v5005_v20 = vsel %vm4981_vm3, %v4972_v23, %v12177_v36  ;;  %v3085_v3 = vadd.f32 %v12063_v27, %v3050_v6  ;;  %v3054_v25 = vmul.f32 %v12188_v10, %v12187_v41 }
 0x96d   : > { %v5100_v53 = vsel %vm5080_vm6, %v5067_v12, %v4891_v43  ;;  %v5132_v45 = vsel %vm5113_vm7, %v5099_v42, 0.0  ;;  %v5038_v33 = vsel %vm5014_vm4, %v5005_v20, %v10226_v52  ;;  %v12180_v52 = vld [vmem:[#allocation107_spill] sm:$0xff]  ;;  %v12189_v43 = vld [vmem:[#allocation196_spill] sm:$0xff]  ;;  %v12199_v20 = vld [vmem:[#allocation61_spill] sm:$0xff] }
 0x96e   : > { %v5133_v19 = vsel %vm5113_vm7, %v5100_v53, 0.0  ;;  %5165 = vst.msk [vmem:[%s10381_s15 + $0x90] sm:$0xff] %vm5146_vm8, %v5132_v45  ;;  %v5071_v47 = vsel %vm5047_vm5, %v5038_v33, %v10331_v4  ;;  %v4974_v29 = vsel %vm4948_vm2, %v3085_v3, %v12178_v51  ;;  %v3052_v18 = vmul.f32 %v12180_v52, %v12179_v21  ;;  %v12191_v53 = vld [vmem:[#allocation134_spill] sm:$0xff]  ;;  %v12193_v45 = vld [vmem:[#allocation187_spill] sm:$0xff]  ;;  %v12201_v51 = vld [vmem:[#allocation209_spill] sm:$0xff] }
 0x96f   : > { %5166 = vst.msk [vmem:[%s10381_s15 + $0x98] sm:$0xff] %vm5146_vm8, %v5133_v19  ;;  %v4893_v60 = vpop.permute.xlu1 %4892  ;;  %v5007_v44 = vsel %vm4981_vm3, %v4974_v29, %v12181_v49  ;;  %v3089_v13 = vadd.f32 %v12063_v27, %v3054_v25  ;;  %v5074_v46 = vsel %vm5047_vm5, %v12192_v62, %v12191_v53  ;;  %v12202_v21 = vld [vmem:[#allocation198_spill] sm:$0xff] }
 0x970   : > { %v4895_v59 = vpop.permute.xlu0 %4894  ;;  %v5101_v39 = vsel %vm5080_vm6, %v5068_v28, %v4893_v60  ;;  %v3087_v4 = vadd.f32 %v12063_v27, %v3052_v18  ;;  %v5040_v57 = vsel %vm5014_vm4, %v5007_v44, %v12182_v7  ;;  %v12194_v28 = vld [vmem:[#allocation215_spill] sm:$0xff]  ;;  %v12203_v52 = vld [vmem:[#allocation62_spill] sm:$0xff] }
 0x971   : > { %v5102_v63 = vsel %vm5080_vm6, %v5069_v22, %v4895_v59  ;;  %v5134_v31 = vsel %vm5113_vm7, %v5101_v39, 0.0  ;;  %v5073_v37 = vsel %vm5047_vm5, %v5040_v57, %v12185_v55  ;;  %v4978_v27 = vsel %vm4948_vm2, %v3089_v13, %v12194_v28  ;;  %v12195_v59 = vld [vmem:[#allocation52_spill] sm:$0xff]  ;;  %v12197_v39 = vld [vmem:[#allocation186_spill] sm:$0xff] }
 0x972   : > { %v5135_v58 = vsel %vm5113_vm7, %v5102_v63, 0.0  ;;  %5167 = vst.msk [vmem:[%s10381_s15 + $0xa0] sm:$0xff] %vm5146_vm8, %v5134_v31  ;;  %v4976_v14 = vsel %vm4948_vm2, %v3087_v4, %v12186_v61  ;;  %v5011_v5 = vsel %vm4981_vm3, %v4978_v27, %v12195_v59  ;;  %v12198_v63 = vld [vmem:[#allocation60_spill] sm:$0xff]  ;;  %v5079_v18 = vsel %vm5047_vm5, %v12203_v52, %v12202_v21 }
 0x973   : > { %5168 = vst.msk [vmem:[%s10381_s15 + $0xa8] sm:$0xff] %vm5146_vm8, %v5135_v58  ;;  %v4897_v56 = vpop.permute.xlu1 %4896  ;;  %v5009_v11 = vsel %vm4981_vm3, %v4976_v14, %v12189_v43  ;;  %v5044_v6 = vsel %vm5014_vm4, %v5011_v5, %v12196_v17  ;;  %v5076_v36 = vsel %vm5047_vm5, %v12198_v63, %v12197_v39 }
 0x974   : > { %v4899_v34 = vpop.permute.xlu0 %4898  ;;  %v5103_v16 = vsel %vm5080_vm6, %v5070_v54, %v4897_v56  ;;  %v5042_v42 = vsel %vm5014_vm4, %v5009_v11, %v12190_v35  ;;  %v5077_v31 = vsel %vm5047_vm5, %v5044_v6, %v12199_v20 }
 0x975   : > { %v5104_v32 = vsel %vm5080_vm6, %v5071_v47, %v4899_v34  ;;  %v5136_v8 = vsel %vm5113_vm7, %v5103_v16, 0.0  ;;  %v5075_v19 = vsel %vm5047_vm5, %v5042_v42, %v12193_v45  ;;  %v12200_v34 = vld [vmem:[#allocation167_spill] sm:$0xff] }
 0x976   : > { %v5137_v2 = vsel %vm5113_vm7, %v5104_v32, 0.0  ;;  %5169 = vst.msk [vmem:[%s10381_s15 + $0xb0] sm:$0xff] %vm5146_vm8, %v5136_v8  ;;  %v5078_v29 = vsel %vm5047_vm5, %v12201_v51, %v12200_v34 }
 0x977   : > { %5170 = vst.msk [vmem:[%s10381_s15 + $0xb8] sm:$0xff] %vm5146_vm8, %v5137_v2  ;;  %v4901_v48 = vpop.permute.xlu1 %4900 }
 0x978   : > { %v4903_v0 = vpop.permute.xlu0 %4902  ;;  %v5105_v12 = vsel %vm5080_vm6, %v5072_v30, %v4901_v48 }
 0x979   : > { %v5106_v15 = vsel %vm5080_vm6, %v5073_v37, %v4903_v0  ;;  %v5138_v1 = vsel %vm5113_vm7, %v5105_v12, 0.0 }
 0x97a   : > { %v5139_v9 = vsel %vm5113_vm7, %v5106_v15, 0.0  ;;  %5171 = vst.msk [vmem:[%s10381_s15 + $0xc0] sm:$0xff] %vm5146_vm8, %v5138_v1 }
 0x97b   : > { %5172 = vst.msk [vmem:[%s10381_s15 + $0xc8] sm:$0xff] %vm5146_vm8, %v5139_v9  ;;  %v4905_v40 = vpop.permute.xlu1 %4904 }
 0x97c   : > { %v4907_v26 = vpop.permute.xlu0 %4906  ;;  %v5107_v22 = vsel %vm5080_vm6, %v5074_v46, %v4905_v40 }
 0x97d   : > { %v5108_v60 = vsel %vm5080_vm6, %v5075_v19, %v4907_v26  ;;  %v5140_v23 = vsel %vm5113_vm7, %v5107_v22, 0.0 }
 0x97e   : > { %v5141_v50 = vsel %vm5113_vm7, %v5108_v60, 0.0  ;;  %5173 = vst.msk [vmem:[%s10381_s15 + $0xd0] sm:$0xff] %vm5146_vm8, %v5140_v23 }
 0x97f   : > { %5174 = vst.msk [vmem:[%s10381_s15 + $0xd8] sm:$0xff] %vm5146_vm8, %v5141_v50  ;;  %v4909_v58 = vpop.permute.xlu1 %4908 }
 0x980   : > { %v4911_v3 = vpop.permute.xlu0 %4910  ;;  %v5109_v33 = vsel %vm5080_vm6, %v5076_v36, %v4909_v58 }
 0x981   : > { %v5110_v54 = vsel %vm5080_vm6, %v5077_v31, %v4911_v3  ;;  %v5142_v47 = vsel %vm5113_vm7, %v5109_v33, 0.0 }
 0x982   : > { %v5143_v56 = vsel %vm5113_vm7, %v5110_v54, 0.0  ;;  %5175 = vst.msk [vmem:[%s10381_s15 + $0xe0] sm:$0xff] %vm5146_vm8, %v5142_v47 }
 0x983   : > { %5176 = vst.msk [vmem:[%s10381_s15 + $0xe8] sm:$0xff] %vm5146_vm8, %v5143_v56  ;;  %v4913_v16 = vpop.permute.xlu1 %4912 }
 0x984   : > { %v4915_v32 = vpop.permute.xlu0 %4914  ;;  %v5111_v49 = vsel %vm5080_vm6, %v5078_v29, %v4913_v16 }
 0x985   : > { %v5112_v44 = vsel %vm5080_vm6, %v5079_v18, %v4915_v32  ;;  %v5144_v8 = vsel %vm5113_vm7, %v5111_v49, 0.0 }
 0x986   : > { %v5145_v2 = vsel %vm5113_vm7, %v5112_v44, 0.0  ;;  %5177 = vst.msk [vmem:[%s10381_s15 + $0xf0] sm:$0xff] %vm5146_vm8, %v5144_v8 }
 0x987   : > { %5178 = vst.msk [vmem:[%s10381_s15 + $0xf8] sm:$0xff] %vm5146_vm8, %v5145_v2 }
 0x988 PF: > { %s19_s29 = sadd.s32 1, %s6030_s29   ;;  %s12204_s27 = smov %s6026_s28 }
 0x989   : > { %p16_p5 = scmp.ge.s32.totalorder %s19_s29, 4   ;;  %s12205_s28 = smov %s12207_s30 }
 0x98b   :  { %18 = sbr.rel (!%p16_p5) target bundleno = 2 (0x2), region = 101 }

</bundles_post_ra>
